<compile_context>
chip_gen: v7x
topology: tpu7x:2x2x1
jax: 0.10.0
libtpu: 0.0.40
codegen_flags: <defaults>
</compile_context>

<pallas_src>
import functools

import numpy as np
import jax
import jax.numpy as jnp
from jax.experimental import pallas as pl
from jax.experimental.pallas import tpu as pltpu


MATMUL_DTYPE = jnp.bfloat16     # MXU operand dtype (accumulation is always f32).
MAX_ROW_TILE = 512              # row tile for large batches (~85% HBM roofline)
_VMEM_CAP = 128 * 1024 * 1024   # never request more scoped VMEM than physically exists


def _round_up(x, m):
    return ((x + m - 1) // m) * m


def _choose_row_tile(rows):
    """Row tile: always a multiple of 8, <= MAX_ROW_TILE, >=2 grid steps when feasible."""
    if rows >= 2 * MAX_ROW_TILE:
        return MAX_ROW_TILE
    if rows > 16:
        # Two "parallel" grid steps -> both v7x TensorCores busy (no-op on 1-TC v5e/v6e).
        return _round_up((rows + 1) // 2, 8)
    # Tiny (ODE-solver) batches: single step; splitting would just re-stream the weights
    # on each v7x core in an already weight-DMA-bound regime.
    return 8


# --------------------------------------------------------------------------- #
# Generic fused "stack of affine (+ optional ReLU) layers" kernel              #
#   y = x; for l: y = maybe_relu(y @ W_l + b_l)                                #
# --------------------------------------------------------------------------- #
def _stacked_affine_kernel(x_ref, *refs, num_layers, relu_flags):
    # refs = (W_0, b_0, W_1, b_1, ..., W_{L-1}, b_{L-1}, o_ref)
    o_ref = refs[-1]
    x = x_ref[...]                                           # f32 activations
    for l in range(num_layers):
        w = refs[2 * l][...]                                 # bf16 (or f32) MXU operand
        b = refs[2 * l + 1][...]                             # (1, N) f32, lane-dense
        y = jnp.dot(x.astype(w.dtype), w,
                    preferred_element_type=jnp.float32) + b  # f32 accumulate + bias
        x = jnp.maximum(y, 0.0) if relu_flags[l] else y      # f32 elementwise (v5e-safe)
    o_ref[...] = x.astype(o_ref.dtype)


def _stacked_affine_ref(x, layers):
    """Pure-JAX replay of the kernel math (same dtypes) -- correctness reference."""
    for (w, b, relu) in layers:
        x = jnp.dot(x.astype(w.dtype), w, preferred_element_type=jnp.float32) + b
        if relu:
            x = jnp.maximum(x, 0.0)
    return x


def stacked_affine(x, layers):
    """x: (rows, K) f32.  layers: list of (W (K_l, N_l), b (1, N_l), relu: bool)."""
    rows, k0 = x.shape
    n_out = layers[-1][0].shape[1]

    tile = _choose_row_tile(rows)
    padded_rows = _round_up(rows, tile)
    if padded_rows != rows:
        x = jnp.pad(x, ((0, padded_rows - rows), (0, 0)))    # zero rows sliced off below
    grid = (padded_rows // tile,)

    in_specs = [pl.BlockSpec((tile, k0), lambda i: (i, 0))]  # double-buffered row tiles
    operands = [x]
    weight_bytes = 0
    act_bytes = 0
    flops = 0
    for (w, b, _) in layers:
        # Grid-invariant blocks: single-buffer them (default double-buffering only
        # doubles their VMEM footprint since the block index never changes).
        in_specs.append(pl.BlockSpec(w.shape, lambda i: (0, 0),
                                     pipeline_mode=pl.Buffered(1)))
        in_specs.append(pl.BlockSpec(b.shape, lambda i: (0, 0),
                                     pipeline_mode=pl.Buffered(1)))
        operands += [w, b]
        weight_bytes += w.size * w.dtype.itemsize + b.size * b.dtype.itemsize
        act_bytes += tile * w.shape[1] * 4                   # per-layer f32 intermediate
        flops += 2 * padded_rows * w.shape[0] * w.shape[1]
    relu_flags = tuple(bool(r) for (_, _, r) in layers)

    io_bytes = 2 * tile * (k0 + n_out) * 4                   # double-buffered in/out tiles
    vmem_limit = int(1.25 * (weight_bytes + act_bytes + io_bytes)) + (1 << 20)
    vmem_limit = min(vmem_limit, _VMEM_CAP)

    cost = pl.CostEstimate(
        flops=flops, transcendentals=0,
        bytes_accessed=padded_rows * (k0 + n_out) * 4 + weight_bytes)

    out = pl.pallas_call(
        functools.partial(_stacked_affine_kernel,
                          num_layers=len(layers), relu_flags=relu_flags),
        out_shape=jax.ShapeDtypeStruct((padded_rows, n_out), jnp.float32),
        grid=grid,
        in_specs=in_specs,
        out_specs=pl.BlockSpec((tile, n_out), lambda i: (i, 0)),
        compiler_params=pltpu.CompilerParams(
            dimension_semantics=("parallel",),
            vmem_limit_bytes=vmem_limit),
        cost_estimate=cost,
    )(*operands)
    return out[:rows] if padded_rows != rows else out


# --------------------------------------------------------------------------- #
# Host-side (float64) folding of the FNO into dense per-layer operators        #
# --------------------------------------------------------------------------- #
def _dft_matrices(G, M):
    """Real DFT / inverse-DFT matrices reproducing rfft -> truncate -> irfft(n=G)."""
    n = np.arange(G, dtype=np.float64)[:, None]
    k = np.arange(M, dtype=np.float64)[None, :]
    theta = 2.0 * np.pi * n * k / G
    fcos = np.cos(theta)                       # (G, M)  Re part of rfft
    fsin = -np.sin(theta)                      # (G, M)  Im part of rfft
    a = np.full((M,), 2.0 / G)
    a[0] = 1.0 / G                             # DC counted once (imag ignored)
    if G % 2 == 0 and M == G // 2 + 1:
        a[-1] = 1.0 / G                        # Nyquist counted once (imag ignored)
    theta_i = 2.0 * np.pi * np.arange(M, dtype=np.float64)[:, None] * \
        np.arange(G, dtype=np.float64)[None, :] / G
    cinv = a[:, None] * np.cos(theta_i)        # (M, G)
    sinv = -a[:, None] * np.sin(theta_i)       # (M, G)
    return fcos, fsin, cinv, sinv


def _fold_fourier_layer(wr, wi, wc, bc, fcos, fsin, cinv, sinv):
    """Dense real operator for one Fourier layer in (grid-major, channel-minor) layout."""
    C = wr.shape[0]
    G = fcos.shape[0]
    K = (np.einsum('gm,com,mh->cgoh', fcos, wr, cinv)
         + np.einsum('gm,com,mh->cgoh', fcos, wi, sinv)
         + np.einsum('gm,com,mh->cgoh', fsin, wr, sinv)
         - np.einsum('gm,com,mh->cgoh', fsin, wi, cinv))     # (Cin, Gin, Cout, Gout)
    idx = np.arange(G)
    K[:, idx, :, idx] += wc.T[None, :, :]                    # pointwise Conv1d (k=1)
    K_gc = np.ascontiguousarray(K.transpose(1, 0, 3, 2)).reshape(G * C, G * C)
    bias_gc = np.tile(bc, G)                                 # bias[g*C + o] = bc[o]
    return K_gc, bias_gc


def fold_params(params, *, grid_size, modes, width, input_dim, output_dim,
                matmul_dtype=MATMUL_DTYPE, relu_last_fourier=True):
    """Fold fc0 + Fourier layers + pointwise final MLP into one MXU-ready layer stack."""
    G, C = grid_size, width
    f64 = lambda a: np.asarray(a, np.float64)
    fcos, fsin, cinv, sinv = _dft_matrices(G, modes)

    w0, b0 = (f64(a) for a in params["fc0"])
    num_fourier = len(params["fourier"])

    layers = []
    for li, (wr, wi, wc, bc) in enumerate(params["fourier"]):
        K, bias = _fold_fourier_layer(f64(wr), f64(wi), f64(wc), f64(bc),
                                      fcos, fsin, cinv, sinv)
        if li == 0:
            # fc0 has no activation before the first Fourier layer -> fold it in.
            bias = np.tile(b0, G) @ K + bias                 # (G*C,)
            K = np.kron(np.eye(G), w0) @ K                   # (G*input_dim, G*C)
            dtype_l = jnp.float32   # small composite operator; f32 limits bf16 drift
        else:
            dtype_l = matmul_dtype
        # TODO(synk): some FNO references skip the activation on the last spectral layer;
        #             the reference evap_model is unspecified -- configurable here.
        relu = True if li < num_fourier - 1 else bool(relu_last_fourier)
        layers.append((jnp.asarray(K, dtype_l),
                       jnp.asarray(bias.reshape(1, -1), jnp.float32),
                       relu))

    # Pointwise final MLP folded as block-diagonal kron(I_G, W): the whole evap model is
    # a single lane-dense pallas_call (no HBM round-trip of the (B, G*C) intermediate).
    fcs = params["final_fc"]
    eye_g = np.eye(G)
    for i, ((w, b), relu) in enumerate(fcs):
        Wk = np.kron(eye_g, f64(w))                          # (G*K_in, G*K_out)
        bk = np.tile(f64(b), G)
        if i == len(fcs) - 1:
            n = Wk.shape[1]
            n_pad = _round_up(n, 128)                        # lane-dense final store
            Wp = np.zeros((Wk.shape[0], n_pad)); Wp[:, :n] = Wk
            bp = np.zeros((n_pad,));             bp[:n] = bk
            Wk, bk = Wp, bp
        layers.append((jnp.asarray(Wk, matmul_dtype),
                       jnp.asarray(bk.reshape(1, -1), jnp.float32),
                       bool(relu)))

    return {"layers": layers,
            "meta": dict(grid_size=G, width=C, input_dim=input_dim,
                         output_dim=output_dim)}


# --------------------------------------------------------------------------- #
# Parameter init (deterministic, mirrors the shapes in the FNO evap model)     #
# --------------------------------------------------------------------------- #
def init_params(key, input_dim, output_dim, num_fno_layers, modes, width,
                num_fc_layers, fc_width):
    keys = jax.random.split(key, 2 + 3 * num_fno_layers + 2 * num_fc_layers)
    ki = iter(keys)

    def lin_init(k, fan_in, fan_out):
        kw, kb = jax.random.split(k)
        bound = 1.0 / np.sqrt(fan_in)
        w = jax.random.uniform(kw, (fan_in, fan_out), jnp.float32, -bound, bound)
        b = jax.random.uniform(kb, (fan_out,), jnp.float32, -bound, bound)
        return w, b

    params = {"fc0": lin_init(next(ki), input_dim, width)}

    scale = 1.0 / (width * width)
    fourier = []
    for _ in range(num_fno_layers):
        wr = scale * jax.random.uniform(next(ki), (width, width, modes), jnp.float32)
        wi = scale * jax.random.uniform(next(ki), (width, width, modes), jnp.float32)
        kcw, kcb = jax.random.split(next(ki))
        bound = 1.0 / np.sqrt(width)
        wc = jax.random.uniform(kcw, (width, width), jnp.float32, -bound, bound)
        bc = jax.random.uniform(kcb, (width,), jnp.float32, -bound, bound)
        fourier.append((wr, wi, wc, bc))
    params["fourier"] = fourier

    fcs = [(lin_init(next(ki), width, fc_width), True)]
    for _ in range(num_fc_layers - 2):
        fcs.append((lin_init(next(ki), fc_width, fc_width), True))
    fcs.append((lin_init(next(ki), fc_width, output_dim), False))
    params["final_fc"] = fcs
    return params


# --------------------------------------------------------------------------- #
# FNO (evap model) forward: ONE pallas_call, batch folded into rows            #
# --------------------------------------------------------------------------- #
def fno_forward(folded, h0, z, t=None, *, affine_fn=None):
    """h0: (B, G), z: (B, z_dim)[, t] -> (B, G) for output_dim == 1."""
    if affine_fn is None:
        affine_fn = stacked_affine
    meta = folded["meta"]
    G, out_dim = meta["grid_size"], meta["output_dim"]
    B = h0.shape[0]

    feats = [h0[..., None],
             jnp.broadcast_to(z[:, None, :], (B, G, z.shape[-1]))]
    if t is not None:
        t_arr = jnp.asarray(t, jnp.float32)
        if t_arr.ndim == 0:
            t_arr = jnp.full((B, 1), t_arr, jnp.float32)
        feats.append(jnp.broadcast_to(t_arr[:, None, :], (B, G, t_arr.shape[-1])))
    inp = jnp.concatenate(feats, axis=-1)                    # (B, G, input_dim)
    assert inp.shape[-1] == meta["input_dim"], (inp.shape, meta)

    x = inp.reshape(B, G * inp.shape[-1]).astype(jnp.float32)   # grid-major flat rows
    y = affine_fn(x, folded["layers"])                           # (B, padded out cols)
    y = y[:, :G * out_dim].reshape(B, G, out_dim)
    return y[..., 0] if out_dim == 1 else y


# --------------------------------------------------------------------------- #
# NeuralDrop forward                                                           #
# --------------------------------------------------------------------------- #
def neural_drop_forward(folded_evap, t, h, z, *, flow_dh_dt_fn,
                        profile_scale=1.0, time_scale=1.0, evap_uses_t=False):
    """dh_dt = time_scale * flow_term - evap_term  (NeuralDrop.forward semantics)."""
    # TODO(synk): flow_model.calc_flow_dh_dt (thin-film flow physics) is not defined in
    #             the provided spec; it is taken as a user-supplied JAX callable here.
    def flow_model_scaled(h_in):
        return flow_dh_dt_fn(h_in / profile_scale) * profile_scale

    flow_term = jax.vmap(flow_model_scaled, in_axes=0)(h)        # batched flow model
    evap_term = fno_forward(folded_evap, h, z,
                            t=(t if evap_uses_t else None))      # spec: evap_model(h, z)
    return time_scale * flow_term - evap_term


# --------------------------------------------------------------------------- #
if __name__ == "__main__":
    key = jax.random.PRNGKey(0)
    B, G = 2, 32                 # batch, grid points
    z_dim = 3
    input_dim = 1 + z_dim        # per-grid-point features [h, z] -> G*input_dim = 128 lanes
    output_dim = 1
    width, modes = 32, 8
    num_fno_layers = 2
    num_fc_layers, fc_width = 2, 64

    k_h, k_z, k_p = jax.random.split(key, 3)
    h = jax.random.normal(k_h, (B, G), jnp.float32)
    z = jax.random.normal(k_z, (B, z_dim), jnp.float32)
    t = jnp.zeros((), jnp.float32)   # ODE-solver scalar time (unused by evap per the spec)

    params = init_params(k_p, input_dim, output_dim, num_fno_layers, modes,
                         width, num_fc_layers, fc_width)
    folded = fold_params(params, grid_size=G, modes=modes, width=width,
                         input_dim=input_dim, output_dim=output_dim)

    # evap model (FNO) alone: Pallas kernel vs pure-JAX replay of the same folded math
    evap = jax.block_until_ready(fno_forward(folded, h, z))
    assert evap.shape == (B, G), evap.shape
    assert bool(jnp.all(jnp.isfinite(evap)))
    evap_ref = jax.block_until_ready(
        fno_forward(folded, h, z, affine_fn=_stacked_affine_ref))
    np.testing.assert_allclose(np.asarray(evap), np.asarray(evap_ref),
                               rtol=2e-2, atol=2e-2)

    # full NeuralDrop forward (external flow model: zero stand-in, see TODO above)
    dh_dt = neural_drop_forward(folded, t, h, z,
                                flow_dh_dt_fn=lambda hp: jnp.zeros_like(hp),
                                profile_scale=2.0, time_scale=0.5)
    dh_dt = jax.block_until_ready(dh_dt)
    assert dh_dt.shape == (B, G), dh_dt.shape
    assert bool(jnp.all(jnp.isfinite(dh_dt)))
    print("KERNEL_OK")
</pallas_src>

<mosaic_0001>
module attributes {stable_mosaic.version = 11 : i64} {
  func.func @_stacked_affine_kernel(%arg0: i32, %arg1: memref<8x128xf32, #tpu.memory_space<vmem>>, %arg2: memref<128x1024xf32, #tpu.memory_space<vmem>>, %arg3: memref<1x1024xf32, #tpu.memory_space<vmem>>, %arg4: memref<1024x1024xbf16, #tpu.memory_space<vmem>>, %arg5: memref<1x1024xf32, #tpu.memory_space<vmem>>, %arg6: memref<1024x2048xbf16, #tpu.memory_space<vmem>>, %arg7: memref<1x2048xf32, #tpu.memory_space<vmem>>, %arg8: memref<2048x128xbf16, #tpu.memory_space<vmem>>, %arg9: memref<1x128xf32, #tpu.memory_space<vmem>>, %arg10: memref<8x128xf32, #tpu.memory_space<vmem>>) attributes {dimension_semantics = [#tpu.dimension_semantics<parallel>], iteration_bounds = array<i64: 1>, scalar_prefetch = 0 : i64, scratch_operands = 0 : i64, tpu.core_type = #tpu.core_type<tc>, window_params = [{transform_indices = @transform_0, window_bounds = array<i64: 8, 128>}, {pipeline_mode = #tpu.pipeline_mode<synchronous>, transform_indices = @transform_1, window_bounds = array<i64: 128, 1024>}, {pipeline_mode = #tpu.pipeline_mode<synchronous>, transform_indices = @transform_2, window_bounds = array<i64: 1, 1024>}, {pipeline_mode = #tpu.pipeline_mode<synchronous>, transform_indices = @transform_3, window_bounds = array<i64: 1024, 1024>}, {pipeline_mode = #tpu.pipeline_mode<synchronous>, transform_indices = @transform_4, window_bounds = array<i64: 1, 1024>}, {pipeline_mode = #tpu.pipeline_mode<synchronous>, transform_indices = @transform_5, window_bounds = array<i64: 1024, 2048>}, {pipeline_mode = #tpu.pipeline_mode<synchronous>, transform_indices = @transform_6, window_bounds = array<i64: 1, 2048>}, {pipeline_mode = #tpu.pipeline_mode<synchronous>, transform_indices = @transform_7, window_bounds = array<i64: 2048, 128>}, {pipeline_mode = #tpu.pipeline_mode<synchronous>, transform_indices = @transform_8, window_bounds = array<i64: 1, 128>}, {transform_indices = @transform_9, window_bounds = array<i64: 8, 128>}]} {
    %c0 = arith.constant 0 : index
    %c0_0 = arith.constant 0 : index
    %0 = vector.load %arg1[%c0, %c0_0] : memref<8x128xf32, #tpu.memory_space<vmem>>, vector<8x128xf32>
    %c0_1 = arith.constant 0 : index
    %c0_2 = arith.constant 0 : index
    %1 = vector.load %arg2[%c0_1, %c0_2] : memref<128x1024xf32, #tpu.memory_space<vmem>>, vector<128x1024xf32>
    %c0_3 = arith.constant 0 : index
    %c0_4 = arith.constant 0 : index
    %2 = vector.load %arg3[%c0_3, %c0_4] : memref<1x1024xf32, #tpu.memory_space<vmem>>, vector<1x1024xf32>
    %cst = arith.constant dense<0.000000e+00> : vector<8x1024xf32>
    %3 = tpu.matmul %0, %1, %cst {dimension_numbers = #tpu.dot_dimension_numbers<[1], [0], [0], [1], [0, 0, 1, 1], [], []>} : vector<8x128xf32>, vector<128x1024xf32>, vector<8x1024xf32> -> vector<8x1024xf32>
    %4 = vector.broadcast %2 : vector<1x1024xf32> to vector<8x1024xf32>
    %5 = arith.addf %3, %4 : vector<8x1024xf32>
    %cst_5 = arith.constant 0.000000e+00 : f32
    %6 = vector.broadcast %cst_5 : f32 to vector<8x1024xf32>
    %7 = arith.maximumf %5, %6 : vector<8x1024xf32>
    %c0_6 = arith.constant 0 : index
    %c0_7 = arith.constant 0 : index
    %8 = vector.load %arg4[%c0_6, %c0_7] : memref<1024x1024xbf16, #tpu.memory_space<vmem>>, vector<1024x1024xbf16>
    %c0_8 = arith.constant 0 : index
    %c0_9 = arith.constant 0 : index
    %9 = vector.load %arg5[%c0_8, %c0_9] : memref<1x1024xf32, #tpu.memory_space<vmem>>, vector<1x1024xf32>
    %10 = arith.truncf %7 : vector<8x1024xf32> to vector<8x1024xbf16>
    %cst_10 = arith.constant dense<0.000000e+00> : vector<8x1024xf32>
    %11 = tpu.matmul %10, %8, %cst_10 {dimension_numbers = #tpu.dot_dimension_numbers<[1], [0], [0], [1], [0, 0, 1, 1], [], []>} : vector<8x1024xbf16>, vector<1024x1024xbf16>, vector<8x1024xf32> -> vector<8x1024xf32>
    %12 = vector.broadcast %9 : vector<1x1024xf32> to vector<8x1024xf32>
    %13 = arith.addf %11, %12 : vector<8x1024xf32>
    %cst_11 = arith.constant 0.000000e+00 : f32
    %14 = vector.broadcast %cst_11 : f32 to vector<8x1024xf32>
    %15 = arith.maximumf %13, %14 : vector<8x1024xf32>
    %c0_12 = arith.constant 0 : index
    %c0_13 = arith.constant 0 : index
    %16 = vector.load %arg6[%c0_12, %c0_13] : memref<1024x2048xbf16, #tpu.memory_space<vmem>>, vector<1024x2048xbf16>
    %c0_14 = arith.constant 0 : index
    %c0_15 = arith.constant 0 : index
    %17 = vector.load %arg7[%c0_14, %c0_15] : memref<1x2048xf32, #tpu.memory_space<vmem>>, vector<1x2048xf32>
    %18 = arith.truncf %15 : vector<8x1024xf32> to vector<8x1024xbf16>
    %cst_16 = arith.constant dense<0.000000e+00> : vector<8x2048xf32>
    %19 = tpu.matmul %18, %16, %cst_16 {dimension_numbers = #tpu.dot_dimension_numbers<[1], [0], [0], [1], [0, 0, 1, 1], [], []>} : vector<8x1024xbf16>, vector<1024x2048xbf16>, vector<8x2048xf32> -> vector<8x2048xf32>
    %20 = vector.broadcast %17 : vector<1x2048xf32> to vector<8x2048xf32>
    %21 = arith.addf %19, %20 : vector<8x2048xf32>
    %cst_17 = arith.constant 0.000000e+00 : f32
    %22 = vector.broadcast %cst_17 : f32 to vector<8x2048xf32>
    %23 = arith.maximumf %21, %22 : vector<8x2048xf32>
    %c0_18 = arith.constant 0 : index
    %c0_19 = arith.constant 0 : index
    %24 = vector.load %arg8[%c0_18, %c0_19] : memref<2048x128xbf16, #tpu.memory_space<vmem>>, vector<2048x128xbf16>
    %c0_20 = arith.constant 0 : index
    %c0_21 = arith.constant 0 : index
    %25 = vector.load %arg9[%c0_20, %c0_21] : memref<1x128xf32, #tpu.memory_space<vmem>>, vector<1x128xf32>
    %26 = arith.truncf %23 : vector<8x2048xf32> to vector<8x2048xbf16>
    %cst_22 = arith.constant dense<0.000000e+00> : vector<8x128xf32>
    %27 = tpu.matmul %26, %24, %cst_22 {dimension_numbers = #tpu.dot_dimension_numbers<[1], [0], [0], [1], [0, 0, 1, 1], [], []>} : vector<8x2048xbf16>, vector<2048x128xbf16>, vector<8x128xf32> -> vector<8x128xf32>
    %28 = vector.broadcast %25 : vector<1x128xf32> to vector<8x128xf32>
    %29 = arith.addf %27, %28 : vector<8x128xf32>
    %c0_23 = arith.constant 0 : index
    %c0_24 = arith.constant 0 : index
    %30 = vector.load %arg10[%c0_23, %c0_24] : memref<8x128xf32, #tpu.memory_space<vmem>>, vector<8x128xf32>
    tpu.vector_store %arg10[%c0_23, %c0_24], %29 {strides = array<i32>} : memref<8x128xf32, #tpu.memory_space<vmem>>, vector<8x128xf32>,
    return
  }
  func.func @transform_0(%arg0: i32) -> (i32, i32) {
    %c0_i32 = arith.constant 0 : i32
    %c0_i32_0 = arith.constant 0 : i32
    return %arg0, %c0_i32 : i32, i32
  }
  func.func @transform_1(%arg0: i32) -> (i32, i32) {
    %c0_i32 = arith.constant 0 : i32
    %c0_i32_0 = arith.constant 0 : i32
    %c0_i32_1 = arith.constant 0 : i32
    return %c0_i32, %c0_i32_0 : i32, i32
  }
  func.func @transform_2(%arg0: i32) -> (i32, i32) {
    %c0_i32 = arith.constant 0 : i32
    %c0_i32_0 = arith.constant 0 : i32
    %c0_i32_1 = arith.constant 0 : i32
    return %c0_i32, %c0_i32_0 : i32, i32
  }
  func.func @transform_3(%arg0: i32) -> (i32, i32) {
    %c0_i32 = arith.constant 0 : i32
    %c0_i32_0 = arith.constant 0 : i32
    %c0_i32_1 = arith.constant 0 : i32
    return %c0_i32, %c0_i32_0 : i32, i32
  }
  func.func @transform_4(%arg0: i32) -> (i32, i32) {
    %c0_i32 = arith.constant 0 : i32
    %c0_i32_0 = arith.constant 0 : i32
    %c0_i32_1 = arith.constant 0 : i32
    return %c0_i32, %c0_i32_0 : i32, i32
  }
  func.func @transform_5(%arg0: i32) -> (i32, i32) {
    %c0_i32 = arith.constant 0 : i32
    %c0_i32_0 = arith.constant 0 : i32
    %c0_i32_1 = arith.constant 0 : i32
    return %c0_i32, %c0_i32_0 : i32, i32
  }
  func.func @transform_6(%arg0: i32) -> (i32, i32) {
    %c0_i32 = arith.constant 0 : i32
    %c0_i32_0 = arith.constant 0 : i32
    %c0_i32_1 = arith.constant 0 : i32
    return %c0_i32, %c0_i32_0 : i32, i32
  }
  func.func @transform_7(%arg0: i32) -> (i32, i32) {
    %c0_i32 = arith.constant 0 : i32
    %c0_i32_0 = arith.constant 0 : i32
    %c0_i32_1 = arith.constant 0 : i32
    return %c0_i32, %c0_i32_0 : i32, i32
  }
  func.func @transform_8(%arg0: i32) -> (i32, i32) {
    %c0_i32 = arith.constant 0 : i32
    %c0_i32_0 = arith.constant 0 : i32
    %c0_i32_1 = arith.constant 0 : i32
    return %c0_i32, %c0_i32_0 : i32, i32
  }
  func.func @transform_9(%arg0: i32) -> (i32, i32) {
    %c0_i32 = arith.constant 0 : i32
    %c0_i32_0 = arith.constant 0 : i32
    return %arg0, %c0_i32 : i32, i32
  }
}

</mosaic_0001>

<bundles_post_ra>
// kernel: tpu_custom_call.1
= control target key start
LH: loop header
LB: loop body
LE: loop exit
PB: predicated region body
PF: predicated region fallthrough
CT: control target
= control target key end

     0   :  { %14 = vsyncpa [#allocation3], 0  ;;  %s16365_s0 = inlined_call_operand.hbm [shape: f32[8,128], index: 0, kind: input, shape index: {}]   ;;  %s16366_s1 = inlined_call_operand.hbm [shape: f32[128,1024], index: 1, kind: input, shape index: {}]   ;;  %s16367_s2 = inlined_call_operand.hbm [shape: f32[1,1024], index: 2, kind: input, shape index: {}]   ;;  %s16368_s3 = inlined_call_operand.hbm [shape: bf16[1024,1024], index: 3, kind: input, shape index: {}]   ;;  %s16369_s4 = inlined_call_operand.hbm [shape: f32[1,1024], index: 4, kind: input, shape index: {}]   ;;  %s16370_s5 = inlined_call_operand.hbm [shape: bf16[1024,2048], index: 5, kind: input, shape index: {}]   ;;  %s16371_s6 = inlined_call_operand.hbm [shape: f32[1,2048], index: 6, kind: input, shape index: {}]   ;;  %s16372_s7 = inlined_call_operand.hbm [shape: bf16[2048,128], index: 7, kind: input, shape index: {}]   ;;  %s16373_s8 = inlined_call_operand.hbm [shape: f32[1,128], index: 8, kind: input, shape index: {}]   ;;  %s16374_s9 = inlined_call_operand.hbm [shape: f32[8,128], index: 9, kind: output, shape index: {}]  }
   0x1   :  { %15 = vsyncpa [#allocation6], 0 }
   0x2   :  { %16 = vsyncpa [#allocation9], 0 }
   0x3   :  { %17 = vsyncpa [#allocation12], 0 }
   0x4   :  { %18 = vsyncpa [#allocation15], 0 }
   0x5   :  { %19 = vsyncpa [#allocation4], 0  ;;  %s15861_s30 = smov [#allocation5]   ;;  %s15629_s13 = scalar_lea.hbm %s16366_s1, 16384 }
   0x6   :  { %s35_s10 = sshll.u32 %s15861_s30, 4  ;;  %p15630_p0 = scmp.ne.s32.totalorder %s16366_s1, %s15629_s13  ;;  %s36_s10 = int_to_ptr.vmem [resolvable:$true] %s35_s10 }
   0x7   :  { %p15633_p1 = scmp.lt.u32.totalorder %s15629_s13, %s16366_s1 }
   0x9   :  { %p15635_p2 = pnand %p15633_p1, %p15630_p0 }
   0xb   :  { %15638 = shalt.err (!%p15635_p2)
}
   0xc   :  { %s15639_s18 = scalar_lea.vmem %s36_s10, 16384  ;;  %p15644_p4 = scmp.lt.s32.totalorder %s36_s10, %s36_s10 }
   0xd   :  { %p15640_p3 = scmp.ne.s32.totalorder %s36_s10, %s15639_s18  ;;  %p15645_p5 = scmp.lt.s32.totalorder %s15639_s18, %s15639_s18 }
   0xf   :  { %p15646_p6 = por %p15645_p5, %p15644_p4 }
  0x11   :  { %p15647_p7 = pnand %p15646_p6, %p15640_p3 }
  0x13   :  { %15650 = shalt.err (!%p15647_p7)
}
  0x14   :  { %s15862_s19 = smov 1024   ;;  %s15863_s20 = smov 64  }
  0x15   :  { %41 = dma.hbm_to_vmem [thread:$0]  %s16366_s1, 16384, %s36_s10, [#allocation6], %s15862_s19, %s15862_s19, %s15863_s20  }
  0x16   :  { %s15864_s23 = smov [#allocation8]   ;;  %s15651_s27 = scalar_lea.hbm %s16368_s3, 65536 }
  0x17   :  { %s57_s24 = sshll.u32 %s15864_s23, 4  ;;  %p15652_p8 = scmp.ne.s32.totalorder %s16368_s3, %s15651_s27  ;;  %s58_s24 = int_to_ptr.vmem [resolvable:$true] %s57_s24 }
  0x18   :  { %p15655_p9 = scmp.lt.u32.totalorder %s15651_s27, %s16368_s3 }
  0x1a   :  { %p15657_p10 = pnand %p15655_p9, %p15652_p8 }
  0x1c   :  { %15660 = shalt.err (!%p15657_p10)
}
  0x1d   :  { %s15661_s12 = scalar_lea.vmem %s58_s24, 65536  ;;  %p15666_p12 = scmp.lt.s32.totalorder %s58_s24, %s58_s24 }
  0x1e   :  { %p15662_p11 = scmp.ne.s32.totalorder %s58_s24, %s15661_s12  ;;  %p15667_p13 = scmp.lt.s32.totalorder %s15661_s12, %s15661_s12 }
  0x20   :  { %p15668_p0 = por %p15667_p13, %p15666_p12 }
  0x22   :  { %p15669_p1 = pnand %p15668_p0, %p15662_p11 }
  0x24   :  { %15672 = shalt.err (!%p15669_p1)
}
  0x25   :  { %s15865_s1 = smov 512   ;;  %s15866_s10 = smov 32  }
  0x26   :  { %63 = dma.hbm_to_vmem [thread:$0]  %s16368_s3, 65536, %s58_s24, [#allocation9], %s15865_s1, %s15865_s1, %s15866_s10  }
  0x27   :  { %s15867_s15 = smov [#allocation11]   ;;  %s15868_s17 = smov [#allocation14]  }
  0x28   :  { %s79_s16 = sshll.u32 %s15867_s15, 4  ;;  %s101_s18 = sshll.u32 %s15868_s17, 4  ;;  %s80_s16 = int_to_ptr.vmem [resolvable:$true] %s79_s16  ;;  %s15954_s18 = int_to_ptr.vmem [resolvable:$true] %s101_s18 }
  0x29   :  { %s15673_s23 = scalar_lea.hbm %s16370_s5, 131072 }
  0x2a   :  { %p15674_p2 = scmp.ne.s32.totalorder %s16370_s5, %s15673_s23  ;;  %p15677_p3 = scmp.lt.u32.totalorder %s15673_s23, %s16370_s5 }
  0x2c   :  { %p15679_p4 = pnand %p15677_p3, %p15674_p2 }
  0x2e   :  { %15682 = shalt.err (!%p15679_p4)
}
  0x2f   :  { %s15683_s3 = scalar_lea.vmem %s80_s16, 131072  ;;  %p15688_p6 = scmp.lt.s32.totalorder %s80_s16, %s80_s16 }
  0x30   :  { %p15684_p5 = scmp.ne.s32.totalorder %s80_s16, %s15683_s3  ;;  %p15689_p7 = scmp.lt.s32.totalorder %s15683_s3, %s15683_s3 }
  0x32   :  { %p15690_p8 = por %p15689_p7, %p15688_p6 }
  0x34   :  { %p15691_p9 = pnand %p15690_p8, %p15684_p5 }
  0x36   :  { %15694 = shalt.err (!%p15691_p9)
}
  0x37   :  { %85 = dma.hbm_to_vmem [thread:$0]  %s16370_s5, 131072, %s80_s16, [#allocation12], %s15862_s19, %s15862_s19, %s15863_s20  }
  0x38   :  { %s15695_s12 = scalar_lea.hbm %s16372_s7, 16384 }
  0x39   :  { %p15696_p10 = scmp.ne.s32.totalorder %s16372_s7, %s15695_s12  ;;  %p15699_p11 = scmp.lt.u32.totalorder %s15695_s12, %s16372_s7 }
  0x3b   :  { %p15701_p12 = pnand %p15699_p11, %p15696_p10 }
  0x3d   :  { %15704 = shalt.err (!%p15701_p12)
}
  0x3e   :  { %s15705_s15 = scalar_lea.vmem %s15954_s18, 16384  ;;  %p15710_p0 = scmp.lt.s32.totalorder %s15954_s18, %s15954_s18 }
  0x3f   :  { %p15706_p13 = scmp.ne.s32.totalorder %s15954_s18, %s15705_s15  ;;  %p15711_p1 = scmp.lt.s32.totalorder %s15705_s15, %s15705_s15 }
  0x41   :  { %p15712_p2 = por %p15711_p1, %p15710_p0 }
  0x43   :  { %p15713_p3 = pnand %p15712_p2, %p15706_p13 }
  0x45   :  { %15716 = shalt.err (!%p15713_p3)
}
  0x46   :  { %s15869_s5 = smov 4   ;;  %s15870_s17 = smov [#allocation2]  }
  0x47   :  { %107 = dma.hbm_to_vmem [thread:$0]  %s16372_s7, 16384, %s15954_s18, [#allocation15], %s15863_s20, %s15863_s20, %s15869_s5  }
  0x48   :  { %s26_s21 = sshll.u32 %s15870_s17, 4  ;;  %s15871_s22 = smov [#allocation7]   ;;  %s27_s21 = int_to_ptr.vmem [resolvable:$true] %s26_s21 }
  0x49   :  { %s48_s23 = sshll.u32 %s15871_s22, 4  ;;  %s15717_s27 = scalar_lea.hbm %s16365_s0, 128  ;;  %s49_s23 = int_to_ptr.vmem [resolvable:$true] %s48_s23 }
  0x4a   :  { %p15718_p4 = scmp.ne.s32.totalorder %s16365_s0, %s15717_s27  ;;  %p15721_p5 = scmp.lt.u32.totalorder %s15717_s27, %s16365_s0 }
  0x4c   :  { %p15723_p6 = pnand %p15721_p5, %p15718_p4 }
  0x4e   :  { %15726 = shalt.err (!%p15723_p6)
}
  0x4f   :  { %s15727_s7 = scalar_lea.vmem %s27_s21, 128  ;;  %p15732_p8 = scmp.lt.s32.totalorder %s27_s21, %s27_s21 }
  0x50   :  { %p15728_p7 = scmp.ne.s32.totalorder %s27_s21, %s15727_s7  ;;  %p15733_p9 = scmp.lt.s32.totalorder %s15727_s7, %s15727_s7 }
  0x52   :  { %p15734_p10 = por %p15733_p9, %p15732_p8 }
  0x54   :  { %p15735_p11 = pnand %p15734_p10, %p15728_p7 }
  0x56   :  { %15738 = shalt.err (!%p15735_p11)
}
  0x57   :  { %29 = dma.hbm_to_vmem [thread:$0]  %s16365_s0, 128, %s27_s21, [#allocation3]  }
  0x58   :  { %s15739_s12 = scalar_lea.hbm %s16367_s2, 128 }
  0x59   :  { %p15740_p12 = scmp.ne.s32.totalorder %s16367_s2, %s15739_s12  ;;  %p15743_p13 = scmp.lt.u32.totalorder %s15739_s12, %s16367_s2 }
  0x5b   :  { %p15745_p0 = pnand %p15743_p13, %p15740_p12 }
  0x5d   :  { %15748 = shalt.err (!%p15745_p0)
}
  0x5e   :  { %s15749_s15 = scalar_lea.vmem %s49_s23, 128  ;;  %p15754_p2 = scmp.lt.s32.totalorder %s49_s23, %s49_s23 }
  0x5f   :  { %p15750_p1 = scmp.ne.s32.totalorder %s49_s23, %s15749_s15  ;;  %p15755_p3 = scmp.lt.s32.totalorder %s15749_s15, %s15749_s15 }
  0x61   :  { %p15756_p4 = por %p15755_p3, %p15754_p2 }
  0x63   :  { %p15757_p5 = pnand %p15756_p4, %p15750_p1 }
  0x65   :  { %15760 = shalt.err (!%p15757_p5)
}
  0x66   :  { %51 = dma.hbm_to_vmem [thread:$0]  %s16367_s2, 128, %s49_s23, [#allocation6]  }
  0x67   :  { %s15872_s19 = smov [#allocation10]   ;;  %s15873_s17 = smov [#allocation13]  }
  0x68   :  { %s70_s16 = sshll.u32 %s15872_s19, 4  ;;  %s92_s21 = sshll.u32 %s15873_s17, 4  ;;  %s71_s16 = int_to_ptr.vmem [resolvable:$true] %s70_s16  ;;  %s93_s21 = int_to_ptr.vmem [resolvable:$true] %s92_s21 }
  0x69   :  { %s15761_s26 = scalar_lea.hbm %s16369_s4, 128 }
  0x6a   :  { %p15762_p6 = scmp.ne.s32.totalorder %s16369_s4, %s15761_s26  ;;  %p15765_p7 = scmp.lt.u32.totalorder %s15761_s26, %s16369_s4 }
  0x6c   :  { %p15767_p8 = pnand %p15765_p7, %p15762_p6 }
  0x6e   :  { %15770 = shalt.err (!%p15767_p8)
}
  0x6f   :  { %s15771_s2 = scalar_lea.vmem %s71_s16, 128  ;;  %p15776_p10 = scmp.lt.s32.totalorder %s71_s16, %s71_s16 }
  0x70   :  { %p15772_p9 = scmp.ne.s32.totalorder %s71_s16, %s15771_s2  ;;  %p15777_p11 = scmp.lt.s32.totalorder %s15771_s2, %s15771_s2 }
  0x72   :  { %p15778_p12 = por %p15777_p11, %p15776_p10 }
  0x74   :  { %p15779_p13 = pnand %p15778_p12, %p15772_p9 }
  0x76   :  { %15782 = shalt.err (!%p15779_p13)
}
  0x77   :  { %73 = dma.hbm_to_vmem [thread:$0]  %s16369_s4, 128, %s71_s16, [#allocation9]  }
  0x78   :  { %s15783_s18 = scalar_lea.hbm %s16371_s6, 256 }
  0x79   :  { %p15784_p0 = scmp.ne.s32.totalorder %s16371_s6, %s15783_s18  ;;  %p15787_p1 = scmp.lt.u32.totalorder %s15783_s18, %s16371_s6 }
  0x7b   :  { %p15789_p2 = pnand %p15787_p1, %p15784_p0 }
  0x7d   :  { %15792 = shalt.err (!%p15789_p2)
}
  0x7e   :  { %s15793_s10 = scalar_lea.vmem %s93_s21, 256  ;;  %p15798_p4 = scmp.lt.s32.totalorder %s93_s21, %s93_s21 }
  0x7f   :  { %p15794_p3 = scmp.ne.s32.totalorder %s93_s21, %s15793_s10  ;;  %p15799_p5 = scmp.lt.s32.totalorder %s15793_s10, %s15793_s10 }
  0x81   :  { %p15800_p6 = por %p15799_p5, %p15798_p4 }
  0x83   :  { %p15801_p7 = pnand %p15800_p6, %p15794_p3 }
  0x85   :  { %15804 = shalt.err (!%p15801_p7)
}
  0x86   :  { %95 = dma.hbm_to_vmem [thread:$0]  %s16371_s6, 256, %s93_s21, [#allocation12]  }
  0x87   :  { %s15874_s14 = smov [#allocation16]   ;;  %s15805_s19 = scalar_lea.hbm %s16373_s8, 16 }
  0x88   :  { %s114_s15 = sshll.u32 %s15874_s14, 4  ;;  %p15806_p8 = scmp.ne.s32.totalorder %s16373_s8, %s15805_s19  ;;  %s115_s15 = int_to_ptr.vmem [resolvable:$true] %s114_s15 }
  0x89   :  { %p15809_p9 = scmp.lt.u32.totalorder %s15805_s19, %s16373_s8 }
  0x8b   :  { %p15811_p10 = pnand %p15809_p9, %p15806_p8 }
  0x8d   :  { %15814 = shalt.err (!%p15811_p10)
}
  0x8e   :  { %s15815_s26 = scalar_lea.vmem %s115_s15, 16  ;;  %s15819_s6 = scalar_lea.vmem %s115_s15, 32 }
  0x8f   :  { %p15816_p11 = scmp.ne.s32.totalorder %s115_s15, %s15815_s26  ;;  %p15820_p12 = scmp.lt.s32.totalorder %s115_s15, %s115_s15 }
  0x90   :  { %p15821_p13 = scmp.lt.s32.totalorder %s15819_s6, %s15815_s26 }
  0x92   :  { %p15822_p0 = por %p15821_p13, %p15820_p12 }
  0x94   :  { %p15823_p1 = pnand %p15822_p0, %p15816_p11 }
  0x96   :  { %15826 = shalt.err (!%p15823_p1)
}
  0x97   :  { %117 = dma.hbm_to_vmem [thread:$0]  %s16373_s8, 16, %s115_s15, [#allocation15]  }
  0x98   :  { %15849 = dma.done.wait [#allocation3], 128  }
  0x99   :  { %15850 = vsyncadd [#allocation3], 4294967168 }
  0x9a   :  { %15851 = dma.done.wait [#allocation6], 16512  }
  0x9b   :  { %15852 = vsyncadd [#allocation6], 4294950784 }
  0x9c   :  { %15853 = dma.done.wait [#allocation9], 65664  }
  0x9d   :  { %15854 = vsyncadd [#allocation9], 4294901632 }
  0x9e   :  { %15855 = dma.done.wait [#allocation12], 131328  }
  0x9f   :  { %15856 = vsyncadd [#allocation12], 4294835968 }
  0xa0   :  { %15857 = dma.done.wait [#allocation15], 16400  }
  0xa1   :  { %15858 = vsyncadd [#allocation15], 4294950896  ;;  %v15875_v0 = vmov 0.0   ;;  %v148_v1 = vld [vmem:[#allocation5 + $0x8] sm:$0xff]  ;;  %v147_v3 = vld [vmem:[#allocation5] sm:$0xff]  ;;  %s15876_s8 = smov [#allocation17]  }
  0xa2   :  { %381 = vmatprep.mubr.f32.mxu0 %v15875_v0  ;;  %452 = vmatprep.mubr.f32.mxu1 %v15875_v0  ;;  %v156_v2 = vld [vmem:[#allocation5 + $0x48] sm:$0xff]  ;;  %v155_v5 = vld [vmem:[#allocation5 + $0x40] sm:$0xff]  ;;  %v150_v28 = vld [vmem:[#allocation5 + $0x18] sm:$0xff]  ;;  %s13333_s28 = sshll.u32 %s15876_s8, 4  ;;  %s13334_s28 = int_to_ptr.vmem [resolvable:$true] %s13333_s28 }
  0xa3   :  { %v15187_v4 = vpack.c.bf16 %v156_v2, %v148_v1  ;;  %v164_v6 = vld [vmem:[#allocation5 + $0x88] sm:$0xff]  ;;  %v15189_v8 = vpack.c.bf16 %v155_v5, %v147_v3  ;;  %v163_v10 = vld [vmem:[#allocation5 + $0x80] sm:$0xff]  ;;  %v158_v29 = vld [vmem:[#allocation5 + $0x58] sm:$0xff]  ;;  %s15827_s3 = scalar_lea.vmem %s13334_s28, 128  ;;  %p15832_p3 = scmp.lt.s32.totalorder %s13334_s28, %s13334_s28 }
  0xa4   :  { %v172_v7 = vld [vmem:[#allocation5 + $0xc8] sm:$0xff]  ;;  %v171_v11 = vld [vmem:[#allocation5 + $0xc0] sm:$0xff]  ;;  %v149_v30 = vld [vmem:[#allocation5 + $0x10] sm:$0xff]  ;;  %v15219_v32 = vpack.c.bf16 %v158_v29, %v150_v28  ;;  %p15828_p2 = scmp.ne.s32.totalorder %s13334_s28, %s15827_s3  ;;  %p15833_p4 = scmp.lt.s32.totalorder %s15827_s3, %s15827_s3 }
  0xa5   :  { %v15191_v9 = vpack.c.bf16 %v172_v7, %v164_v6  ;;  %v180_v12 = vld [vmem:[#allocation5 + $0x108] sm:$0xff]  ;;  %15188 = vmatprep.subr.bf16.mxu0 %v15187_v4  ;;  %v15193_v14 = vpack.c.bf16 %v171_v11, %v163_v10  ;;  %v179_v16 = vld [vmem:[#allocation5 + $0x100] sm:$0xff]  ;;  %v157_v33 = vld [vmem:[#allocation5 + $0x50] sm:$0xff] }
  0xa6   :  { %v188_v13 = vld [vmem:[#allocation5 + $0x148] sm:$0xff]  ;;  %15190 = vmatpush1.bf16.msra.mxu0 %v15189_v8  ;;  %v187_v17 = vld [vmem:[#allocation5 + $0x140] sm:$0xff]  ;;  %v166_v34 = vld [vmem:[#allocation5 + $0x98] sm:$0xff]  ;;  %v15221_v37 = vpack.c.bf16 %v157_v33, %v149_v30  ;;  %15220 = vmatprep.subr.bf16.mxu1 %v15219_v32  ;;  %p15834_p5 = por %p15833_p4, %p15832_p3 }
  0xa7   :  { %15192 = vmatprep.subr.bf16.mxu0 %v15191_v9  ;;  %v15195_v15 = vpack.c.bf16 %v188_v13, %v180_v12  ;;  %v196_v18 = vld [vmem:[#allocation5 + $0x188] sm:$0xff]  ;;  %v15197_v20 = vpack.c.bf16 %v187_v17, %v179_v16  ;;  %v195_v22 = vld [vmem:[#allocation5 + $0x180] sm:$0xff]  ;;  %v174_v35 = vld [vmem:[#allocation5 + $0xd8] sm:$0xff] }
  0xa8   :  { %v204_v19 = vld [vmem:[#allocation5 + $0x1c8] sm:$0xff]  ;;  %v203_v23 = vld [vmem:[#allocation5 + $0x1c0] sm:$0xff]  ;;  %v15223_v38 = vpack.c.bf16 %v174_v35, %v166_v34  ;;  %v165_v39 = vld [vmem:[#allocation5 + $0x90] sm:$0xff]  ;;  %15222 = vmatpush1.bf16.msra.mxu1 %v15221_v37  ;;  %p15835_p6 = pnand %p15834_p5, %p15828_p2 }
  0xa9   :  { %v15199_v21 = vpack.c.bf16 %v204_v19, %v196_v18  ;;  %v212_v24 = vld [vmem:[#allocation5 + $0x208] sm:$0xff]  ;;  %v211_v26 = vld [vmem:[#allocation5 + $0x200] sm:$0xff]  ;;  %v15201_v31 = vpack.c.bf16 %v203_v23, %v195_v22  ;;  %v173_v40 = vld [vmem:[#allocation5 + $0xd0] sm:$0xff] }
  0xaa   :  { %15194 = vmatpush1.bf16.msra.mxu0 %v15193_v14  ;;  %v220_v25 = vld [vmem:[#allocation5 + $0x248] sm:$0xff]  ;;  %v219_v27 = vld [vmem:[#allocation5 + $0x240] sm:$0xff]  ;;  %v182_v41 = vld [vmem:[#allocation5 + $0x118] sm:$0xff]  ;;  %v15225_v45 = vpack.c.bf16 %v173_v40, %v165_v39  ;;  %15224 = vmatprep.subr.bf16.mxu1 %v15223_v38 }
  0xab   :  { %15196 = vmatprep.subr.bf16.mxu0 %v15195_v15  ;;  %v15203_v36 = vpack.c.bf16 %v220_v25, %v212_v24  ;;  %v228_v42 = vld [vmem:[#allocation5 + $0x288] sm:$0xff]  ;;  %v190_v44 = vld [vmem:[#allocation5 + $0x158] sm:$0xff]  ;;  %v15205_v46 = vpack.c.bf16 %v219_v27, %v211_v26  ;;  %v227_v47 = vld [vmem:[#allocation5 + $0x280] sm:$0xff] }
  0xac   :  { %v236_v43 = vld [vmem:[#allocation5 + $0x2c8] sm:$0xff]  ;;  %v15227_v48 = vpack.c.bf16 %v190_v44, %v182_v41  ;;  %v181_v49 = vld [vmem:[#allocation5 + $0x110] sm:$0xff]  ;;  %v235_v52 = vld [vmem:[#allocation5 + $0x2c0] sm:$0xff]  ;;  %15226 = vmatpush1.bf16.msra.mxu1 %v15225_v45 }
  0xad   :  { %v189_v50 = vld [vmem:[#allocation5 + $0x150] sm:$0xff]  ;;  %v15207_v51 = vpack.c.bf16 %v236_v43, %v228_v42  ;;  %v198_v53 = vld [vmem:[#allocation5 + $0x198] sm:$0xff]  ;;  %v244_v55 = vld [vmem:[#allocation5 + $0x308] sm:$0xff]  ;;  %v15209_v58 = vpack.c.bf16 %v235_v52, %v227_v47 }
  0xae   :  { %15198 = vmatpush1.bf16.msra.mxu0 %v15197_v20  ;;  %v206_v54 = vld [vmem:[#allocation5 + $0x1d8] sm:$0xff]  ;;  %v252_v56 = vld [vmem:[#allocation5 + $0x348] sm:$0xff]  ;;  %v15229_v57 = vpack.c.bf16 %v189_v50, %v181_v49  ;;  %v243_v59 = vld [vmem:[#allocation5 + $0x300] sm:$0xff]  ;;  %15228 = vmatprep.subr.bf16.mxu1 %v15227_v48 }
  0xaf   :  { %15200 = vmatprep.subr.bf16.mxu0 %v15199_v21  ;;  %v15231_v60 = vpack.c.bf16 %v206_v54, %v198_v53  ;;  %v197_v61 = vld [vmem:[#allocation5 + $0x190] sm:$0xff]  ;;  %v15211_v63 = vpack.c.bf16 %v252_v56, %v244_v55  ;;  %v251_v1 = vld [vmem:[#allocation5 + $0x340] sm:$0xff]  ;;  %v214_v2 = vld [vmem:[#allocation5 + $0x218] sm:$0xff] }
  0xb0   :  { %v205_v62 = vld [vmem:[#allocation5 + $0x1d0] sm:$0xff]  ;;  %v222_v3 = vld [vmem:[#allocation5 + $0x258] sm:$0xff]  ;;  %v260_v4 = vld [vmem:[#allocation5 + $0x388] sm:$0xff]  ;;  %15230 = vmatpush1.bf16.msra.mxu1 %v15229_v57  ;;  %v15213_v7 = vpack.c.bf16 %v251_v1, %v243_v59 }
  0xb1   :  { %v268_v5 = vld [vmem:[#allocation5 + $0x3c8] sm:$0xff]  ;;  %v15233_v6 = vpack.c.bf16 %v205_v62, %v197_v61  ;;  %v259_v8 = vld [vmem:[#allocation5 + $0x380] sm:$0xff]  ;;  %15232 = vmatprep.subr.bf16.mxu1 %v15231_v60  ;;  %v15235_v9 = vpack.c.bf16 %v222_v3, %v214_v2  ;;  %v213_v10 = vld [vmem:[#allocation5 + $0x210] sm:$0xff] }
  0xb2   :  { %15202 = vmatpush1.bf16.msra.mxu0 %v15201_v31  ;;  %v221_v11 = vld [vmem:[#allocation5 + $0x250] sm:$0xff]  ;;  %v15215_v12 = vpack.c.bf16 %v268_v5, %v260_v4  ;;  %v267_v13 = vld [vmem:[#allocation5 + $0x3c0] sm:$0xff]  ;;  %v230_v14 = vld [vmem:[#allocation5 + $0x298] sm:$0xff] }
  0xb3   :  { %15204 = vmatprep.subr.bf16.mxu0 %v15203_v36  ;;  %v238_v15 = vld [vmem:[#allocation5 + $0x2d8] sm:$0xff]  ;;  %v152_v16 = vld [vmem:[#allocation5 + $0x28] sm:$0xff]  ;;  %v15237_v18 = vpack.c.bf16 %v221_v11, %v213_v10  ;;  %v15217_v19 = vpack.c.bf16 %v267_v13, %v259_v8  ;;  %v229_v21 = vld [vmem:[#allocation5 + $0x290] sm:$0xff] }
  0xb4   :  { %v160_v17 = vld [vmem:[#allocation5 + $0x68] sm:$0xff]  ;;  %15234 = vmatpush1.bf16.msra.mxu1 %v15233_v6  ;;  %v15239_v20 = vpack.c.bf16 %v238_v15, %v230_v14  ;;  %v237_v22 = vld [vmem:[#allocation5 + $0x2d0] sm:$0xff]  ;;  %v246_v23 = vld [vmem:[#allocation5 + $0x318] sm:$0xff] }
  0xb5   :  { %15236 = vmatprep.subr.bf16.mxu1 %v15235_v9  ;;  %v254_v24 = vld [vmem:[#allocation5 + $0x358] sm:$0xff]  ;;  %v15251_v25 = vpack.c.bf16 %v160_v17, %v152_v16  ;;  %v151_v26 = vld [vmem:[#allocation5 + $0x20] sm:$0xff]  ;;  %v168_v28 = vld [vmem:[#allocation5 + $0xa8] sm:$0xff]  ;;  %v15241_v31 = vpack.c.bf16 %v237_v22, %v229_v21 }
  0xb6   :  { %15206 = vmatpush1.bf16.msra.mxu0 %v15205_v46  ;;  %v159_v27 = vld [vmem:[#allocation5 + $0x60] sm:$0xff]  ;;  %v176_v29 = vld [vmem:[#allocation5 + $0xe8] sm:$0xff]  ;;  %v16052_v30 = vld [vmem:[#allocation2] sm:$0xff]  ;;  %v15243_v32 = vpack.c.bf16 %v254_v24, %v246_v23 }
  0xb7   :  { %15208 = vmatprep.subr.bf16.mxu0 %v15207_v51  ;;  %v245_v33 = vld [vmem:[#allocation5 + $0x310] sm:$0xff]  ;;  %v262_v35 = vld [vmem:[#allocation5 + $0x398] sm:$0xff]  ;;  %v15253_v36 = vpack.c.bf16 %v159_v27, %v151_v26  ;;  %v15255_v38 = vpack.c.bf16 %v176_v29, %v168_v28  ;;  %v167_v39 = vld [vmem:[#allocation5 + $0xa0] sm:$0xff] }
  0xb8   :  { %15238 = vmatpush1.bf16.msra.mxu1 %v15237_v18  ;;  %v253_v34 = vld [vmem:[#allocation5 + $0x350] sm:$0xff]  ;;  %v270_v37 = vld [vmem:[#allocation5 + $0x3d8] sm:$0xff]  ;;  %v175_v40 = vld [vmem:[#allocation5 + $0xe0] sm:$0xff] }
  0xb9   :  { %15240 = vmatprep.subr.bf16.mxu1 %v15239_v20  ;;  %v184_v41 = vld [vmem:[#allocation5 + $0x128] sm:$0xff]  ;;  %v15245_v43 = vpack.c.bf16 %v253_v34, %v245_v33  ;;  %v15247_v44 = vpack.c.bf16 %v270_v37, %v262_v35  ;;  %v261_v45 = vld [vmem:[#allocation5 + $0x390] sm:$0xff]  ;;  %v15257_v47 = vpack.c.bf16 %v175_v40, %v167_v39  ;;  %v183_v48 = vld [vmem:[#allocation5 + $0x120] sm:$0xff] }
  0xba   :  { %15210 = vmatpush1.bf16.msra.mxu0 %v15209_v58  ;;  %v192_v42 = vld [vmem:[#allocation5 + $0x168] sm:$0xff]  ;;  %v269_v46 = vld [vmem:[#allocation5 + $0x3d0] sm:$0xff]  ;;  %v191_v50 = vld [vmem:[#allocation5 + $0x160] sm:$0xff] }
  0xbb   :  { %15212 = vmatprep.subr.bf16.mxu0 %v15211_v63  ;;  %v15259_v49 = vpack.c.bf16 %v192_v42, %v184_v41  ;;  %v154_v51 = vld [vmem:[#allocation5 + $0x38] sm:$0xff]  ;;  %v200_v53 = vld [vmem:[#allocation5 + $0x1a8] sm:$0xff]  ;;  %v15249_v55 = vpack.c.bf16 %v269_v46, %v261_v45  ;;  %v15261_v56 = vpack.c.bf16 %v191_v50, %v183_v48  ;;  %v199_v57 = vld [vmem:[#allocation5 + $0x1a0] sm:$0xff] }
  0xbc   :  { %15242 = vmatpush1.bf16.msra.mxu1 %v15241_v31  ;;  %v162_v52 = vld [vmem:[#allocation5 + $0x78] sm:$0xff]  ;;  %v208_v54 = vld [vmem:[#allocation5 + $0x1e8] sm:$0xff]  ;;  %v153_v59 = vld [vmem:[#allocation5 + $0x30] sm:$0xff] }
  0xbd   :  { %15244 = vmatprep.subr.bf16.mxu1 %v15243_v32  ;;  %v15283_v58 = vpack.c.bf16 %v162_v52, %v154_v51  ;;  %v161_v60 = vld [vmem:[#allocation5 + $0x70] sm:$0xff]  ;;  %v15263_v61 = vpack.c.bf16 %v208_v54, %v200_v53  ;;  %v207_v62 = vld [vmem:[#allocation5 + $0x1e0] sm:$0xff]  ;;  %v170_v63 = vld [vmem:[#allocation5 + $0xb8] sm:$0xff] }
  0xbe   :  { %15214 = vmatpush1.bf16.msra.mxu0 %v15213_v7  ;;  %v178_v1 = vld [vmem:[#allocation5 + $0xf8] sm:$0xff]  ;;  %v216_v2 = vld [vmem:[#allocation5 + $0x228] sm:$0xff]  ;;  %v15285_v4 = vpack.c.bf16 %v161_v60, %v153_v59  ;;  %v15265_v5 = vpack.c.bf16 %v207_v62, %v199_v57  ;;  %v215_v6 = vld [vmem:[#allocation5 + $0x220] sm:$0xff] }
  0xbf   :  { %15216 = vmatprep.subr.bf16.mxu0 %v15215_v12  ;;  %v224_v3 = vld [vmem:[#allocation5 + $0x268] sm:$0xff]  ;;  %v15287_v7 = vpack.c.bf16 %v178_v1, %v170_v63  ;;  %v169_v8 = vld [vmem:[#allocation5 + $0xb0] sm:$0xff]  ;;  %v223_v11 = vld [vmem:[#allocation5 + $0x260] sm:$0xff] }
  0xc0   :  { %15246 = vmatpush1.bf16.msra.mxu1 %v15245_v43  ;;  %v177_v9 = vld [vmem:[#allocation5 + $0xf0] sm:$0xff]  ;;  %v15267_v10 = vpack.c.bf16 %v224_v3, %v216_v2  ;;  %v186_v12 = vld [vmem:[#allocation5 + $0x138] sm:$0xff]  ;;  %v232_v14 = vld [vmem:[#allocation5 + $0x2a8] sm:$0xff]  ;;  %v15269_v17 = vpack.c.bf16 %v223_v11, %v215_v6 }
  0xc1   :  { %15248 = vmatprep.subr.bf16.mxu1 %v15247_v44  ;;  %v194_v13 = vld [vmem:[#allocation5 + $0x178] sm:$0xff]  ;;  %v240_v15 = vld [vmem:[#allocation5 + $0x2e8] sm:$0xff]  ;;  %v15289_v16 = vpack.c.bf16 %v177_v9, %v169_v8  ;;  %v231_v18 = vld [vmem:[#allocation5 + $0x2a0] sm:$0xff] }
  0xc2   :  { %15218 = vmatpush1.bf16.msra.mxu0 %v15217_v19  ;;  %v15291_v19 = vpack.c.bf16 %v194_v13, %v186_v12  ;;  %v185_v20 = vld [vmem:[#allocation5 + $0x130] sm:$0xff]  ;;  %v15271_v22 = vpack.c.bf16 %v240_v15, %v232_v14  ;;  %v239_v23 = vld [vmem:[#allocation5 + $0x2e0] sm:$0xff]  ;;  %v202_v24 = vld [vmem:[#allocation5 + $0x1b8] sm:$0xff] }
  0xc3   :  { %15252 = vmatprep.subr.bf16.mxu0 %v15251_v25  ;;  %v193_v21 = vld [vmem:[#allocation5 + $0x170] sm:$0xff]  ;;  %v210_v25 = vld [vmem:[#allocation5 + $0x1f8] sm:$0xff]  ;;  %v248_v26 = vld [vmem:[#allocation5 + $0x328] sm:$0xff]  ;;  %v15273_v29 = vpack.c.bf16 %v239_v23, %v231_v18 }
  0xc4   :  { %15250 = vmatpush1.bf16.msra.mxu1 %v15249_v55  ;;  %v256_v27 = vld [vmem:[#allocation5 + $0x368] sm:$0xff]  ;;  %v15293_v28 = vpack.c.bf16 %v193_v21, %v185_v20  ;;  %v247_v31 = vld [vmem:[#allocation5 + $0x320] sm:$0xff]  ;;  %v201_v32 = vld [vmem:[#allocation5 + $0x1b0] sm:$0xff] }
  0xc5   :  { %382 = vmatmul.mubr.f32.vlgmr.msra.gmra.mrb[0].mxu0 %v16052_v30  ;;  %15284 = vmatprep.subr.bf16.mxu1 %v15283_v58  ;;  %v209_v33 = vld [vmem:[#allocation5 + $0x1f0] sm:$0xff]  ;;  %v15275_v34 = vpack.c.bf16 %v256_v27, %v248_v26  ;;  %v255_v35 = vld [vmem:[#allocation5 + $0x360] sm:$0xff]  ;;  %v226_v37 = vld [vmem:[#allocation5 + $0x278] sm:$0xff] }
  0xc6   :  { %15254 = vmatpush1.bf16.msra.mxu0 %v15253_v36  ;;  %523 = vmatprep.mubr.f32.mxu0 %v15875_v0  ;;  %v218_v36 = vld [vmem:[#allocation5 + $0x238] sm:$0xff]  ;;  %v272_v39 = vld [vmem:[#allocation5 + $0x3e8] sm:$0xff]  ;;  %v15297_v40 = vpack.c.bf16 %v209_v33, %v201_v32  ;;  %v15277_v41 = vpack.c.bf16 %v255_v35, %v247_v31  ;;  %v263_v42 = vld [vmem:[#allocation5 + $0x3a0] sm:$0xff] }
  0xc7   :  { %15256 = vmatprep.subr.bf16.mxu0 %v15255_v38  ;;  %453 = vmatmul.mubr.f32.vlgmr.msra.gmra.mrb[0].mxu1 %v16052_v30  ;;  %v264_v38 = vld [vmem:[#allocation5 + $0x3a8] sm:$0xff]  ;;  %v15299_v43 = vpack.c.bf16 %v226_v37, %v218_v36  ;;  %v217_v44 = vld [vmem:[#allocation5 + $0x230] sm:$0xff]  ;;  %v234_v48 = vld [vmem:[#allocation5 + $0x2b8] sm:$0xff] }
  0xc8   :  { %15286 = vmatpush1.bf16.msra.mxu1 %v15285_v4  ;;  %594 = vmatprep.mubr.f32.mxu1 %v15875_v0  ;;  %v15295_v0 = vpack.c.bf16 %v210_v25, %v202_v24  ;;  %v225_v45 = vld [vmem:[#allocation5 + $0x270] sm:$0xff]  ;;  %v15279_v46 = vpack.c.bf16 %v272_v39, %v264_v38  ;;  %v609_v50 = vld [vmem:[#allocation8] sm:$0xff]  ;;  %v250_v57 = vld [vmem:[#allocation5 + $0x338] sm:$0xff] }
  0xc9   :  { %15288 = vmatprep.subr.bf16.mxu1 %v15287_v7  ;;  %v613_v51 = vld [vmem:[#allocation8 + $0x20] sm:$0xff]  ;;  %v15301_v52 = vpack.c.bf16 %v225_v45, %v217_v44  ;;  %v233_v55 = vld [vmem:[#allocation5 + $0x2b0] sm:$0xff]  ;;  %v258_v58 = vld [vmem:[#allocation5 + $0x378] sm:$0xff] }
  0xca   :  { %15258 = vmatpush1.bf16.msra.mxu0 %v15257_v47  ;;  %v271_v47 = vld [vmem:[#allocation5 + $0x3e0] sm:$0xff]  ;;  %v13347_v59 = vcombine.high %v609_v50, %v613_v51  ;;  %v617_v60 = vld [vmem:[#allocation8 + $0x40] sm:$0xff]  ;;  %v249_v62 = vld [vmem:[#allocation5 + $0x330] sm:$0xff]  ;;  %v15307_v4 = vpack.c.bf16 %v258_v58, %v250_v57 }
  0xcb   :  { %15260 = vmatprep.subr.bf16.mxu0 %v15259_v49  ;;  %v242_v49 = vld [vmem:[#allocation5 + $0x2f8] sm:$0xff]  ;;  %v15281_v53 = vpack.c.bf16 %v271_v47, %v263_v42  ;;  %v257_v63 = vld [vmem:[#allocation5 + $0x370] sm:$0xff]  ;;  %v625_v6 = vld [vmem:[#allocation8 + $0x80] sm:$0xff] }
  0xcc   :  { %15290 = vmatpush1.bf16.msra.mxu1 %v15289_v16  ;;  %v15303_v54 = vpack.c.bf16 %v242_v49, %v234_v48  ;;  %v266_v2 = vld [vmem:[#allocation5 + $0x3b8] sm:$0xff]  ;;  %v629_v7 = vld [vmem:[#allocation8 + $0xa0] sm:$0xff]  ;;  %v265_v9 = vld [vmem:[#allocation5 + $0x3b0] sm:$0xff]  ;;  %v15309_v11 = vpack.c.bf16 %v257_v63, %v249_v62 }
  0xcd   :  { %15292 = vmatprep.subr.bf16.mxu1 %v15291_v19  ;;  %v274_v3 = vld [vmem:[#allocation5 + $0x3f8] sm:$0xff]  ;;  %v610_v12 = vld [vmem:[#allocation8 + $0x8] sm:$0xff]  ;;  %v633_v16 = vld [vmem:[#allocation8 + $0xc0] sm:$0xff]  ;;  %v13363_v18 = vcombine.high %v625_v6, %v629_v7  ;;  %v13362_v23 = vcombine.low %v625_v6, %v629_v7 }
  0xce   :  { %15262 = vmatpush1.bf16.msra.mxu0 %v15261_v56  ;;  %v241_v56 = vld [vmem:[#allocation5 + $0x2f0] sm:$0xff]  ;;  %v15311_v14 = vpack.c.bf16 %v274_v3, %v266_v2  ;;  %v641_v24 = vld [vmem:[#allocation8 + $0x100] sm:$0xff] }
  0xcf   :  { %15264 = vmatprep.subr.bf16.mxu0 %v15263_v61  ;;  %v621_v61 = vld [vmem:[#allocation8 + $0x60] sm:$0xff]  ;;  %v15305_v1 = vpack.c.bf16 %v241_v56, %v233_v55  ;;  %v614_v13 = vld [vmem:[#allocation8 + $0x28] sm:$0xff] }
  0xd0   :  { %15294 = vmatpush1.bf16.msra.mxu1 %v15293_v28  ;;  %v13355_v8 = vcombine.high %v617_v60, %v621_v61  ;;  %v13354_v15 = vcombine.low %v617_v60, %v621_v61  ;;  %v618_v20 = vld [vmem:[#allocation8 + $0x48] sm:$0xff]  ;;  %v645_v25 = vld [vmem:[#allocation8 + $0x120] sm:$0xff]  ;;  %v13348_v27 = vcombine.low %v610_v12, %v614_v13 }
  0xd1   :  { %15296 = vmatprep.subr.bf16.mxu1 %v15295_v0  ;;  %v622_v21 = vld [vmem:[#allocation8 + $0x68] sm:$0xff]  ;;  %v649_v32 = vld [vmem:[#allocation8 + $0x140] sm:$0xff]  ;;  %v13378_v39 = vcombine.low %v641_v24, %v645_v25 }
  0xd2   :  { %15266 = vmatpush1.bf16.msra.mxu0 %v15265_v5  ;;  %v13346_v5 = vcombine.low %v609_v50, %v613_v51  ;;  %v626_v28 = vld [vmem:[#allocation8 + $0x88] sm:$0xff]  ;;  %v13357_v31 = vcombine.high %v618_v20, %v622_v21  ;;  %v653_v33 = vld [vmem:[#allocation8 + $0x160] sm:$0xff]  ;;  %v13356_v35 = vcombine.low %v618_v20, %v622_v21 }
  0xd3   :  { %15268 = vmatprep.subr.bf16.mxu0 %v15267_v10  ;;  %v273_v10 = vld [vmem:[#allocation5 + $0x3f0] sm:$0xff]  ;;  %v13387_v42 = vcombine.high %v649_v32, %v653_v33  ;;  %v665_v47 = vld [vmem:[#allocation8 + $0x1c0] sm:$0xff] }
  0xd4   :  { %15298 = vmatpush1.bf16.msra.mxu1 %v15297_v40  ;;  %v15313_v19 = vpack.c.bf16 %v273_v10, %v265_v9  ;;  %v634_v36 = vld [vmem:[#allocation8 + $0xc8] sm:$0xff]  ;;  %v657_v40 = vld [vmem:[#allocation8 + $0x180] sm:$0xff] }
  0xd5   :  { %15300 = vmatprep.subr.bf16.mxu1 %v15299_v43  ;;  %v638_v37 = vld [vmem:[#allocation8 + $0xe8] sm:$0xff]  ;;  %v669_v48 = vld [vmem:[#allocation8 + $0x1e0] sm:$0xff] }
  0xd6   :  { %15270 = vmatpush1.bf16.msra.mxu0 %v15269_v17  ;;  %v637_v17 = vld [vmem:[#allocation8 + $0xe0] sm:$0xff]  ;;  %v642_v44 = vld [vmem:[#allocation8 + $0x108] sm:$0xff]  ;;  %v13372_v50 = vcombine.low %v634_v36, %v638_v37  ;;  %v13403_v57 = vcombine.high %v665_v47, %v669_v48  ;;  %v13402_v62 = vcombine.low %v665_v47, %v669_v48 }
  0xd7   :  { %15272 = vmatprep.subr.bf16.mxu0 %v15271_v22  ;;  %v13349_v22 = vcombine.high %v610_v12, %v614_v13  ;;  %v13371_v26 = vcombine.high %v633_v16, %v637_v17  ;;  %v13370_v0 = vcombine.low %v633_v16, %v637_v17  ;;  %v646_v45 = vld [vmem:[#allocation8 + $0x128] sm:$0xff]  ;;  %v673_v55 = vld [vmem:[#allocation8 + $0x200] sm:$0xff] }
  0xd8   :  { %15302 = vmatpush1.bf16.msra.mxu1 %v15301_v52  ;;  %v650_v51 = vld [vmem:[#allocation8 + $0x148] sm:$0xff]  ;;  %v677_v56 = vld [vmem:[#allocation8 + $0x220] sm:$0xff]  ;;  %v13380_v58 = vcombine.low %v642_v44, %v646_v45 }
  0xd9   :  { %15304 = vmatprep.subr.bf16.mxu1 %v15303_v54  ;;  %v654_v52 = vld [vmem:[#allocation8 + $0x168] sm:$0xff]  ;;  %v681_v63 = vld [vmem:[#allocation8 + $0x240] sm:$0xff]  ;;  %v13411_v2 = vcombine.high %v673_v55, %v677_v56  ;;  %v13410_v7 = vcombine.low %v673_v55, %v677_v56 }
  0xda   :  { %15274 = vmatpush1.bf16.msra.mxu0 %v15273_v29  ;;  %v630_v29 = vld [vmem:[#allocation8 + $0xa8] sm:$0xff]  ;;  %v13389_v61 = vcombine.high %v650_v51, %v654_v52  ;;  %v13388_v3 = vcombine.low %v650_v51, %v654_v52  ;;  %v693_v9 = vld [vmem:[#allocation8 + $0x2a0] sm:$0xff] }
  0xdb   :  { %15276 = vmatprep.subr.bf16.mxu0 %v15275_v34  ;;  %v13379_v34 = vcombine.high %v641_v24, %v645_v25  ;;  %v13365_v38 = vcombine.high %v626_v28, %v630_v29  ;;  %v13364_v43 = vcombine.low %v626_v28, %v630_v29  ;;  %v662_v60 = vld [vmem:[#allocation8 + $0x1a8] sm:$0xff]  ;;  %v697_v16 = vld [vmem:[#allocation8 + $0x2c0] sm:$0xff] }
  0xdc   :  { %15306 = vmatpush1.bf16.msra.mxu1 %v15305_v1  ;;  %v685_v1 = vld [vmem:[#allocation8 + $0x260] sm:$0xff]  ;;  %v674_v12 = vld [vmem:[#allocation8 + $0x208] sm:$0xff] }
  0xdd   :  { %15308 = vmatprep.subr.bf16.mxu1 %v15307_v4  ;;  %v666_v4 = vld [vmem:[#allocation8 + $0x1c8] sm:$0xff]  ;;  %v13419_v10 = vcombine.high %v681_v63, %v685_v1  ;;  %v701_v17 = vld [vmem:[#allocation8 + $0x2e0] sm:$0xff] }
  0xde   :  { %15278 = vmatpush1.bf16.msra.mxu0 %v15277_v41  ;;  %v661_v41 = vld [vmem:[#allocation8 + $0x1a0] sm:$0xff]  ;;  %v678_v13 = vld [vmem:[#allocation8 + $0x228] sm:$0xff] }
  0xdf   :  { %15280 = vmatprep.subr.bf16.mxu0 %v15279_v46  ;;  %v13373_v46 = vcombine.high %v634_v36, %v638_v37  ;;  %v13395_v49 = vcombine.high %v657_v40, %v661_v41  ;;  %v13394_v54 = vcombine.low %v657_v40, %v661_v41  ;;  %v682_v20 = vld [vmem:[#allocation8 + $0x248] sm:$0xff]  ;;  %v705_v24 = vld [vmem:[#allocation8 + $0x300] sm:$0xff] }
  0xe0   :  { %15310 = vmatpush1.bf16.msra.mxu1 %v15309_v11  ;;  %v686_v21 = vld [vmem:[#allocation8 + $0x268] sm:$0xff]  ;;  %v709_v25 = vld [vmem:[#allocation8 + $0x320] sm:$0xff] }
  0xe1   :  { %15312 = vmatprep.subr.bf16.mxu1 %v15311_v14  ;;  %v690_v28 = vld [vmem:[#allocation8 + $0x288] sm:$0xff]  ;;  %v733_v51 = vld [vmem:[#allocation8 + $0x3e0] sm:$0xff] }
  0xe2   :  { %15282 = vmatpush1.bf16.msra.mxu0 %v15281_v53  ;;  %v13381_v53 = vcombine.high %v642_v44, %v646_v45  ;;  %v694_v29 = vld [vmem:[#allocation8 + $0x2a8] sm:$0xff]  ;;  %v725_v44 = vld [vmem:[#allocation8 + $0x3a0] sm:$0xff] }
  0xe3   :  { %3731 = vmatprep.subr.bf16.mxu0 %v13347_v59  ;;  %v658_v59 = vld [vmem:[#allocation8 + $0x188] sm:$0xff]  ;;  %v13428_v41 = vcombine.low %v690_v28, %v694_v29 }
  0xe4   :  { %15314 = vmatpush1.bf16.msra.mxu1 %v15313_v19  ;;  %v13397_v6 = vcombine.high %v658_v59, %v662_v60  ;;  %v13396_v11 = vcombine.low %v658_v59, %v662_v60  ;;  %v698_v36 = vld [vmem:[#allocation8 + $0x2c8] sm:$0xff]  ;;  %v737_v59 = vld [vmem:[#allocation8 + $0x400] sm:$0xff] }
  0xe5   :  { %524 = vmatmul.mubr.f32.vlgmr.msra.gmra.mrb[2].mxu0 %v16052_v30  ;;  %3895 = vmatprep.subr.bf16.mxu1 %v13349_v22  ;;  %v13413_v22 = vcombine.high %v674_v12, %v678_v13  ;;  %v702_v37 = vld [vmem:[#allocation8 + $0x2e8] sm:$0xff]  ;;  %v741_v60 = vld [vmem:[#allocation8 + $0x420] sm:$0xff] }
  0xe6   :  { %3732 = vmatpush1.bf16.msra.mxu0 %v13346_v5  ;;  %v670_v5 = vld [vmem:[#allocation8 + $0x1e8] sm:$0xff]  ;;  %v13437_v45 = vcombine.high %v698_v36, %v702_v37  ;;  %v13436_v48 = vcombine.low %v698_v36, %v702_v37  ;;  %v757_v36 = vld [vmem:[#allocation8 + $0x4a0] sm:$0xff] }
  0xe7   :  { %3733 = vmatprep.subr.bf16.mxu0 %v13355_v8  ;;  %595 = vmatmul.mubr.f32.vlgmr.msra.gmra.mrb[2].mxu1 %v16052_v30  ;;  %v13386_v30 = vcombine.low %v649_v32, %v653_v33  ;;  %v689_v8 = vld [vmem:[#allocation8 + $0x280] sm:$0xff]  ;;  %v13405_v14 = vcombine.high %v666_v4, %v670_v5  ;;  %v13404_v19 = vcombine.low %v666_v4, %v670_v5  ;;  %v754_v37 = vld [vmem:[#allocation8 + $0x488] sm:$0xff] }
  0xe8   :  { %3896 = vmatpush1.bf16.msra.mxu1 %v13348_v27  ;;  %v13412_v27 = vcombine.low %v674_v12, %v678_v13  ;;  %v713_v32 = vld [vmem:[#allocation8 + $0x340] sm:$0xff]  ;;  %v277_v13 = vlaneseq }
  0xe9   :  { %3897 = vmatprep.subr.bf16.mxu1 %v13357_v31  ;;  %v13421_v31 = vcombine.high %v682_v20, %v686_v21  ;;  %v717_v33 = vld [vmem:[#allocation8 + $0x360] sm:$0xff] }
  0xea   :  { %3734 = vmatpush1.bf16.msra.mxu0 %v13354_v15  ;;  %v13418_v15 = vcombine.low %v681_v63, %v685_v1  ;;  %v13451_v40 = vcombine.high %v713_v32, %v717_v33  ;;  %v742_v1 = vld [vmem:[#allocation8 + $0x428] sm:$0xff] }
  0xeb   :  { %3735 = vmatprep.subr.bf16.mxu0 %v13363_v18  ;;  %v13427_v18 = vcombine.high %v689_v8, %v693_v9 }
  0xec   :  { %3898 = vmatpush1.bf16.msra.mxu1 %v13356_v35  ;;  %v13420_v35 = vcombine.low %v682_v20, %v686_v21 }
  0xed   :  { %3899 = vmatprep.subr.bf16.mxu1 %v13365_v38  ;;  %v13429_v38 = vcombine.high %v690_v28, %v694_v29  ;;  %v746_v28 = vld [vmem:[#allocation8 + $0x448] sm:$0xff] }
  0xee   :  { %3736 = vmatpush1.bf16.msra.mxu0 %v13362_v23  ;;  %v13426_v23 = vcombine.low %v689_v8, %v693_v9  ;;  %v734_v8 = vld [vmem:[#allocation8 + $0x3e8] sm:$0xff] }
  0xef   :  { %3737 = vmatprep.subr.bf16.mxu0 %v13371_v26  ;;  %v13435_v26 = vcombine.high %v697_v16, %v701_v17  ;;  %v750_v29 = vld [vmem:[#allocation8 + $0x468] sm:$0xff] }
  0xf0   :  { %3900 = vmatpush1.bf16.msra.mxu1 %v13364_v43  ;;  %v721_v43 = vld [vmem:[#allocation8 + $0x380] sm:$0xff] }
  0xf1   :  { %3901 = vmatprep.subr.bf16.mxu1 %v13373_v46  ;;  %v710_v46 = vld [vmem:[#allocation8 + $0x328] sm:$0xff]  ;;  %v13459_v47 = vcombine.high %v721_v43, %v725_v44 }
  0xf2   :  { %3738 = vmatpush1.bf16.msra.mxu0 %v13370_v0  ;;  %v13434_v0 = vcombine.low %v697_v16, %v701_v17  ;;  %v16065_v16 = vld [vmem:[#allocation7] sm:$0xff] }
  0xf3   :  { %3739 = vmatprep.subr.bf16.mxu0 %v13379_v34  ;;  %v13443_v34 = vcombine.high %v705_v24, %v709_v25 }
  0xf4   :  { %3902 = vmatpush1.bf16.msra.mxu1 %v13372_v50  ;;  %v729_v50 = vld [vmem:[#allocation8 + $0x3c0] sm:$0xff] }
  0xf5   :  { %3903 = vmatprep.subr.bf16.mxu1 %v13381_v53  ;;  %v718_v53 = vld [vmem:[#allocation8 + $0x368] sm:$0xff]  ;;  %v13467_v55 = vcombine.high %v729_v50, %v733_v51  ;;  %v13466_v63 = vcombine.low %v729_v50, %v733_v51 }
  0xf6   :  { %3740 = vmatpush1.bf16.msra.mxu0 %v13378_v39  ;;  %v13442_v39 = vcombine.low %v705_v24, %v709_v25  ;;  %v745_v25 = vld [vmem:[#allocation8 + $0x440] sm:$0xff] }
  0xf7   :  { %3741 = vmatprep.subr.bf16.mxu0 %v13387_v42  ;;  %v706_v42 = vld [vmem:[#allocation8 + $0x308] sm:$0xff] }
  0xf8   :  { %3904 = vmatpush1.bf16.msra.mxu1 %v13380_v58  ;;  %v13445_v52 = vcombine.high %v706_v42, %v710_v46  ;;  %v13444_v56 = vcombine.low %v706_v42, %v710_v46  ;;  %v726_v58 = vld [vmem:[#allocation8 + $0x3a8] sm:$0xff]  ;;  %v765_v46 = vld [vmem:[#allocation8 + $0x4e0] sm:$0xff] }
  0xf9   :  { %3905 = vmatprep.subr.bf16.mxu1 %v13389_v61  ;;  %v738_v61 = vld [vmem:[#allocation8 + $0x408] sm:$0xff] }
  0xfa   :  { %3742 = vmatpush1.bf16.msra.mxu0 %v13386_v30  ;;  %v13450_v30 = vcombine.low %v713_v32, %v717_v33  ;;  %v13476_v4 = vcombine.low %v738_v61, %v742_v1  ;;  %v13477_v12 = vcombine.high %v738_v61, %v742_v1  ;;  %v777_v1 = vld [vmem:[#allocation8 + $0x540] sm:$0xff] }
  0xfb   :  { %3743 = vmatprep.subr.bf16.mxu0 %v13395_v49  ;;  %v714_v49 = vld [vmem:[#allocation8 + $0x348] sm:$0xff] }
  0xfc   :  { %3906 = vmatpush1.bf16.msra.mxu1 %v13388_v3  ;;  %v13475_v3 = vcombine.high %v737_v59, %v741_v60  ;;  %v13452_v5 = vcombine.low %v714_v49, %v718_v53 }
  0xfd   :  { %3907 = vmatprep.subr.bf16.mxu1 %v13397_v6 }
  0xfe   :  { %3744 = vmatpush1.bf16.msra.mxu0 %v13394_v54  ;;  %v13458_v54 = vcombine.low %v721_v43, %v725_v44  ;;  %v761_v44 = vld [vmem:[#allocation8 + $0x4c0] sm:$0xff] }
  0xff   :  { %3745 = vmatprep.subr.bf16.mxu0 %v13403_v57  ;;  %v722_v57 = vld [vmem:[#allocation8 + $0x388] sm:$0xff] }
 0x100   :  { %3908 = vmatpush1.bf16.msra.mxu1 %v13396_v11  ;;  %v13461_v6 = vcombine.high %v722_v57, %v726_v58  ;;  %v13460_v9 = vcombine.low %v722_v57, %v726_v58  ;;  %v770_v57 = vld [vmem:[#allocation8 + $0x508] sm:$0xff] }
 0x101   :  { %3909 = vmatprep.subr.bf16.mxu1 %v13405_v14  ;;  %v16060_v14 = vshrl.u32 %v277_v13, 7  ;;  %v774_v58 = vld [vmem:[#allocation8 + $0x528] sm:$0xff] }
 0x102   :  { %3746 = vmatpush1.bf16.msra.mxu0 %v13402_v62  ;;  %v13453_v62 = vcombine.high %v714_v49, %v718_v53 }
 0x103   :  { %3747 = vmatprep.subr.bf16.mxu0 %v13411_v2  ;;  %v13474_v2 = vcombine.low %v737_v59, %v741_v60  ;;  %v16068_v17 = vsub.s32 1, %v16060_v14  ;;  %v13498_v60 = vcombine.low %v761_v44, %v765_v46 }
 0x104   :  { %3910 = vmatpush1.bf16.msra.mxu1 %v13404_v19 }
 0x105   :  { %3911 = vmatprep.subr.bf16.mxu1 %v13413_v22  ;;  %v284_v19 = vrot.slane %v16065_v16, %v16068_v17 }
 0x106   :  { %3748 = vmatpush1.bf16.msra.mxu0 %v13410_v7  ;;  %v730_v7 = vld [vmem:[#allocation8 + $0x3c8] sm:$0xff] }
 0x107   :  { %3749 = vmatprep.subr.bf16.mxu0 %v13419_v10  ;;  %v13469_v10 = vcombine.high %v730_v7, %v734_v8  ;;  %v13468_v11 = vcombine.low %v730_v7, %v734_v8 }
 0x108   :  { %3912 = vmatpush1.bf16.msra.mxu1 %v13412_v27  ;;  %v749_v27 = vld [vmem:[#allocation8 + $0x460] sm:$0xff] }
 0x109   :  { %3913 = vmatprep.subr.bf16.mxu1 %v13421_v31  ;;  %v16075_v31 = vsub.s32 3, %v16060_v14  ;;  %v13483_v33 = vcombine.high %v745_v25, %v749_v27 }
 0x10a   :  { %3750 = vmatpush1.bf16.msra.mxu0 %v13418_v15  ;;  %v16063_v15 = vsub.s32 0, %v16060_v14 }
 0x10b   :  { %3751 = vmatprep.subr.bf16.mxu0 %v13427_v18 }
 0x10c   :  { %3914 = vmatpush1.bf16.msra.mxu1 %v13420_v35  ;;  %v280_v18 = vrot.slane %v16065_v16, %v16063_v15  ;;  %v753_v35 = vld [vmem:[#allocation8 + $0x480] sm:$0xff] }
 0x10d   :  { %3915 = vmatprep.subr.bf16.mxu1 %v13429_v38  ;;  %v758_v38 = vld [vmem:[#allocation8 + $0x4a8] sm:$0xff]  ;;  %v13491_v42 = vcombine.high %v753_v35, %v757_v36  ;;  %v13490_v50 = vcombine.low %v753_v35, %v757_v36 }
 0x10e   :  { %3752 = vmatpush1.bf16.msra.mxu0 %v13426_v23  ;;  %v13493_v43 = vcombine.high %v754_v37, %v758_v38  ;;  %v13492_v51 = vcombine.low %v754_v37, %v758_v38  ;;  %v806_v35 = vld [vmem:[#allocation8 + $0x628] sm:$0xff] }
 0x10f   :  { %3753 = vmatprep.subr.bf16.mxu0 %v13435_v26 }
 0x110   :  { %3916 = vmatpush1.bf16.msra.mxu1 %v13428_v41  ;;  %v13484_v41 = vcombine.low %v746_v28, %v750_v29 }
 0x111   :  { %3917 = vmatprep.subr.bf16.mxu1 %v13437_v45 }
 0x112   :  { %3754 = vmatpush1.bf16.msra.mxu0 %v13434_v0 }
 0x113   :  { %3755 = vmatprep.subr.bf16.mxu0 %v13443_v34  ;;  %v13485_v34 = vcombine.high %v746_v28, %v750_v29  ;;  %v801_v29 = vld [vmem:[#allocation8 + $0x600] sm:$0xff] }
 0x114   :  { %3918 = vmatpush1.bf16.msra.mxu1 %v13436_v48 }
 0x115   :  { %3919 = vmatprep.subr.bf16.mxu1 %v13445_v52  ;;  %v13499_v52 = vcombine.high %v761_v44, %v765_v46  ;;  %v810_v44 = vld [vmem:[#allocation8 + $0x648] sm:$0xff] }
 0x116   :  { %3756 = vmatpush1.bf16.msra.mxu0 %v13442_v39  ;;  %v292_v39 = vrot.slane %v16065_v16, %v16075_v31  ;;  %v814_v46 = vld [vmem:[#allocation8 + $0x668] sm:$0xff] }
 0x117   :  { %3757 = vmatprep.subr.bf16.mxu0 %v13451_v40  ;;  %v13482_v40 = vcombine.low %v745_v25, %v749_v27 }
 0x118   :  { %3920 = vmatpush1.bf16.msra.mxu1 %v13444_v56  ;;  %v773_v56 = vld [vmem:[#allocation8 + $0x520] sm:$0xff] }
 0x119   :  { %3921 = vmatprep.subr.bf16.mxu1 %v13453_v62 }
 0x11a   :  { %3758 = vmatpush1.bf16.msra.mxu0 %v13450_v30  ;;  %v762_v30 = vld [vmem:[#allocation8 + $0x4c8] sm:$0xff] }
 0x11b   :  { %3759 = vmatprep.subr.bf16.mxu0 %v13459_v47  ;;  %v766_v47 = vld [vmem:[#allocation8 + $0x4e8] sm:$0xff] }
 0x11c   :  { %3922 = vmatpush1.bf16.msra.mxu1 %v13452_v5  ;;  %v13501_v53 = vcombine.high %v762_v30, %v766_v47  ;;  %v13500_v61 = vcombine.low %v762_v30, %v766_v47 }
 0x11d   :  { %3923 = vmatprep.subr.bf16.mxu1 %v13461_v6  ;;  %v13508_v6 = vcombine.low %v770_v57, %v774_v58 }
 0x11e   :  { %3760 = vmatpush1.bf16.msra.mxu0 %v13458_v54  ;;  %v769_v54 = vld [vmem:[#allocation8 + $0x500] sm:$0xff] }
 0x11f   :  { %3761 = vmatprep.subr.bf16.mxu0 %v13467_v55  ;;  %v13507_v62 = vcombine.high %v769_v54, %v773_v56  ;;  %v13506_v5 = vcombine.low %v769_v54, %v773_v56 }
 0x120   :  { %3924 = vmatpush1.bf16.msra.mxu1 %v13460_v9  ;;  %v785_v9 = vld [vmem:[#allocation8 + $0x580] sm:$0xff] }
 0x121   :  { %3925 = vmatprep.subr.bf16.mxu1 %v13469_v10  ;;  %v789_v10 = vld [vmem:[#allocation8 + $0x5a0] sm:$0xff] }
 0x122   :  { %3762 = vmatpush1.bf16.msra.mxu0 %v13466_v63  ;;  %v13509_v63 = vcombine.high %v770_v57, %v774_v58  ;;  %v13522_v25 = vcombine.low %v785_v9, %v789_v10  ;;  %v825_v58 = vld [vmem:[#allocation8 + $0x6c0] sm:$0xff] }
 0x123   :  { %3772 = vmatprep.subr.bf16.mxu0 %v13475_v3  ;;  %v778_v3 = vld [vmem:[#allocation8 + $0x548] sm:$0xff] }
 0x124   :  { %3926 = vmatpush1.bf16.msra.mxu1 %v13468_v11  ;;  %v786_v11 = vld [vmem:[#allocation8 + $0x588] sm:$0xff] }
 0x125   :  { %3936 = vmatprep.subr.bf16.mxu1 %v13477_v12  ;;  %v790_v12 = vld [vmem:[#allocation8 + $0x5a8] sm:$0xff] }
 0x198   :  { %v383_v20 = vpop.f32.mrb[0].mxu0 }
 0x199   :  { %v384_v21 = vadd.f32 %v383_v20, %v280_v18  ;;  %v385_v22 = vpop.f32.mrb[1].mxu0  ;;  %v13525_v20 = vcombine.high %v786_v11, %v790_v12 }
 0x19a   :  { %v386_v23 = vadd.f32 %v385_v22, %v284_v19  ;;  %v16087_v45 = vpop.f32.mrb[0].mxu1  ;;  %v13523_v19 = vcombine.high %v785_v9, %v789_v10  ;;  %v797_v22 = vld [vmem:[#allocation8 + $0x5e0] sm:$0xff] }
 0x19b   :  { %v601_v24 = vmax.f32 %v384_v21, 0.0  ;;  %v456_v48 = vpop.f32.mrb[1].mxu1  ;;  %v793_v21 = vld [vmem:[#allocation8 + $0x5c0] sm:$0xff] }
 0x19c   :  { %v602_v26 = vmax.f32 %v386_v23, 0.0  ;;  %v457_v49 = vadd.f32 %v456_v48, %v292_v39  ;;  %v794_v23 = vld [vmem:[#allocation8 + $0x5c8] sm:$0xff]  ;;  %v13531_v27 = vcombine.high %v793_v21, %v797_v22  ;;  %v13530_v38 = vcombine.low %v793_v21, %v797_v22 }
 0x19d   :  { %v16079_v32 = vpack.c.bf16 %v601_v24, %v601_v24  ;;  %v798_v24 = vld [vmem:[#allocation8 + $0x5e8] sm:$0xff] }
 0x19e   :  { %v16077_v0 = vpack.c.bf16 %v602_v26, %v602_v26  ;;  %v604_v55 = vmax.f32 %v457_v49, 0.0  ;;  %v13524_v26 = vcombine.low %v786_v11, %v790_v12  ;;  %v13533_v28 = vcombine.high %v794_v23, %v798_v24  ;;  %v841_v12 = vld [vmem:[#allocation8 + $0x740] sm:$0xff] }
 0x19f   :  { %v13532_v39 = vcombine.low %v794_v23, %v798_v24  ;;  %v13549_v49 = vcombine.high %v810_v44, %v814_v46 }
 0x1a0   :  { %3763 = vmatprep.mubr.bf16.mxu0 %v16077_v0  ;;  %3927 = vmatprep.mubr.bf16.mxu1 %v16077_v0  ;;  %v16089_v59 = vpack.c.bf16 %v604_v55, %v604_v55  ;;  %v13548_v55 = vcombine.low %v810_v44, %v814_v46  ;;  %v858_v44 = vld [vmem:[#allocation8 + $0x7c8] sm:$0xff] }
 0x1a1   :  { %3764 = vmatmul.mubr.bf16.vlgmr.msra.gmra.mrb[4].mxu0 %v16079_v32  ;;  %3928 = vmatmul.mubr.bf16.vlgmr.msra.gmra.mrb[4].mxu1 %v16079_v32  ;;  %v862_v46 = vld [vmem:[#allocation8 + $0x7e8] sm:$0xff] }
 0x1a2   :  { %3773 = vmatpush1.bf16.msra.mxu0 %v13474_v2  ;;  %3937 = vmatpush1.bf16.msra.mxu1 %v13476_v4  ;;  %v781_v2 = vld [vmem:[#allocation8 + $0x560] sm:$0xff]  ;;  %v782_v4 = vld [vmem:[#allocation8 + $0x568] sm:$0xff] }
 0x1a3   :  { %3774 = vmatprep.subr.bf16.mxu0 %v13483_v33  ;;  %3938 = vmatprep.subr.bf16.mxu1 %v13485_v34  ;;  %v13515_v7 = vcombine.high %v777_v1, %v781_v2  ;;  %v13517_v8 = vcombine.high %v778_v3, %v782_v4  ;;  %v13514_v13 = vcombine.low %v777_v1, %v781_v2  ;;  %v805_v33 = vld [vmem:[#allocation8 + $0x620] sm:$0xff]  ;;  %v802_v34 = vld [vmem:[#allocation8 + $0x608] sm:$0xff] }
 0x1a4   :  { %3804 = vmatprep.mubr.bf16.mxu0 %v16089_v59  ;;  %3968 = vmatprep.mubr.bf16.mxu1 %v16089_v59  ;;  %v13516_v18 = vcombine.low %v778_v3, %v782_v4  ;;  %v13538_v30 = vcombine.low %v801_v29, %v805_v33  ;;  %v13540_v47 = vcombine.low %v802_v34, %v806_v35  ;;  %v833_v4 = vld [vmem:[#allocation8 + $0x700] sm:$0xff] }
 0x1a6   :  { %3775 = vmatpush1.bf16.msra.mxu0 %v13482_v40  ;;  %3939 = vmatpush1.bf16.msra.mxu1 %v13484_v41  ;;  %v13539_v40 = vcombine.high %v801_v29, %v805_v33  ;;  %v13541_v41 = vcombine.high %v802_v34, %v806_v35  ;;  %v850_v29 = vld [vmem:[#allocation8 + $0x788] sm:$0xff]  ;;  %v16105_v34 = vsub.s32 5, %v16060_v14 }
 0x1a7   :  { %3776 = vmatprep.subr.bf16.mxu0 %v13491_v42  ;;  %3940 = vmatprep.subr.bf16.mxu1 %v13493_v43  ;;  %v809_v42 = vld [vmem:[#allocation8 + $0x640] sm:$0xff]  ;;  %v854_v33 = vld [vmem:[#allocation8 + $0x7a8] sm:$0xff] }
 0x1a8   :  { %v813_v43 = vld [vmem:[#allocation8 + $0x660] sm:$0xff] }
 0x1a9   :  { %v13547_v48 = vcombine.high %v809_v42, %v813_v43  ;;  %v13546_v54 = vcombine.low %v809_v42, %v813_v43  ;;  %v857_v42 = vld [vmem:[#allocation8 + $0x7c0] sm:$0xff] }
 0x1aa   :  { %3777 = vmatpush1.bf16.msra.mxu0 %v13490_v50  ;;  %3941 = vmatpush1.bf16.msra.mxu1 %v13492_v51  ;;  %v817_v50 = vld [vmem:[#allocation8 + $0x680] sm:$0xff] }
 0x1ab   :  { %3778 = vmatprep.subr.bf16.mxu0 %v13499_v52  ;;  %3942 = vmatprep.subr.bf16.mxu1 %v13501_v53  ;;  %v821_v51 = vld [vmem:[#allocation8 + $0x6a0] sm:$0xff]  ;;  %v818_v52 = vld [vmem:[#allocation8 + $0x688] sm:$0xff] }
 0x1ac   :  { %v822_v53 = vld [vmem:[#allocation8 + $0x6a8] sm:$0xff]  ;;  %v13555_v56 = vcombine.high %v817_v50, %v821_v51  ;;  %v861_v43 = vld [vmem:[#allocation8 + $0x7e0] sm:$0xff] }
 0x1ad   :  { %v13557_v57 = vcombine.high %v818_v52, %v822_v53  ;;  %v13556_v1 = vcombine.low %v818_v52, %v822_v53  ;;  %v865_v52 = vld [vmem:[#allocation8 + $0x800] sm:$0xff] }
 0x1ae   :  { %3779 = vmatpush1.bf16.msra.mxu0 %v13498_v60  ;;  %3943 = vmatpush1.bf16.msra.mxu1 %v13500_v61  ;;  %v829_v60 = vld [vmem:[#allocation8 + $0x6e0] sm:$0xff]  ;;  %v826_v61 = vld [vmem:[#allocation8 + $0x6c8] sm:$0xff] }
 0x1af   :  { %3780 = vmatprep.subr.bf16.mxu0 %v13507_v62  ;;  %3944 = vmatprep.subr.bf16.mxu1 %v13509_v63  ;;  %v830_v62 = vld [vmem:[#allocation8 + $0x6e8] sm:$0xff]  ;;  %v13554_v63 = vcombine.low %v817_v50, %v821_v51  ;;  %v13563_v2 = vcombine.high %v825_v58, %v829_v60  ;;  %v13595_v50 = vcombine.high %v857_v42, %v861_v43  ;;  %v869_v53 = vld [vmem:[#allocation8 + $0x820] sm:$0xff] }
 0x1b0   :  { %v13565_v3 = vcombine.high %v826_v61, %v830_v62  ;;  %v13564_v9 = vcombine.low %v826_v61, %v830_v62  ;;  %v13597_v51 = vcombine.high %v858_v44, %v862_v46  ;;  %v873_v62 = vld [vmem:[#allocation8 + $0x840] sm:$0xff] }
 0x1b2   :  { %3781 = vmatpush1.bf16.msra.mxu0 %v13506_v5  ;;  %3945 = vmatpush1.bf16.msra.mxu1 %v13508_v6  ;;  %v837_v5 = vld [vmem:[#allocation8 + $0x720] sm:$0xff]  ;;  %v834_v6 = vld [vmem:[#allocation8 + $0x708] sm:$0xff] }
 0x1b3   :  { %3782 = vmatprep.subr.bf16.mxu0 %v13515_v7  ;;  %3946 = vmatprep.subr.bf16.mxu1 %v13517_v8  ;;  %v838_v7 = vld [vmem:[#allocation8 + $0x728] sm:$0xff]  ;;  %v13562_v8 = vcombine.low %v825_v58, %v829_v60  ;;  %v13571_v10 = vcombine.high %v833_v4, %v837_v5  ;;  %v13570_v21 = vcombine.low %v833_v4, %v837_v5 }
 0x1b4   :  { %v13573_v11 = vcombine.high %v834_v6, %v838_v7  ;;  %v13572_v22 = vcombine.low %v834_v6, %v838_v7  ;;  %v13594_v58 = vcombine.low %v857_v42, %v861_v43  ;;  %v13596_v60 = vcombine.low %v858_v44, %v862_v46 }
 0x1b5   :  { %v13602_v5 = vcombine.low %v865_v52, %v869_v53 }
 0x1b6   :  { %3783 = vmatpush1.bf16.msra.mxu0 %v13514_v13  ;;  %3947 = vmatpush1.bf16.msra.mxu1 %v13516_v18  ;;  %v845_v13 = vld [vmem:[#allocation8 + $0x760] sm:$0xff]  ;;  %v842_v18 = vld [vmem:[#allocation8 + $0x748] sm:$0xff] }
 0x1b7   :  { %3784 = vmatprep.subr.bf16.mxu0 %v13523_v19  ;;  %3948 = vmatprep.subr.bf16.mxu1 %v13525_v20  ;;  %v846_v19 = vld [vmem:[#allocation8 + $0x768] sm:$0xff]  ;;  %v16098_v20 = vsub.s32 2, %v16060_v14  ;;  %v13579_v24 = vcombine.high %v841_v12, %v845_v13 }
 0x1b8   :  { %v16093_v36 = vpop.f32.mrb[2].mxu0 }
 0x1b9   :  { %v16095_v37 = vpop.f32.mrb[3].mxu0  ;;  %v288_v35 = vrot.slane %v16065_v16, %v16098_v20 }
 0x1ba   :  { %3785 = vmatpush1.bf16.msra.mxu0 %v13522_v25  ;;  %3949 = vmatpush1.bf16.msra.mxu1 %v13524_v26  ;;  %v16100_v23 = vpop.f32.mrb[2].mxu1  ;;  %v13581_v25 = vcombine.high %v842_v18, %v846_v19  ;;  %v849_v26 = vld [vmem:[#allocation8 + $0x780] sm:$0xff] }
 0x1bb   :  { %3786 = vmatprep.subr.bf16.mxu0 %v13531_v27  ;;  %3950 = vmatprep.subr.bf16.mxu1 %v13533_v28  ;;  %v16102_v27 = vpop.f32.mrb[3].mxu1  ;;  %v853_v28 = vld [vmem:[#allocation8 + $0x7a0] sm:$0xff] }
 0x1be   :  { %3787 = vmatpush1.bf16.msra.mxu0 %v13530_v38  ;;  %3951 = vmatpush1.bf16.msra.mxu1 %v13532_v39  ;;  %v13578_v38 = vcombine.low %v841_v12, %v845_v13  ;;  %v13580_v39 = vcombine.low %v842_v18, %v846_v19 }
 0x1bf   :  { %3788 = vmatprep.subr.bf16.mxu0 %v13539_v40  ;;  %3952 = vmatprep.subr.bf16.mxu1 %v13541_v41  ;;  %v13587_v40 = vcombine.high %v849_v26, %v853_v28  ;;  %v13589_v41 = vcombine.high %v850_v29, %v854_v33 }
 0x1c2   :  { %3789 = vmatpush1.bf16.msra.mxu0 %v13538_v30  ;;  %3953 = vmatpush1.bf16.msra.mxu1 %v13540_v47  ;;  %v300_v30 = vrot.slane %v16065_v16, %v16105_v34  ;;  %v455_v47 = vadd.f32 %v16087_v45, %v288_v35  ;;  %v13603_v45 = vcombine.high %v865_v52, %v869_v53 }
 0x1c3   :  { %3790 = vmatprep.subr.bf16.mxu0 %v13547_v48  ;;  %3954 = vmatprep.subr.bf16.mxu1 %v13549_v49  ;;  %v13586_v48 = vcombine.low %v849_v26, %v853_v28  ;;  %v13588_v49 = vcombine.low %v850_v29, %v854_v33  ;;  %v894_v26 = vld [vmem:[#allocation8 + $0x8e8] sm:$0xff] }
 0x1c6   :  { %3791 = vmatpush1.bf16.msra.mxu0 %v13546_v54  ;;  %3955 = vmatpush1.bf16.msra.mxu1 %v13548_v55  ;;  %v866_v54 = vld [vmem:[#allocation8 + $0x808] sm:$0xff] }
 0x1c7   :  { %3792 = vmatprep.subr.bf16.mxu0 %v13555_v56  ;;  %3956 = vmatprep.subr.bf16.mxu1 %v13557_v57  ;;  %v870_v55 = vld [vmem:[#allocation8 + $0x828] sm:$0xff]  ;;  %v528_v56 = vadd.f32 %v16095_v37, %v300_v30  ;;  %v603_v57 = vmax.f32 %v455_v47, 0.0  ;;  %v905_v30 = vld [vmem:[#allocation8 + $0x940] sm:$0xff] }
 0x1c8   :  { %v13605_v61 = vcombine.high %v866_v54, %v870_v55  ;;  %v13604_v37 = vcombine.low %v866_v54, %v870_v55  ;;  %v909_v47 = vld [vmem:[#allocation8 + $0x960] sm:$0xff] }
 0x1c9   :  { %v16113_v4 = vpack.c.bf16 %v603_v57, %v603_v57  ;;  %v13643_v52 = vcombine.high %v905_v30, %v909_v47  ;;  %v913_v54 = vld [vmem:[#allocation8 + $0x980] sm:$0xff]  ;;  %v918_v57 = vld [vmem:[#allocation8 + $0x9a8] sm:$0xff] }
 0x1ca   :  { %3793 = vmatpush1.bf16.msra.mxu0 %v13554_v63  ;;  %3957 = vmatpush1.bf16.msra.mxu1 %v13556_v1  ;;  %v877_v63 = vld [vmem:[#allocation8 + $0x860] sm:$0xff]  ;;  %v874_v1 = vld [vmem:[#allocation8 + $0x848] sm:$0xff] }
 0x1cb   :  { %3794 = vmatprep.subr.bf16.mxu0 %v13563_v2  ;;  %3958 = vmatprep.subr.bf16.mxu1 %v13565_v3  ;;  %v878_v2 = vld [vmem:[#allocation8 + $0x868] sm:$0xff]  ;;  %v606_v3 = vmax.f32 %v528_v56, 0.0  ;;  %v13611_v6 = vcombine.high %v873_v62, %v877_v63  ;;  %v13610_v13 = vcombine.low %v873_v62, %v877_v63  ;;  %v917_v55 = vld [vmem:[#allocation8 + $0x9a0] sm:$0xff] }
 0x1cc   :  { %v13613_v7 = vcombine.high %v874_v1, %v878_v2  ;;  %v13612_v18 = vcombine.low %v874_v1, %v878_v2  ;;  %v914_v56 = vld [vmem:[#allocation8 + $0x988] sm:$0xff]  ;;  %v921_v62 = vld [vmem:[#allocation8 + $0x9c0] sm:$0xff] }
 0x1cd   :  { %v16115_v12 = vpack.c.bf16 %v606_v3, %v606_v3  ;;  %v925_v63 = vld [vmem:[#allocation8 + $0x9e0] sm:$0xff]  ;;  %v922_v1 = vld [vmem:[#allocation8 + $0x9c8] sm:$0xff]  ;;  %v13650_v3 = vcombine.low %v913_v54, %v917_v55 }
 0x1ce   :  { %3795 = vmatpush1.bf16.msra.mxu0 %v13562_v8  ;;  %3959 = vmatpush1.bf16.msra.mxu1 %v13564_v9  ;;  %v881_v8 = vld [vmem:[#allocation8 + $0x880] sm:$0xff]  ;;  %v926_v2 = vld [vmem:[#allocation8 + $0x9e8] sm:$0xff] }
 0x1cf   :  { %3796 = vmatprep.subr.bf16.mxu0 %v13571_v10  ;;  %3960 = vmatprep.subr.bf16.mxu1 %v13573_v11  ;;  %v885_v9 = vld [vmem:[#allocation8 + $0x8a0] sm:$0xff]  ;;  %v882_v10 = vld [vmem:[#allocation8 + $0x888] sm:$0xff] }
 0x1d0   :  { %v886_v11 = vld [vmem:[#allocation8 + $0x8a8] sm:$0xff]  ;;  %v13619_v19 = vcombine.high %v881_v8, %v885_v9  ;;  %v13618_v28 = vcombine.low %v881_v8, %v885_v9  ;;  %v933_v8 = vld [vmem:[#allocation8 + $0xa20] sm:$0xff] }
 0x1d1   :  { %v13620_v29 = vcombine.low %v882_v10, %v886_v11  ;;  %v930_v9 = vld [vmem:[#allocation8 + $0xa08] sm:$0xff] }
 0x1d2   :  { %3797 = vmatpush1.bf16.msra.mxu0 %v13570_v21  ;;  %3961 = vmatpush1.bf16.msra.mxu1 %v13572_v22  ;;  %v13621_v21 = vcombine.high %v882_v10, %v886_v11  ;;  %v889_v22 = vld [vmem:[#allocation8 + $0x8c0] sm:$0xff]  ;;  %v934_v10 = vld [vmem:[#allocation8 + $0xa28] sm:$0xff]  ;;  %v13658_v11 = vcombine.low %v921_v62, %v925_v63 }
 0x1d3   :  { %3798 = vmatprep.subr.bf16.mxu0 %v13579_v24  ;;  %3962 = vmatprep.subr.bf16.mxu1 %v13581_v25  ;;  %v893_v24 = vld [vmem:[#allocation8 + $0x8e0] sm:$0xff]  ;;  %v890_v25 = vld [vmem:[#allocation8 + $0x8c8] sm:$0xff] }
 0x1d4   :  { %v13627_v33 = vcombine.high %v889_v22, %v893_v24  ;;  %v13629_v35 = vcombine.high %v890_v25, %v894_v26  ;;  %v13626_v42 = vcombine.low %v889_v22, %v893_v24  ;;  %v13628_v43 = vcombine.low %v890_v25, %v894_v26  ;;  %v941_v22 = vld [vmem:[#allocation8 + $0xa60] sm:$0xff]  ;;  %v938_v24 = vld [vmem:[#allocation8 + $0xa48] sm:$0xff] }
 0x1d5   :  { %v942_v25 = vld [vmem:[#allocation8 + $0xa68] sm:$0xff] }
 0x1d6   :  { %3799 = vmatpush1.bf16.msra.mxu0 %v13578_v38  ;;  %3963 = vmatpush1.bf16.msra.mxu1 %v13580_v39  ;;  %v897_v38 = vld [vmem:[#allocation8 + $0x900] sm:$0xff] }
 0x1d7   :  { %3800 = vmatprep.subr.bf16.mxu0 %v13587_v40  ;;  %3964 = vmatprep.subr.bf16.mxu1 %v13589_v41  ;;  %v901_v39 = vld [vmem:[#allocation8 + $0x920] sm:$0xff]  ;;  %v898_v40 = vld [vmem:[#allocation8 + $0x908] sm:$0xff] }
 0x1d8   :  { %v902_v41 = vld [vmem:[#allocation8 + $0x928] sm:$0xff]  ;;  %v13635_v44 = vcombine.high %v897_v38, %v901_v39 }
 0x1d9   :  { %v13637_v46 = vcombine.high %v898_v40, %v902_v41 }
 0x1da   :  { %3801 = vmatpush1.bf16.msra.mxu0 %v13586_v48  ;;  %3965 = vmatpush1.bf16.msra.mxu1 %v13588_v49  ;;  %v906_v48 = vld [vmem:[#allocation8 + $0x948] sm:$0xff] }
 0x1db   :  { %3802 = vmatprep.subr.bf16.mxu0 %v13595_v50  ;;  %3966 = vmatprep.subr.bf16.mxu1 %v13597_v51  ;;  %v910_v49 = vld [vmem:[#allocation8 + $0x968] sm:$0xff]  ;;  %v13634_v50 = vcombine.low %v897_v38, %v901_v39  ;;  %v13636_v51 = vcombine.low %v898_v40, %v902_v41  ;;  %v949_v38 = vld [vmem:[#allocation8 + $0xaa0] sm:$0xff] }
 0x1dc   :  { %v13645_v53 = vcombine.high %v906_v48, %v910_v49  ;;  %v946_v39 = vld [vmem:[#allocation8 + $0xa88] sm:$0xff] }
 0x1dd   :  { %v950_v40 = vld [vmem:[#allocation8 + $0xaa8] sm:$0xff] }
 0x1de   :  { %3803 = vmatpush1.bf16.msra.mxu0 %v13594_v58  ;;  %3967 = vmatpush1.bf16.msra.mxu1 %v13596_v60  ;;  %v13642_v58 = vcombine.low %v905_v30, %v909_v47  ;;  %v13644_v60 = vcombine.low %v906_v48, %v910_v49  ;;  %v957_v30 = vld [vmem:[#allocation8 + $0xae0] sm:$0xff]  ;;  %v954_v47 = vld [vmem:[#allocation8 + $0xac8] sm:$0xff] }
 0x1df   :  { %3813 = vmatprep.subr.bf16.mxu0 %v13603_v45  ;;  %3977 = vmatprep.subr.bf16.mxu1 %v13605_v61  ;;  %v13651_v45 = vcombine.high %v913_v54, %v917_v55  ;;  %v13653_v61 = vcombine.high %v914_v56, %v918_v57  ;;  %v958_v48 = vld [vmem:[#allocation8 + $0xae8] sm:$0xff]  ;;  %v965_v54 = vld [vmem:[#allocation8 + $0xb20] sm:$0xff] }
 0x1e0   :  { %v962_v55 = vld [vmem:[#allocation8 + $0xb08] sm:$0xff] }
 0x1e1   :  { %3805 = vmatmul.mubr.bf16.vlgmr.msra.gmra.mrb[4].mxu0 %v16113_v4  ;;  %3969 = vmatmul.mubr.bf16.vlgmr.msra.gmra.mrb[4].mxu1 %v16113_v4 }
 0x1e2   :  { %3814 = vmatpush1.bf16.msra.mxu0 %v13602_v5  ;;  %3978 = vmatpush1.bf16.msra.mxu1 %v13604_v37  ;;  %v13652_v5 = vcombine.low %v914_v56, %v918_v57  ;;  %v13659_v37 = vcombine.high %v921_v62, %v925_v63  ;;  %v966_v56 = vld [vmem:[#allocation8 + $0xb28] sm:$0xff]  ;;  %v973_v62 = vld [vmem:[#allocation8 + $0xb60] sm:$0xff] }
 0x1e3   :  { %3815 = vmatprep.subr.bf16.mxu0 %v13611_v6  ;;  %3979 = vmatprep.subr.bf16.mxu1 %v13613_v7  ;;  %v13661_v6 = vcombine.high %v922_v1, %v926_v2  ;;  %v929_v7 = vld [vmem:[#allocation8 + $0xa00] sm:$0xff]  ;;  %v970_v63 = vld [vmem:[#allocation8 + $0xb48] sm:$0xff] }
 0x1e4   :  { %3845 = vmatprep.mubr.bf16.mxu0 %v16115_v12  ;;  %4009 = vmatprep.mubr.bf16.mxu1 %v16115_v12  ;;  %v13666_v26 = vcombine.low %v929_v7, %v933_v8 }
 0x1e6   :  { %3816 = vmatpush1.bf16.msra.mxu0 %v13610_v13  ;;  %3980 = vmatpush1.bf16.msra.mxu1 %v13612_v18  ;;  %v13660_v13 = vcombine.low %v922_v1, %v926_v2  ;;  %v13667_v18 = vcombine.high %v929_v7, %v933_v8  ;;  %v974_v1 = vld [vmem:[#allocation8 + $0xb68] sm:$0xff]  ;;  %v16122_v2 = vsub.s32 4, %v16060_v14  ;;  %v977_v7 = vld [vmem:[#allocation8 + $0xb80] sm:$0xff] }
 0x1e7   :  { %3817 = vmatprep.subr.bf16.mxu0 %v13619_v19  ;;  %3981 = vmatprep.subr.bf16.mxu1 %v13621_v21  ;;  %v13669_v19 = vcombine.high %v930_v9, %v934_v10  ;;  %v937_v21 = vld [vmem:[#allocation8 + $0xa40] sm:$0xff] }
 0x1e8   :  { %v13674_v41 = vcombine.low %v937_v21, %v941_v22  ;;  %v981_v8 = vld [vmem:[#allocation8 + $0xba0] sm:$0xff] }
 0x1ea   :  { %3818 = vmatpush1.bf16.msra.mxu0 %v13618_v28  ;;  %3982 = vmatpush1.bf16.msra.mxu1 %v13620_v29  ;;  %v13668_v28 = vcombine.low %v930_v9, %v934_v10  ;;  %v13675_v29 = vcombine.high %v937_v21, %v941_v22  ;;  %v978_v9 = vld [vmem:[#allocation8 + $0xb88] sm:$0xff]  ;;  %v13715_v21 = vcombine.high %v977_v7, %v981_v8 }
 0x1eb   :  { %3819 = vmatprep.subr.bf16.mxu0 %v13627_v33  ;;  %3983 = vmatprep.subr.bf16.mxu1 %v13629_v35  ;;  %v13677_v33 = vcombine.high %v938_v24, %v942_v25  ;;  %v945_v35 = vld [vmem:[#allocation8 + $0xa80] sm:$0xff]  ;;  %v982_v10 = vld [vmem:[#allocation8 + $0xba8] sm:$0xff] }
 0x1ec   :  { %v13682_v49 = vcombine.low %v945_v35, %v949_v38  ;;  %v13717_v22 = vcombine.high %v978_v9, %v982_v10 }
 0x1ee   :  { %3820 = vmatpush1.bf16.msra.mxu0 %v13626_v42  ;;  %3984 = vmatpush1.bf16.msra.mxu1 %v13628_v43  ;;  %v13676_v42 = vcombine.low %v938_v24, %v942_v25  ;;  %v13683_v43 = vcombine.high %v945_v35, %v949_v38  ;;  %v985_v24 = vld [vmem:[#allocation8 + $0xbc0] sm:$0xff]  ;;  %v13714_v35 = vcombine.low %v977_v7, %v981_v8  ;;  %v1018_v7 = vld [vmem:[#allocation8 + $0xcc8] sm:$0xff] }
 0x1ef   :  { %3821 = vmatprep.subr.bf16.mxu0 %v13635_v44  ;;  %3985 = vmatprep.subr.bf16.mxu1 %v13637_v46  ;;  %v13685_v44 = vcombine.high %v946_v39, %v950_v40  ;;  %v953_v46 = vld [vmem:[#allocation8 + $0xac0] sm:$0xff]  ;;  %v13716_v38 = vcombine.low %v978_v9, %v982_v10  ;;  %v1022_v8 = vld [vmem:[#allocation8 + $0xce8] sm:$0xff] }
 0x1f0   :  { %v13690_v57 = vcombine.low %v953_v46, %v957_v30  ;;  %v989_v25 = vld [vmem:[#allocation8 + $0xbe0] sm:$0xff] }
 0x1f2   :  { %3822 = vmatpush1.bf16.msra.mxu0 %v13634_v50  ;;  %3986 = vmatpush1.bf16.msra.mxu1 %v13636_v51  ;;  %v13684_v50 = vcombine.low %v946_v39, %v950_v40  ;;  %v13691_v51 = vcombine.high %v953_v46, %v957_v30  ;;  %v13723_v39 = vcombine.high %v985_v24, %v989_v25 }
 0x1f3   :  { %3823 = vmatprep.subr.bf16.mxu0 %v13643_v52  ;;  %3987 = vmatprep.subr.bf16.mxu1 %v13645_v53  ;;  %v13693_v52 = vcombine.high %v954_v47, %v958_v48  ;;  %v961_v53 = vld [vmem:[#allocation8 + $0xb00] sm:$0xff] }
 0x1f6   :  { %3824 = vmatpush1.bf16.msra.mxu0 %v13642_v58  ;;  %3988 = vmatpush1.bf16.msra.mxu1 %v13644_v60  ;;  %v13692_v58 = vcombine.low %v954_v47, %v958_v48  ;;  %v13699_v60 = vcombine.high %v961_v53, %v965_v54 }
 0x1f7   :  { %3825 = vmatprep.subr.bf16.mxu0 %v13651_v45  ;;  %3989 = vmatprep.subr.bf16.mxu1 %v13653_v61  ;;  %v13701_v45 = vcombine.high %v962_v55, %v966_v56  ;;  %v969_v61 = vld [vmem:[#allocation8 + $0xb40] sm:$0xff] }
 0x1fa   :  { %3826 = vmatpush1.bf16.msra.mxu0 %v13650_v3  ;;  %3990 = vmatpush1.bf16.msra.mxu1 %v13652_v5  ;;  %v13698_v3 = vcombine.low %v961_v53, %v965_v54  ;;  %v13700_v5 = vcombine.low %v962_v55, %v966_v56 }
 0x1fb   :  { %3827 = vmatprep.subr.bf16.mxu0 %v13659_v37  ;;  %3991 = vmatprep.subr.bf16.mxu1 %v13661_v6  ;;  %v13707_v37 = vcombine.high %v969_v61, %v973_v62  ;;  %v13709_v6 = vcombine.high %v970_v63, %v974_v1 }
 0x1fe   :  { %3828 = vmatpush1.bf16.msra.mxu0 %v13658_v11  ;;  %3992 = vmatpush1.bf16.msra.mxu1 %v13660_v13  ;;  %v16125_v11 = vsub.s32 7, %v16060_v14  ;;  %v296_v13 = vrot.slane %v16065_v16, %v16122_v2 }
 0x1ff   :  { %3829 = vmatprep.subr.bf16.mxu0 %v13667_v18  ;;  %3993 = vmatprep.subr.bf16.mxu1 %v13669_v19  ;;  %v13706_v18 = vcombine.low %v969_v61, %v973_v62  ;;  %v13708_v19 = vcombine.low %v970_v63, %v974_v1  ;;  %v1014_v61 = vld [vmem:[#allocation8 + $0xca8] sm:$0xff] }
 0x202   :  { %3830 = vmatpush1.bf16.msra.mxu0 %v13666_v26  ;;  %3994 = vmatpush1.bf16.msra.mxu1 %v13668_v28  ;;  %v986_v26 = vld [vmem:[#allocation8 + $0xbc8] sm:$0xff] }
 0x203   :  { %3831 = vmatprep.subr.bf16.mxu0 %v13675_v29  ;;  %3995 = vmatprep.subr.bf16.mxu1 %v13677_v33  ;;  %v990_v28 = vld [vmem:[#allocation8 + $0xbe8] sm:$0xff]  ;;  %v308_v29 = vrot.slane %v16065_v16, %v16125_v11  ;;  %v526_v33 = vadd.f32 %v16093_v36, %v296_v13  ;;  %v13722_v16 = vcombine.low %v985_v24, %v989_v25 }
 0x204   :  { %v13725_v40 = vcombine.high %v986_v26, %v990_v28  ;;  %v13724_v47 = vcombine.low %v986_v26, %v990_v28  ;;  %v1030_v24 = vld [vmem:[#allocation8 + $0xd28] sm:$0xff]  ;;  %v13756_v26 = vcombine.low %v1018_v7, %v1022_v8 }
 0x205   :  { %v599_v46 = vadd.f32 %v16102_v27, %v308_v29  ;;  %v605_v30 = vmax.f32 %v526_v33, 0.0  ;;  %v1033_v33 = vld [vmem:[#allocation8 + $0xd40] sm:$0xff] }
 0x206   :  { %3832 = vmatpush1.bf16.msra.mxu0 %v13674_v41  ;;  %3996 = vmatpush1.bf16.msra.mxu1 %v13676_v42  ;;  %v993_v41 = vld [vmem:[#allocation8 + $0xc00] sm:$0xff] }
 0x207   :  { %3833 = vmatprep.subr.bf16.mxu0 %v13683_v43  ;;  %3997 = vmatprep.subr.bf16.mxu1 %v13685_v44  ;;  %v997_v42 = vld [vmem:[#allocation8 + $0xc20] sm:$0xff]  ;;  %v994_v43 = vld [vmem:[#allocation8 + $0xc08] sm:$0xff]  ;;  %v608_v53 = vmax.f32 %v599_v46, 0.0  ;;  %v16133_v54 = vpack.c.bf16 %v605_v30, %v605_v30 }
 0x208   :  { %v998_v44 = vld [vmem:[#allocation8 + $0xc28] sm:$0xff]  ;;  %v13731_v36 = vcombine.high %v993_v41, %v997_v42  ;;  %v13730_v55 = vcombine.low %v993_v41, %v997_v42  ;;  %v1045_v46 = vld [vmem:[#allocation8 + $0xda0] sm:$0xff] }
 0x209   :  { %v13733_v48 = vcombine.high %v994_v43, %v998_v44  ;;  %v13732_v27 = vcombine.low %v994_v43, %v998_v44  ;;  %v16135_v62 = vpack.c.bf16 %v608_v53, %v608_v53  ;;  %v1041_v44 = vld [vmem:[#allocation8 + $0xd80] sm:$0xff]  ;;  %v1042_v30 = vld [vmem:[#allocation8 + $0xd88] sm:$0xff] }
 0x20a   :  { %3834 = vmatpush1.bf16.msra.mxu0 %v13682_v49  ;;  %3998 = vmatpush1.bf16.msra.mxu1 %v13684_v50  ;;  %v1001_v49 = vld [vmem:[#allocation8 + $0xc40] sm:$0xff]  ;;  %v1054_v53 = vld [vmem:[#allocation8 + $0xde8] sm:$0xff] }
 0x20b   :  { %3835 = vmatprep.subr.bf16.mxu0 %v13691_v51  ;;  %3999 = vmatprep.subr.bf16.mxu1 %v13693_v52  ;;  %v1005_v50 = vld [vmem:[#allocation8 + $0xc60] sm:$0xff]  ;;  %v1002_v51 = vld [vmem:[#allocation8 + $0xc48] sm:$0xff] }
 0x20c   :  { %v1006_v52 = vld [vmem:[#allocation8 + $0xc68] sm:$0xff]  ;;  %v13739_v56 = vcombine.high %v1001_v49, %v1005_v50  ;;  %v13738_v63 = vcombine.low %v1001_v49, %v1005_v50  ;;  %v1049_v50 = vld [vmem:[#allocation8 + $0xdc0] sm:$0xff] }
 0x20d   :  { %v13740_v1 = vcombine.low %v1002_v51, %v1006_v52 }
 0x20e   :  { %3836 = vmatpush1.bf16.msra.mxu0 %v13690_v57  ;;  %4000 = vmatpush1.bf16.msra.mxu1 %v13692_v58  ;;  %v13741_v57 = vcombine.high %v1002_v51, %v1006_v52  ;;  %v1009_v58 = vld [vmem:[#allocation8 + $0xc80] sm:$0xff]  ;;  %v1050_v52 = vld [vmem:[#allocation8 + $0xdc8] sm:$0xff] }
 0x20f   :  { %3837 = vmatprep.subr.bf16.mxu0 %v13699_v60  ;;  %4001 = vmatprep.subr.bf16.mxu1 %v13701_v45  ;;  %v1013_v60 = vld [vmem:[#allocation8 + $0xca0] sm:$0xff]  ;;  %v1010_v45 = vld [vmem:[#allocation8 + $0xc88] sm:$0xff] }
 0x210   :  { %v13746_v9 = vcombine.low %v1009_v58, %v1013_v60  ;;  %v13748_v10 = vcombine.low %v1010_v45, %v1014_v61  ;;  %v1053_v51 = vld [vmem:[#allocation8 + $0xde0] sm:$0xff] }
 0x212   :  { %3838 = vmatpush1.bf16.msra.mxu0 %v13698_v3  ;;  %4002 = vmatpush1.bf16.msra.mxu1 %v13700_v5  ;;  %v13747_v3 = vcombine.high %v1009_v58, %v1013_v60  ;;  %v13749_v5 = vcombine.high %v1010_v45, %v1014_v61  ;;  %v1057_v58 = vld [vmem:[#allocation8 + $0xe00] sm:$0xff]  ;;  %v1058_v45 = vld [vmem:[#allocation8 + $0xe08] sm:$0xff] }
 0x213   :  { %3839 = vmatprep.subr.bf16.mxu0 %v13707_v37  ;;  %4003 = vmatprep.subr.bf16.mxu1 %v13709_v6  ;;  %v1017_v37 = vld [vmem:[#allocation8 + $0xcc0] sm:$0xff]  ;;  %v1062_v61 = vld [vmem:[#allocation8 + $0xe28] sm:$0xff] }
 0x214   :  { %v1021_v6 = vld [vmem:[#allocation8 + $0xce0] sm:$0xff] }
 0x215   :  { %v13755_v13 = vcombine.high %v1017_v37, %v1021_v6  ;;  %v13754_v25 = vcombine.low %v1017_v37, %v1021_v6  ;;  %v1061_v60 = vld [vmem:[#allocation8 + $0xe20] sm:$0xff] }
 0x216   :  { %3840 = vmatpush1.bf16.msra.mxu0 %v13706_v18  ;;  %4004 = vmatpush1.bf16.msra.mxu1 %v13708_v19  ;;  %v13757_v18 = vcombine.high %v1018_v7, %v1022_v8  ;;  %v1025_v19 = vld [vmem:[#allocation8 + $0xd00] sm:$0xff]  ;;  %v1066_v7 = vld [vmem:[#allocation8 + $0xe48] sm:$0xff] }
 0x217   :  { %3841 = vmatprep.subr.bf16.mxu0 %v13715_v21  ;;  %4005 = vmatprep.subr.bf16.mxu1 %v13717_v22  ;;  %v1029_v21 = vld [vmem:[#allocation8 + $0xd20] sm:$0xff]  ;;  %v1026_v22 = vld [vmem:[#allocation8 + $0xd08] sm:$0xff] }
 0x218   :  { %v13763_v28 = vcombine.high %v1025_v19, %v1029_v21  ;;  %v13765_v29 = vcombine.high %v1026_v22, %v1030_v24  ;;  %v13764_v41 = vcombine.low %v1026_v22, %v1030_v24  ;;  %v1065_v37 = vld [vmem:[#allocation8 + $0xe40] sm:$0xff]  ;;  %v1070_v8 = vld [vmem:[#allocation8 + $0xe68] sm:$0xff] }
 0x219   :  { %v1069_v6 = vld [vmem:[#allocation8 + $0xe60] sm:$0xff]  ;;  %v1074_v22 = vld [vmem:[#allocation8 + $0xe88] sm:$0xff] }
 0x21a   :  { %3842 = vmatpush1.bf16.msra.mxu0 %v13714_v35  ;;  %4006 = vmatpush1.bf16.msra.mxu1 %v13716_v38  ;;  %v1037_v35 = vld [vmem:[#allocation8 + $0xd60] sm:$0xff]  ;;  %v1034_v38 = vld [vmem:[#allocation8 + $0xd48] sm:$0xff] }
 0x21b   :  { %3843 = vmatprep.subr.bf16.mxu0 %v13723_v39  ;;  %4007 = vmatprep.subr.bf16.mxu1 %v13725_v40  ;;  %v1038_v39 = vld [vmem:[#allocation8 + $0xd68] sm:$0xff]  ;;  %v13762_v40 = vcombine.low %v1025_v19, %v1029_v21  ;;  %v13771_v42 = vcombine.high %v1033_v33, %v1037_v35  ;;  %v1073_v19 = vld [vmem:[#allocation8 + $0xe80] sm:$0xff] }
 0x21c   :  { %v13773_v43 = vcombine.high %v1034_v38, %v1038_v39  ;;  %v1077_v21 = vld [vmem:[#allocation8 + $0xea0] sm:$0xff]  ;;  %v1078_v24 = vld [vmem:[#allocation8 + $0xea8] sm:$0xff] }
 0x21e   :  { %3844 = vmatpush1.bf16.msra.mxu0 %v13722_v16  ;;  %4008 = vmatpush1.bf16.msra.mxu1 %v13724_v47  ;;  %v1046_v16 = vld [vmem:[#allocation8 + $0xda8] sm:$0xff]  ;;  %v13770_v47 = vcombine.low %v1033_v33, %v1037_v35  ;;  %v1081_v33 = vld [vmem:[#allocation8 + $0xec0] sm:$0xff] }
 0x21f   :  { %3854 = vmatprep.subr.bf16.mxu0 %v13731_v36  ;;  %4018 = vmatprep.subr.bf16.mxu1 %v13733_v48  ;;  %v13772_v36 = vcombine.low %v1034_v38, %v1038_v39  ;;  %v13779_v48 = vcombine.high %v1041_v44, %v1045_v46  ;;  %v13781_v49 = vcombine.high %v1042_v30, %v1046_v16  ;;  %v1085_v35 = vld [vmem:[#allocation8 + $0xee0] sm:$0xff]  ;;  %v1082_v38 = vld [vmem:[#allocation8 + $0xec8] sm:$0xff] }
 0x220   :  { %v1086_v39 = vld [vmem:[#allocation8 + $0xee8] sm:$0xff] }
 0x221   :  { %3846 = vmatmul.mubr.bf16.vlgmr.msra.gmra.mrb[4].mxu0 %v16133_v54  ;;  %4010 = vmatmul.mubr.bf16.vlgmr.msra.gmra.mrb[4].mxu1 %v16133_v54 }
 0x222   :  { %3855 = vmatpush1.bf16.msra.mxu0 %v13730_v55  ;;  %4019 = vmatpush1.bf16.msra.mxu1 %v13732_v27  ;;  %v13778_v55 = vcombine.low %v1041_v44, %v1045_v46  ;;  %v13780_v27 = vcombine.low %v1042_v30, %v1046_v16  ;;  %v1089_v44 = vld [vmem:[#allocation8 + $0xf00] sm:$0xff]  ;;  %v1090_v30 = vld [vmem:[#allocation8 + $0xf08] sm:$0xff] }
 0x223   :  { %3856 = vmatprep.subr.bf16.mxu0 %v13739_v56  ;;  %4020 = vmatprep.subr.bf16.mxu1 %v13741_v57  ;;  %v13787_v56 = vcombine.high %v1049_v50, %v1053_v51  ;;  %v13789_v57 = vcombine.high %v1050_v52, %v1054_v53  ;;  %v1093_v46 = vld [vmem:[#allocation8 + $0xf20] sm:$0xff]  ;;  %v1094_v16 = vld [vmem:[#allocation8 + $0xf28] sm:$0xff] }
 0x224   :  { %3886 = vmatprep.mubr.bf16.mxu0 %v16135_v62  ;;  %4050 = vmatprep.mubr.bf16.mxu1 %v16135_v62 }
 0x226   :  { %3857 = vmatpush1.bf16.msra.mxu0 %v13738_v63  ;;  %4021 = vmatpush1.bf16.msra.mxu1 %v13740_v1  ;;  %v13786_v63 = vcombine.low %v1049_v50, %v1053_v51  ;;  %v13788_v1 = vcombine.low %v1050_v52, %v1054_v53  ;;  %v1097_v50 = vld [vmem:[#allocation8 + $0xf40] sm:$0xff]  ;;  %v1098_v52 = vld [vmem:[#allocation8 + $0xf48] sm:$0xff] }
 0x227   :  { %3858 = vmatprep.subr.bf16.mxu0 %v13747_v3  ;;  %4022 = vmatprep.subr.bf16.mxu1 %v13749_v5  ;;  %v13795_v3 = vcombine.high %v1057_v58, %v1061_v60  ;;  %v13797_v5 = vcombine.high %v1058_v45, %v1062_v61  ;;  %v1101_v51 = vld [vmem:[#allocation8 + $0xf60] sm:$0xff]  ;;  %v1102_v53 = vld [vmem:[#allocation8 + $0xf68] sm:$0xff] }
 0x22a   :  { %3859 = vmatpush1.bf16.msra.mxu0 %v13746_v9  ;;  %4023 = vmatpush1.bf16.msra.mxu1 %v13748_v10  ;;  %v13794_v9 = vcombine.low %v1057_v58, %v1061_v60  ;;  %v13796_v10 = vcombine.low %v1058_v45, %v1062_v61  ;;  %v13837_v58 = vcombine.high %v1098_v52, %v1102_v53  ;;  %v1105_v60 = vld [vmem:[#allocation8 + $0xf80] sm:$0xff]  ;;  %v1106_v61 = vld [vmem:[#allocation8 + $0xf88] sm:$0xff] }
 0x22b   :  { %3860 = vmatprep.subr.bf16.mxu0 %v13755_v13  ;;  %4024 = vmatprep.subr.bf16.mxu1 %v13757_v18  ;;  %v13803_v13 = vcombine.high %v1065_v37, %v1069_v6  ;;  %v13805_v18 = vcombine.high %v1066_v7, %v1070_v8  ;;  %v1109_v45 = vld [vmem:[#allocation8 + $0xfa0] sm:$0xff] }
 0x22e   :  { %3861 = vmatpush1.bf16.msra.mxu0 %v13754_v25  ;;  %4025 = vmatpush1.bf16.msra.mxu1 %v13756_v26  ;;  %v13802_v25 = vcombine.low %v1065_v37, %v1069_v6  ;;  %v13804_v26 = vcombine.low %v1066_v7, %v1070_v8  ;;  %v13843_v6 = vcombine.high %v1105_v60, %v1109_v45  ;;  %v1113_v7 = vld [vmem:[#allocation8 + $0xfc0] sm:$0xff] }
 0x22f   :  { %3862 = vmatprep.subr.bf16.mxu0 %v13763_v28  ;;  %4026 = vmatprep.subr.bf16.mxu1 %v13765_v29  ;;  %v13811_v28 = vcombine.high %v1073_v19, %v1077_v21  ;;  %v13813_v29 = vcombine.high %v1074_v22, %v1078_v24  ;;  %v1117_v8 = vld [vmem:[#allocation8 + $0xfe0] sm:$0xff] }
 0x232   :  { %3863 = vmatpush1.bf16.msra.mxu0 %v13762_v40  ;;  %4027 = vmatpush1.bf16.msra.mxu1 %v13764_v41  ;;  %v13810_v40 = vcombine.low %v1073_v19, %v1077_v21  ;;  %v13812_v41 = vcombine.low %v1074_v22, %v1078_v24  ;;  %v13851_v21 = vcombine.high %v1113_v7, %v1117_v8  ;;  %v611_v24 = vld [vmem:[#allocation8 + $0x10] sm:$0xff] }
 0x233   :  { %3864 = vmatprep.subr.bf16.mxu0 %v13771_v42  ;;  %4028 = vmatprep.subr.bf16.mxu1 %v13773_v43  ;;  %v13819_v42 = vcombine.high %v1081_v33, %v1085_v35  ;;  %v13821_v43 = vcombine.high %v1082_v38, %v1086_v39 }
 0x236   :  { %3865 = vmatpush1.bf16.msra.mxu0 %v13770_v47  ;;  %4029 = vmatpush1.bf16.msra.mxu1 %v13772_v36  ;;  %v13818_v47 = vcombine.low %v1081_v33, %v1085_v35  ;;  %v13820_v36 = vcombine.low %v1082_v38, %v1086_v39 }
 0x237   :  { %3866 = vmatprep.subr.bf16.mxu0 %v13779_v48  ;;  %4030 = vmatprep.subr.bf16.mxu1 %v13781_v49  ;;  %v13827_v48 = vcombine.high %v1089_v44, %v1093_v46  ;;  %v13829_v49 = vcombine.high %v1090_v30, %v1094_v16 }
 0x23a   :  { %3867 = vmatpush1.bf16.msra.mxu0 %v13778_v55  ;;  %4031 = vmatpush1.bf16.msra.mxu1 %v13780_v27  ;;  %v13826_v55 = vcombine.low %v1089_v44, %v1093_v46  ;;  %v13828_v27 = vcombine.low %v1090_v30, %v1094_v16 }
 0x23b   :  { %3868 = vmatprep.subr.bf16.mxu0 %v13787_v56  ;;  %4032 = vmatprep.subr.bf16.mxu1 %v13789_v57  ;;  %v16142_v56 = vsub.s32 6, %v16060_v14  ;;  %v13835_v57 = vcombine.high %v1097_v50, %v1101_v51 }
 0x23e   :  { %3869 = vmatpush1.bf16.msra.mxu0 %v13786_v63  ;;  %4033 = vmatpush1.bf16.msra.mxu1 %v13788_v1  ;;  %v1110_v63 = vld [vmem:[#allocation8 + $0xfa8] sm:$0xff]  ;;  %v13834_v1 = vcombine.low %v1097_v50, %v1101_v51 }
 0x23f   :  { %3870 = vmatprep.subr.bf16.mxu0 %v13795_v3  ;;  %4034 = vmatprep.subr.bf16.mxu1 %v13797_v5  ;;  %v13836_v3 = vcombine.low %v1098_v52, %v1102_v53  ;;  %v15627_v5 = vld [vmem:[#allocation7] sm:$0xff]  ;;  %v13845_v14 = vcombine.high %v1106_v61, %v1110_v63 }
 0x240   :  { %v304_v37 = vrot.slane %v15627_v5, %v16142_v56  ;;  %v648_v5 = vld [vmem:[#allocation8 + $0x138] sm:$0xff] }
 0x242   :  { %3871 = vmatpush1.bf16.msra.mxu0 %v13794_v9  ;;  %4035 = vmatpush1.bf16.msra.mxu1 %v13796_v10  ;;  %v1114_v9 = vld [vmem:[#allocation8 + $0xfc8] sm:$0xff]  ;;  %v597_v19 = vadd.f32 %v16100_v23, %v304_v37  ;;  %v620_v23 = vld [vmem:[#allocation8 + $0x58] sm:$0xff] }
 0x243   :  { %3872 = vmatprep.subr.bf16.mxu0 %v13803_v13  ;;  %4036 = vmatprep.subr.bf16.mxu1 %v13805_v18  ;;  %v1118_v10 = vld [vmem:[#allocation8 + $0xfe8] sm:$0xff]  ;;  %v13842_v13 = vcombine.low %v1105_v60, %v1109_v45  ;;  %v13844_v18 = vcombine.low %v1106_v61, %v1110_v63 }
 0x244   :  { %v13853_v22 = vcombine.high %v1114_v9, %v1118_v10  ;;  %v13852_v33 = vcombine.low %v1114_v9, %v1118_v10  ;;  %v607_v35 = vmax.f32 %v597_v19, 0.0  ;;  %v655_v9 = vld [vmem:[#allocation8 + $0x170] sm:$0xff]  ;;  %v652_v10 = vld [vmem:[#allocation8 + $0x158] sm:$0xff] }
 0x246   :  { %3873 = vmatpush1.bf16.msra.mxu0 %v13802_v25  ;;  %4037 = vmatpush1.bf16.msra.mxu1 %v13804_v26  ;;  %v615_v25 = vld [vmem:[#allocation8 + $0x30] sm:$0xff]  ;;  %v612_v26 = vld [vmem:[#allocation8 + $0x18] sm:$0xff]  ;;  %v16146_v44 = vpack.c.bf16 %v607_v35, %v607_v35 }
 0x247   :  { %3874 = vmatprep.subr.bf16.mxu0 %v13811_v28  ;;  %4038 = vmatprep.subr.bf16.mxu1 %v13813_v29  ;;  %v616_v28 = vld [vmem:[#allocation8 + $0x38] sm:$0xff]  ;;  %v13850_v29 = vcombine.low %v1113_v7, %v1117_v8  ;;  %v13351_v38 = vcombine.high %v611_v24, %v615_v25  ;;  %v651_v8 = vld [vmem:[#allocation8 + $0x150] sm:$0xff] }
 0x248   :  { %v13353_v39 = vcombine.high %v612_v26, %v616_v28  ;;  %v13352_v46 = vcombine.low %v612_v26, %v616_v28  ;;  %v660_v26 = vld [vmem:[#allocation8 + $0x198] sm:$0xff] }
 0x249   :  { %v664_v28 = vld [vmem:[#allocation8 + $0x1b8] sm:$0xff] }
 0x24a   :  { %3875 = vmatpush1.bf16.msra.mxu0 %v13810_v40  ;;  %4039 = vmatpush1.bf16.msra.mxu1 %v13812_v41  ;;  %v619_v40 = vld [vmem:[#allocation8 + $0x50] sm:$0xff] }
 0x24b   :  { %3876 = vmatprep.subr.bf16.mxu0 %v13819_v42  ;;  %4040 = vmatprep.subr.bf16.mxu1 %v13821_v43  ;;  %v623_v41 = vld [vmem:[#allocation8 + $0x70] sm:$0xff]  ;;  %v624_v42 = vld [vmem:[#allocation8 + $0x78] sm:$0xff]  ;;  %v13350_v43 = vcombine.low %v611_v24, %v615_v25 }
 0x24c   :  { %v13359_v30 = vcombine.high %v619_v40, %v623_v41  ;;  %v13361_v16 = vcombine.high %v620_v23, %v624_v42  ;;  %v13358_v50 = vcombine.low %v619_v40, %v623_v41  ;;  %v13360_v51 = vcombine.low %v620_v23, %v624_v42  ;;  %v659_v24 = vld [vmem:[#allocation8 + $0x190] sm:$0xff]  ;;  %v668_v41 = vld [vmem:[#allocation8 + $0x1d8] sm:$0xff] }
 0x24d   :  { %v663_v25 = vld [vmem:[#allocation8 + $0x1b0] sm:$0xff]  ;;  %v672_v23 = vld [vmem:[#allocation8 + $0x1f8] sm:$0xff] }
 0x24e   :  { %3877 = vmatpush1.bf16.msra.mxu0 %v13818_v47  ;;  %4041 = vmatpush1.bf16.msra.mxu1 %v13820_v36  ;;  %v627_v47 = vld [vmem:[#allocation8 + $0x90] sm:$0xff]  ;;  %v13399_v35 = vcombine.high %v659_v24, %v663_v25  ;;  %v13398_v42 = vcombine.low %v659_v24, %v663_v25  ;;  %v708_v25 = vld [vmem:[#allocation8 + $0x318] sm:$0xff] }
 0x24f   :  { %3878 = vmatprep.subr.bf16.mxu0 %v13827_v48  ;;  %4042 = vmatprep.subr.bf16.mxu1 %v13829_v49  ;;  %v631_v36 = vld [vmem:[#allocation8 + $0xb0] sm:$0xff]  ;;  %v628_v48 = vld [vmem:[#allocation8 + $0x98] sm:$0xff] }
 0x250   :  { %v632_v49 = vld [vmem:[#allocation8 + $0xb8] sm:$0xff]  ;;  %v13367_v52 = vcombine.high %v627_v47, %v631_v36  ;;  %v13366_v60 = vcombine.low %v627_v47, %v631_v36  ;;  %v671_v40 = vld [vmem:[#allocation8 + $0x1f0] sm:$0xff] }
 0x251   :  { %v13369_v53 = vcombine.high %v628_v48, %v632_v49  ;;  %v13368_v45 = vcombine.low %v628_v48, %v632_v49  ;;  %v679_v47 = vld [vmem:[#allocation8 + $0x230] sm:$0xff]  ;;  %v676_v36 = vld [vmem:[#allocation8 + $0x218] sm:$0xff] }
 0x252   :  { %3879 = vmatpush1.bf16.msra.mxu0 %v13826_v55  ;;  %4043 = vmatpush1.bf16.msra.mxu1 %v13828_v27  ;;  %v635_v55 = vld [vmem:[#allocation8 + $0xd0] sm:$0xff]  ;;  %v680_v48 = vld [vmem:[#allocation8 + $0x238] sm:$0xff] }
 0x253   :  { %3880 = vmatprep.subr.bf16.mxu0 %v13835_v57  ;;  %4044 = vmatprep.subr.bf16.mxu1 %v13837_v58  ;;  %v639_v27 = vld [vmem:[#allocation8 + $0xf0] sm:$0xff]  ;;  %v636_v57 = vld [vmem:[#allocation8 + $0xd8] sm:$0xff] }
 0x254   :  { %v640_v58 = vld [vmem:[#allocation8 + $0xf8] sm:$0xff]  ;;  %v13375_v61 = vcombine.high %v635_v55, %v639_v27  ;;  %v13374_v37 = vcombine.low %v635_v55, %v639_v27  ;;  %v687_v55 = vld [vmem:[#allocation8 + $0x270] sm:$0xff] }
 0x255   :  { %v13377_v63 = vcombine.high %v636_v57, %v640_v58  ;;  %v684_v27 = vld [vmem:[#allocation8 + $0x258] sm:$0xff]  ;;  %v711_v24 = vld [vmem:[#allocation8 + $0x330] sm:$0xff] }
 0x256   :  { %3881 = vmatpush1.bf16.msra.mxu0 %v13834_v1  ;;  %4045 = vmatpush1.bf16.msra.mxu1 %v13836_v3  ;;  %v643_v1 = vld [vmem:[#allocation8 + $0x110] sm:$0xff] }
 0x257   :  { %3882 = vmatprep.subr.bf16.mxu0 %v13843_v6  ;;  %4046 = vmatprep.subr.bf16.mxu1 %v13845_v14  ;;  %v647_v3 = vld [vmem:[#allocation8 + $0x130] sm:$0xff]  ;;  %v13376_v6 = vcombine.low %v636_v57, %v640_v58  ;;  %v688_v57 = vld [vmem:[#allocation8 + $0x278] sm:$0xff] }
 0x258   :  { %v13383_v14 = vcombine.high %v643_v1, %v647_v3 }
 0x25a   :  { %3883 = vmatpush1.bf16.msra.mxu0 %v13842_v13  ;;  %4047 = vmatpush1.bf16.msra.mxu1 %v13844_v18  ;;  %v656_v13 = vld [vmem:[#allocation8 + $0x178] sm:$0xff]  ;;  %v13382_v18 = vcombine.low %v643_v1, %v647_v3  ;;  %v695_v1 = vld [vmem:[#allocation8 + $0x2b0] sm:$0xff] }
 0x25b   :  { %3884 = vmatprep.subr.bf16.mxu0 %v13851_v21  ;;  %4048 = vmatprep.subr.bf16.mxu1 %v13853_v22  ;;  %v13391_v21 = vcombine.high %v651_v8, %v655_v9  ;;  %v13393_v22 = vcombine.high %v652_v10, %v656_v13  ;;  %v692_v3 = vld [vmem:[#allocation8 + $0x298] sm:$0xff] }
 0x25e   :  { %3885 = vmatpush1.bf16.msra.mxu0 %v13850_v29  ;;  %4049 = vmatpush1.bf16.msra.mxu1 %v13852_v33  ;;  %v13390_v29 = vcombine.low %v651_v8, %v655_v9  ;;  %v13392_v33 = vcombine.low %v652_v10, %v656_v13  ;;  %v703_v8 = vld [vmem:[#allocation8 + $0x2f0] sm:$0xff]  ;;  %v700_v9 = vld [vmem:[#allocation8 + $0x2d8] sm:$0xff] }
 0x25f   :  { %4059 = vmatprep.subr.bf16.mxu0 %v13351_v38  ;;  %4223 = vmatprep.subr.bf16.mxu1 %v13353_v39  ;;  %v13401_v38 = vcombine.high %v660_v26, %v664_v28  ;;  %v667_v39 = vld [vmem:[#allocation8 + $0x1d0] sm:$0xff]  ;;  %v704_v10 = vld [vmem:[#allocation8 + $0x2f8] sm:$0xff] }
 0x260   :  { %v13406_v49 = vcombine.low %v667_v39, %v671_v40 }
 0x261   :  { %3887 = vmatmul.mubr.bf16.vlgmr.msra.gmra.mrb[4].mxu0 %v16146_v44  ;;  %4051 = vmatmul.mubr.bf16.vlgmr.msra.gmra.mrb[4].mxu1 %v16146_v44 }
 0x262   :  { %4060 = vmatpush1.bf16.msra.mxu0 %v13350_v43  ;;  %4091 = vmatprep.mubr.bf16.mxu0 %v16077_v0  ;;  %v13400_v43 = vcombine.low %v660_v26, %v664_v28  ;;  %v712_v26 = vld [vmem:[#allocation8 + $0x338] sm:$0xff] }
 0x263   :  { %4224 = vmatpush1.bf16.msra.mxu1 %v13352_v46  ;;  %4255 = vmatprep.mubr.bf16.mxu1 %v16077_v0  ;;  %v644_v0 = vld [vmem:[#allocation8 + $0x118] sm:$0xff]  ;;  %v13407_v46 = vcombine.high %v667_v39, %v671_v40  ;;  %v719_v39 = vld [vmem:[#allocation8 + $0x370] sm:$0xff] }
 0x264   :  { %4061 = vmatprep.subr.bf16.mxu0 %v13359_v30  ;;  %4225 = vmatprep.subr.bf16.mxu1 %v13361_v16  ;;  %v13385_v7 = vcombine.high %v644_v0, %v648_v5  ;;  %v13384_v19 = vcombine.low %v644_v0, %v648_v5  ;;  %v13409_v30 = vcombine.high %v668_v41, %v672_v23  ;;  %v675_v16 = vld [vmem:[#allocation8 + $0x210] sm:$0xff]  ;;  %v696_v0 = vld [vmem:[#allocation8 + $0x2b8] sm:$0xff] }
 0x265   :  { %v13414_v58 = vcombine.low %v675_v16, %v679_v47  ;;  %v716_v40 = vld [vmem:[#allocation8 + $0x358] sm:$0xff] }
 0x266   :  { %4062 = vmatpush1.bf16.msra.mxu0 %v13358_v50  ;;  %v13408_v50 = vcombine.low %v668_v41, %v672_v23  ;;  %v720_v41 = vld [vmem:[#allocation8 + $0x378] sm:$0xff] }
 0x267   :  { %4226 = vmatpush1.bf16.msra.mxu1 %v13360_v51  ;;  %4063 = vmatprep.subr.bf16.mxu0 %v13367_v52  ;;  %v13415_v51 = vcombine.high %v675_v16, %v679_v47  ;;  %v13417_v52 = vcombine.high %v676_v36, %v680_v48  ;;  %v727_v16 = vld [vmem:[#allocation8 + $0x3b0] sm:$0xff]  ;;  %v724_v47 = vld [vmem:[#allocation8 + $0x398] sm:$0xff] }
 0x268   :  { %4227 = vmatprep.subr.bf16.mxu1 %v13369_v53  ;;  %v683_v53 = vld [vmem:[#allocation8 + $0x250] sm:$0xff] }
 0x269   :  { %v13422_v5 = vcombine.low %v683_v53, %v687_v55 }
 0x26a   :  { %4064 = vmatpush1.bf16.msra.mxu0 %v13366_v60  ;;  %v13416_v60 = vcombine.low %v676_v36, %v680_v48  ;;  %v728_v36 = vld [vmem:[#allocation8 + $0x3b8] sm:$0xff] }
 0x26b   :  { %4228 = vmatpush1.bf16.msra.mxu1 %v13368_v45  ;;  %4065 = vmatprep.subr.bf16.mxu0 %v13375_v61  ;;  %v13423_v45 = vcombine.high %v683_v53, %v687_v55  ;;  %v13425_v61 = vcombine.high %v684_v27, %v688_v57  ;;  %v735_v53 = vld [vmem:[#allocation8 + $0x3f0] sm:$0xff]  ;;  %v732_v55 = vld [vmem:[#allocation8 + $0x3d8] sm:$0xff] }
 0x26c   :  { %4229 = vmatprep.subr.bf16.mxu1 %v13377_v63  ;;  %v691_v63 = vld [vmem:[#allocation8 + $0x290] sm:$0xff] }
 0x26d   :  { %v13430_v13 = vcombine.low %v691_v63, %v695_v1 }
 0x26e   :  { %4066 = vmatpush1.bf16.msra.mxu0 %v13374_v37  ;;  %v13424_v37 = vcombine.low %v684_v27, %v688_v57  ;;  %v736_v27 = vld [vmem:[#allocation8 + $0x3f8] sm:$0xff] }
 0x26f   :  { %4230 = vmatpush1.bf16.msra.mxu1 %v13376_v6  ;;  %4067 = vmatprep.subr.bf16.mxu0 %v13383_v14  ;;  %v13431_v6 = vcombine.high %v691_v63, %v695_v1  ;;  %v13433_v14 = vcombine.high %v692_v3, %v696_v0  ;;  %v743_v63 = vld [vmem:[#allocation8 + $0x430] sm:$0xff]  ;;  %v740_v1 = vld [vmem:[#allocation8 + $0x418] sm:$0xff] }
 0x270   :  { %4231 = vmatprep.subr.bf16.mxu1 %v13385_v7  ;;  %v699_v7 = vld [vmem:[#allocation8 + $0x2d0] sm:$0xff] }
 0x271   :  { %v13438_v28 = vcombine.low %v699_v7, %v703_v8 }
 0x272   :  { %4068 = vmatpush1.bf16.msra.mxu0 %v13382_v18  ;;  %v13432_v18 = vcombine.low %v692_v3, %v696_v0  ;;  %v744_v3 = vld [vmem:[#allocation8 + $0x438] sm:$0xff] }
 0x273   :  { %4232 = vmatpush1.bf16.msra.mxu1 %v13384_v19  ;;  %4069 = vmatprep.subr.bf16.mxu0 %v13391_v21  ;;  %v13439_v19 = vcombine.high %v699_v7, %v703_v8  ;;  %v13441_v21 = vcombine.high %v700_v9, %v704_v10  ;;  %v751_v7 = vld [vmem:[#allocation8 + $0x470] sm:$0xff] }
 0x274   :  { %4233 = vmatprep.subr.bf16.mxu1 %v13393_v22  ;;  %v707_v22 = vld [vmem:[#allocation8 + $0x310] sm:$0xff] }
 0x275   :  { %v13446_v23 = vcombine.low %v707_v22, %v711_v24 }
 0x276   :  { %4070 = vmatpush1.bf16.msra.mxu0 %v13390_v29  ;;  %v13440_v29 = vcombine.low %v700_v9, %v704_v10  ;;  %v748_v9 = vld [vmem:[#allocation8 + $0x458] sm:$0xff] }
 0x277   :  { %4234 = vmatpush1.bf16.msra.mxu1 %v13392_v33  ;;  %4071 = vmatprep.subr.bf16.mxu0 %v13399_v35  ;;  %v13447_v33 = vcombine.high %v707_v22, %v711_v24  ;;  %v13449_v35 = vcombine.high %v708_v25, %v712_v26  ;;  %v752_v10 = vld [vmem:[#allocation8 + $0x478] sm:$0xff] }
 0x278   :  { %4235 = vmatprep.subr.bf16.mxu1 %v13401_v38  ;;  %v715_v38 = vld [vmem:[#allocation8 + $0x350] sm:$0xff]  ;;  %v13489_v22 = vcombine.high %v748_v9, %v752_v10  ;;  %v756_v24 = vld [vmem:[#allocation8 + $0x498] sm:$0xff] }
 0x279   :  { %v13454_v48 = vcombine.low %v715_v38, %v719_v39 }
 0x27a   :  { %4072 = vmatpush1.bf16.msra.mxu0 %v13398_v42  ;;  %v13448_v42 = vcombine.low %v708_v25, %v712_v26  ;;  %v760_v25 = vld [vmem:[#allocation8 + $0x4b8] sm:$0xff] }
 0x27b   :  { %4236 = vmatpush1.bf16.msra.mxu1 %v13400_v43  ;;  %4073 = vmatprep.subr.bf16.mxu0 %v13407_v46  ;;  %v13455_v43 = vcombine.high %v715_v38, %v719_v39  ;;  %v13457_v46 = vcombine.high %v716_v40, %v720_v41  ;;  %v767_v38 = vld [vmem:[#allocation8 + $0x4f0] sm:$0xff]  ;;  %v764_v39 = vld [vmem:[#allocation8 + $0x4d8] sm:$0xff] }
 0x27c   :  { %4237 = vmatprep.subr.bf16.mxu1 %v13409_v30  ;;  %v723_v30 = vld [vmem:[#allocation8 + $0x390] sm:$0xff] }
 0x27d   :  { %v13462_v57 = vcombine.low %v723_v30, %v727_v16 }
 0x27e   :  { %4074 = vmatpush1.bf16.msra.mxu0 %v13406_v49  ;;  %v13456_v49 = vcombine.low %v716_v40, %v720_v41  ;;  %v768_v40 = vld [vmem:[#allocation8 + $0x4f8] sm:$0xff] }
 0x27f   :  { %4238 = vmatpush1.bf16.msra.mxu1 %v13408_v50  ;;  %4075 = vmatprep.subr.bf16.mxu0 %v13415_v51  ;;  %v13463_v50 = vcombine.high %v723_v30, %v727_v16  ;;  %v13465_v51 = vcombine.high %v724_v47, %v728_v36  ;;  %v772_v30 = vld [vmem:[#allocation8 + $0x518] sm:$0xff] }
 0x280   :  { %4239 = vmatprep.subr.bf16.mxu1 %v13417_v52  ;;  %v731_v52 = vld [vmem:[#allocation8 + $0x3d0] sm:$0xff]  ;;  %v776_v16 = vld [vmem:[#allocation8 + $0x538] sm:$0xff] }
 0x281   :  { %v13470_v0 = vcombine.low %v731_v52, %v735_v53 }
 0x282   :  { %4076 = vmatpush1.bf16.msra.mxu0 %v13414_v58  ;;  %v13464_v58 = vcombine.low %v724_v47, %v728_v36  ;;  %v13504_v47 = vcombine.low %v764_v39, %v768_v40 }
 0x283   :  { %4240 = vmatpush1.bf16.msra.mxu1 %v13416_v60  ;;  %4077 = vmatprep.subr.bf16.mxu0 %v13423_v45  ;;  %v13471_v60 = vcombine.high %v731_v52, %v735_v53  ;;  %v13473_v45 = vcombine.high %v732_v55, %v736_v27  ;;  %v784_v52 = vld [vmem:[#allocation8 + $0x578] sm:$0xff] }
 0x284   :  { %4241 = vmatprep.subr.bf16.mxu1 %v13425_v61  ;;  %v739_v61 = vld [vmem:[#allocation8 + $0x410] sm:$0xff] }
 0x285   :  { %v13478_v8 = vcombine.low %v739_v61, %v743_v63 }
 0x286   :  { %4078 = vmatpush1.bf16.msra.mxu0 %v13422_v5  ;;  %v13472_v5 = vcombine.low %v732_v55, %v736_v27  ;;  %v13512_v55 = vcombine.low %v772_v30, %v776_v16 }
 0x287   :  { %4242 = vmatpush1.bf16.msra.mxu1 %v13424_v37  ;;  %4079 = vmatprep.subr.bf16.mxu0 %v13431_v6  ;;  %v13479_v37 = vcombine.high %v739_v61, %v743_v63  ;;  %v13481_v6 = vcombine.high %v740_v1, %v744_v3  ;;  %v792_v61 = vld [vmem:[#allocation8 + $0x5b8] sm:$0xff] }
 0x288   :  { %4243 = vmatprep.subr.bf16.mxu1 %v13433_v14  ;;  %v747_v14 = vld [vmem:[#allocation8 + $0x450] sm:$0xff] }
 0x289   :  { %v13486_v26 = vcombine.low %v747_v14, %v751_v7 }
 0x28a   :  { %4080 = vmatpush1.bf16.msra.mxu0 %v13430_v13  ;;  %v13480_v13 = vcombine.low %v740_v1, %v744_v3 }
 0x28b   :  { %4244 = vmatpush1.bf16.msra.mxu1 %v13432_v18  ;;  %4081 = vmatprep.subr.bf16.mxu0 %v13439_v19  ;;  %v13487_v18 = vcombine.high %v747_v14, %v751_v7  ;;  %v755_v19 = vld [vmem:[#allocation8 + $0x490] sm:$0xff]  ;;  %v800_v14 = vld [vmem:[#allocation8 + $0x5f8] sm:$0xff] }
 0x28c   :  { %4245 = vmatprep.subr.bf16.mxu1 %v13441_v21  ;;  %v759_v21 = vld [vmem:[#allocation8 + $0x4b0] sm:$0xff] }
 0x28d   :  { %v13494_v41 = vcombine.low %v755_v19, %v759_v21 }
 0x28e   :  { %4082 = vmatpush1.bf16.msra.mxu0 %v13438_v28  ;;  %v13488_v28 = vcombine.low %v748_v9, %v752_v10 }
 0x28f   :  { %4246 = vmatpush1.bf16.msra.mxu1 %v13440_v29  ;;  %4083 = vmatprep.subr.bf16.mxu0 %v13447_v33  ;;  %v13495_v29 = vcombine.high %v755_v19, %v759_v21  ;;  %v13497_v33 = vcombine.high %v756_v24, %v760_v25  ;;  %v804_v19 = vld [vmem:[#allocation8 + $0x618] sm:$0xff] }
 0x290   :  { %4247 = vmatprep.subr.bf16.mxu1 %v13449_v35  ;;  %v763_v35 = vld [vmem:[#allocation8 + $0x4d0] sm:$0xff]  ;;  %v808_v21 = vld [vmem:[#allocation8 + $0x638] sm:$0xff] }
 0x292   :  { %4084 = vmatpush1.bf16.msra.mxu0 %v13446_v23  ;;  %v13503_v23 = vcombine.high %v763_v35, %v767_v38 }
 0x293   :  { %4248 = vmatpush1.bf16.msra.mxu1 %v13448_v42  ;;  %4085 = vmatprep.subr.bf16.mxu0 %v13455_v43  ;;  %v13505_v42 = vcombine.high %v764_v39, %v768_v40  ;;  %v771_v43 = vld [vmem:[#allocation8 + $0x510] sm:$0xff]  ;;  %v13544_v39 = vcombine.low %v804_v19, %v808_v21 }
 0x294   :  { %4249 = vmatprep.subr.bf16.mxu1 %v13457_v46  ;;  %v775_v46 = vld [vmem:[#allocation8 + $0x530] sm:$0xff] }
 0x295   :  { %v13511_v36 = vcombine.high %v771_v43, %v775_v46  ;;  %v13510_v53 = vcombine.low %v771_v43, %v775_v46  ;;  %v824_v43 = vld [vmem:[#allocation8 + $0x6b8] sm:$0xff] }
 0x296   :  { %4086 = vmatpush1.bf16.msra.mxu0 %v13454_v48  ;;  %v13513_v48 = vcombine.high %v772_v30, %v776_v16 }
 0x297   :  { %4250 = vmatpush1.bf16.msra.mxu1 %v13456_v49  ;;  %4087 = vmatprep.subr.bf16.mxu0 %v13463_v50  ;;  %v779_v49 = vld [vmem:[#allocation8 + $0x550] sm:$0xff] }
 0x298   :  { %4251 = vmatprep.subr.bf16.mxu1 %v13465_v51  ;;  %v783_v50 = vld [vmem:[#allocation8 + $0x570] sm:$0xff]  ;;  %v780_v51 = vld [vmem:[#allocation8 + $0x558] sm:$0xff] }
 0x299   :  { %v13519_v27 = vcombine.high %v779_v49, %v783_v50  ;;  %v13518_v63 = vcombine.low %v779_v49, %v783_v50  ;;  %v13520_v1 = vcombine.low %v780_v51, %v784_v52  ;;  %v832_v49 = vld [vmem:[#allocation8 + $0x6f8] sm:$0xff] }
 0x29a   :  { %4088 = vmatpush1.bf16.msra.mxu0 %v13462_v57  ;;  %v13521_v57 = vcombine.high %v780_v51, %v784_v52 }
 0x29b   :  { %4252 = vmatpush1.bf16.msra.mxu1 %v13464_v58  ;;  %4089 = vmatprep.subr.bf16.mxu0 %v13471_v60  ;;  %v787_v58 = vld [vmem:[#allocation8 + $0x590] sm:$0xff] }
 0x29c   :  { %4253 = vmatprep.subr.bf16.mxu1 %v13473_v45  ;;  %v791_v60 = vld [vmem:[#allocation8 + $0x5b0] sm:$0xff]  ;;  %v788_v45 = vld [vmem:[#allocation8 + $0x598] sm:$0xff] }
 0x29d   :  { %v13527_v3 = vcombine.high %v787_v58, %v791_v60  ;;  %v13526_v7 = vcombine.low %v787_v58, %v791_v60  ;;  %v840_v58 = vld [vmem:[#allocation8 + $0x738] sm:$0xff] }
 0x29e   :  { %4090 = vmatpush1.bf16.msra.mxu0 %v13470_v0  ;;  %v13529_v0 = vcombine.high %v788_v45, %v792_v61 }
 0x29f   :  { %4254 = vmatpush1.bf16.msra.mxu1 %v13472_v5  ;;  %4100 = vmatprep.subr.bf16.mxu0 %v13479_v37  ;;  %v795_v5 = vld [vmem:[#allocation8 + $0x5d0] sm:$0xff] }
 0x2a0   :  { %4264 = vmatprep.subr.bf16.mxu1 %v13481_v6  ;;  %v799_v37 = vld [vmem:[#allocation8 + $0x5f0] sm:$0xff]  ;;  %v796_v6 = vld [vmem:[#allocation8 + $0x5d8] sm:$0xff] }
 0x2a1   :  { %4092 = vmatmul.mubr.bf16.vlgmr.msra.gmra.mrb[8].mxu0 %v16079_v32  ;;  %v13535_v9 = vcombine.high %v795_v5, %v799_v37  ;;  %v13537_v10 = vcombine.high %v796_v6, %v800_v14 }
 0x2a2   :  { %4256 = vmatmul.mubr.bf16.vlgmr.msra.gmra.mrb[8].mxu1 %v16079_v32  ;;  %4101 = vmatpush1.bf16.msra.mxu0 %v13478_v8  ;;  %v13496_v32 = vcombine.low %v756_v24, %v760_v25  ;;  %v13528_v8 = vcombine.low %v788_v45, %v792_v61  ;;  %v13536_v24 = vcombine.low %v796_v6, %v800_v14 }
 0x2a3   :  { %4132 = vmatprep.mubr.bf16.mxu0 %v16089_v59  ;;  %4265 = vmatpush1.bf16.msra.mxu1 %v13480_v13  ;;  %v803_v13 = vld [vmem:[#allocation8 + $0x610] sm:$0xff] }
 0x2a4   :  { %4296 = vmatprep.mubr.bf16.mxu1 %v16089_v59  ;;  %4102 = vmatprep.subr.bf16.mxu0 %v13487_v18  ;;  %v13502_v59 = vcombine.low %v763_v35, %v767_v38  ;;  %v807_v18 = vld [vmem:[#allocation8 + $0x630] sm:$0xff]  ;;  %v816_v35 = vld [vmem:[#allocation8 + $0x678] sm:$0xff] }
 0x2a5   :  { %4266 = vmatprep.subr.bf16.mxu1 %v13489_v22  ;;  %v13534_v22 = vcombine.low %v795_v5, %v799_v37  ;;  %v13543_v25 = vcombine.high %v803_v13, %v807_v18  ;;  %v13542_v38 = vcombine.low %v803_v13, %v807_v18  ;;  %v848_v5 = vld [vmem:[#allocation8 + $0x778] sm:$0xff] }
 0x2a6   :  { %4103 = vmatpush1.bf16.msra.mxu0 %v13486_v26  ;;  %v13545_v26 = vcombine.high %v804_v19, %v808_v21  ;;  %v856_v13 = vld [vmem:[#allocation8 + $0x7b8] sm:$0xff] }
 0x2a7   :  { %4267 = vmatpush1.bf16.msra.mxu1 %v13488_v28  ;;  %4104 = vmatprep.subr.bf16.mxu0 %v13495_v29  ;;  %v811_v28 = vld [vmem:[#allocation8 + $0x650] sm:$0xff] }
 0x2a8   :  { %4268 = vmatprep.subr.bf16.mxu1 %v13497_v33  ;;  %v815_v29 = vld [vmem:[#allocation8 + $0x670] sm:$0xff]  ;;  %v812_v33 = vld [vmem:[#allocation8 + $0x658] sm:$0xff] }
 0x2a9   :  { %v13551_v40 = vcombine.high %v811_v28, %v815_v29  ;;  %v13550_v46 = vcombine.low %v811_v28, %v815_v29  ;;  %v13552_v30 = vcombine.low %v812_v33, %v816_v35  ;;  %v864_v28 = vld [vmem:[#allocation8 + $0x7f8] sm:$0xff] }
 0x2aa   :  { %4105 = vmatpush1.bf16.msra.mxu0 %v13494_v41  ;;  %v13553_v41 = vcombine.high %v812_v33, %v816_v35 }
 0x2ab   :  { %4269 = vmatpush1.bf16.msra.mxu1 %v13496_v32  ;;  %4106 = vmatprep.subr.bf16.mxu0 %v13503_v23  ;;  %v819_v32 = vld [vmem:[#allocation8 + $0x690] sm:$0xff] }
 0x2ac   :  { %4270 = vmatprep.subr.bf16.mxu1 %v13505_v42  ;;  %v823_v23 = vld [vmem:[#allocation8 + $0x6b0] sm:$0xff]  ;;  %v820_v42 = vld [vmem:[#allocation8 + $0x698] sm:$0xff] }
 0x2ad   :  { %v13559_v16 = vcombine.high %v819_v32, %v823_v23  ;;  %v13558_v50 = vcombine.low %v819_v32, %v823_v23  ;;  %v13560_v51 = vcombine.low %v820_v42, %v824_v43  ;;  %v872_v32 = vld [vmem:[#allocation8 + $0x838] sm:$0xff] }
 0x2ae   :  { %4107 = vmatpush1.bf16.msra.mxu0 %v13502_v59  ;;  %v13561_v59 = vcombine.high %v820_v42, %v824_v43 }
 0x2af   :  { %4271 = vmatpush1.bf16.msra.mxu1 %v13504_v47  ;;  %4108 = vmatprep.subr.bf16.mxu0 %v13511_v36  ;;  %v827_v47 = vld [vmem:[#allocation8 + $0x6d0] sm:$0xff] }
 0x2b0   :  { %4272 = vmatprep.subr.bf16.mxu1 %v13513_v48  ;;  %v831_v36 = vld [vmem:[#allocation8 + $0x6f0] sm:$0xff]  ;;  %v828_v48 = vld [vmem:[#allocation8 + $0x6d8] sm:$0xff] }
 0x2b1   :  { %v13567_v52 = vcombine.high %v827_v47, %v831_v36  ;;  %v13566_v60 = vcombine.low %v827_v47, %v831_v36  ;;  %v13568_v45 = vcombine.low %v828_v48, %v832_v49  ;;  %v876_v47 = vld [vmem:[#allocation8 + $0x858] sm:$0xff] }
 0x2b2   :  { %4109 = vmatpush1.bf16.msra.mxu0 %v13510_v53  ;;  %v13569_v53 = vcombine.high %v828_v48, %v832_v49  ;;  %v880_v36 = vld [vmem:[#allocation8 + $0x878] sm:$0xff] }
 0x2b3   :  { %4273 = vmatpush1.bf16.msra.mxu1 %v13512_v55  ;;  %4110 = vmatprep.subr.bf16.mxu0 %v13519_v27  ;;  %v835_v55 = vld [vmem:[#allocation8 + $0x710] sm:$0xff] }
 0x2b4   :  { %4274 = vmatprep.subr.bf16.mxu1 %v13521_v57  ;;  %v839_v27 = vld [vmem:[#allocation8 + $0x730] sm:$0xff]  ;;  %v836_v57 = vld [vmem:[#allocation8 + $0x718] sm:$0xff] }
 0x2b5   :  { %v13575_v61 = vcombine.high %v835_v55, %v839_v27  ;;  %v13574_v37 = vcombine.low %v835_v55, %v839_v27  ;;  %v13576_v6 = vcombine.low %v836_v57, %v840_v58  ;;  %v888_v55 = vld [vmem:[#allocation8 + $0x8b8] sm:$0xff] }
 0x2b6   :  { %4111 = vmatpush1.bf16.msra.mxu0 %v13518_v63  ;;  %v13577_v63 = vcombine.high %v836_v57, %v840_v58  ;;  %v13616_v57 = vcombine.low %v876_v47, %v880_v36 }
 0x2b7   :  { %4275 = vmatpush1.bf16.msra.mxu1 %v13520_v1  ;;  %4112 = vmatprep.subr.bf16.mxu0 %v13527_v3  ;;  %v843_v1 = vld [vmem:[#allocation8 + $0x750] sm:$0xff] }
 0x2b8   :  { %4276 = vmatprep.subr.bf16.mxu1 %v13529_v0  ;;  %v847_v3 = vld [vmem:[#allocation8 + $0x770] sm:$0xff]  ;;  %v844_v0 = vld [vmem:[#allocation8 + $0x758] sm:$0xff] }
 0x2b9   :  { %v13583_v14 = vcombine.high %v843_v1, %v847_v3  ;;  %v13582_v18 = vcombine.low %v843_v1, %v847_v3  ;;  %v13584_v19 = vcombine.low %v844_v0, %v848_v5  ;;  %v896_v1 = vld [vmem:[#allocation8 + $0x8f8] sm:$0xff] }
 0x2ba   :  { %4113 = vmatpush1.bf16.msra.mxu0 %v13526_v7  ;;  %v13585_v7 = vcombine.high %v844_v0, %v848_v5 }
 0x2bb   :  { %4277 = vmatpush1.bf16.msra.mxu1 %v13528_v8  ;;  %4114 = vmatprep.subr.bf16.mxu0 %v13535_v9  ;;  %v851_v8 = vld [vmem:[#allocation8 + $0x790] sm:$0xff] }
 0x2bc   :  { %4278 = vmatprep.subr.bf16.mxu1 %v13537_v10  ;;  %v855_v9 = vld [vmem:[#allocation8 + $0x7b0] sm:$0xff]  ;;  %v852_v10 = vld [vmem:[#allocation8 + $0x798] sm:$0xff] }
 0x2bd   :  { %v13591_v21 = vcombine.high %v851_v8, %v855_v9  ;;  %v13590_v29 = vcombine.low %v851_v8, %v855_v9  ;;  %v13592_v33 = vcombine.low %v852_v10, %v856_v13 }
 0x2be   :  { %4115 = vmatpush1.bf16.msra.mxu0 %v13534_v22  ;;  %v13593_v22 = vcombine.high %v852_v10, %v856_v13  ;;  %v907_v13 = vld [vmem:[#allocation8 + $0x950] sm:$0xff] }
 0x2bf   :  { %4279 = vmatpush1.bf16.msra.mxu1 %v13536_v24  ;;  %4116 = vmatprep.subr.bf16.mxu0 %v13543_v25  ;;  %v859_v24 = vld [vmem:[#allocation8 + $0x7d0] sm:$0xff] }
 0x2c0   :  { %4280 = vmatprep.subr.bf16.mxu1 %v13545_v26  ;;  %v863_v25 = vld [vmem:[#allocation8 + $0x7f0] sm:$0xff]  ;;  %v860_v26 = vld [vmem:[#allocation8 + $0x7d8] sm:$0xff] }
 0x2c1   :  { %v13599_v35 = vcombine.high %v859_v24, %v863_v25  ;;  %v13598_v23 = vcombine.low %v859_v24, %v863_v25  ;;  %v13600_v42 = vcombine.low %v860_v26, %v864_v28 }
 0x2c2   :  { %4117 = vmatpush1.bf16.msra.mxu0 %v13542_v38  ;;  %v13601_v38 = vcombine.high %v860_v26, %v864_v28  ;;  %v915_v28 = vld [vmem:[#allocation8 + $0x990] sm:$0xff] }
 0x2c3   :  { %4281 = vmatpush1.bf16.msra.mxu1 %v13544_v39  ;;  %4118 = vmatprep.subr.bf16.mxu0 %v13551_v40  ;;  %v867_v39 = vld [vmem:[#allocation8 + $0x810] sm:$0xff] }
 0x2c4   :  { %4282 = vmatprep.subr.bf16.mxu1 %v13553_v41  ;;  %v871_v40 = vld [vmem:[#allocation8 + $0x830] sm:$0xff]  ;;  %v868_v41 = vld [vmem:[#allocation8 + $0x818] sm:$0xff] }
 0x2c5   :  { %v13607_v43 = vcombine.high %v867_v39, %v871_v40  ;;  %v13608_v48 = vcombine.low %v868_v41, %v872_v32 }
 0x2c6   :  { %4119 = vmatpush1.bf16.msra.mxu0 %v13550_v46  ;;  %v13609_v46 = vcombine.high %v868_v41, %v872_v32  ;;  %v923_v32 = vld [vmem:[#allocation8 + $0x9d0] sm:$0xff] }
 0x2c7   :  { %4283 = vmatpush1.bf16.msra.mxu1 %v13552_v30  ;;  %4120 = vmatprep.subr.bf16.mxu0 %v13559_v16  ;;  %v875_v30 = vld [vmem:[#allocation8 + $0x850] sm:$0xff] }
 0x2c8   :  { %4284 = vmatprep.subr.bf16.mxu1 %v13561_v59  ;;  %v879_v16 = vld [vmem:[#allocation8 + $0x870] sm:$0xff]  ;;  %v13606_v59 = vcombine.low %v867_v39, %v871_v40 }
 0x2c9   :  { %v13615_v49 = vcombine.high %v875_v30, %v879_v16  ;;  %v13614_v27 = vcombine.low %v875_v30, %v879_v16 }
 0x2ca   :  { %4121 = vmatpush1.bf16.msra.mxu0 %v13558_v50  ;;  %v883_v50 = vld [vmem:[#allocation8 + $0x890] sm:$0xff] }
 0x2cb   :  { %4285 = vmatpush1.bf16.msra.mxu1 %v13560_v51  ;;  %4122 = vmatprep.subr.bf16.mxu0 %v13567_v52  ;;  %v887_v51 = vld [vmem:[#allocation8 + $0x8b0] sm:$0xff]  ;;  %v13617_v52 = vcombine.high %v876_v47, %v880_v36 }
 0x2cc   :  { %4286 = vmatprep.subr.bf16.mxu1 %v13569_v53  ;;  %v884_v53 = vld [vmem:[#allocation8 + $0x898] sm:$0xff]  ;;  %v13623_v58 = vcombine.high %v883_v50, %v887_v51  ;;  %v13622_v3 = vcombine.low %v883_v50, %v887_v51  ;;  %v931_v47 = vld [vmem:[#allocation8 + $0xa10] sm:$0xff] }
 0x2cd   :  { %v935_v36 = vld [vmem:[#allocation8 + $0xa30] sm:$0xff] }
 0x2ce   :  { %4123 = vmatpush1.bf16.msra.mxu0 %v13566_v60  ;;  %v13625_v60 = vcombine.high %v884_v53, %v888_v55 }
 0x2cf   :  { %4287 = vmatpush1.bf16.msra.mxu1 %v13568_v45  ;;  %4124 = vmatprep.subr.bf16.mxu0 %v13575_v61  ;;  %v891_v45 = vld [vmem:[#allocation8 + $0x8d0] sm:$0xff] }
 0x2d0   :  { %4288 = vmatprep.subr.bf16.mxu1 %v13577_v63  ;;  %v895_v61 = vld [vmem:[#allocation8 + $0x8f0] sm:$0xff]  ;;  %v892_v63 = vld [vmem:[#allocation8 + $0x8d8] sm:$0xff] }
 0x2d1   :  { %v13631_v0 = vcombine.high %v891_v45, %v895_v61  ;;  %v13633_v5 = vcombine.high %v892_v63, %v896_v1  ;;  %v13632_v8 = vcombine.low %v892_v63, %v896_v1  ;;  %v947_v1 = vld [vmem:[#allocation8 + $0xa90] sm:$0xff] }
 0x2d2   :  { %4125 = vmatpush1.bf16.msra.mxu0 %v13574_v37  ;;  %v899_v37 = vld [vmem:[#allocation8 + $0x910] sm:$0xff] }
 0x2d3   :  { %4289 = vmatpush1.bf16.msra.mxu1 %v13576_v6  ;;  %4126 = vmatprep.subr.bf16.mxu0 %v13583_v14  ;;  %v903_v6 = vld [vmem:[#allocation8 + $0x930] sm:$0xff]  ;;  %v900_v14 = vld [vmem:[#allocation8 + $0x918] sm:$0xff] }
 0x2d4   :  { %4290 = vmatprep.subr.bf16.mxu1 %v13585_v7  ;;  %v904_v7 = vld [vmem:[#allocation8 + $0x938] sm:$0xff]  ;;  %v13639_v9 = vcombine.high %v899_v37, %v903_v6 }
 0x2d5   :  { %v13641_v10 = vcombine.high %v900_v14, %v904_v7  ;;  %v13640_v24 = vcombine.low %v900_v14, %v904_v7  ;;  %v955_v7 = vld [vmem:[#allocation8 + $0xad0] sm:$0xff] }
 0x2d6   :  { %4127 = vmatpush1.bf16.msra.mxu0 %v13582_v18  ;;  %v911_v18 = vld [vmem:[#allocation8 + $0x970] sm:$0xff] }
 0x2d7   :  { %4291 = vmatpush1.bf16.msra.mxu1 %v13584_v19  ;;  %4128 = vmatprep.subr.bf16.mxu0 %v13591_v21  ;;  %v908_v19 = vld [vmem:[#allocation8 + $0x958] sm:$0xff]  ;;  %v13647_v25 = vcombine.high %v907_v13, %v911_v18 }
 0x2d8   :  { %4292 = vmatprep.subr.bf16.mxu1 %v13593_v22  ;;  %v912_v21 = vld [vmem:[#allocation8 + $0x978] sm:$0xff]  ;;  %v13638_v22 = vcombine.low %v899_v37, %v903_v6 }
 0x2d9   :  { %v13649_v26 = vcombine.high %v908_v19, %v912_v21  ;;  %v13648_v39 = vcombine.low %v908_v19, %v912_v21  ;;  %v963_v21 = vld [vmem:[#allocation8 + $0xb10] sm:$0xff] }
 0x2da   :  { %4129 = vmatpush1.bf16.msra.mxu0 %v13590_v29  ;;  %v919_v29 = vld [vmem:[#allocation8 + $0x9b0] sm:$0xff] }
 0x2db   :  { %4293 = vmatpush1.bf16.msra.mxu1 %v13592_v33  ;;  %4130 = vmatprep.subr.bf16.mxu0 %v13599_v35  ;;  %v916_v33 = vld [vmem:[#allocation8 + $0x998] sm:$0xff]  ;;  %v13655_v40 = vcombine.high %v915_v28, %v919_v29 }
 0x2dc   :  { %4294 = vmatprep.subr.bf16.mxu1 %v13601_v38  ;;  %v920_v35 = vld [vmem:[#allocation8 + $0x9b8] sm:$0xff]  ;;  %v13646_v38 = vcombine.low %v907_v13, %v911_v18 }
 0x2dd   :  { %v13657_v41 = vcombine.high %v916_v33, %v920_v35  ;;  %v13656_v30 = vcombine.low %v916_v33, %v920_v35  ;;  %v971_v35 = vld [vmem:[#allocation8 + $0xb50] sm:$0xff] }
 0x2de   :  { %4131 = vmatpush1.bf16.msra.mxu0 %v13598_v23  ;;  %v927_v23 = vld [vmem:[#allocation8 + $0x9f0] sm:$0xff] }
 0x2df   :  { %4295 = vmatpush1.bf16.msra.mxu1 %v13600_v42  ;;  %4141 = vmatprep.subr.bf16.mxu0 %v13607_v43  ;;  %v924_v42 = vld [vmem:[#allocation8 + $0x9d8] sm:$0xff]  ;;  %v13663_v16 = vcombine.high %v923_v32, %v927_v23  ;;  %v13662_v50 = vcombine.low %v923_v32, %v927_v23 }
 0x2e0   :  { %4305 = vmatprep.subr.bf16.mxu1 %v13609_v46  ;;  %v928_v43 = vld [vmem:[#allocation8 + $0x9f8] sm:$0xff]  ;;  %v13654_v46 = vcombine.low %v915_v28, %v919_v29 }
 0x2e1   :  { %4133 = vmatmul.mubr.bf16.vlgmr.msra.gmra.mrb[8].mxu0 %v16113_v4  ;;  %v13664_v51 = vcombine.low %v924_v42, %v928_v43 }
 0x2e2   :  { %4297 = vmatmul.mubr.bf16.vlgmr.msra.gmra.mrb[8].mxu1 %v16113_v4  ;;  %4142 = vmatpush1.bf16.msra.mxu0 %v13606_v59  ;;  %v13624_v4 = vcombine.low %v884_v53, %v888_v55  ;;  %v13665_v59 = vcombine.high %v924_v42, %v928_v43  ;;  %v939_v55 = vld [vmem:[#allocation8 + $0xa50] sm:$0xff] }
 0x2e3   :  { %4173 = vmatprep.mubr.bf16.mxu0 %v16115_v12  ;;  %4306 = vmatpush1.bf16.msra.mxu1 %v13608_v48  ;;  %v932_v48 = vld [vmem:[#allocation8 + $0xa18] sm:$0xff]  ;;  %v979_v43 = vld [vmem:[#allocation8 + $0xb90] sm:$0xff] }
 0x2e4   :  { %4337 = vmatprep.mubr.bf16.mxu1 %v16115_v12  ;;  %4143 = vmatprep.subr.bf16.mxu0 %v13615_v49  ;;  %v13630_v12 = vcombine.low %v891_v45, %v895_v61  ;;  %v936_v49 = vld [vmem:[#allocation8 + $0xa38] sm:$0xff] }
 0x2e5   :  { %4307 = vmatprep.subr.bf16.mxu1 %v13617_v52  ;;  %v13671_v52 = vcombine.high %v931_v47, %v935_v36  ;;  %v13673_v53 = vcombine.high %v932_v48, %v936_v49  ;;  %v13672_v45 = vcombine.low %v932_v48, %v936_v49  ;;  %v987_v49 = vld [vmem:[#allocation8 + $0xbd0] sm:$0xff] }
 0x2e6   :  { %4144 = vmatpush1.bf16.msra.mxu0 %v13614_v27  ;;  %v943_v27 = vld [vmem:[#allocation8 + $0xa70] sm:$0xff] }
 0x2e7   :  { %4308 = vmatpush1.bf16.msra.mxu1 %v13616_v57  ;;  %4145 = vmatprep.subr.bf16.mxu0 %v13623_v58  ;;  %v940_v57 = vld [vmem:[#allocation8 + $0xa58] sm:$0xff]  ;;  %v13679_v61 = vcombine.high %v939_v55, %v943_v27 }
 0x2e8   :  { %4309 = vmatprep.subr.bf16.mxu1 %v13625_v60  ;;  %v944_v58 = vld [vmem:[#allocation8 + $0xa78] sm:$0xff]  ;;  %v13670_v60 = vcombine.low %v931_v47, %v935_v36 }
 0x2e9   :  { %v13681_v63 = vcombine.high %v940_v57, %v944_v58  ;;  %v13680_v37 = vcombine.low %v940_v57, %v944_v58  ;;  %v995_v58 = vld [vmem:[#allocation8 + $0xc10] sm:$0xff] }
 0x2ea   :  { %4146 = vmatpush1.bf16.msra.mxu0 %v13622_v3  ;;  %v951_v3 = vld [vmem:[#allocation8 + $0xab0] sm:$0xff] }
 0x2eb   :  { %4310 = vmatpush1.bf16.msra.mxu1 %v13624_v4  ;;  %4147 = vmatprep.subr.bf16.mxu0 %v13631_v0  ;;  %v948_v4 = vld [vmem:[#allocation8 + $0xa98] sm:$0xff]  ;;  %v13687_v6 = vcombine.high %v947_v1, %v951_v3 }
 0x2ec   :  { %4311 = vmatprep.subr.bf16.mxu1 %v13633_v5  ;;  %v952_v0 = vld [vmem:[#allocation8 + $0xab8] sm:$0xff]  ;;  %v13678_v5 = vcombine.low %v939_v55, %v943_v27 }
 0x2ed   :  { %v13689_v14 = vcombine.high %v948_v4, %v952_v0  ;;  %v13688_v13 = vcombine.low %v948_v4, %v952_v0  ;;  %v1003_v0 = vld [vmem:[#allocation8 + $0xc50] sm:$0xff] }
 0x2ee   :  { %4148 = vmatpush1.bf16.msra.mxu0 %v13630_v12  ;;  %v959_v12 = vld [vmem:[#allocation8 + $0xaf0] sm:$0xff] }
 0x2ef   :  { %4312 = vmatpush1.bf16.msra.mxu1 %v13632_v8  ;;  %4149 = vmatprep.subr.bf16.mxu0 %v13639_v9  ;;  %v956_v8 = vld [vmem:[#allocation8 + $0xad8] sm:$0xff]  ;;  %v13695_v18 = vcombine.high %v955_v7, %v959_v12 }
 0x2f0   :  { %4313 = vmatprep.subr.bf16.mxu1 %v13641_v10  ;;  %v960_v9 = vld [vmem:[#allocation8 + $0xaf8] sm:$0xff]  ;;  %v13686_v10 = vcombine.low %v947_v1, %v951_v3 }
 0x2f1   :  { %v13697_v19 = vcombine.high %v956_v8, %v960_v9  ;;  %v13696_v28 = vcombine.low %v956_v8, %v960_v9  ;;  %v1011_v8 = vld [vmem:[#allocation8 + $0xc90] sm:$0xff] }
 0x2f2   :  { %4150 = vmatpush1.bf16.msra.mxu0 %v13638_v22  ;;  %v967_v22 = vld [vmem:[#allocation8 + $0xb30] sm:$0xff] }
 0x2f3   :  { %4314 = vmatpush1.bf16.msra.mxu1 %v13640_v24  ;;  %4151 = vmatprep.subr.bf16.mxu0 %v13647_v25  ;;  %v964_v24 = vld [vmem:[#allocation8 + $0xb18] sm:$0xff]  ;;  %v13703_v29 = vcombine.high %v963_v21, %v967_v22  ;;  %v1015_v9 = vld [vmem:[#allocation8 + $0xcb0] sm:$0xff] }
 0x2f4   :  { %4315 = vmatprep.subr.bf16.mxu1 %v13649_v26  ;;  %v968_v25 = vld [vmem:[#allocation8 + $0xb38] sm:$0xff]  ;;  %v13694_v26 = vcombine.low %v955_v7, %v959_v12 }
 0x2f5   :  { %v13705_v33 = vcombine.high %v964_v24, %v968_v25  ;;  %v13704_v32 = vcombine.low %v964_v24, %v968_v25  ;;  %v1019_v25 = vld [vmem:[#allocation8 + $0xcd0] sm:$0xff] }
 0x2f6   :  { %4152 = vmatpush1.bf16.msra.mxu0 %v13646_v38  ;;  %v975_v38 = vld [vmem:[#allocation8 + $0xb70] sm:$0xff] }
 0x2f7   :  { %4316 = vmatpush1.bf16.msra.mxu1 %v13648_v39  ;;  %4153 = vmatprep.subr.bf16.mxu0 %v13655_v40  ;;  %v972_v39 = vld [vmem:[#allocation8 + $0xb58] sm:$0xff]  ;;  %v13711_v23 = vcombine.high %v971_v35, %v975_v38 }
 0x2f8   :  { %4317 = vmatprep.subr.bf16.mxu1 %v13657_v41  ;;  %v976_v40 = vld [vmem:[#allocation8 + $0xb78] sm:$0xff]  ;;  %v13702_v41 = vcombine.low %v963_v21, %v967_v22  ;;  %v13751_v22 = vcombine.high %v1011_v8, %v1015_v9 }
 0x2f9   :  { %v13713_v42 = vcombine.high %v972_v39, %v976_v40  ;;  %v13712_v47 = vcombine.low %v972_v39, %v976_v40  ;;  %v1027_v39 = vld [vmem:[#allocation8 + $0xd10] sm:$0xff] }
 0x2fa   :  { %4154 = vmatpush1.bf16.msra.mxu0 %v13654_v46  ;;  %v983_v46 = vld [vmem:[#allocation8 + $0xbb0] sm:$0xff] }
 0x2fb   :  { %4318 = vmatpush1.bf16.msra.mxu1 %v13656_v30  ;;  %4155 = vmatprep.subr.bf16.mxu0 %v13663_v16  ;;  %v980_v30 = vld [vmem:[#allocation8 + $0xb98] sm:$0xff]  ;;  %v13719_v36 = vcombine.high %v979_v43, %v983_v46  ;;  %v1031_v40 = vld [vmem:[#allocation8 + $0xd30] sm:$0xff] }
 0x2fc   :  { %4319 = vmatprep.subr.bf16.mxu1 %v13665_v59  ;;  %v984_v16 = vld [vmem:[#allocation8 + $0xbb8] sm:$0xff]  ;;  %v13710_v59 = vcombine.low %v971_v35, %v975_v38 }
 0x2fd   :  { %v13721_v48 = vcombine.high %v980_v30, %v984_v16  ;;  %v13720_v55 = vcombine.low %v980_v30, %v984_v16  ;;  %v1039_v30 = vld [vmem:[#allocation8 + $0xd70] sm:$0xff]  ;;  %v1036_v16 = vld [vmem:[#allocation8 + $0xd58] sm:$0xff] }
 0x2fe   :  { %4156 = vmatpush1.bf16.msra.mxu0 %v13662_v50  ;;  %v991_v50 = vld [vmem:[#allocation8 + $0xbf0] sm:$0xff] }
 0x2ff   :  { %4320 = vmatpush1.bf16.msra.mxu1 %v13664_v51  ;;  %4157 = vmatprep.subr.bf16.mxu0 %v13671_v52  ;;  %v988_v51 = vld [vmem:[#allocation8 + $0xbd8] sm:$0xff]  ;;  %v13727_v27 = vcombine.high %v987_v49, %v991_v50 }
 0x300   :  { %4321 = vmatprep.subr.bf16.mxu1 %v13673_v53  ;;  %v992_v52 = vld [vmem:[#allocation8 + $0xbf8] sm:$0xff]  ;;  %v13718_v53 = vcombine.low %v979_v43, %v983_v46  ;;  %v1035_v46 = vld [vmem:[#allocation8 + $0xd50] sm:$0xff] }
 0x301   :  { %v13729_v57 = vcombine.high %v988_v51, %v992_v52  ;;  %v13728_v1 = vcombine.low %v988_v51, %v992_v52  ;;  %v1047_v51 = vld [vmem:[#allocation8 + $0xdb0] sm:$0xff]  ;;  %v1044_v52 = vld [vmem:[#allocation8 + $0xd98] sm:$0xff] }
 0x302   :  { %4158 = vmatpush1.bf16.msra.mxu0 %v13670_v60  ;;  %v999_v60 = vld [vmem:[#allocation8 + $0xc30] sm:$0xff] }
 0x303   :  { %4322 = vmatpush1.bf16.msra.mxu1 %v13672_v45  ;;  %4159 = vmatprep.subr.bf16.mxu0 %v13679_v61  ;;  %v996_v45 = vld [vmem:[#allocation8 + $0xc18] sm:$0xff]  ;;  %v13735_v3 = vcombine.high %v995_v58, %v999_v60 }
 0x304   :  { %4323 = vmatprep.subr.bf16.mxu1 %v13681_v63  ;;  %v1000_v61 = vld [vmem:[#allocation8 + $0xc38] sm:$0xff]  ;;  %v13726_v63 = vcombine.low %v987_v49, %v991_v50  ;;  %v1043_v50 = vld [vmem:[#allocation8 + $0xd90] sm:$0xff] }
 0x305   :  { %v13737_v4 = vcombine.high %v996_v45, %v1000_v61  ;;  %v13736_v7 = vcombine.low %v996_v45, %v1000_v61  ;;  %v1051_v61 = vld [vmem:[#allocation8 + $0xdd0] sm:$0xff] }
 0x306   :  { %4160 = vmatpush1.bf16.msra.mxu0 %v13678_v5  ;;  %v1007_v5 = vld [vmem:[#allocation8 + $0xc70] sm:$0xff] }
 0x307   :  { %4324 = vmatpush1.bf16.msra.mxu1 %v13680_v37  ;;  %4161 = vmatprep.subr.bf16.mxu0 %v13687_v6  ;;  %v13734_v37 = vcombine.low %v995_v58, %v999_v60  ;;  %v1004_v6 = vld [vmem:[#allocation8 + $0xc58] sm:$0xff]  ;;  %v13743_v12 = vcombine.high %v1003_v0, %v1007_v5 }
 0x308   :  { %4325 = vmatprep.subr.bf16.mxu1 %v13689_v14  ;;  %v1008_v14 = vld [vmem:[#allocation8 + $0xc78] sm:$0xff] }
 0x309   :  { %v13744_v21 = vcombine.low %v1004_v6, %v1008_v14 }
 0x30a   :  { %4162 = vmatpush1.bf16.msra.mxu0 %v13686_v10  ;;  %v13745_v10 = vcombine.high %v1004_v6, %v1008_v14  ;;  %v13782_v6 = vcombine.low %v1043_v50, %v1047_v51 }
 0x30b   :  { %4326 = vmatpush1.bf16.msra.mxu1 %v13688_v13  ;;  %4163 = vmatprep.subr.bf16.mxu0 %v13695_v18  ;;  %v1012_v13 = vld [vmem:[#allocation8 + $0xc98] sm:$0xff] }
 0x30c   :  { %4327 = vmatprep.subr.bf16.mxu1 %v13697_v19  ;;  %v1016_v18 = vld [vmem:[#allocation8 + $0xcb8] sm:$0xff]  ;;  %v13742_v19 = vcombine.low %v1003_v0, %v1007_v5 }
 0x30d   :  { %v13753_v24 = vcombine.high %v1012_v13, %v1016_v18  ;;  %v1056_v0 = vld [vmem:[#allocation8 + $0xdf8] sm:$0xff] }
 0x30e   :  { %4164 = vmatpush1.bf16.msra.mxu0 %v13694_v26  ;;  %v1023_v26 = vld [vmem:[#allocation8 + $0xcf0] sm:$0xff] }
 0x30f   :  { %4328 = vmatpush1.bf16.msra.mxu1 %v13696_v28  ;;  %4165 = vmatprep.subr.bf16.mxu0 %v13703_v29  ;;  %v1020_v28 = vld [vmem:[#allocation8 + $0xcd8] sm:$0xff]  ;;  %v13759_v35 = vcombine.high %v1019_v25, %v1023_v26 }
 0x310   :  { %4329 = vmatprep.subr.bf16.mxu1 %v13705_v33  ;;  %v1024_v29 = vld [vmem:[#allocation8 + $0xcf8] sm:$0xff]  ;;  %v13750_v33 = vcombine.low %v1011_v8, %v1015_v9 }
 0x311   :  { %v13761_v38 = vcombine.high %v1020_v28, %v1024_v29 }
 0x312   :  { %4166 = vmatpush1.bf16.msra.mxu0 %v13702_v41  ;;  %v1028_v41 = vld [vmem:[#allocation8 + $0xd18] sm:$0xff] }
 0x313   :  { %4330 = vmatpush1.bf16.msra.mxu1 %v13704_v32  ;;  %4167 = vmatprep.subr.bf16.mxu0 %v13711_v23  ;;  %v1032_v32 = vld [vmem:[#allocation8 + $0xd38] sm:$0xff]  ;;  %v13760_v23 = vcombine.low %v1020_v28, %v1024_v29  ;;  %v1071_v28 = vld [vmem:[#allocation8 + $0xe70] sm:$0xff] }
 0x314   :  { %4331 = vmatprep.subr.bf16.mxu1 %v13713_v42  ;;  %v13767_v42 = vcombine.high %v1027_v39, %v1031_v40  ;;  %v13769_v43 = vcombine.high %v1028_v41, %v1032_v32  ;;  %v1068_v29 = vld [vmem:[#allocation8 + $0xe58] sm:$0xff] }
 0x316   :  { %4168 = vmatpush1.bf16.msra.mxu0 %v13710_v59  ;;  %v1040_v59 = vld [vmem:[#allocation8 + $0xd78] sm:$0xff] }
 0x317   :  { %4332 = vmatpush1.bf16.msra.mxu1 %v13712_v47  ;;  %4169 = vmatprep.subr.bf16.mxu0 %v13719_v36  ;;  %v13766_v47 = vcombine.low %v1027_v39, %v1031_v40  ;;  %v13768_v36 = vcombine.low %v1028_v41, %v1032_v32  ;;  %v13777_v49 = vcombine.high %v1036_v16, %v1040_v59  ;;  %v1075_v40 = vld [vmem:[#allocation8 + $0xe90] sm:$0xff]  ;;  %v1076_v32 = vld [vmem:[#allocation8 + $0xe98] sm:$0xff] }
 0x318   :  { %4333 = vmatprep.subr.bf16.mxu1 %v13721_v48  ;;  %v13775_v48 = vcombine.high %v1035_v46, %v1039_v30  ;;  %v1079_v41 = vld [vmem:[#allocation8 + $0xeb0] sm:$0xff] }
 0x31a   :  { %4170 = vmatpush1.bf16.msra.mxu0 %v13718_v53  ;;  %v1048_v53 = vld [vmem:[#allocation8 + $0xdb8] sm:$0xff] }
 0x31b   :  { %4334 = vmatpush1.bf16.msra.mxu1 %v13720_v55  ;;  %4171 = vmatprep.subr.bf16.mxu0 %v13727_v27  ;;  %v13774_v55 = vcombine.low %v1035_v46, %v1039_v30  ;;  %v13776_v27 = vcombine.low %v1036_v16, %v1040_v59  ;;  %v13785_v45 = vcombine.high %v1044_v52, %v1048_v53  ;;  %v1083_v30 = vld [vmem:[#allocation8 + $0xed0] sm:$0xff]  ;;  %v1084_v59 = vld [vmem:[#allocation8 + $0xed8] sm:$0xff] }
 0x31c   :  { %4335 = vmatprep.subr.bf16.mxu1 %v13729_v57  ;;  %v13783_v57 = vcombine.high %v1043_v50, %v1047_v51  ;;  %v1087_v16 = vld [vmem:[#allocation8 + $0xef0] sm:$0xff] }
 0x31d   :  { %v1091_v51 = vld [vmem:[#allocation8 + $0xf10] sm:$0xff] }
 0x31e   :  { %4172 = vmatpush1.bf16.msra.mxu0 %v13726_v63  ;;  %v1055_v63 = vld [vmem:[#allocation8 + $0xdf0] sm:$0xff] }
 0x31f   :  { %4336 = vmatpush1.bf16.msra.mxu1 %v13728_v1  ;;  %4182 = vmatprep.subr.bf16.mxu0 %v13735_v3  ;;  %v13791_v8 = vcombine.high %v1051_v61, %v1055_v63 }
 0x320   :  { %4346 = vmatprep.subr.bf16.mxu1 %v13737_v4  ;;  %v1052_v4 = vld [vmem:[#allocation8 + $0xdd8] sm:$0xff] }
 0x321   :  { %4174 = vmatmul.mubr.bf16.vlgmr.msra.gmra.mrb[8].mxu0 %v16133_v54  ;;  %v13793_v9 = vcombine.high %v1052_v4, %v1056_v0 }
 0x322   :  { %4338 = vmatmul.mubr.bf16.vlgmr.msra.gmra.mrb[8].mxu1 %v16133_v54  ;;  %4183 = vmatpush1.bf16.msra.mxu0 %v13734_v37  ;;  %v13752_v54 = vcombine.low %v1012_v13, %v1016_v18  ;;  %v1063_v13 = vld [vmem:[#allocation8 + $0xe30] sm:$0xff]  ;;  %v1060_v18 = vld [vmem:[#allocation8 + $0xe18] sm:$0xff] }
 0x323   :  { %4214 = vmatprep.mubr.bf16.mxu0 %v16135_v62  ;;  %4347 = vmatpush1.bf16.msra.mxu1 %v13736_v7 }
 0x324   :  { %4378 = vmatprep.mubr.bf16.mxu1 %v16135_v62  ;;  %4184 = vmatprep.subr.bf16.mxu0 %v13743_v12  ;;  %v13758_v62 = vcombine.low %v1019_v25, %v1023_v26  ;;  %v13784_v12 = vcombine.low %v1044_v52, %v1048_v53  ;;  %v1067_v26 = vld [vmem:[#allocation8 + $0xe50] sm:$0xff]  ;;  %v1092_v53 = vld [vmem:[#allocation8 + $0xf18] sm:$0xff] }
 0x325   :  { %4348 = vmatprep.subr.bf16.mxu1 %v13745_v10  ;;  %v1059_v10 = vld [vmem:[#allocation8 + $0xe10] sm:$0xff] }
 0x326   :  { %4185 = vmatpush1.bf16.msra.mxu0 %v13742_v19  ;;  %v1064_v19 = vld [vmem:[#allocation8 + $0xe38] sm:$0xff]  ;;  %v1095_v52 = vld [vmem:[#allocation8 + $0xf30] sm:$0xff] }
 0x327   :  { %4349 = vmatpush1.bf16.msra.mxu1 %v13744_v21  ;;  %4186 = vmatprep.subr.bf16.mxu0 %v13751_v22  ;;  %v13790_v21 = vcombine.low %v1051_v61, %v1055_v63  ;;  %v13792_v22 = vcombine.low %v1052_v4, %v1056_v0  ;;  %v13801_v25 = vcombine.high %v1060_v18, %v1064_v19  ;;  %v1099_v63 = vld [vmem:[#allocation8 + $0xf50] sm:$0xff]  ;;  %v1100_v0 = vld [vmem:[#allocation8 + $0xf58] sm:$0xff] }
 0x328   :  { %4350 = vmatprep.subr.bf16.mxu1 %v13753_v24  ;;  %v13799_v24 = vcombine.high %v1059_v10, %v1063_v13  ;;  %v1103_v4 = vld [vmem:[#allocation8 + $0xf70] sm:$0xff] }
 0x32a   :  { %4187 = vmatpush1.bf16.msra.mxu0 %v13750_v33  ;;  %v1072_v33 = vld [vmem:[#allocation8 + $0xe78] sm:$0xff] }
 0x32b   :  { %4351 = vmatpush1.bf16.msra.mxu1 %v13752_v54  ;;  %4188 = vmatprep.subr.bf16.mxu0 %v13759_v35  ;;  %v13798_v54 = vcombine.low %v1059_v10, %v1063_v13  ;;  %v13800_v35 = vcombine.low %v1060_v18, %v1064_v19  ;;  %v13809_v39 = vcombine.high %v1068_v29, %v1072_v33  ;;  %v1112_v10 = vld [vmem:[#allocation8 + $0xfb8] sm:$0xff]  ;;  %v16172_v13 = vld [vmem:[#allocation10] sm:$0xff] }
 0x32c   :  { %4352 = vmatprep.subr.bf16.mxu1 %v13761_v38  ;;  %v13807_v38 = vcombine.high %v1067_v26, %v1071_v28  ;;  %v13838_v18 = vcombine.low %v1099_v63, %v1103_v4 }
 0x32e   :  { %4189 = vmatpush1.bf16.msra.mxu0 %v13758_v62  ;;  %v1080_v62 = vld [vmem:[#allocation8 + $0xeb8] sm:$0xff] }
 0x32f   :  { %4353 = vmatpush1.bf16.msra.mxu1 %v13760_v23  ;;  %4190 = vmatprep.subr.bf16.mxu0 %v13767_v42  ;;  %v13806_v23 = vcombine.low %v1067_v26, %v1071_v28  ;;  %v13808_v42 = vcombine.low %v1068_v29, %v1072_v33  ;;  %v13817_v46 = vcombine.high %v1076_v32, %v1080_v62  ;;  %v1116_v28 = vld [vmem:[#allocation8 + $0xfd8] sm:$0xff] }
 0x330   :  { %4354 = vmatprep.subr.bf16.mxu1 %v13769_v43  ;;  %v13815_v43 = vcombine.high %v1075_v40, %v1079_v41  ;;  %v1138_v26 = vrot.slane %v16172_v13, %v16068_v17  ;;  %v1120_v29 = vld [vmem:[#allocation8 + $0xff8] sm:$0xff] }
 0x332   :  { %4191 = vmatpush1.bf16.msra.mxu0 %v13766_v47  ;;  %v1088_v47 = vld [vmem:[#allocation8 + $0xef8] sm:$0xff] }
 0x333   :  { %4355 = vmatpush1.bf16.msra.mxu1 %v13768_v36  ;;  %4192 = vmatprep.subr.bf16.mxu0 %v13775_v48  ;;  %v13814_v36 = vcombine.low %v1075_v40, %v1079_v41  ;;  %v13816_v48 = vcombine.low %v1076_v32, %v1080_v62  ;;  %v13825_v50 = vcombine.high %v1084_v59, %v1088_v47  ;;  %v4403_v40 = vld [vmem:[#allocation11 + $0x40] sm:$0xff]  ;;  %v4396_v32 = vld [vmem:[#allocation11 + $0x8] sm:$0xff] }
 0x334   :  { %v16164_v58 = vpop.f32.mrb[4].mxu0  ;;  %v16166_v60 = vpop.f32.mrb[4].mxu1  ;;  %4356 = vmatprep.subr.bf16.mxu1 %v13777_v49  ;;  %v13823_v49 = vcombine.high %v1083_v30, %v1087_v16  ;;  %v4404_v62 = vld [vmem:[#allocation11 + $0x48] sm:$0xff] }
 0x335   :  { %v16168_v1 = vpop.f32.mrb[5].mxu0  ;;  %v16170_v3 = vpop.f32.mrb[5].mxu1 }
 0x336   :  { %v3892_v5 = vpop.f32.mrb[6].mxu0  ;;  %v4056_v37 = vpop.f32.mrb[6].mxu1  ;;  %4193 = vmatpush1.bf16.msra.mxu0 %v13774_v55  ;;  %v1096_v55 = vld [vmem:[#allocation8 + $0xf38] sm:$0xff]  ;;  %v15316_v41 = vadd.f32 %v16168_v1, %v1138_v26  ;;  %v13860_v1 = vcombine.low %v4396_v32, %v4404_v62  ;;  %v4476_v26 = vld [vmem:[#allocation11 + $0x288] sm:$0xff] }
 0x337   :  { %4357 = vmatpush1.bf16.msra.mxu1 %v13776_v27  ;;  %v3893_v14 = vpop.f32.mrb[7].mxu0  ;;  %v4057_v7 = vpop.f32.mrb[7].mxu1  ;;  %4194 = vmatprep.subr.bf16.mxu0 %v13783_v57  ;;  %v13822_v27 = vcombine.low %v1083_v30, %v1087_v16  ;;  %v13824_v57 = vcombine.low %v1084_v59, %v1088_v47  ;;  %v13833_v61 = vcombine.high %v1092_v53, %v1096_v55  ;;  %v1104_v5 = vld [vmem:[#allocation8 + $0xf78] sm:$0xff]  ;;  %v4411_v16 = vld [vmem:[#allocation11 + $0x80] sm:$0xff] }
 0x338   :  { %4358 = vmatprep.subr.bf16.mxu1 %v13785_v45  ;;  %v13831_v45 = vcombine.high %v1091_v51, %v1095_v52  ;;  %v13830_v37 = vcombine.low %v1091_v51, %v1095_v52  ;;  %v13839_v14 = vcombine.high %v1099_v63, %v1103_v4  ;;  %v13841_v7 = vcombine.high %v1100_v0, %v1104_v5  ;;  %v4419_v59 = vld [vmem:[#allocation11 + $0xc0] sm:$0xff] }
 0x339   :  { %v13840_v19 = vcombine.low %v1100_v0, %v1104_v5  ;;  %v4388_v30 = vmax.f32 %v15316_v41, 0.0  ;;  %v4435_v51 = vld [vmem:[#allocation11 + $0x140] sm:$0xff]  ;;  %v4444_v5 = vld [vmem:[#allocation11 + $0x188] sm:$0xff] }
 0x33a   :  { %4195 = vmatpush1.bf16.msra.mxu0 %v13782_v6  ;;  %v13832_v6 = vcombine.low %v1092_v53, %v1096_v55  ;;  %v4428_v55 = vld [vmem:[#allocation11 + $0x108] sm:$0xff]  ;;  %v4443_v4 = vld [vmem:[#allocation11 + $0x180] sm:$0xff] }
 0x33b   :  { %4359 = vmatpush1.bf16.msra.mxu1 %v13784_v12  ;;  %4196 = vmatprep.subr.bf16.mxu0 %v13791_v8  ;;  %v1107_v12 = vld [vmem:[#allocation8 + $0xf90] sm:$0xff]  ;;  %v16177_v52 = vpack.c.bf16 %v4388_v30, %v4388_v30  ;;  %v4451_v0 = vld [vmem:[#allocation11 + $0x1c0] sm:$0xff] }
 0x33c   :  { %4360 = vmatprep.subr.bf16.mxu1 %v13793_v9  ;;  %v1111_v8 = vld [vmem:[#allocation8 + $0xfb0] sm:$0xff]  ;;  %v1108_v9 = vld [vmem:[#allocation8 + $0xf98] sm:$0xff] }
 0x33d   :  { %v13846_v33 = vcombine.low %v1107_v12, %v1111_v8  ;;  %v4500_v41 = vld [vmem:[#allocation11 + $0x348] sm:$0xff] }
 0x33e   :  { %4197 = vmatpush1.bf16.msra.mxu0 %v13790_v21  ;;  %v13847_v21 = vcombine.high %v1107_v12, %v1111_v8  ;;  %v4459_v12 = vld [vmem:[#allocation11 + $0x200] sm:$0xff]  ;;  %v4508_v30 = vld [vmem:[#allocation11 + $0x388] sm:$0xff] }
 0x33f   :  { %4361 = vmatpush1.bf16.msra.mxu1 %v13792_v22  ;;  %4198 = vmatprep.subr.bf16.mxu0 %v13799_v24  ;;  %v13849_v22 = vcombine.high %v1108_v9, %v1112_v10  ;;  %v1115_v24 = vld [vmem:[#allocation8 + $0xfd0] sm:$0xff]  ;;  %v4467_v8 = vld [vmem:[#allocation11 + $0x240] sm:$0xff] }
 0x340   :  { %4362 = vmatprep.subr.bf16.mxu1 %v13801_v25  ;;  %v1119_v25 = vld [vmem:[#allocation8 + $0xff0] sm:$0xff] }
 0x342   :  { %4199 = vmatpush1.bf16.msra.mxu0 %v13798_v54  ;;  %v13848_v54 = vcombine.low %v1108_v9, %v1112_v10  ;;  %v4460_v9 = vld [vmem:[#allocation11 + $0x208] sm:$0xff] }
 0x343   :  { %4363 = vmatpush1.bf16.msra.mxu1 %v13800_v35  ;;  %4200 = vmatprep.subr.bf16.mxu0 %v13807_v38  ;;  %v13855_v35 = vcombine.high %v1115_v24, %v1119_v25  ;;  %v13857_v38 = vcombine.high %v1116_v28, %v1120_v29  ;;  %v4468_v10 = vld [vmem:[#allocation11 + $0x248] sm:$0xff] }
 0x344   :  { %4364 = vmatprep.subr.bf16.mxu1 %v13809_v39  ;;  %v4395_v39 = vld [vmem:[#allocation11] sm:$0xff] }
 0x345   :  { %v13858_v47 = vcombine.low %v4395_v39, %v4403_v40 }
 0x346   :  { %4201 = vmatpush1.bf16.msra.mxu0 %v13806_v23  ;;  %v13854_v23 = vcombine.low %v1115_v24, %v1119_v25  ;;  %v4475_v24 = vld [vmem:[#allocation11 + $0x280] sm:$0xff] }
 0x347   :  { %4365 = vmatpush1.bf16.msra.mxu1 %v13808_v42  ;;  %4202 = vmatprep.subr.bf16.mxu0 %v13815_v43  ;;  %v13856_v42 = vcombine.low %v1116_v28, %v1120_v29  ;;  %v13859_v43 = vcombine.high %v4395_v39, %v4403_v40  ;;  %v4483_v25 = vld [vmem:[#allocation11 + $0x2c0] sm:$0xff]  ;;  %v4484_v28 = vld [vmem:[#allocation11 + $0x2c8] sm:$0xff]  ;;  %v13922_v29 = vcombine.low %v4459_v12, %v4467_v8 }
 0x348   :  { %4366 = vmatprep.subr.bf16.mxu1 %v13817_v46  ;;  %v13861_v46 = vcombine.high %v4396_v32, %v4404_v62  ;;  %v4499_v39 = vld [vmem:[#allocation11 + $0x340] sm:$0xff]  ;;  %v4492_v40 = vld [vmem:[#allocation11 + $0x308] sm:$0xff]  ;;  %v13938_v32 = vcombine.low %v4475_v24, %v4483_v25  ;;  %v13940_v62 = vcombine.low %v4476_v26, %v4484_v28 }
 0x34a   :  { %4203 = vmatpush1.bf16.msra.mxu0 %v13814_v36  ;;  %v4412_v36 = vld [vmem:[#allocation11 + $0x88] sm:$0xff] }
 0x34b   :  { %4367 = vmatpush1.bf16.msra.mxu1 %v13816_v48  ;;  %4204 = vmatprep.subr.bf16.mxu0 %v13823_v49  ;;  %v4420_v48 = vld [vmem:[#allocation11 + $0xc8] sm:$0xff]  ;;  %v13875_v49 = vcombine.high %v4411_v16, %v4419_v59 }
 0x34c   :  { %4368 = vmatprep.subr.bf16.mxu1 %v13825_v50  ;;  %v4427_v50 = vld [vmem:[#allocation11 + $0x100] sm:$0xff]  ;;  %v13877_v53 = vcombine.high %v4412_v36, %v4420_v48 }
 0x34e   :  { %4205 = vmatpush1.bf16.msra.mxu0 %v13822_v27  ;;  %v4436_v27 = vld [vmem:[#allocation11 + $0x148] sm:$0xff] }
 0x34f   :  { %4369 = vmatpush1.bf16.msra.mxu1 %v13824_v57  ;;  %4206 = vmatprep.subr.bf16.mxu0 %v13831_v45  ;;  %v13874_v57 = vcombine.low %v4411_v16, %v4419_v59  ;;  %v13876_v45 = vcombine.low %v4412_v36, %v4420_v48  ;;  %v13893_v63 = vcombine.high %v4428_v55, %v4436_v27  ;;  %v4516_v16 = vld [vmem:[#allocation11 + $0x3c8] sm:$0xff] }
 0x350   :  { %4370 = vmatprep.subr.bf16.mxu1 %v13833_v61  ;;  %v13891_v61 = vcombine.high %v4427_v50, %v4435_v51  ;;  %v13973_v48 = vcombine.high %v4508_v30, %v4516_v16 }
 0x352   :  { %4207 = vmatpush1.bf16.msra.mxu0 %v13830_v37  ;;  %v4452_v37 = vld [vmem:[#allocation11 + $0x1c8] sm:$0xff] }
 0x353   :  { %4371 = vmatpush1.bf16.msra.mxu1 %v13832_v6  ;;  %4208 = vmatprep.subr.bf16.mxu0 %v13839_v14  ;;  %v13890_v6 = vcombine.low %v4427_v50, %v4435_v51  ;;  %v13907_v14 = vcombine.high %v4443_v4, %v4451_v0  ;;  %v4524_v50 = vld [vmem:[#allocation11 + $0x408] sm:$0xff] }
 0x354   :  { %4372 = vmatprep.subr.bf16.mxu1 %v13841_v7  ;;  %v13909_v7 = vcombine.high %v4444_v5, %v4452_v37  ;;  %v4532_v51 = vld [vmem:[#allocation11 + $0x448] sm:$0xff] }
 0x356   :  { %4209 = vmatpush1.bf16.msra.mxu0 %v13838_v18  ;;  %v13906_v18 = vcombine.low %v4443_v4, %v4451_v0  ;;  %v4548_v4 = vld [vmem:[#allocation11 + $0x4c8] sm:$0xff] }
 0x357   :  { %4373 = vmatpush1.bf16.msra.mxu1 %v13840_v19  ;;  %4210 = vmatprep.subr.bf16.mxu0 %v13847_v21  ;;  %v13908_v19 = vcombine.low %v4444_v5, %v4452_v37  ;;  %v13923_v21 = vcombine.high %v4459_v12, %v4467_v8  ;;  %v13988_v5 = vcombine.low %v4524_v50, %v4532_v51  ;;  %v4564_v12 = vld [vmem:[#allocation11 + $0x548] sm:$0xff] }
 0x358   :  { %4374 = vmatprep.subr.bf16.mxu1 %v13849_v22  ;;  %v13925_v22 = vcombine.high %v4460_v9, %v4468_v10 }
 0x35a   :  { %4211 = vmatpush1.bf16.msra.mxu0 %v13846_v33  ;;  %v13924_v33 = vcombine.low %v4460_v9, %v4468_v10 }
 0x35b   :  { %4375 = vmatpush1.bf16.msra.mxu1 %v13848_v54  ;;  %4212 = vmatprep.subr.bf16.mxu0 %v13855_v35  ;;  %v13939_v54 = vcombine.high %v4475_v24, %v4483_v25  ;;  %v13941_v35 = vcombine.high %v4476_v26, %v4484_v28  ;;  %v4580_v24 = vld [vmem:[#allocation11 + $0x5c8] sm:$0xff] }
 0x35c   :  { %4376 = vmatprep.subr.bf16.mxu1 %v13857_v38  ;;  %v4491_v38 = vld [vmem:[#allocation11 + $0x300] sm:$0xff] }
 0x35d   :  { %v13954_v59 = vcombine.low %v4491_v38, %v4499_v39 }
 0x35e   :  { %4213 = vmatpush1.bf16.msra.mxu0 %v13854_v23  ;;  %v13955_v23 = vcombine.high %v4491_v38, %v4499_v39  ;;  %v4596_v38 = vld [vmem:[#allocation11 + $0x648] sm:$0xff] }
 0x35f   :  { %4377 = vmatpush1.bf16.msra.mxu1 %v13856_v42  ;;  %10631 = vmatprep.subr.bf16.mxu0 %v13859_v43  ;;  %v13957_v42 = vcombine.high %v4492_v40, %v4500_v41  ;;  %v4507_v43 = vld [vmem:[#allocation11 + $0x380] sm:$0xff] }
 0x360   :  { %10795 = vmatprep.subr.bf16.mxu1 %v13861_v46  ;;  %v4515_v46 = vld [vmem:[#allocation11 + $0x3c0] sm:$0xff] }
 0x361   :  { %4215 = vmatmul.mubr.bf16.vlgmr.msra.gmra.mrb[8].mxu0 %v16146_v44  ;;  %v13971_v36 = vcombine.high %v4507_v43, %v4515_v46 }
 0x362   :  { %4379 = vmatmul.mubr.bf16.vlgmr.msra.gmra.mrb[8].mxu1 %v16146_v44  ;;  %10632 = vmatpush1.bf16.msra.mxu0 %v13858_v47  ;;  %v13892_v44 = vcombine.low %v4428_v55, %v4436_v27  ;;  %v13956_v47 = vcombine.low %v4492_v40, %v4500_v41  ;;  %v13972_v55 = vcombine.low %v4508_v30, %v4516_v16 }
 0x363   :  { %10663 = vmatprep.mubr.bf16.mxu0 %v16177_v52  ;;  %10796 = vmatpush1.bf16.msra.mxu1 %v13860_v1  ;;  %v4523_v1 = vld [vmem:[#allocation11 + $0x400] sm:$0xff] }
 0x364   :  { %10827 = vmatprep.mubr.bf16.mxu1 %v16177_v52  ;;  %10633 = vmatprep.subr.bf16.mxu0 %v13875_v49  ;;  %v4531_v49 = vld [vmem:[#allocation11 + $0x440] sm:$0xff] }
 0x365   :  { %10797 = vmatprep.subr.bf16.mxu1 %v13877_v53  ;;  %v13970_v53 = vcombine.low %v4507_v43, %v4515_v46  ;;  %v13987_v27 = vcombine.high %v4523_v1, %v4531_v49  ;;  %v13986_v0 = vcombine.low %v4523_v1, %v4531_v49  ;;  %v4612_v43 = vld [vmem:[#allocation11 + $0x6c8] sm:$0xff] }
 0x366   :  { %10634 = vmatpush1.bf16.msra.mxu0 %v13874_v57  ;;  %v13989_v57 = vcombine.high %v4524_v50, %v4532_v51  ;;  %v4628_v1 = vld [vmem:[#allocation11 + $0x748] sm:$0xff]  ;;  %v1134_v50 = vrot.slane %v16172_v13, %v16063_v15 }
 0x367   :  { %10798 = vmatpush1.bf16.msra.mxu1 %v13876_v45  ;;  %10635 = vmatprep.subr.bf16.mxu0 %v13891_v61  ;;  %v4539_v45 = vld [vmem:[#allocation11 + $0x480] sm:$0xff] }
 0x368   :  { %10799 = vmatprep.subr.bf16.mxu1 %v13893_v63  ;;  %v4547_v61 = vld [vmem:[#allocation11 + $0x4c0] sm:$0xff]  ;;  %v4540_v63 = vld [vmem:[#allocation11 + $0x488] sm:$0xff] }
 0x369   :  { %v14003_v37 = vcombine.high %v4539_v45, %v4547_v61  ;;  %v14002_v8 = vcombine.low %v4539_v45, %v4547_v61  ;;  %v14004_v9 = vcombine.low %v4540_v63, %v4548_v4  ;;  %v1146_v45 = vrot.slane %v16172_v13, %v16075_v31  ;;  %v4636_v61 = vld [vmem:[#allocation11 + $0x788] sm:$0xff] }
 0x36a   :  { %10636 = vmatpush1.bf16.msra.mxu0 %v13890_v6  ;;  %v14005_v6 = vcombine.high %v4540_v63, %v4548_v4  ;;  %v4644_v63 = vld [vmem:[#allocation11 + $0x7c8] sm:$0xff] }
 0x36b   :  { %10800 = vmatpush1.bf16.msra.mxu1 %v13892_v44  ;;  %10637 = vmatprep.subr.bf16.mxu0 %v13907_v14  ;;  %v4555_v44 = vld [vmem:[#allocation11 + $0x500] sm:$0xff] }
 0x36c   :  { %10801 = vmatprep.subr.bf16.mxu1 %v13909_v7  ;;  %v4563_v14 = vld [vmem:[#allocation11 + $0x540] sm:$0xff]  ;;  %v4556_v7 = vld [vmem:[#allocation11 + $0x508] sm:$0xff] }
 0x36d   :  { %v14019_v10 = vcombine.high %v4555_v44, %v4563_v14  ;;  %v14018_v25 = vcombine.low %v4555_v44, %v4563_v14  ;;  %v14020_v26 = vcombine.low %v4556_v7, %v4564_v12  ;;  %v4651_v44 = vld [vmem:[#allocation11 + $0x800] sm:$0xff] }
 0x36e   :  { %10638 = vmatpush1.bf16.msra.mxu0 %v13906_v18  ;;  %v14021_v18 = vcombine.high %v4556_v7, %v4564_v12  ;;  %v4659_v14 = vld [vmem:[#allocation11 + $0x840] sm:$0xff]  ;;  %v15318_v7 = vadd.f32 %v16170_v3, %v1146_v45  ;;  %v4652_v12 = vld [vmem:[#allocation11 + $0x808] sm:$0xff] }
 0x36f   :  { %10802 = vmatpush1.bf16.msra.mxu1 %v13908_v19  ;;  %10639 = vmatprep.subr.bf16.mxu0 %v13923_v21  ;;  %v4571_v19 = vld [vmem:[#allocation11 + $0x580] sm:$0xff] }
 0x370   :  { %10803 = vmatprep.subr.bf16.mxu1 %v13925_v22  ;;  %v4579_v21 = vld [vmem:[#allocation11 + $0x5c0] sm:$0xff]  ;;  %v4572_v22 = vld [vmem:[#allocation11 + $0x588] sm:$0xff] }
 0x371   :  { %v14035_v28 = vcombine.high %v4571_v19, %v4579_v21  ;;  %v14034_v39 = vcombine.low %v4571_v19, %v4579_v21  ;;  %v14036_v40 = vcombine.low %v4572_v22, %v4580_v24  ;;  %v14115_v19 = vcombine.high %v4651_v44, %v4659_v14  ;;  %v4731_v45 = vld [vmem:[#allocation11 + $0xa80] sm:$0xff] }
 0x372   :  { %10640 = vmatpush1.bf16.msra.mxu0 %v13922_v29  ;;  %v14037_v29 = vcombine.high %v4572_v22, %v4580_v24  ;;  %v4390_v21 = vmax.f32 %v15318_v7, 0.0  ;;  %v4667_v22 = vld [vmem:[#allocation11 + $0x880] sm:$0xff]  ;;  %v4748_v7 = vld [vmem:[#allocation11 + $0xb08] sm:$0xff] }
 0x373   :  { %10804 = vmatpush1.bf16.msra.mxu1 %v13924_v33  ;;  %10641 = vmatprep.subr.bf16.mxu0 %v13939_v54  ;;  %v4587_v33 = vld [vmem:[#allocation11 + $0x600] sm:$0xff] }
 0x374   :  { %10805 = vmatprep.subr.bf16.mxu1 %v13941_v35  ;;  %v4595_v54 = vld [vmem:[#allocation11 + $0x640] sm:$0xff]  ;;  %v4588_v35 = vld [vmem:[#allocation11 + $0x608] sm:$0xff] }
 0x375   :  { %v14051_v41 = vcombine.high %v4587_v33, %v4595_v54  ;;  %v14050_v46 = vcombine.low %v4587_v33, %v4595_v54  ;;  %v14052_v30 = vcombine.low %v4588_v35, %v4596_v38  ;;  %v4675_v24 = vld [vmem:[#allocation11 + $0x8c0] sm:$0xff] }
 0x376   :  { %10642 = vmatpush1.bf16.msra.mxu0 %v13938_v32  ;;  %v14053_v32 = vcombine.high %v4588_v35, %v4596_v38  ;;  %v14131_v33 = vcombine.high %v4667_v22, %v4675_v24  ;;  %v4683_v54 = vld [vmem:[#allocation11 + $0x900] sm:$0xff]  ;;  %v16191_v38 = vpack.c.bf16 %v4390_v21, %v4390_v21  ;;  %v4764_v21 = vld [vmem:[#allocation11 + $0xb88] sm:$0xff] }
 0x377   :  { %10806 = vmatpush1.bf16.msra.mxu1 %v13940_v62  ;;  %10643 = vmatprep.subr.bf16.mxu0 %v13955_v23  ;;  %v4603_v62 = vld [vmem:[#allocation11 + $0x680] sm:$0xff] }
 0x378   :  { %10807 = vmatprep.subr.bf16.mxu1 %v13957_v42  ;;  %v4611_v23 = vld [vmem:[#allocation11 + $0x6c0] sm:$0xff]  ;;  %v4604_v42 = vld [vmem:[#allocation11 + $0x688] sm:$0xff] }
 0x379   :  { %v14067_v16 = vcombine.high %v4603_v62, %v4611_v23  ;;  %v14066_v49 = vcombine.low %v4603_v62, %v4611_v23  ;;  %v14068_v51 = vcombine.low %v4604_v42, %v4612_v43  ;;  %v4691_v35 = vld [vmem:[#allocation11 + $0x940] sm:$0xff] }
 0x37a   :  { %10644 = vmatpush1.bf16.msra.mxu0 %v13954_v59  ;;  %v14069_v59 = vcombine.high %v4604_v42, %v4612_v43  ;;  %v14147_v23 = vcombine.high %v4683_v54, %v4691_v35  ;;  %v4699_v43 = vld [vmem:[#allocation11 + $0x980] sm:$0xff] }
 0x37b   :  { %10808 = vmatpush1.bf16.msra.mxu1 %v13956_v47  ;;  %10645 = vmatprep.subr.bf16.mxu0 %v13971_v36  ;;  %v4619_v47 = vld [vmem:[#allocation11 + $0x700] sm:$0xff] }
 0x37c   :  { %10809 = vmatprep.subr.bf16.mxu1 %v13973_v48  ;;  %v4627_v36 = vld [vmem:[#allocation11 + $0x740] sm:$0xff]  ;;  %v4620_v48 = vld [vmem:[#allocation11 + $0x708] sm:$0xff] }
 0x37d   :  { %v14082_v4 = vcombine.low %v4619_v47, %v4627_v36 }
 0x37e   :  { %10646 = vmatpush1.bf16.msra.mxu0 %v13970_v53  ;;  %v14083_v53 = vcombine.high %v4619_v47, %v4627_v36 }
 0x37f   :  { %10810 = vmatpush1.bf16.msra.mxu1 %v13972_v55  ;;  %10647 = vmatprep.subr.bf16.mxu0 %v13987_v27  ;;  %v14085_v55 = vcombine.high %v4620_v48, %v4628_v1  ;;  %v4635_v27 = vld [vmem:[#allocation11 + $0x780] sm:$0xff] }
 0x380   :  { %10811 = vmatprep.subr.bf16.mxu1 %v13989_v57  ;;  %v4643_v57 = vld [vmem:[#allocation11 + $0x7c0] sm:$0xff] }
 0x382   :  { %10648 = vmatpush1.bf16.msra.mxu0 %v13986_v0  ;;  %v15315_v0 = vadd.f32 %v16164_v58, %v1134_v50  ;;  %v4716_v50 = vld [vmem:[#allocation11 + $0xa08] sm:$0xff] }
 0x383   :  { %10812 = vmatpush1.bf16.msra.mxu1 %v13988_v5  ;;  %10649 = vmatprep.subr.bf16.mxu0 %v14003_v37  ;;  %v14084_v5 = vcombine.low %v4620_v48, %v4628_v1  ;;  %v14099_v37 = vcombine.high %v4635_v27, %v4643_v57  ;;  %v4715_v1 = vld [vmem:[#allocation11 + $0xa00] sm:$0xff] }
 0x384   :  { %10813 = vmatprep.subr.bf16.mxu1 %v14005_v6  ;;  %v14101_v6 = vcombine.high %v4636_v61, %v4644_v63 }
 0x386   :  { %10650 = vmatpush1.bf16.msra.mxu0 %v14002_v8  ;;  %v4660_v8 = vld [vmem:[#allocation11 + $0x848] sm:$0xff] }
 0x387   :  { %10814 = vmatpush1.bf16.msra.mxu1 %v14004_v9  ;;  %10651 = vmatprep.subr.bf16.mxu0 %v14019_v10  ;;  %v14098_v9 = vcombine.low %v4635_v27, %v4643_v57  ;;  %v4387_v10 = vmax.f32 %v15315_v0, 0.0  ;;  %v14117_v58 = vcombine.high %v4652_v12, %v4660_v8  ;;  %v14116_v3 = vcombine.low %v4652_v12, %v4660_v8  ;;  %v4756_v12 = vld [vmem:[#allocation11 + $0xb48] sm:$0xff] }
 0x388   :  { %10815 = vmatprep.subr.bf16.mxu1 %v14021_v18  ;;  %v14100_v18 = vcombine.low %v4636_v61, %v4644_v63  ;;  %v4739_v61 = vld [vmem:[#allocation11 + $0xac0] sm:$0xff]  ;;  %v4732_v63 = vld [vmem:[#allocation11 + $0xa88] sm:$0xff] }
 0x389   :  { %v14194_v8 = vcombine.low %v4731_v45, %v4739_v61 }
 0x38a   :  { %10652 = vmatpush1.bf16.msra.mxu0 %v14018_v25  ;;  %v14114_v25 = vcombine.low %v4651_v44, %v4659_v14  ;;  %v4747_v44 = vld [vmem:[#allocation11 + $0xb00] sm:$0xff] }
 0x38b   :  { %10816 = vmatpush1.bf16.msra.mxu1 %v14020_v26  ;;  %10653 = vmatprep.subr.bf16.mxu0 %v14035_v28  ;;  %v4668_v26 = vld [vmem:[#allocation11 + $0x888] sm:$0xff]  ;;  %v4755_v14 = vld [vmem:[#allocation11 + $0xb40] sm:$0xff] }
 0x38c   :  { %10817 = vmatprep.subr.bf16.mxu1 %v14037_v29  ;;  %v4676_v28 = vld [vmem:[#allocation11 + $0x8c8] sm:$0xff]  ;;  %v16189_v29 = vpack.c.bf16 %v4387_v10, %v4387_v10  ;;  %v14211_v10 = vcombine.high %v4747_v44, %v4755_v14 }
 0x38d   :  { %v14132_v62 = vcombine.low %v4668_v26, %v4676_v28 }
 0x38e   :  { %10654 = vmatpush1.bf16.msra.mxu0 %v14034_v39  ;;  %v14133_v39 = vcombine.high %v4668_v26, %v4676_v28 }
 0x38f   :  { %10818 = vmatpush1.bf16.msra.mxu1 %v14036_v40  ;;  %10655 = vmatprep.subr.bf16.mxu0 %v14051_v41  ;;  %v4684_v40 = vld [vmem:[#allocation11 + $0x908] sm:$0xff] }
 0x390   :  { %10819 = vmatprep.subr.bf16.mxu1 %v14053_v32  ;;  %v4692_v41 = vld [vmem:[#allocation11 + $0x948] sm:$0xff]  ;;  %v14130_v32 = vcombine.low %v4667_v22, %v4675_v24  ;;  %v14210_v24 = vcombine.low %v4747_v44, %v4755_v14 }
 0x391   :  { %v14149_v42 = vcombine.high %v4684_v40, %v4692_v41  ;;  %v14148_v47 = vcombine.low %v4684_v40, %v4692_v41  ;;  %v4772_v22 = vld [vmem:[#allocation11 + $0xbc8] sm:$0xff] }
 0x392   :  { %10656 = vmatpush1.bf16.msra.mxu0 %v14050_v46  ;;  %v4707_v46 = vld [vmem:[#allocation11 + $0x9c0] sm:$0xff]  ;;  %v14229_v28 = vcombine.high %v4764_v21, %v4772_v22  ;;  %v14228_v40 = vcombine.low %v4764_v21, %v4772_v22  ;;  %v4852_v44 = vld [vmem:[#allocation11 + $0xe48] sm:$0xff] }
 0x393   :  { %10820 = vmatpush1.bf16.msra.mxu1 %v14052_v30  ;;  %10657 = vmatprep.subr.bf16.mxu0 %v14067_v16  ;;  %v4700_v30 = vld [vmem:[#allocation11 + $0x988] sm:$0xff]  ;;  %v14163_v36 = vcombine.high %v4699_v43, %v4707_v46 }
 0x394   :  { %10821 = vmatprep.subr.bf16.mxu1 %v14069_v59  ;;  %v4708_v16 = vld [vmem:[#allocation11 + $0x9c8] sm:$0xff]  ;;  %v14146_v59 = vcombine.low %v4683_v54, %v4691_v35 }
 0x395   :  { %v14165_v48 = vcombine.high %v4700_v30, %v4708_v16  ;;  %v4780_v54 = vld [vmem:[#allocation11 + $0xc08] sm:$0xff] }
 0x396   :  { %10658 = vmatpush1.bf16.msra.mxu0 %v14066_v49  ;;  %v4723_v49 = vld [vmem:[#allocation11 + $0xa40] sm:$0xff]  ;;  %v4788_v35 = vld [vmem:[#allocation11 + $0xc48] sm:$0xff] }
 0x397   :  { %10822 = vmatpush1.bf16.msra.mxu1 %v14068_v51  ;;  %10659 = vmatprep.subr.bf16.mxu0 %v14083_v53  ;;  %v4724_v51 = vld [vmem:[#allocation11 + $0xa48] sm:$0xff]  ;;  %v14162_v53 = vcombine.low %v4699_v43, %v4707_v46  ;;  %v14179_v27 = vcombine.high %v4715_v1, %v4723_v49  ;;  %v14178_v0 = vcombine.low %v4715_v1, %v4723_v49 }
 0x398   :  { %10823 = vmatprep.subr.bf16.mxu1 %v14085_v55  ;;  %v14164_v55 = vcombine.low %v4700_v30, %v4708_v16  ;;  %v14181_v57 = vcombine.high %v4716_v50, %v4724_v51  ;;  %v4804_v43 = vld [vmem:[#allocation11 + $0xcc8] sm:$0xff]  ;;  %v14244_v30 = vcombine.low %v4780_v54, %v4788_v35 }
 0x399   :  { %v4820_v1 = vld [vmem:[#allocation11 + $0xd48] sm:$0xff] }
 0x39a   :  { %10660 = vmatpush1.bf16.msra.mxu0 %v14082_v4  ;;  %v4740_v4 = vld [vmem:[#allocation11 + $0xac8] sm:$0xff] }
 0x39b   :  { %10824 = vmatpush1.bf16.msra.mxu1 %v14084_v5  ;;  %10661 = vmatprep.subr.bf16.mxu0 %v14099_v37  ;;  %v14180_v5 = vcombine.low %v4716_v50, %v4724_v51  ;;  %v14195_v37 = vcombine.high %v4731_v45, %v4739_v61  ;;  %v4836_v45 = vld [vmem:[#allocation11 + $0xdc8] sm:$0xff] }
 0x39c   :  { %10825 = vmatprep.subr.bf16.mxu1 %v14101_v6  ;;  %v14197_v6 = vcombine.high %v4732_v63, %v4740_v4 }
 0x39e   :  { %10662 = vmatpush1.bf16.msra.mxu0 %v14098_v9  ;;  %v14196_v9 = vcombine.low %v4732_v63, %v4740_v4 }
 0x39f   :  { %10826 = vmatpush1.bf16.msra.mxu1 %v14100_v18  ;;  %10672 = vmatprep.subr.bf16.mxu0 %v14115_v19  ;;  %v14213_v18 = vcombine.high %v4748_v7, %v4756_v12  ;;  %v4763_v19 = vld [vmem:[#allocation11 + $0xb80] sm:$0xff] }
 0x3a0   :  { %10836 = vmatprep.subr.bf16.mxu1 %v14117_v58  ;;  %v4771_v58 = vld [vmem:[#allocation11 + $0xbc0] sm:$0xff] }
 0x3a1   :  { %10664 = vmatmul.mubr.bf16.vlgmr.msra.gmra.mrb[12].mxu0 %v16189_v29  ;;  %v14227_v26 = vcombine.high %v4763_v19, %v4771_v58 }
 0x3a2   :  { %10828 = vmatmul.mubr.bf16.vlgmr.msra.gmra.mrb[12].mxu1 %v16189_v29  ;;  %10673 = vmatpush1.bf16.msra.mxu0 %v14114_v25  ;;  %v14212_v25 = vcombine.low %v4748_v7, %v4756_v12 }
 0x3a3   :  { %10704 = vmatprep.mubr.bf16.mxu0 %v16191_v38  ;;  %10837 = vmatpush1.bf16.msra.mxu1 %v14116_v3  ;;  %v4779_v3 = vld [vmem:[#allocation11 + $0xc00] sm:$0xff] }
 0x3a4   :  { %10868 = vmatprep.mubr.bf16.mxu1 %v16191_v38  ;;  %10674 = vmatprep.subr.bf16.mxu0 %v14131_v33  ;;  %v4787_v33 = vld [vmem:[#allocation11 + $0xc40] sm:$0xff] }
 0x3a5   :  { %10838 = vmatprep.subr.bf16.mxu1 %v14133_v39  ;;  %v14226_v39 = vcombine.low %v4763_v19, %v4771_v58  ;;  %v14243_v41 = vcombine.high %v4779_v3, %v4787_v33  ;;  %v14242_v46 = vcombine.low %v4779_v3, %v4787_v33  ;;  %v4868_v19 = vld [vmem:[#allocation11 + $0xec8] sm:$0xff] }
 0x3a6   :  { %10675 = vmatpush1.bf16.msra.mxu0 %v14130_v32  ;;  %v14245_v32 = vcombine.high %v4780_v54, %v4788_v35  ;;  %v4884_v3 = vld [vmem:[#allocation11 + $0xf48] sm:$0xff]  ;;  %v1142_v54 = vrot.slane %v16172_v13, %v16098_v20 }
 0x3a7   :  { %10839 = vmatpush1.bf16.msra.mxu1 %v14132_v62  ;;  %10676 = vmatprep.subr.bf16.mxu0 %v14147_v23  ;;  %v4795_v62 = vld [vmem:[#allocation11 + $0xc80] sm:$0xff] }
 0x3a8   :  { %10840 = vmatprep.subr.bf16.mxu1 %v14149_v42  ;;  %v4803_v23 = vld [vmem:[#allocation11 + $0xcc0] sm:$0xff]  ;;  %v4796_v42 = vld [vmem:[#allocation11 + $0xc88] sm:$0xff] }
 0x3a9   :  { %v14259_v16 = vcombine.high %v4795_v62, %v4803_v23  ;;  %v14258_v49 = vcombine.low %v4795_v62, %v4803_v23  ;;  %v14260_v50 = vcombine.low %v4796_v42, %v4804_v43  ;;  %v4892_v62 = vld [vmem:[#allocation11 + $0xf88] sm:$0xff] }
 0x3aa   :  { %10677 = vmatpush1.bf16.msra.mxu0 %v14146_v59  ;;  %v14261_v59 = vcombine.high %v4796_v42, %v4804_v43  ;;  %v4900_v23 = vld [vmem:[#allocation11 + $0xfc8] sm:$0xff]  ;;  %v15317_v43 = vadd.f32 %v16166_v60, %v1142_v54  ;;  %v4923_v60 = vld [vmem:[#allocation11 + $0x1080] sm:$0xff] }
 0x3ab   :  { %10841 = vmatpush1.bf16.msra.mxu1 %v14148_v47  ;;  %10678 = vmatprep.subr.bf16.mxu0 %v14163_v36  ;;  %v4811_v47 = vld [vmem:[#allocation11 + $0xd00] sm:$0xff]  ;;  %v14357_v13 = vcombine.high %v4892_v62, %v4900_v23 }
 0x3ac   :  { %10842 = vmatprep.subr.bf16.mxu1 %v14165_v48  ;;  %v4819_v36 = vld [vmem:[#allocation11 + $0xd40] sm:$0xff]  ;;  %v4812_v48 = vld [vmem:[#allocation11 + $0xd08] sm:$0xff] }
 0x3ad   :  { %v14275_v51 = vcombine.high %v4811_v47, %v4819_v36  ;;  %v14274_v61 = vcombine.low %v4811_v47, %v4819_v36  ;;  %v14276_v63 = vcombine.low %v4812_v48, %v4820_v1  ;;  %v4908_v47 = vld [vmem:[#allocation11 + $0x1008] sm:$0xff] }
 0x3ae   :  { %10679 = vmatpush1.bf16.msra.mxu0 %v14162_v53  ;;  %v14277_v53 = vcombine.high %v4812_v48, %v4820_v1  ;;  %v4916_v36 = vld [vmem:[#allocation11 + $0x1048] sm:$0xff]  ;;  %v4389_v1 = vmax.f32 %v15317_v43, 0.0 }
 0x3af   :  { %10843 = vmatpush1.bf16.msra.mxu1 %v14164_v55  ;;  %10680 = vmatprep.subr.bf16.mxu0 %v14179_v27  ;;  %v4827_v55 = vld [vmem:[#allocation11 + $0xd80] sm:$0xff] }
 0x3b0   :  { %10844 = vmatprep.subr.bf16.mxu1 %v14181_v57  ;;  %v4835_v27 = vld [vmem:[#allocation11 + $0xdc0] sm:$0xff]  ;;  %v4828_v57 = vld [vmem:[#allocation11 + $0xd88] sm:$0xff] }
 0x3b1   :  { %v14291_v4 = vcombine.high %v4827_v55, %v4835_v27  ;;  %v14290_v14 = vcombine.low %v4827_v55, %v4835_v27  ;;  %v14292_v7 = vcombine.low %v4828_v57, %v4836_v45  ;;  %v4924_v55 = vld [vmem:[#allocation11 + $0x1088] sm:$0xff] }
 0x3b2   :  { %10681 = vmatpush1.bf16.msra.mxu0 %v14178_v0  ;;  %v14293_v0 = vcombine.high %v4828_v57, %v4836_v45  ;;  %v4932_v27 = vld [vmem:[#allocation11 + $0x10c8] sm:$0xff]  ;;  %v16200_v45 = vpack.c.bf16 %v4389_v1, %v4389_v1  ;;  %v5019_v1 = vld [vmem:[#allocation11 + $0x1380] sm:$0xff] }
 0x3b3   :  { %10845 = vmatpush1.bf16.msra.mxu1 %v14180_v5  ;;  %10682 = vmatprep.subr.bf16.mxu0 %v14195_v37  ;;  %v4843_v5 = vld [vmem:[#allocation11 + $0xe00] sm:$0xff] }
 0x3b4   :  { %10846 = vmatprep.subr.bf16.mxu1 %v14197_v6  ;;  %v4851_v37 = vld [vmem:[#allocation11 + $0xe40] sm:$0xff]  ;;  %v4844_v6 = vld [vmem:[#allocation11 + $0xe08] sm:$0xff] }
 0x3b5   :  { %v14307_v12 = vcombine.high %v4843_v5, %v4851_v37  ;;  %v14306_v58 = vcombine.low %v4843_v5, %v4851_v37  ;;  %v14308_v21 = vcombine.low %v4844_v6, %v4852_v44  ;;  %v4947_v5 = vld [vmem:[#allocation11 + $0x1140] sm:$0xff]  ;;  %v4940_v37 = vld [vmem:[#allocation11 + $0x1108] sm:$0xff] }
 0x3b6   :  { %10683 = vmatpush1.bf16.msra.mxu0 %v14194_v8  ;;  %v14309_v8 = vcombine.high %v4844_v6, %v4852_v44  ;;  %v4948_v6 = vld [vmem:[#allocation11 + $0x1148] sm:$0xff] }
 0x3b7   :  { %10847 = vmatpush1.bf16.msra.mxu1 %v14196_v9  ;;  %10684 = vmatprep.subr.bf16.mxu0 %v14211_v10  ;;  %v4859_v9 = vld [vmem:[#allocation11 + $0xe80] sm:$0xff] }
 0x3b8   :  { %10848 = vmatprep.subr.bf16.mxu1 %v14213_v18  ;;  %v4867_v10 = vld [vmem:[#allocation11 + $0xec0] sm:$0xff]  ;;  %v4860_v18 = vld [vmem:[#allocation11 + $0xe88] sm:$0xff] }
 0x3b9   :  { %v14323_v22 = vcombine.high %v4859_v9, %v4867_v10  ;;  %v14322_v33 = vcombine.low %v4859_v9, %v4867_v10  ;;  %v14324_v35 = vcombine.low %v4860_v18, %v4868_v19  ;;  %v4963_v9 = vld [vmem:[#allocation11 + $0x11c0] sm:$0xff]  ;;  %v4956_v10 = vld [vmem:[#allocation11 + $0x1188] sm:$0xff] }
 0x3ba   :  { %10685 = vmatpush1.bf16.msra.mxu0 %v14210_v24  ;;  %v14325_v24 = vcombine.high %v4860_v18, %v4868_v19  ;;  %v4964_v18 = vld [vmem:[#allocation11 + $0x11c8] sm:$0xff] }
 0x3bb   :  { %10849 = vmatpush1.bf16.msra.mxu1 %v14212_v25  ;;  %10686 = vmatprep.subr.bf16.mxu0 %v14227_v26  ;;  %v4875_v25 = vld [vmem:[#allocation11 + $0xf00] sm:$0xff] }
 0x3bc   :  { %10850 = vmatprep.subr.bf16.mxu1 %v14229_v28  ;;  %v4883_v26 = vld [vmem:[#allocation11 + $0xf40] sm:$0xff]  ;;  %v4876_v28 = vld [vmem:[#allocation11 + $0xf08] sm:$0xff] }
 0x3bd   :  { %v14338_v42 = vcombine.low %v4875_v25, %v4883_v26 }
 0x3be   :  { %10687 = vmatpush1.bf16.msra.mxu0 %v14226_v39  ;;  %v14339_v39 = vcombine.high %v4875_v25, %v4883_v26  ;;  %v4979_v25 = vld [vmem:[#allocation11 + $0x1240] sm:$0xff]  ;;  %v4972_v26 = vld [vmem:[#allocation11 + $0x1208] sm:$0xff] }
 0x3bf   :  { %10851 = vmatpush1.bf16.msra.mxu1 %v14228_v40  ;;  %10688 = vmatprep.subr.bf16.mxu0 %v14243_v41  ;;  %v14341_v40 = vcombine.high %v4876_v28, %v4884_v3  ;;  %v4891_v41 = vld [vmem:[#allocation11 + $0xf80] sm:$0xff] }
 0x3c0   :  { %10852 = vmatprep.subr.bf16.mxu1 %v14245_v32  ;;  %v4899_v32 = vld [vmem:[#allocation11 + $0xfc0] sm:$0xff] }
 0x3c1   :  { %v14354_v48 = vcombine.low %v4891_v41, %v4899_v32 }
 0x3c2   :  { %10689 = vmatpush1.bf16.msra.mxu0 %v14242_v46  ;;  %v14340_v46 = vcombine.low %v4876_v28, %v4884_v3  ;;  %v4980_v28 = vld [vmem:[#allocation11 + $0x1248] sm:$0xff] }
 0x3c3   :  { %10853 = vmatpush1.bf16.msra.mxu1 %v14244_v30  ;;  %10690 = vmatprep.subr.bf16.mxu0 %v14259_v16  ;;  %v14355_v30 = vcombine.high %v4891_v41, %v4899_v32  ;;  %v4907_v16 = vld [vmem:[#allocation11 + $0x1000] sm:$0xff]  ;;  %v4988_v41 = vld [vmem:[#allocation11 + $0x1288] sm:$0xff] }
 0x3c4   :  { %10854 = vmatprep.subr.bf16.mxu1 %v14261_v59  ;;  %v4915_v59 = vld [vmem:[#allocation11 + $0x1040] sm:$0xff]  ;;  %v4996_v32 = vld [vmem:[#allocation11 + $0x12c8] sm:$0xff] }
 0x3c5   :  { %v14370_v57 = vcombine.low %v4907_v16, %v4915_v59  ;;  %v14453_v43 = vcombine.high %v4988_v41, %v4996_v32 }
 0x3c6   :  { %10691 = vmatpush1.bf16.msra.mxu0 %v14258_v49  ;;  %v14356_v49 = vcombine.low %v4892_v62, %v4900_v23  ;;  %v14436_v23 = vcombine.low %v4972_v26, %v4980_v28 }
 0x3c7   :  { %10855 = vmatpush1.bf16.msra.mxu1 %v14260_v50  ;;  %10692 = vmatprep.subr.bf16.mxu0 %v14275_v51  ;;  %v14371_v50 = vcombine.high %v4907_v16, %v4915_v59  ;;  %v14373_v51 = vcombine.high %v4908_v47, %v4916_v36  ;;  %v5012_v16 = vld [vmem:[#allocation11 + $0x1348] sm:$0xff] }
 0x3c8   :  { %10856 = vmatprep.subr.bf16.mxu1 %v14277_v53  ;;  %v4931_v53 = vld [vmem:[#allocation11 + $0x10c0] sm:$0xff] }
 0x3c9   :  { %v14386_v44 = vcombine.low %v4923_v60, %v4931_v53 }
 0x3ca   :  { %10693 = vmatpush1.bf16.msra.mxu0 %v14274_v61  ;;  %v14372_v61 = vcombine.low %v4908_v47, %v4916_v36  ;;  %v14452_v47 = vcombine.low %v4988_v41, %v4996_v32 }
 0x3cb   :  { %10857 = vmatpush1.bf16.msra.mxu1 %v14276_v63  ;;  %10694 = vmatprep.subr.bf16.mxu0 %v14291_v4  ;;  %v14387_v63 = vcombine.high %v4923_v60, %v4931_v53  ;;  %v14389_v4 = vcombine.high %v4924_v55, %v4932_v27 }
 0x3cc   :  { %10858 = vmatprep.subr.bf16.mxu1 %v14293_v0  ;;  %v4939_v0 = vld [vmem:[#allocation11 + $0x1100] sm:$0xff] }
 0x3cd   :  { %v14402_v19 = vcombine.low %v4939_v0, %v4947_v5 }
 0x3ce   :  { %10695 = vmatpush1.bf16.msra.mxu0 %v14290_v14  ;;  %v14388_v14 = vcombine.low %v4924_v55, %v4932_v27 }
 0x3cf   :  { %10859 = vmatpush1.bf16.msra.mxu1 %v14292_v7  ;;  %10696 = vmatprep.subr.bf16.mxu0 %v14307_v12  ;;  %v14403_v7 = vcombine.high %v4939_v0, %v4947_v5  ;;  %v14405_v12 = vcombine.high %v4940_v37, %v4948_v6 }
 0x3d0   :  { %10860 = vmatprep.subr.bf16.mxu1 %v14309_v8  ;;  %v4955_v8 = vld [vmem:[#allocation11 + $0x1180] sm:$0xff] }
 0x3d1   :  { %v14418_v3 = vcombine.low %v4955_v8, %v4963_v9 }
 0x3d2   :  { %10697 = vmatpush1.bf16.msra.mxu0 %v14306_v58  ;;  %v14404_v58 = vcombine.low %v4940_v37, %v4948_v6 }
 0x3d3   :  { %10861 = vmatpush1.bf16.msra.mxu1 %v14308_v21  ;;  %10698 = vmatprep.subr.bf16.mxu0 %v14323_v22  ;;  %v14419_v21 = vcombine.high %v4955_v8, %v4963_v9  ;;  %v14421_v22 = vcombine.high %v4956_v10, %v4964_v18 }
 0x3d4   :  { %10862 = vmatprep.subr.bf16.mxu1 %v14325_v24  ;;  %v4971_v24 = vld [vmem:[#allocation11 + $0x1200] sm:$0xff] }
 0x3d5   :  { %v14435_v54 = vcombine.high %v4971_v24, %v4979_v25  ;;  %v14434_v62 = vcombine.low %v4971_v24, %v4979_v25 }
 0x3d6   :  { %10699 = vmatpush1.bf16.msra.mxu0 %v14322_v33  ;;  %v14420_v33 = vcombine.low %v4956_v10, %v4964_v18 }
 0x3d7   :  { %10863 = vmatpush1.bf16.msra.mxu1 %v14324_v35  ;;  %10700 = vmatprep.subr.bf16.mxu0 %v14339_v39  ;;  %v14437_v35 = vcombine.high %v4972_v26, %v4980_v28  ;;  %v4987_v39 = vld [vmem:[#allocation11 + $0x1280] sm:$0xff] }
 0x3d8   :  { %10864 = vmatprep.subr.bf16.mxu1 %v14341_v40  ;;  %v4995_v40 = vld [vmem:[#allocation11 + $0x12c0] sm:$0xff] }
 0x3d9   :  { %v14450_v59 = vcombine.low %v4987_v39, %v4995_v40 }
 0x3da   :  { %10701 = vmatpush1.bf16.msra.mxu0 %v14338_v42  ;;  %v14451_v42 = vcombine.high %v4987_v39, %v4995_v40 }
 0x3db   :  { %10865 = vmatpush1.bf16.msra.mxu1 %v14340_v46  ;;  %10702 = vmatprep.subr.bf16.mxu0 %v14355_v30  ;;  %v5003_v46 = vld [vmem:[#allocation11 + $0x1300] sm:$0xff] }
 0x3dc   :  { %10866 = vmatprep.subr.bf16.mxu1 %v14357_v13  ;;  %v5011_v30 = vld [vmem:[#allocation11 + $0x1340] sm:$0xff]  ;;  %v5004_v13 = vld [vmem:[#allocation11 + $0x1308] sm:$0xff] }
 0x3dd   :  { %v14467_v36 = vcombine.high %v5003_v46, %v5011_v30  ;;  %v14466_v60 = vcombine.low %v5003_v46, %v5011_v30  ;;  %v14468_v53 = vcombine.low %v5004_v13, %v5012_v16 }
 0x3de   :  { %10703 = vmatpush1.bf16.msra.mxu0 %v14354_v48  ;;  %v14469_v48 = vcombine.high %v5004_v13, %v5012_v16 }
 0x3df   :  { %10867 = vmatpush1.bf16.msra.mxu1 %v14356_v49  ;;  %10713 = vmatprep.subr.bf16.mxu0 %v14371_v50  ;;  %v5027_v49 = vld [vmem:[#allocation11 + $0x13c0] sm:$0xff]  ;;  %v5020_v50 = vld [vmem:[#allocation11 + $0x1388] sm:$0xff] }
 0x3e0   :  { %10877 = vmatprep.subr.bf16.mxu1 %v14373_v51  ;;  %v5028_v51 = vld [vmem:[#allocation11 + $0x13c8] sm:$0xff]  ;;  %v14483_v55 = vcombine.high %v5019_v1, %v5027_v49  ;;  %v14482_v0 = vcombine.low %v5019_v1, %v5027_v49 }
 0x3e1   :  { %10705 = vmatmul.mubr.bf16.vlgmr.msra.gmra.mrb[12].mxu0 %v16200_v45  ;;  %v14485_v27 = vcombine.high %v5020_v50, %v5028_v51  ;;  %v14484_v5 = vcombine.low %v5020_v50, %v5028_v51 }
 0x3e2   :  { %10869 = vmatmul.mubr.bf16.vlgmr.msra.gmra.mrb[12].mxu1 %v16200_v45  ;;  %10714 = vmatpush1.bf16.msra.mxu0 %v14370_v57  ;;  %v5035_v57 = vld [vmem:[#allocation11 + $0x1400] sm:$0xff] }
 0x3e3   :  { %10878 = vmatpush1.bf16.msra.mxu1 %v14372_v61  ;;  %10715 = vmatprep.subr.bf16.mxu0 %v14387_v63  ;;  %v5043_v61 = vld [vmem:[#allocation11 + $0x1440] sm:$0xff]  ;;  %v5036_v63 = vld [vmem:[#allocation11 + $0x1408] sm:$0xff] }
 0x3e4   :  { %10879 = vmatprep.subr.bf16.mxu1 %v14389_v4  ;;  %v5044_v4 = vld [vmem:[#allocation11 + $0x1448] sm:$0xff]  ;;  %v14499_v37 = vcombine.high %v5035_v57, %v5043_v61  ;;  %v14498_v8 = vcombine.low %v5035_v57, %v5043_v61 }
 0x3e5   :  { %v14501_v6 = vcombine.high %v5036_v63, %v5044_v4  ;;  %v14500_v9 = vcombine.low %v5036_v63, %v5044_v4 }
 0x3e6   :  { %10716 = vmatpush1.bf16.msra.mxu0 %v14386_v44  ;;  %v5051_v44 = vld [vmem:[#allocation11 + $0x1480] sm:$0xff] }
 0x3e7   :  { %10880 = vmatpush1.bf16.msra.mxu1 %v14388_v14  ;;  %10717 = vmatprep.subr.bf16.mxu0 %v14403_v7  ;;  %v5059_v14 = vld [vmem:[#allocation11 + $0x14c0] sm:$0xff]  ;;  %v5052_v7 = vld [vmem:[#allocation11 + $0x1488] sm:$0xff] }
 0x3e8   :  { %10881 = vmatprep.subr.bf16.mxu1 %v14405_v12  ;;  %v5060_v12 = vld [vmem:[#allocation11 + $0x14c8] sm:$0xff]  ;;  %v14515_v10 = vcombine.high %v5051_v44, %v5059_v14  ;;  %v14514_v24 = vcombine.low %v5051_v44, %v5059_v14 }
 0x3e9   :  { %v14517_v18 = vcombine.high %v5052_v7, %v5060_v12  ;;  %v14516_v25 = vcombine.low %v5052_v7, %v5060_v12 }
 0x3ea   :  { %10718 = vmatpush1.bf16.msra.mxu0 %v14402_v19  ;;  %v5067_v19 = vld [vmem:[#allocation11 + $0x1500] sm:$0xff] }
 0x3eb   :  { %10882 = vmatpush1.bf16.msra.mxu1 %v14404_v58  ;;  %10719 = vmatprep.subr.bf16.mxu0 %v14419_v21  ;;  %v5075_v58 = vld [vmem:[#allocation11 + $0x1540] sm:$0xff]  ;;  %v5068_v21 = vld [vmem:[#allocation11 + $0x1508] sm:$0xff] }
 0x3ec   :  { %10883 = vmatprep.subr.bf16.mxu1 %v14421_v22  ;;  %v5076_v22 = vld [vmem:[#allocation11 + $0x1548] sm:$0xff]  ;;  %v14531_v26 = vcombine.high %v5067_v19, %v5075_v58  ;;  %v14530_v39 = vcombine.low %v5067_v19, %v5075_v58 }
 0x3ed   :  { %v14533_v28 = vcombine.high %v5068_v21, %v5076_v22  ;;  %v14532_v40 = vcombine.low %v5068_v21, %v5076_v22 }
 0x3ee   :  { %10720 = vmatpush1.bf16.msra.mxu0 %v14418_v3  ;;  %v5083_v3 = vld [vmem:[#allocation11 + $0x1580] sm:$0xff] }
 0x3ef   :  { %10884 = vmatpush1.bf16.msra.mxu1 %v14420_v33  ;;  %10721 = vmatprep.subr.bf16.mxu0 %v14435_v54  ;;  %v5091_v33 = vld [vmem:[#allocation11 + $0x15c0] sm:$0xff]  ;;  %v5084_v54 = vld [vmem:[#allocation11 + $0x1588] sm:$0xff] }
 0x3f0   :  { %10885 = vmatprep.subr.bf16.mxu1 %v14437_v35  ;;  %v5092_v35 = vld [vmem:[#allocation11 + $0x15c8] sm:$0xff]  ;;  %v14547_v41 = vcombine.high %v5083_v3, %v5091_v33  ;;  %v14546_v46 = vcombine.low %v5083_v3, %v5091_v33 }
 0x3f1   :  { %v14549_v32 = vcombine.high %v5084_v54, %v5092_v35  ;;  %v14548_v30 = vcombine.low %v5084_v54, %v5092_v35 }
 0x3f2   :  { %10722 = vmatpush1.bf16.msra.mxu0 %v14434_v62  ;;  %v5099_v62 = vld [vmem:[#allocation11 + $0x1600] sm:$0xff] }
 0x3f3   :  { %10886 = vmatpush1.bf16.msra.mxu1 %v14436_v23  ;;  %10723 = vmatprep.subr.bf16.mxu0 %v14451_v42  ;;  %v5107_v23 = vld [vmem:[#allocation11 + $0x1640] sm:$0xff]  ;;  %v5100_v42 = vld [vmem:[#allocation11 + $0x1608] sm:$0xff] }
 0x3f4   :  { %10887 = vmatprep.subr.bf16.mxu1 %v14453_v43  ;;  %v5108_v43 = vld [vmem:[#allocation11 + $0x1648] sm:$0xff]  ;;  %v14563_v13 = vcombine.high %v5099_v62, %v5107_v23  ;;  %v14562_v1 = vcombine.low %v5099_v62, %v5107_v23 }
 0x3f5   :  { %v14565_v16 = vcombine.high %v5100_v42, %v5108_v43  ;;  %v14564_v49 = vcombine.low %v5100_v42, %v5108_v43 }
 0x3f6   :  { %10724 = vmatpush1.bf16.msra.mxu0 %v14450_v59  ;;  %v5115_v59 = vld [vmem:[#allocation11 + $0x1680] sm:$0xff] }
 0x3f7   :  { %10888 = vmatpush1.bf16.msra.mxu1 %v14452_v47  ;;  %10725 = vmatprep.subr.bf16.mxu0 %v14467_v36  ;;  %v5123_v47 = vld [vmem:[#allocation11 + $0x16c0] sm:$0xff]  ;;  %v5116_v36 = vld [vmem:[#allocation11 + $0x1688] sm:$0xff] }
 0x3f8   :  { %10889 = vmatprep.subr.bf16.mxu1 %v14469_v48  ;;  %v5124_v48 = vld [vmem:[#allocation11 + $0x16c8] sm:$0xff]  ;;  %v14579_v50 = vcombine.high %v5115_v59, %v5123_v47  ;;  %v14578_v57 = vcombine.low %v5115_v59, %v5123_v47 }
 0x3f9   :  { %v14581_v51 = vcombine.high %v5116_v36, %v5124_v48  ;;  %v14580_v61 = vcombine.low %v5116_v36, %v5124_v48  ;;  %v5180_v59 = vld [vmem:[#allocation11 + $0x1888] sm:$0xff] }
 0x3fa   :  { %10726 = vmatpush1.bf16.msra.mxu0 %v14466_v60  ;;  %v5131_v60 = vld [vmem:[#allocation11 + $0x1700] sm:$0xff]  ;;  %v5188_v47 = vld [vmem:[#allocation11 + $0x18c8] sm:$0xff] }
 0x3fb   :  { %10890 = vmatpush1.bf16.msra.mxu1 %v14468_v53  ;;  %10727 = vmatprep.subr.bf16.mxu0 %v14483_v55  ;;  %v5139_v53 = vld [vmem:[#allocation11 + $0x1740] sm:$0xff]  ;;  %v5132_v55 = vld [vmem:[#allocation11 + $0x1708] sm:$0xff] }
 0x3fc   :  { %10891 = vmatprep.subr.bf16.mxu1 %v14485_v27  ;;  %v5140_v27 = vld [vmem:[#allocation11 + $0x1748] sm:$0xff]  ;;  %v14595_v63 = vcombine.high %v5131_v60, %v5139_v53  ;;  %v14594_v44 = vcombine.low %v5131_v60, %v5139_v53  ;;  %v14645_v60 = vcombine.high %v5180_v59, %v5188_v47  ;;  %v5203_v53 = vld [vmem:[#allocation11 + $0x1940] sm:$0xff] }
 0x3fd   :  { %v14597_v4 = vcombine.high %v5132_v55, %v5140_v27  ;;  %v14596_v14 = vcombine.low %v5132_v55, %v5140_v27  ;;  %v5196_v55 = vld [vmem:[#allocation11 + $0x1908] sm:$0xff] }
 0x3fe   :  { %10728 = vmatpush1.bf16.msra.mxu0 %v14482_v0  ;;  %v5147_v0 = vld [vmem:[#allocation11 + $0x1780] sm:$0xff]  ;;  %v5204_v27 = vld [vmem:[#allocation11 + $0x1948] sm:$0xff] }
 0x3ff   :  { %10892 = vmatpush1.bf16.msra.mxu1 %v14484_v5  ;;  %10729 = vmatprep.subr.bf16.mxu0 %v14499_v37  ;;  %v5155_v5 = vld [vmem:[#allocation11 + $0x17c0] sm:$0xff]  ;;  %v5148_v37 = vld [vmem:[#allocation11 + $0x1788] sm:$0xff] }
 0x400   :  { %10893 = vmatprep.subr.bf16.mxu1 %v14501_v6  ;;  %v5156_v6 = vld [vmem:[#allocation11 + $0x17c8] sm:$0xff]  ;;  %v14611_v7 = vcombine.high %v5147_v0, %v5155_v5  ;;  %v14610_v19 = vcombine.low %v5147_v0, %v5155_v5  ;;  %v14661_v0 = vcombine.high %v5196_v55, %v5204_v27  ;;  %v5211_v5 = vld [vmem:[#allocation11 + $0x1980] sm:$0xff] }
 0x401   :  { %v14613_v12 = vcombine.high %v5148_v37, %v5156_v6  ;;  %v14612_v58 = vcombine.low %v5148_v37, %v5156_v6  ;;  %v5219_v37 = vld [vmem:[#allocation11 + $0x19c0] sm:$0xff]  ;;  %v5212_v6 = vld [vmem:[#allocation11 + $0x1988] sm:$0xff] }
 0x402   :  { %10730 = vmatpush1.bf16.msra.mxu0 %v14498_v8  ;;  %v5163_v8 = vld [vmem:[#allocation11 + $0x1800] sm:$0xff] }
 0x403   :  { %10894 = vmatpush1.bf16.msra.mxu1 %v14500_v9  ;;  %10731 = vmatprep.subr.bf16.mxu0 %v14515_v10  ;;  %v5171_v9 = vld [vmem:[#allocation11 + $0x1840] sm:$0xff]  ;;  %v5164_v10 = vld [vmem:[#allocation11 + $0x1808] sm:$0xff] }
 0x404   :  { %10895 = vmatprep.subr.bf16.mxu1 %v14517_v18  ;;  %v5172_v18 = vld [vmem:[#allocation11 + $0x1848] sm:$0xff]  ;;  %v14627_v21 = vcombine.high %v5163_v8, %v5171_v9  ;;  %v14626_v48 = vcombine.low %v5163_v8, %v5171_v9  ;;  %v5227_v9 = vld [vmem:[#allocation11 + $0x1a00] sm:$0xff] }
 0x405   :  { %v14629_v22 = vcombine.high %v5164_v10, %v5172_v18 }
 0x406   :  { %10732 = vmatpush1.bf16.msra.mxu0 %v14514_v24  ;;  %v16204_v24 = vld [vmem:[#allocation10] sm:$0xff] }
 0x407   :  { %10896 = vmatpush1.bf16.msra.mxu1 %v14516_v25  ;;  %10733 = vmatprep.subr.bf16.mxu0 %v14531_v26  ;;  %v1150_v25 = vrot.slane %v16204_v24, %v16122_v2  ;;  %v1154_v26 = vrot.slane %v16204_v24, %v16105_v34 }
 0x408   :  { %10897 = vmatprep.subr.bf16.mxu1 %v14533_v28  ;;  %v1162_v28 = vrot.slane %v16204_v24, %v16125_v11 }
 0x40a   :  { %10734 = vmatpush1.bf16.msra.mxu0 %v14530_v39 }
 0x40b   :  { %10898 = vmatpush1.bf16.msra.mxu1 %v14532_v40  ;;  %10735 = vmatprep.subr.bf16.mxu0 %v14547_v41 }
 0x40c   :  { %10899 = vmatprep.subr.bf16.mxu1 %v14549_v32 }
 0x40e   :  { %10736 = vmatpush1.bf16.msra.mxu0 %v14546_v46 }
 0x40f   :  { %10900 = vmatpush1.bf16.msra.mxu1 %v14548_v30  ;;  %10737 = vmatprep.subr.bf16.mxu0 %v14563_v13  ;;  %v5179_v30 = vld [vmem:[#allocation11 + $0x1880] sm:$0xff] }
 0x410   :  { %10901 = vmatprep.subr.bf16.mxu1 %v14565_v16  ;;  %v5187_v16 = vld [vmem:[#allocation11 + $0x18c0] sm:$0xff] }
 0x412   :  { %10738 = vmatpush1.bf16.msra.mxu0 %v14562_v1  ;;  %v14628_v1 = vcombine.low %v5164_v10, %v5172_v18  ;;  %v5235_v10 = vld [vmem:[#allocation11 + $0x1a40] sm:$0xff]  ;;  %v5228_v18 = vld [vmem:[#allocation11 + $0x1a08] sm:$0xff] }
 0x413   :  { %10902 = vmatpush1.bf16.msra.mxu1 %v14564_v49  ;;  %10739 = vmatprep.subr.bf16.mxu0 %v14579_v50  ;;  %v5195_v50 = vld [vmem:[#allocation11 + $0x1900] sm:$0xff] }
 0x414   :  { %10903 = vmatprep.subr.bf16.mxu1 %v14581_v51  ;;  %v14643_v51 = vcombine.high %v5179_v30, %v5187_v16 }
 0x416   :  { %10740 = vmatpush1.bf16.msra.mxu0 %v14578_v57 }
 0x417   :  { %10904 = vmatpush1.bf16.msra.mxu1 %v14580_v61  ;;  %10741 = vmatprep.subr.bf16.mxu0 %v14595_v63  ;;  %v14642_v61 = vcombine.low %v5179_v30, %v5187_v16  ;;  %v14644_v63 = vcombine.low %v5180_v59, %v5188_v47  ;;  %v5275_v16 = vld [vmem:[#allocation11 + $0x1b80] sm:$0xff]  ;;  %v5276_v47 = vld [vmem:[#allocation11 + $0x1b88] sm:$0xff] }
 0x418   :  { %10905 = vmatprep.subr.bf16.mxu1 %v14597_v4  ;;  %v14659_v4 = vcombine.high %v5195_v50, %v5203_v53  ;;  %v5283_v59 = vld [vmem:[#allocation11 + $0x1bc0] sm:$0xff] }
 0x41a   :  { %10742 = vmatpush1.bf16.msra.mxu0 %v14594_v44  ;;  %v5220_v44 = vld [vmem:[#allocation11 + $0x19c8] sm:$0xff] }
 0x41b   :  { %10906 = vmatpush1.bf16.msra.mxu1 %v14596_v14  ;;  %10743 = vmatprep.subr.bf16.mxu0 %v14611_v7  ;;  %v14658_v14 = vcombine.low %v5195_v50, %v5203_v53  ;;  %v14660_v7 = vcombine.low %v5196_v55, %v5204_v27  ;;  %v14677_v8 = vcombine.high %v5212_v6, %v5220_v44  ;;  %v5291_v53 = vld [vmem:[#allocation11 + $0x1c00] sm:$0xff]  ;;  %v5292_v27 = vld [vmem:[#allocation11 + $0x1c08] sm:$0xff] }
 0x41c   :  { %10907 = vmatprep.subr.bf16.mxu1 %v14613_v12  ;;  %v14675_v12 = vcombine.high %v5211_v5, %v5219_v37  ;;  %v5299_v55 = vld [vmem:[#allocation11 + $0x1c40] sm:$0xff] }
 0x41e   :  { %10744 = vmatpush1.bf16.msra.mxu0 %v14610_v19  ;;  %v5236_v19 = vld [vmem:[#allocation11 + $0x1a48] sm:$0xff] }
 0x41f   :  { %10908 = vmatpush1.bf16.msra.mxu1 %v14612_v58  ;;  %10754 = vmatprep.subr.bf16.mxu0 %v14627_v21  ;;  %v14674_v58 = vcombine.low %v5211_v5, %v5219_v37  ;;  %v14676_v21 = vcombine.low %v5212_v6, %v5220_v44  ;;  %v5307_v37 = vld [vmem:[#allocation11 + $0x1c80] sm:$0xff]  ;;  %v5308_v44 = vld [vmem:[#allocation11 + $0x1c88] sm:$0xff] }
 0x420   :  { %10918 = vmatprep.subr.bf16.mxu1 %v14629_v22  ;;  %v14691_v22 = vcombine.high %v5227_v9, %v5235_v10  ;;  %v5315_v6 = vld [vmem:[#allocation11 + $0x1cc0] sm:$0xff] }
 0x434   :  { %v4216_v3 = vpop.f32.mrb[8].mxu0 }
 0x435   :  { %v15319_v33 = vadd.f32 %v4216_v3, %v1150_v25  ;;  %v16212_v54 = vpop.f32.mrb[8].mxu1  ;;  %v4218_v35 = vpop.f32.mrb[9].mxu0  ;;  %v14693_v25 = vcombine.high %v5228_v18, %v5236_v19  ;;  %v5244_v3 = vld [vmem:[#allocation11 + $0x1a88] sm:$0xff] }
 0x436   :  { %v15320_v39 = vadd.f32 %v4218_v35, %v1154_v26  ;;  %v4382_v40 = vpop.f32.mrb[9].mxu1  ;;  %v4220_v41 = vpop.f32.mrb[10].mxu0  ;;  %v5243_v26 = vld [vmem:[#allocation11 + $0x1a80] sm:$0xff]  ;;  %v14690_v35 = vcombine.low %v5227_v9, %v5235_v10 }
 0x437   :  { %v4391_v32 = vmax.f32 %v15319_v33, 0.0  ;;  %v15322_v62 = vadd.f32 %v4382_v40, %v1162_v28  ;;  %v4384_v23 = vpop.f32.mrb[10].mxu1  ;;  %v4221_v42 = vpop.f32.mrb[11].mxu0  ;;  %v5251_v28 = vld [vmem:[#allocation11 + $0x1ac0] sm:$0xff]  ;;  %v5252_v33 = vld [vmem:[#allocation11 + $0x1ac8] sm:$0xff] }
 0x438   :  { %v4392_v43 = vmax.f32 %v15320_v39, 0.0  ;;  %v4385_v46 = vpop.f32.mrb[11].mxu1  ;;  %v14692_v39 = vcombine.low %v5228_v18, %v5236_v19  ;;  %v14707_v40 = vcombine.high %v5243_v26, %v5251_v28  ;;  %v14709_v41 = vcombine.high %v5244_v3, %v5252_v33  ;;  %v5260_v23 = vld [vmem:[#allocation11 + $0x1b08] sm:$0xff]  ;;  %v5323_v10 = vld [vmem:[#allocation11 + $0x1d00] sm:$0xff] }
 0x439   :  { %v4394_v13 = vmax.f32 %v15322_v62, 0.0  ;;  %v16216_v49 = vpack.c.bf16 %v4391_v32, %v4391_v32  ;;  %v5259_v32 = vld [vmem:[#allocation11 + $0x1b00] sm:$0xff]  ;;  %v5268_v42 = vld [vmem:[#allocation11 + $0x1b48] sm:$0xff]  ;;  %v14708_v46 = vcombine.low %v5244_v3, %v5252_v33 }
 0x43a   :  { %v16214_v36 = vpack.c.bf16 %v4392_v43, %v4392_v43  ;;  %v5267_v62 = vld [vmem:[#allocation11 + $0x1b40] sm:$0xff]  ;;  %v14706_v43 = vcombine.low %v5243_v26, %v5251_v28  ;;  %v14724_v50 = vcombine.low %v5260_v23, %v5268_v42  ;;  %v5324_v19 = vld [vmem:[#allocation11 + $0x1d08] sm:$0xff] }
 0x43b   :  { %v16220_v57 = vpack.c.bf16 %v4394_v13, %v4394_v13  ;;  %v14723_v30 = vcombine.high %v5259_v32, %v5267_v62  ;;  %v14725_v13 = vcombine.high %v5260_v23, %v5268_v42  ;;  %v5331_v18 = vld [vmem:[#allocation11 + $0x1d40] sm:$0xff]  ;;  %v5340_v33 = vld [vmem:[#allocation11 + $0x1d88] sm:$0xff] }
 0x43c   :  { %10745 = vmatprep.mubr.bf16.mxu0 %v16214_v36  ;;  %10909 = vmatprep.mubr.bf16.mxu1 %v16214_v36  ;;  %v5339_v28 = vld [vmem:[#allocation11 + $0x1d80] sm:$0xff]  ;;  %v5356_v42 = vld [vmem:[#allocation11 + $0x1e08] sm:$0xff] }
 0x43d   :  { %10746 = vmatmul.mubr.bf16.vlgmr.msra.gmra.mrb[12].mxu0 %v16216_v49  ;;  %10910 = vmatmul.mubr.bf16.vlgmr.msra.gmra.mrb[12].mxu1 %v16216_v49  ;;  %v5347_v3 = vld [vmem:[#allocation11 + $0x1dc0] sm:$0xff] }
 0x43e   :  { %10755 = vmatpush1.bf16.msra.mxu0 %v14626_v48  ;;  %10919 = vmatpush1.bf16.msra.mxu1 %v14628_v1  ;;  %v5284_v48 = vld [vmem:[#allocation11 + $0x1bc8] sm:$0xff]  ;;  %v14722_v1 = vcombine.low %v5259_v32, %v5267_v62  ;;  %v5355_v62 = vld [vmem:[#allocation11 + $0x1e00] sm:$0xff] }
 0x43f   :  { %10786 = vmatprep.mubr.bf16.mxu0 %v16220_v57  ;;  %10950 = vmatprep.mubr.bf16.mxu1 %v16220_v57  ;;  %v5363_v23 = vld [vmem:[#allocation11 + $0x1e40] sm:$0xff] }
 0x440   :  { %10756 = vmatprep.subr.bf16.mxu0 %v14643_v51  ;;  %10920 = vmatprep.subr.bf16.mxu1 %v14645_v60  ;;  %v14739_v51 = vcombine.high %v5275_v16, %v5283_v59  ;;  %v14741_v60 = vcombine.high %v5276_v47, %v5284_v48 }
 0x442   :  { %10757 = vmatpush1.bf16.msra.mxu0 %v14642_v61  ;;  %10921 = vmatpush1.bf16.msra.mxu1 %v14644_v63  ;;  %v5300_v61 = vld [vmem:[#allocation11 + $0x1c48] sm:$0xff]  ;;  %v14738_v63 = vcombine.low %v5275_v16, %v5283_v59  ;;  %v5371_v59 = vld [vmem:[#allocation11 + $0x1e80] sm:$0xff] }
 0x443   :  { %10758 = vmatprep.subr.bf16.mxu0 %v14659_v4  ;;  %10922 = vmatprep.subr.bf16.mxu1 %v14661_v0  ;;  %v14740_v4 = vcombine.low %v5276_v47, %v5284_v48  ;;  %v14755_v0 = vcombine.high %v5291_v53, %v5299_v55  ;;  %v14757_v5 = vcombine.high %v5292_v27, %v5300_v61  ;;  %v5379_v47 = vld [vmem:[#allocation11 + $0x1ec0] sm:$0xff]  ;;  %v5372_v48 = vld [vmem:[#allocation11 + $0x1e88] sm:$0xff] }
 0x446   :  { %10759 = vmatpush1.bf16.msra.mxu0 %v14658_v14  ;;  %10923 = vmatpush1.bf16.msra.mxu1 %v14660_v7  ;;  %v5316_v14 = vld [vmem:[#allocation11 + $0x1cc8] sm:$0xff]  ;;  %v14754_v7 = vcombine.low %v5291_v53, %v5299_v55  ;;  %v5387_v55 = vld [vmem:[#allocation11 + $0x1f00] sm:$0xff] }
 0x447   :  { %10760 = vmatprep.subr.bf16.mxu0 %v14675_v12  ;;  %10924 = vmatprep.subr.bf16.mxu1 %v14677_v8  ;;  %v14756_v12 = vcombine.low %v5292_v27, %v5300_v61  ;;  %v14771_v8 = vcombine.high %v5307_v37, %v5315_v6  ;;  %v14773_v9 = vcombine.high %v5308_v44, %v5316_v14  ;;  %v5395_v27 = vld [vmem:[#allocation11 + $0x1f40] sm:$0xff]  ;;  %v5388_v61 = vld [vmem:[#allocation11 + $0x1f08] sm:$0xff] }
 0x44a   :  { %10761 = vmatpush1.bf16.msra.mxu0 %v14674_v58  ;;  %10925 = vmatpush1.bf16.msra.mxu1 %v14676_v21  ;;  %v5332_v58 = vld [vmem:[#allocation11 + $0x1d48] sm:$0xff]  ;;  %v14770_v21 = vcombine.low %v5307_v37, %v5315_v6  ;;  %v14851_v37 = vcombine.high %v5387_v55, %v5395_v27 }
 0x44b   :  { %10762 = vmatprep.subr.bf16.mxu0 %v14691_v22  ;;  %10926 = vmatprep.subr.bf16.mxu1 %v14693_v25  ;;  %v14772_v22 = vcombine.low %v5308_v44, %v5316_v14  ;;  %v14787_v25 = vcombine.high %v5323_v10, %v5331_v18  ;;  %v14789_v26 = vcombine.high %v5324_v19, %v5332_v58  ;;  %v5403_v44 = vld [vmem:[#allocation11 + $0x1f80] sm:$0xff] }
 0x44c   :  { %v5411_v14 = vld [vmem:[#allocation11 + $0x1fc0] sm:$0xff] }
 0x44e   :  { %10763 = vmatpush1.bf16.msra.mxu0 %v14690_v35  ;;  %10927 = vmatpush1.bf16.msra.mxu1 %v14692_v39  ;;  %v5348_v35 = vld [vmem:[#allocation11 + $0x1dc8] sm:$0xff]  ;;  %v14786_v39 = vcombine.low %v5323_v10, %v5331_v18  ;;  %v14867_v18 = vcombine.high %v5403_v44, %v5411_v14 }
 0x44f   :  { %10764 = vmatprep.subr.bf16.mxu0 %v14707_v40  ;;  %10928 = vmatprep.subr.bf16.mxu1 %v14709_v41  ;;  %v14788_v40 = vcombine.low %v5324_v19, %v5332_v58  ;;  %v14803_v41 = vcombine.high %v5339_v28, %v5347_v3  ;;  %v14805_v32 = vcombine.high %v5340_v33, %v5348_v35  ;;  %v4397_v58 = vld [vmem:[#allocation11 + $0x10] sm:$0xff] }
 0x452   :  { %10765 = vmatpush1.bf16.msra.mxu0 %v14706_v43  ;;  %10929 = vmatpush1.bf16.msra.mxu1 %v14708_v46  ;;  %v5364_v43 = vld [vmem:[#allocation11 + $0x1e48] sm:$0xff]  ;;  %v14802_v46 = vcombine.low %v5339_v28, %v5347_v3 }
 0x453   :  { %10766 = vmatprep.subr.bf16.mxu0 %v14723_v30  ;;  %10930 = vmatprep.subr.bf16.mxu1 %v14725_v13  ;;  %v14804_v30 = vcombine.low %v5340_v33, %v5348_v35  ;;  %v14819_v13 = vcombine.high %v5355_v62, %v5363_v23  ;;  %v14821_v16 = vcombine.high %v5356_v42, %v5364_v43  ;;  %v4413_v35 = vld [vmem:[#allocation11 + $0x90] sm:$0xff] }
 0x456   :  { %10767 = vmatpush1.bf16.msra.mxu0 %v14722_v1  ;;  %10931 = vmatpush1.bf16.msra.mxu1 %v14724_v50  ;;  %v5380_v1 = vld [vmem:[#allocation11 + $0x1ec8] sm:$0xff]  ;;  %v14818_v50 = vcombine.low %v5355_v62, %v5363_v23 }
 0x457   :  { %10768 = vmatprep.subr.bf16.mxu0 %v14739_v51  ;;  %10932 = vmatprep.subr.bf16.mxu1 %v14741_v60  ;;  %v14820_v51 = vcombine.low %v5356_v42, %v5364_v43  ;;  %v14835_v60 = vcombine.high %v5371_v59, %v5379_v47  ;;  %v14837_v53 = vcombine.high %v5372_v48, %v5380_v1  ;;  %v4429_v43 = vld [vmem:[#allocation11 + $0x110] sm:$0xff] }
 0x45a   :  { %10769 = vmatpush1.bf16.msra.mxu0 %v14738_v63  ;;  %10933 = vmatpush1.bf16.msra.mxu1 %v14740_v4  ;;  %v5396_v63 = vld [vmem:[#allocation11 + $0x1f48] sm:$0xff]  ;;  %v14834_v4 = vcombine.low %v5371_v59, %v5379_v47 }
 0x45b   :  { %10770 = vmatprep.subr.bf16.mxu0 %v14755_v0  ;;  %10934 = vmatprep.subr.bf16.mxu1 %v14757_v5  ;;  %v14836_v0 = vcombine.low %v5372_v48, %v5380_v1  ;;  %v1158_v5 = vrot.slane %v16204_v24, %v16142_v56  ;;  %v14853_v6 = vcombine.high %v5388_v61, %v5396_v63  ;;  %v4405_v24 = vld [vmem:[#allocation11 + $0x50] sm:$0xff] }
 0x45c   :  { %v13863_v3 = vcombine.high %v4397_v58, %v4405_v24  ;;  %v4445_v1 = vld [vmem:[#allocation11 + $0x190] sm:$0xff] }
 0x45d   :  { %v15321_v10 = vadd.f32 %v16212_v54, %v1158_v5  ;;  %v4414_v54 = vld [vmem:[#allocation11 + $0x98] sm:$0xff] }
 0x45e   :  { %10771 = vmatpush1.bf16.msra.mxu0 %v14754_v7  ;;  %10935 = vmatpush1.bf16.msra.mxu1 %v14756_v12  ;;  %v5404_v7 = vld [vmem:[#allocation11 + $0x1f88] sm:$0xff]  ;;  %v4470_v5 = vld [vmem:[#allocation11 + $0x258] sm:$0xff] }
 0x45f   :  { %10772 = vmatprep.subr.bf16.mxu0 %v14771_v8  ;;  %10936 = vmatprep.subr.bf16.mxu1 %v14773_v9  ;;  %v5412_v12 = vld [vmem:[#allocation11 + $0x1fc8] sm:$0xff]  ;;  %v14850_v8 = vcombine.low %v5387_v55, %v5395_v27  ;;  %v14852_v9 = vcombine.low %v5388_v61, %v5396_v63  ;;  %v4393_v28 = vmax.f32 %v15321_v10, 0.0  ;;  %v4461_v63 = vld [vmem:[#allocation11 + $0x210] sm:$0xff] }
 0x460   :  { %v14869_v19 = vcombine.high %v5404_v7, %v5412_v12 }
 0x462   :  { %10773 = vmatpush1.bf16.msra.mxu0 %v14770_v21  ;;  %10937 = vmatpush1.bf16.msra.mxu1 %v14772_v22  ;;  %v4398_v21 = vld [vmem:[#allocation11 + $0x18] sm:$0xff] }
 0x463   :  { %10774 = vmatprep.subr.bf16.mxu0 %v14787_v25  ;;  %10938 = vmatprep.subr.bf16.mxu1 %v14789_v26  ;;  %v4406_v22 = vld [vmem:[#allocation11 + $0x58] sm:$0xff]  ;;  %v14866_v25 = vcombine.low %v5403_v44, %v5411_v14  ;;  %v14868_v26 = vcombine.low %v5404_v7, %v5412_v12  ;;  %v4477_v7 = vld [vmem:[#allocation11 + $0x290] sm:$0xff] }
 0x464   :  { %v13865_v33 = vcombine.high %v4398_v21, %v4406_v22  ;;  %v13864_v62 = vcombine.low %v4398_v21, %v4406_v22  ;;  %v4485_v12 = vld [vmem:[#allocation11 + $0x2d0] sm:$0xff]  ;;  %v4494_v22 = vld [vmem:[#allocation11 + $0x318] sm:$0xff] }
 0x465   :  { %v4501_v21 = vld [vmem:[#allocation11 + $0x350] sm:$0xff] }
 0x466   :  { %10775 = vmatpush1.bf16.msra.mxu0 %v14786_v39  ;;  %10939 = vmatpush1.bf16.msra.mxu1 %v14788_v40  ;;  %v4421_v39 = vld [vmem:[#allocation11 + $0xd0] sm:$0xff]  ;;  %v4422_v40 = vld [vmem:[#allocation11 + $0xd8] sm:$0xff] }
 0x467   :  { %10776 = vmatprep.subr.bf16.mxu0 %v14803_v41  ;;  %10940 = vmatprep.subr.bf16.mxu1 %v14805_v32  ;;  %v13862_v41 = vcombine.low %v4397_v58, %v4405_v24  ;;  %v16229_v32 = vpack.c.bf16 %v4393_v28, %v4393_v28  ;;  %v13879_v23 = vcombine.high %v4413_v35, %v4421_v39  ;;  %v4493_v24 = vld [vmem:[#allocation11 + $0x310] sm:$0xff] }
 0x468   :  { %v13881_v42 = vcombine.high %v4414_v54, %v4422_v40  ;;  %v13880_v59 = vcombine.low %v4414_v54, %v4422_v40  ;;  %v4510_v54 = vld [vmem:[#allocation11 + $0x398] sm:$0xff] }
 0x469   :  { %v4518_v40 = vld [vmem:[#allocation11 + $0x3d8] sm:$0xff] }
 0x46a   :  { %10777 = vmatpush1.bf16.msra.mxu0 %v14802_v46  ;;  %10941 = vmatpush1.bf16.msra.mxu1 %v14804_v30  ;;  %v4437_v46 = vld [vmem:[#allocation11 + $0x150] sm:$0xff]  ;;  %v4430_v30 = vld [vmem:[#allocation11 + $0x118] sm:$0xff] }
 0x46b   :  { %10778 = vmatprep.subr.bf16.mxu0 %v14819_v13  ;;  %10942 = vmatprep.subr.bf16.mxu1 %v14821_v16  ;;  %v4438_v13 = vld [vmem:[#allocation11 + $0x158] sm:$0xff]  ;;  %v13878_v16 = vcombine.low %v4413_v35, %v4421_v39  ;;  %v13895_v47 = vcombine.high %v4429_v43, %v4437_v46  ;;  %v4509_v35 = vld [vmem:[#allocation11 + $0x390] sm:$0xff] }
 0x46c   :  { %v13897_v48 = vcombine.high %v4430_v30, %v4438_v13  ;;  %v13896_v55 = vcombine.low %v4430_v30, %v4438_v13  ;;  %v4517_v39 = vld [vmem:[#allocation11 + $0x3d0] sm:$0xff]  ;;  %v4526_v30 = vld [vmem:[#allocation11 + $0x418] sm:$0xff] }
 0x46d   :  { %v4534_v13 = vld [vmem:[#allocation11 + $0x458] sm:$0xff] }
 0x46e   :  { %10779 = vmatpush1.bf16.msra.mxu0 %v14818_v50  ;;  %10943 = vmatpush1.bf16.msra.mxu1 %v14820_v51  ;;  %v4453_v50 = vld [vmem:[#allocation11 + $0x1d0] sm:$0xff]  ;;  %v4446_v51 = vld [vmem:[#allocation11 + $0x198] sm:$0xff] }
 0x46f   :  { %10780 = vmatprep.subr.bf16.mxu0 %v14835_v60  ;;  %10944 = vmatprep.subr.bf16.mxu1 %v14837_v53  ;;  %v4454_v60 = vld [vmem:[#allocation11 + $0x1d8] sm:$0xff]  ;;  %v13894_v53 = vcombine.low %v4429_v43, %v4437_v46  ;;  %v13911_v27 = vcombine.high %v4445_v1, %v4453_v50  ;;  %v4525_v43 = vld [vmem:[#allocation11 + $0x410] sm:$0xff] }
 0x470   :  { %v13913_v61 = vcombine.high %v4446_v51, %v4454_v60  ;;  %v4533_v46 = vld [vmem:[#allocation11 + $0x450] sm:$0xff] }
 0x472   :  { %10781 = vmatpush1.bf16.msra.mxu0 %v14834_v4  ;;  %10945 = vmatpush1.bf16.msra.mxu1 %v14836_v0  ;;  %v4469_v4 = vld [vmem:[#allocation11 + $0x250] sm:$0xff]  ;;  %v4462_v0 = vld [vmem:[#allocation11 + $0x218] sm:$0xff] }
 0x473   :  { %10782 = vmatprep.subr.bf16.mxu0 %v14851_v37  ;;  %10946 = vmatprep.subr.bf16.mxu1 %v14853_v6  ;;  %v13910_v37 = vcombine.low %v4445_v1, %v4453_v50  ;;  %v13912_v6 = vcombine.low %v4446_v51, %v4454_v60  ;;  %v13927_v44 = vcombine.high %v4461_v63, %v4469_v4  ;;  %v4541_v1 = vld [vmem:[#allocation11 + $0x490] sm:$0xff]  ;;  %v4542_v51 = vld [vmem:[#allocation11 + $0x498] sm:$0xff] }
 0x474   :  { %v13929_v14 = vcombine.high %v4462_v0, %v4470_v5  ;;  %v13926_v10 = vcombine.low %v4461_v63, %v4469_v4  ;;  %v4549_v50 = vld [vmem:[#allocation11 + $0x4d0] sm:$0xff]  ;;  %v4550_v60 = vld [vmem:[#allocation11 + $0x4d8] sm:$0xff] }
 0x475   :  { %v4557_v63 = vld [vmem:[#allocation11 + $0x510] sm:$0xff] }
 0x476   :  { %10783 = vmatpush1.bf16.msra.mxu0 %v14850_v8  ;;  %10947 = vmatpush1.bf16.msra.mxu1 %v14852_v9  ;;  %v4478_v8 = vld [vmem:[#allocation11 + $0x298] sm:$0xff]  ;;  %v4565_v4 = vld [vmem:[#allocation11 + $0x550] sm:$0xff] }
 0x477   :  { %10784 = vmatprep.subr.bf16.mxu0 %v14867_v18  ;;  %10948 = vmatprep.subr.bf16.mxu1 %v14869_v19  ;;  %v4486_v9 = vld [vmem:[#allocation11 + $0x2d8] sm:$0xff]  ;;  %v13928_v18 = vcombine.low %v4462_v0, %v4470_v5  ;;  %v13943_v19 = vcombine.high %v4477_v7, %v4485_v12 }
 0x478   :  { %v13945_v58 = vcombine.high %v4478_v8, %v4486_v9  ;;  %v13944_v28 = vcombine.low %v4478_v8, %v4486_v9  ;;  %v4558_v0 = vld [vmem:[#allocation11 + $0x518] sm:$0xff] }
 0x479   :  { %v4566_v5 = vld [vmem:[#allocation11 + $0x558] sm:$0xff] }
 0x47a   :  { %10785 = vmatpush1.bf16.msra.mxu0 %v14866_v25  ;;  %10949 = vmatpush1.bf16.msra.mxu1 %v14868_v26  ;;  %v4502_v25 = vld [vmem:[#allocation11 + $0x358] sm:$0xff]  ;;  %v13942_v26 = vcombine.low %v4477_v7, %v4485_v12  ;;  %v4573_v7 = vld [vmem:[#allocation11 + $0x590] sm:$0xff] }
 0x47b   :  { %10959 = vmatprep.subr.bf16.mxu0 %v13863_v3  ;;  %11123 = vmatprep.subr.bf16.mxu1 %v13865_v33  ;;  %v13959_v3 = vcombine.high %v4493_v24, %v4501_v21  ;;  %v13961_v33 = vcombine.high %v4494_v22, %v4502_v25  ;;  %v4581_v12 = vld [vmem:[#allocation11 + $0x5d0] sm:$0xff]  ;;  %v4574_v8 = vld [vmem:[#allocation11 + $0x598] sm:$0xff] }
 0x47c   :  { %v4582_v9 = vld [vmem:[#allocation11 + $0x5d8] sm:$0xff] }
 0x47d   :  { %10787 = vmatmul.mubr.bf16.vlgmr.msra.gmra.mrb[12].mxu0 %v16229_v32  ;;  %10951 = vmatmul.mubr.bf16.vlgmr.msra.gmra.mrb[12].mxu1 %v16229_v32 }
 0x47e   :  { %10960 = vmatpush1.bf16.msra.mxu0 %v13862_v41  ;;  %10991 = vmatprep.mubr.bf16.mxu0 %v16177_v52  ;;  %v13958_v41 = vcombine.low %v4493_v24, %v4501_v21  ;;  %v4589_v24 = vld [vmem:[#allocation11 + $0x610] sm:$0xff] }
 0x47f   :  { %11124 = vmatpush1.bf16.msra.mxu1 %v13864_v62  ;;  %11155 = vmatprep.mubr.bf16.mxu1 %v16177_v52  ;;  %v13960_v62 = vcombine.low %v4494_v22, %v4502_v25  ;;  %v4597_v21 = vld [vmem:[#allocation11 + $0x650] sm:$0xff]  ;;  %v4590_v22 = vld [vmem:[#allocation11 + $0x618] sm:$0xff] }
 0x480   :  { %10961 = vmatprep.subr.bf16.mxu0 %v13879_v23  ;;  %11125 = vmatprep.subr.bf16.mxu1 %v13881_v42  ;;  %v13975_v23 = vcombine.high %v4509_v35, %v4517_v39  ;;  %v13977_v42 = vcombine.high %v4510_v54, %v4518_v40  ;;  %v4598_v25 = vld [vmem:[#allocation11 + $0x658] sm:$0xff] }
 0x482   :  { %10962 = vmatpush1.bf16.msra.mxu0 %v13878_v16  ;;  %v13974_v16 = vcombine.low %v4509_v35, %v4517_v39  ;;  %v4605_v35 = vld [vmem:[#allocation11 + $0x690] sm:$0xff] }
 0x483   :  { %11126 = vmatpush1.bf16.msra.mxu1 %v13880_v59  ;;  %10963 = vmatprep.subr.bf16.mxu0 %v13895_v47  ;;  %v13976_v59 = vcombine.low %v4510_v54, %v4518_v40  ;;  %v13991_v47 = vcombine.high %v4525_v43, %v4533_v46  ;;  %v4613_v39 = vld [vmem:[#allocation11 + $0x6d0] sm:$0xff]  ;;  %v4606_v54 = vld [vmem:[#allocation11 + $0x698] sm:$0xff] }
 0x484   :  { %11127 = vmatprep.subr.bf16.mxu1 %v13897_v48  ;;  %v13993_v48 = vcombine.high %v4526_v30, %v4534_v13  ;;  %v4614_v40 = vld [vmem:[#allocation11 + $0x6d8] sm:$0xff] }
 0x486   :  { %10964 = vmatpush1.bf16.msra.mxu0 %v13894_v53  ;;  %v13990_v53 = vcombine.low %v4525_v43, %v4533_v46  ;;  %v4621_v43 = vld [vmem:[#allocation11 + $0x710] sm:$0xff] }
 0x487   :  { %11128 = vmatpush1.bf16.msra.mxu1 %v13896_v55  ;;  %10965 = vmatprep.subr.bf16.mxu0 %v13911_v27  ;;  %v13992_v55 = vcombine.low %v4526_v30, %v4534_v13  ;;  %v14007_v27 = vcombine.high %v4541_v1, %v4549_v50  ;;  %v4629_v46 = vld [vmem:[#allocation11 + $0x750] sm:$0xff]  ;;  %v4622_v30 = vld [vmem:[#allocation11 + $0x718] sm:$0xff] }
 0x488   :  { %11129 = vmatprep.subr.bf16.mxu1 %v13913_v61  ;;  %v14009_v61 = vcombine.high %v4542_v51, %v4550_v60  ;;  %v4630_v13 = vld [vmem:[#allocation11 + $0x758] sm:$0xff] }
 0x48a   :  { %10966 = vmatpush1.bf16.msra.mxu0 %v13910_v37  ;;  %v14006_v37 = vcombine.low %v4541_v1, %v4549_v50  ;;  %v4637_v1 = vld [vmem:[#allocation11 + $0x790] sm:$0xff] }
 0x48b   :  { %11130 = vmatpush1.bf16.msra.mxu1 %v13912_v6  ;;  %10967 = vmatprep.subr.bf16.mxu0 %v13927_v44  ;;  %v14008_v6 = vcombine.low %v4542_v51, %v4550_v60  ;;  %v14023_v44 = vcombine.high %v4557_v63, %v4565_v4  ;;  %v4645_v50 = vld [vmem:[#allocation11 + $0x7d0] sm:$0xff]  ;;  %v4638_v51 = vld [vmem:[#allocation11 + $0x798] sm:$0xff] }
 0x48c   :  { %11131 = vmatprep.subr.bf16.mxu1 %v13929_v14  ;;  %v14025_v14 = vcombine.high %v4558_v0, %v4566_v5  ;;  %v4646_v60 = vld [vmem:[#allocation11 + $0x7d8] sm:$0xff] }
 0x48e   :  { %10968 = vmatpush1.bf16.msra.mxu0 %v13926_v10  ;;  %v14022_v10 = vcombine.low %v4557_v63, %v4565_v4  ;;  %v4653_v63 = vld [vmem:[#allocation11 + $0x810] sm:$0xff] }
 0x48f   :  { %11132 = vmatpush1.bf16.msra.mxu1 %v13928_v18  ;;  %10969 = vmatprep.subr.bf16.mxu0 %v13943_v19  ;;  %v14024_v18 = vcombine.low %v4558_v0, %v4566_v5  ;;  %v14039_v19 = vcombine.high %v4573_v7, %v4581_v12  ;;  %v4661_v4 = vld [vmem:[#allocation11 + $0x850] sm:$0xff]  ;;  %v4654_v0 = vld [vmem:[#allocation11 + $0x818] sm:$0xff] }
 0x490   :  { %11133 = vmatprep.subr.bf16.mxu1 %v13945_v58  ;;  %v14041_v58 = vcombine.high %v4574_v8, %v4582_v9  ;;  %v4662_v5 = vld [vmem:[#allocation11 + $0x858] sm:$0xff] }
 0x492   :  { %10970 = vmatpush1.bf16.msra.mxu0 %v13942_v26  ;;  %v14038_v26 = vcombine.low %v4573_v7, %v4581_v12  ;;  %v4669_v7 = vld [vmem:[#allocation11 + $0x890] sm:$0xff] }
 0x493   :  { %11134 = vmatpush1.bf16.msra.mxu1 %v13944_v28  ;;  %10971 = vmatprep.subr.bf16.mxu0 %v13959_v3  ;;  %v14040_v28 = vcombine.low %v4574_v8, %v4582_v9  ;;  %v14055_v3 = vcombine.high %v4589_v24, %v4597_v21  ;;  %v4677_v12 = vld [vmem:[#allocation11 + $0x8d0] sm:$0xff]  ;;  %v14118_v8 = vcombine.low %v4653_v63, %v4661_v4  ;;  %v4670_v9 = vld [vmem:[#allocation11 + $0x898] sm:$0xff] }
 0x494   :  { %11135 = vmatprep.subr.bf16.mxu1 %v13961_v33  ;;  %v14057_v33 = vcombine.high %v4590_v22, %v4598_v25 }
 0x496   :  { %10972 = vmatpush1.bf16.msra.mxu0 %v13958_v41  ;;  %v14054_v41 = vcombine.low %v4589_v24, %v4597_v21  ;;  %v4693_v24 = vld [vmem:[#allocation11 + $0x950] sm:$0xff] }
 0x497   :  { %11136 = vmatpush1.bf16.msra.mxu1 %v13960_v62  ;;  %10973 = vmatprep.subr.bf16.mxu0 %v13975_v23  ;;  %v14056_v62 = vcombine.low %v4590_v22, %v4598_v25  ;;  %v14071_v23 = vcombine.high %v4605_v35, %v4613_v39  ;;  %v4686_v22 = vld [vmem:[#allocation11 + $0x918] sm:$0xff] }
 0x498   :  { %11137 = vmatprep.subr.bf16.mxu1 %v13977_v42  ;;  %v14073_v42 = vcombine.high %v4606_v54, %v4614_v40  ;;  %v4694_v25 = vld [vmem:[#allocation11 + $0x958] sm:$0xff] }
 0x49a   :  { %10974 = vmatpush1.bf16.msra.mxu0 %v13974_v16  ;;  %v14070_v16 = vcombine.low %v4605_v35, %v4613_v39  ;;  %v4701_v35 = vld [vmem:[#allocation11 + $0x990] sm:$0xff] }
 0x49b   :  { %11138 = vmatpush1.bf16.msra.mxu1 %v13976_v59  ;;  %10975 = vmatprep.subr.bf16.mxu0 %v13991_v47  ;;  %v14072_v59 = vcombine.low %v4606_v54, %v4614_v40  ;;  %v14087_v47 = vcombine.high %v4621_v43, %v4629_v46  ;;  %v4709_v39 = vld [vmem:[#allocation11 + $0x9d0] sm:$0xff]  ;;  %v4702_v54 = vld [vmem:[#allocation11 + $0x998] sm:$0xff] }
 0x49c   :  { %11139 = vmatprep.subr.bf16.mxu1 %v13993_v48  ;;  %v14089_v48 = vcombine.high %v4622_v30, %v4630_v13  ;;  %v4710_v40 = vld [vmem:[#allocation11 + $0x9d8] sm:$0xff] }
 0x49e   :  { %10976 = vmatpush1.bf16.msra.mxu0 %v13990_v53  ;;  %v14086_v53 = vcombine.low %v4621_v43, %v4629_v46  ;;  %v4717_v43 = vld [vmem:[#allocation11 + $0xa10] sm:$0xff] }
 0x49f   :  { %11140 = vmatpush1.bf16.msra.mxu1 %v13992_v55  ;;  %10977 = vmatprep.subr.bf16.mxu0 %v14007_v27  ;;  %v14088_v55 = vcombine.low %v4622_v30, %v4630_v13  ;;  %v14103_v27 = vcombine.high %v4637_v1, %v4645_v50  ;;  %v4725_v46 = vld [vmem:[#allocation11 + $0xa50] sm:$0xff]  ;;  %v4718_v30 = vld [vmem:[#allocation11 + $0xa18] sm:$0xff] }
 0x4a0   :  { %11141 = vmatprep.subr.bf16.mxu1 %v14009_v61  ;;  %v14105_v61 = vcombine.high %v4638_v51, %v4646_v60  ;;  %v4726_v13 = vld [vmem:[#allocation11 + $0xa58] sm:$0xff] }
 0x4a2   :  { %10978 = vmatpush1.bf16.msra.mxu0 %v14006_v37  ;;  %v14102_v37 = vcombine.low %v4637_v1, %v4645_v50  ;;  %v4733_v1 = vld [vmem:[#allocation11 + $0xa90] sm:$0xff] }
 0x4a3   :  { %11142 = vmatpush1.bf16.msra.mxu1 %v14008_v6  ;;  %10979 = vmatprep.subr.bf16.mxu0 %v14023_v44  ;;  %v14104_v6 = vcombine.low %v4638_v51, %v4646_v60  ;;  %v14119_v44 = vcombine.high %v4653_v63, %v4661_v4  ;;  %v4741_v50 = vld [vmem:[#allocation11 + $0xad0] sm:$0xff]  ;;  %v4734_v51 = vld [vmem:[#allocation11 + $0xa98] sm:$0xff] }
 0x4a4   :  { %11143 = vmatprep.subr.bf16.mxu1 %v14025_v14  ;;  %v14121_v14 = vcombine.high %v4654_v0, %v4662_v5  ;;  %v4742_v60 = vld [vmem:[#allocation11 + $0xad8] sm:$0xff]  ;;  %v4749_v63 = vld [vmem:[#allocation11 + $0xb10] sm:$0xff] }
 0x4a5   :  { %v4757_v4 = vld [vmem:[#allocation11 + $0xb50] sm:$0xff] }
 0x4a6   :  { %10980 = vmatpush1.bf16.msra.mxu0 %v14022_v10  ;;  %v4678_v10 = vld [vmem:[#allocation11 + $0x8d8] sm:$0xff] }
 0x4a7   :  { %11144 = vmatpush1.bf16.msra.mxu1 %v14024_v18  ;;  %10981 = vmatprep.subr.bf16.mxu0 %v14039_v19  ;;  %v14120_v18 = vcombine.low %v4654_v0, %v4662_v5  ;;  %v14135_v19 = vcombine.high %v4669_v7, %v4677_v12  ;;  %v14137_v21 = vcombine.high %v4670_v9, %v4678_v10  ;;  %v4750_v0 = vld [vmem:[#allocation11 + $0xb18] sm:$0xff] }
 0x4a8   :  { %11145 = vmatprep.subr.bf16.mxu1 %v14041_v58  ;;  %v4685_v58 = vld [vmem:[#allocation11 + $0x910] sm:$0xff]  ;;  %v4758_v5 = vld [vmem:[#allocation11 + $0xb58] sm:$0xff] }
 0x4aa   :  { %10982 = vmatpush1.bf16.msra.mxu0 %v14038_v26  ;;  %v14134_v26 = vcombine.low %v4669_v7, %v4677_v12  ;;  %v4765_v7 = vld [vmem:[#allocation11 + $0xb90] sm:$0xff] }
 0x4ab   :  { %11146 = vmatpush1.bf16.msra.mxu1 %v14040_v28  ;;  %10983 = vmatprep.subr.bf16.mxu0 %v14055_v3  ;;  %v14136_v28 = vcombine.low %v4670_v9, %v4678_v10  ;;  %v14151_v3 = vcombine.high %v4685_v58, %v4693_v24  ;;  %v4773_v12 = vld [vmem:[#allocation11 + $0xbd0] sm:$0xff]  ;;  %v4774_v9 = vld [vmem:[#allocation11 + $0xbd8] sm:$0xff]  ;;  %v14214_v10 = vcombine.low %v4749_v63, %v4757_v4 }
 0x4ac   :  { %11147 = vmatprep.subr.bf16.mxu1 %v14057_v33  ;;  %v14153_v33 = vcombine.high %v4686_v22, %v4694_v25 }
 0x4ae   :  { %10984 = vmatpush1.bf16.msra.mxu0 %v14054_v41  ;;  %v14150_v41 = vcombine.low %v4685_v58, %v4693_v24  ;;  %v4781_v24 = vld [vmem:[#allocation11 + $0xc10] sm:$0xff] }
 0x4af   :  { %11148 = vmatpush1.bf16.msra.mxu1 %v14056_v62  ;;  %10985 = vmatprep.subr.bf16.mxu0 %v14071_v23  ;;  %v14152_v62 = vcombine.low %v4686_v22, %v4694_v25  ;;  %v14167_v23 = vcombine.high %v4701_v35, %v4709_v39  ;;  %v4782_v22 = vld [vmem:[#allocation11 + $0xc18] sm:$0xff] }
 0x4b0   :  { %11149 = vmatprep.subr.bf16.mxu1 %v14073_v42  ;;  %v14169_v42 = vcombine.high %v4702_v54, %v4710_v40  ;;  %v4790_v25 = vld [vmem:[#allocation11 + $0xc58] sm:$0xff] }
 0x4b2   :  { %10986 = vmatpush1.bf16.msra.mxu0 %v14070_v16  ;;  %v14166_v16 = vcombine.low %v4701_v35, %v4709_v39  ;;  %v4797_v35 = vld [vmem:[#allocation11 + $0xc90] sm:$0xff] }
 0x4b3   :  { %11150 = vmatpush1.bf16.msra.mxu1 %v14072_v59  ;;  %10987 = vmatprep.subr.bf16.mxu0 %v14087_v47  ;;  %v14168_v59 = vcombine.low %v4702_v54, %v4710_v40  ;;  %v14183_v47 = vcombine.high %v4717_v43, %v4725_v46  ;;  %v4805_v39 = vld [vmem:[#allocation11 + $0xcd0] sm:$0xff]  ;;  %v4798_v54 = vld [vmem:[#allocation11 + $0xc98] sm:$0xff] }
 0x4b4   :  { %11151 = vmatprep.subr.bf16.mxu1 %v14089_v48  ;;  %v14185_v48 = vcombine.high %v4718_v30, %v4726_v13  ;;  %v4806_v40 = vld [vmem:[#allocation11 + $0xcd8] sm:$0xff] }
 0x4b6   :  { %10988 = vmatpush1.bf16.msra.mxu0 %v14086_v53  ;;  %v14182_v53 = vcombine.low %v4717_v43, %v4725_v46  ;;  %v4813_v43 = vld [vmem:[#allocation11 + $0xd10] sm:$0xff] }
 0x4b7   :  { %11152 = vmatpush1.bf16.msra.mxu1 %v14088_v55  ;;  %10989 = vmatprep.subr.bf16.mxu0 %v14103_v27  ;;  %v14184_v55 = vcombine.low %v4718_v30, %v4726_v13  ;;  %v14199_v27 = vcombine.high %v4733_v1, %v4741_v50  ;;  %v4821_v46 = vld [vmem:[#allocation11 + $0xd50] sm:$0xff]  ;;  %v4814_v30 = vld [vmem:[#allocation11 + $0xd18] sm:$0xff] }
 0x4b8   :  { %11153 = vmatprep.subr.bf16.mxu1 %v14105_v61  ;;  %v14201_v61 = vcombine.high %v4734_v51, %v4742_v60  ;;  %v4822_v13 = vld [vmem:[#allocation11 + $0xd58] sm:$0xff] }
 0x4ba   :  { %10990 = vmatpush1.bf16.msra.mxu0 %v14102_v37  ;;  %v14198_v37 = vcombine.low %v4733_v1, %v4741_v50  ;;  %v4829_v1 = vld [vmem:[#allocation11 + $0xd90] sm:$0xff] }
 0x4bb   :  { %11154 = vmatpush1.bf16.msra.mxu1 %v14104_v6  ;;  %11000 = vmatprep.subr.bf16.mxu0 %v14119_v44  ;;  %v14200_v6 = vcombine.low %v4734_v51, %v4742_v60  ;;  %v14215_v44 = vcombine.high %v4749_v63, %v4757_v4  ;;  %v4837_v50 = vld [vmem:[#allocation11 + $0xdd0] sm:$0xff]  ;;  %v4830_v51 = vld [vmem:[#allocation11 + $0xd98] sm:$0xff] }
 0x4bc   :  { %11164 = vmatprep.subr.bf16.mxu1 %v14121_v14  ;;  %v14217_v14 = vcombine.high %v4750_v0, %v4758_v5  ;;  %v4838_v60 = vld [vmem:[#allocation11 + $0xdd8] sm:$0xff]  ;;  %v4845_v63 = vld [vmem:[#allocation11 + $0xe10] sm:$0xff] }
 0x4bd   :  { %10992 = vmatmul.mubr.bf16.vlgmr.msra.gmra.mrb[16].mxu0 %v16189_v29  ;;  %v4853_v4 = vld [vmem:[#allocation11 + $0xe50] sm:$0xff] }
 0x4be   :  { %11156 = vmatmul.mubr.bf16.vlgmr.msra.gmra.mrb[16].mxu1 %v16189_v29  ;;  %11001 = vmatpush1.bf16.msra.mxu0 %v14118_v8  ;;  %v4766_v8 = vld [vmem:[#allocation11 + $0xb98] sm:$0xff] }
 0x4bf   :  { %11032 = vmatprep.mubr.bf16.mxu0 %v16191_v38  ;;  %11165 = vmatpush1.bf16.msra.mxu1 %v14120_v18  ;;  %v14216_v18 = vcombine.low %v4750_v0, %v4758_v5  ;;  %v14233_v58 = vcombine.high %v4766_v8, %v4774_v9  ;;  %v4846_v0 = vld [vmem:[#allocation11 + $0xe18] sm:$0xff] }
 0x4c0   :  { %11196 = vmatprep.mubr.bf16.mxu1 %v16191_v38  ;;  %11002 = vmatprep.subr.bf16.mxu0 %v14135_v19  ;;  %v14231_v19 = vcombine.high %v4765_v7, %v4773_v12  ;;  %v4854_v5 = vld [vmem:[#allocation11 + $0xe58] sm:$0xff] }
 0x4c1   :  { %11166 = vmatprep.subr.bf16.mxu1 %v14137_v21  ;;  %v4789_v21 = vld [vmem:[#allocation11 + $0xc50] sm:$0xff] }
 0x4c2   :  { %11003 = vmatpush1.bf16.msra.mxu0 %v14134_v26  ;;  %v14230_v26 = vcombine.low %v4765_v7, %v4773_v12  ;;  %v4861_v7 = vld [vmem:[#allocation11 + $0xe90] sm:$0xff] }
 0x4c3   :  { %11167 = vmatpush1.bf16.msra.mxu1 %v14136_v28  ;;  %11004 = vmatprep.subr.bf16.mxu0 %v14151_v3  ;;  %v14232_v28 = vcombine.low %v4766_v8, %v4774_v9  ;;  %v14247_v3 = vcombine.high %v4781_v24, %v4789_v21  ;;  %v4869_v12 = vld [vmem:[#allocation11 + $0xed0] sm:$0xff]  ;;  %v4862_v8 = vld [vmem:[#allocation11 + $0xe98] sm:$0xff] }
 0x4c4   :  { %11168 = vmatprep.subr.bf16.mxu1 %v14153_v33  ;;  %v14249_v33 = vcombine.high %v4782_v22, %v4790_v25  ;;  %v4870_v9 = vld [vmem:[#allocation11 + $0xed8] sm:$0xff] }
 0x4c6   :  { %11005 = vmatpush1.bf16.msra.mxu0 %v14150_v41  ;;  %v14246_v41 = vcombine.low %v4781_v24, %v4789_v21  ;;  %v4877_v24 = vld [vmem:[#allocation11 + $0xf10] sm:$0xff] }
 0x4c7   :  { %11169 = vmatpush1.bf16.msra.mxu1 %v14152_v62  ;;  %11006 = vmatprep.subr.bf16.mxu0 %v14167_v23  ;;  %v14248_v62 = vcombine.low %v4782_v22, %v4790_v25  ;;  %v14263_v23 = vcombine.high %v4797_v35, %v4805_v39  ;;  %v4885_v21 = vld [vmem:[#allocation11 + $0xf50] sm:$0xff]  ;;  %v4878_v22 = vld [vmem:[#allocation11 + $0xf18] sm:$0xff] }
 0x4c8   :  { %11170 = vmatprep.subr.bf16.mxu1 %v14169_v42  ;;  %v14265_v42 = vcombine.high %v4798_v54, %v4806_v40  ;;  %v4886_v25 = vld [vmem:[#allocation11 + $0xf58] sm:$0xff] }
 0x4ca   :  { %11007 = vmatpush1.bf16.msra.mxu0 %v14166_v16  ;;  %v14262_v16 = vcombine.low %v4797_v35, %v4805_v39  ;;  %v4893_v35 = vld [vmem:[#allocation11 + $0xf90] sm:$0xff] }
 0x4cb   :  { %11171 = vmatpush1.bf16.msra.mxu1 %v14168_v59  ;;  %11008 = vmatprep.subr.bf16.mxu0 %v14183_v47  ;;  %v14264_v59 = vcombine.low %v4798_v54, %v4806_v40  ;;  %v14279_v47 = vcombine.high %v4813_v43, %v4821_v46  ;;  %v4901_v39 = vld [vmem:[#allocation11 + $0xfd0] sm:$0xff]  ;;  %v4894_v54 = vld [vmem:[#allocation11 + $0xf98] sm:$0xff] }
 0x4cc   :  { %11172 = vmatprep.subr.bf16.mxu1 %v14185_v48  ;;  %v14281_v48 = vcombine.high %v4814_v30, %v4822_v13  ;;  %v4902_v40 = vld [vmem:[#allocation11 + $0xfd8] sm:$0xff] }
 0x4ce   :  { %11009 = vmatpush1.bf16.msra.mxu0 %v14182_v53  ;;  %v14278_v53 = vcombine.low %v4813_v43, %v4821_v46  ;;  %v4909_v43 = vld [vmem:[#allocation11 + $0x1010] sm:$0xff] }
 0x4cf   :  { %11173 = vmatpush1.bf16.msra.mxu1 %v14184_v55  ;;  %11010 = vmatprep.subr.bf16.mxu0 %v14199_v27  ;;  %v14280_v55 = vcombine.low %v4814_v30, %v4822_v13  ;;  %v14295_v27 = vcombine.high %v4829_v1, %v4837_v50  ;;  %v4917_v46 = vld [vmem:[#allocation11 + $0x1050] sm:$0xff]  ;;  %v4910_v30 = vld [vmem:[#allocation11 + $0x1018] sm:$0xff] }
 0x4d0   :  { %11174 = vmatprep.subr.bf16.mxu1 %v14201_v61  ;;  %v14297_v61 = vcombine.high %v4830_v51, %v4838_v60  ;;  %v4918_v13 = vld [vmem:[#allocation11 + $0x1058] sm:$0xff] }
 0x4d2   :  { %11011 = vmatpush1.bf16.msra.mxu0 %v14198_v37  ;;  %v14294_v37 = vcombine.low %v4829_v1, %v4837_v50  ;;  %v4925_v1 = vld [vmem:[#allocation11 + $0x1090] sm:$0xff] }
 0x4d3   :  { %11175 = vmatpush1.bf16.msra.mxu1 %v14200_v6  ;;  %11012 = vmatprep.subr.bf16.mxu0 %v14215_v44  ;;  %v14296_v6 = vcombine.low %v4830_v51, %v4838_v60  ;;  %v14311_v44 = vcombine.high %v4845_v63, %v4853_v4  ;;  %v4933_v50 = vld [vmem:[#allocation11 + $0x10d0] sm:$0xff]  ;;  %v14374_v51 = vcombine.low %v4909_v43, %v4917_v46  ;;  %v4926_v60 = vld [vmem:[#allocation11 + $0x1098] sm:$0xff] }
 0x4d4   :  { %11176 = vmatprep.subr.bf16.mxu1 %v14217_v14  ;;  %v14313_v14 = vcombine.high %v4846_v0, %v4854_v5 }
 0x4d6   :  { %11013 = vmatpush1.bf16.msra.mxu0 %v14214_v10  ;;  %v14310_v10 = vcombine.low %v4845_v63, %v4853_v4  ;;  %v4949_v63 = vld [vmem:[#allocation11 + $0x1150] sm:$0xff] }
 0x4d7   :  { %11177 = vmatpush1.bf16.msra.mxu1 %v14216_v18  ;;  %11014 = vmatprep.subr.bf16.mxu0 %v14231_v19  ;;  %v14312_v18 = vcombine.low %v4846_v0, %v4854_v5  ;;  %v14327_v19 = vcombine.high %v4861_v7, %v4869_v12  ;;  %v4942_v0 = vld [vmem:[#allocation11 + $0x1118] sm:$0xff] }
 0x4d8   :  { %11178 = vmatprep.subr.bf16.mxu1 %v14233_v58  ;;  %v14329_v58 = vcombine.high %v4862_v8, %v4870_v9  ;;  %v4950_v5 = vld [vmem:[#allocation11 + $0x1158] sm:$0xff] }
 0x4da   :  { %11015 = vmatpush1.bf16.msra.mxu0 %v14230_v26  ;;  %v14326_v26 = vcombine.low %v4861_v7, %v4869_v12  ;;  %v4957_v7 = vld [vmem:[#allocation11 + $0x1190] sm:$0xff] }
 0x4db   :  { %11179 = vmatpush1.bf16.msra.mxu1 %v14232_v28  ;;  %11016 = vmatprep.subr.bf16.mxu0 %v14247_v3  ;;  %v14328_v28 = vcombine.low %v4862_v8, %v4870_v9  ;;  %v14343_v3 = vcombine.high %v4877_v24, %v4885_v21  ;;  %v4965_v12 = vld [vmem:[#allocation11 + $0x11d0] sm:$0xff]  ;;  %v4958_v8 = vld [vmem:[#allocation11 + $0x1198] sm:$0xff] }
 0x4dc   :  { %11180 = vmatprep.subr.bf16.mxu1 %v14249_v33  ;;  %v14345_v33 = vcombine.high %v4878_v22, %v4886_v25  ;;  %v4966_v9 = vld [vmem:[#allocation11 + $0x11d8] sm:$0xff] }
 0x4de   :  { %11017 = vmatpush1.bf16.msra.mxu0 %v14246_v41  ;;  %v14342_v41 = vcombine.low %v4877_v24, %v4885_v21  ;;  %v4973_v24 = vld [vmem:[#allocation11 + $0x1210] sm:$0xff] }
 0x4df   :  { %11181 = vmatpush1.bf16.msra.mxu1 %v14248_v62  ;;  %11018 = vmatprep.subr.bf16.mxu0 %v14263_v23  ;;  %v14344_v62 = vcombine.low %v4878_v22, %v4886_v25  ;;  %v14359_v23 = vcombine.high %v4893_v35, %v4901_v39  ;;  %v4981_v21 = vld [vmem:[#allocation11 + $0x1250] sm:$0xff]  ;;  %v4974_v22 = vld [vmem:[#allocation11 + $0x1218] sm:$0xff] }
 0x4e0   :  { %11182 = vmatprep.subr.bf16.mxu1 %v14265_v42  ;;  %v14361_v42 = vcombine.high %v4894_v54, %v4902_v40  ;;  %v4982_v25 = vld [vmem:[#allocation11 + $0x1258] sm:$0xff] }
 0x4e2   :  { %11019 = vmatpush1.bf16.msra.mxu0 %v14262_v16  ;;  %v14358_v16 = vcombine.low %v4893_v35, %v4901_v39  ;;  %v4989_v35 = vld [vmem:[#allocation11 + $0x1290] sm:$0xff] }
 0x4e3   :  { %11183 = vmatpush1.bf16.msra.mxu1 %v14264_v59  ;;  %11020 = vmatprep.subr.bf16.mxu0 %v14279_v47  ;;  %v14360_v59 = vcombine.low %v4894_v54, %v4902_v40  ;;  %v14375_v47 = vcombine.high %v4909_v43, %v4917_v46  ;;  %v4997_v39 = vld [vmem:[#allocation11 + $0x12d0] sm:$0xff]  ;;  %v4990_v54 = vld [vmem:[#allocation11 + $0x1298] sm:$0xff] }
 0x4e4   :  { %11184 = vmatprep.subr.bf16.mxu1 %v14281_v48  ;;  %v14377_v48 = vcombine.high %v4910_v30, %v4918_v13  ;;  %v4998_v40 = vld [vmem:[#allocation11 + $0x12d8] sm:$0xff]  ;;  %v5005_v43 = vld [vmem:[#allocation11 + $0x1310] sm:$0xff] }
 0x4e5   :  { %v5013_v46 = vld [vmem:[#allocation11 + $0x1350] sm:$0xff] }
 0x4e6   :  { %11021 = vmatpush1.bf16.msra.mxu0 %v14278_v53  ;;  %v4934_v53 = vld [vmem:[#allocation11 + $0x10d8] sm:$0xff] }
 0x4e7   :  { %11185 = vmatpush1.bf16.msra.mxu1 %v14280_v55  ;;  %11022 = vmatprep.subr.bf16.mxu0 %v14295_v27  ;;  %v14376_v55 = vcombine.low %v4910_v30, %v4918_v13  ;;  %v14391_v27 = vcombine.high %v4925_v1, %v4933_v50  ;;  %v14393_v4 = vcombine.high %v4926_v60, %v4934_v53  ;;  %v5006_v30 = vld [vmem:[#allocation11 + $0x1318] sm:$0xff] }
 0x4e8   :  { %11186 = vmatprep.subr.bf16.mxu1 %v14297_v61  ;;  %v4941_v61 = vld [vmem:[#allocation11 + $0x1110] sm:$0xff]  ;;  %v5014_v13 = vld [vmem:[#allocation11 + $0x1358] sm:$0xff] }
 0x4ea   :  { %11023 = vmatpush1.bf16.msra.mxu0 %v14294_v37  ;;  %v14390_v37 = vcombine.low %v4925_v1, %v4933_v50  ;;  %v5021_v1 = vld [vmem:[#allocation11 + $0x1390] sm:$0xff] }
 0x4eb   :  { %11187 = vmatpush1.bf16.msra.mxu1 %v14296_v6  ;;  %11024 = vmatprep.subr.bf16.mxu0 %v14311_v44  ;;  %v14392_v6 = vcombine.low %v4926_v60, %v4934_v53  ;;  %v14407_v44 = vcombine.high %v4941_v61, %v4949_v63  ;;  %v5029_v50 = vld [vmem:[#allocation11 + $0x13d0] sm:$0xff]  ;;  %v5030_v60 = vld [vmem:[#allocation11 + $0x13d8] sm:$0xff]  ;;  %v14470_v53 = vcombine.low %v5005_v43, %v5013_v46 }
 0x4ec   :  { %11188 = vmatprep.subr.bf16.mxu1 %v14313_v14  ;;  %v14409_v14 = vcombine.high %v4942_v0, %v4950_v5 }
 0x4ee   :  { %11025 = vmatpush1.bf16.msra.mxu0 %v14310_v10  ;;  %v14406_v10 = vcombine.low %v4941_v61, %v4949_v63  ;;  %v5037_v63 = vld [vmem:[#allocation11 + $0x1410] sm:$0xff] }
 0x4ef   :  { %11189 = vmatpush1.bf16.msra.mxu1 %v14312_v18  ;;  %11026 = vmatprep.subr.bf16.mxu0 %v14327_v19  ;;  %v14408_v18 = vcombine.low %v4942_v0, %v4950_v5  ;;  %v14423_v19 = vcombine.high %v4957_v7, %v4965_v12  ;;  %v5038_v0 = vld [vmem:[#allocation11 + $0x1418] sm:$0xff] }
 0x4f0   :  { %11190 = vmatprep.subr.bf16.mxu1 %v14329_v58  ;;  %v14425_v58 = vcombine.high %v4958_v8, %v4966_v9  ;;  %v5046_v5 = vld [vmem:[#allocation11 + $0x1458] sm:$0xff] }
 0x4f2   :  { %11027 = vmatpush1.bf16.msra.mxu0 %v14326_v26  ;;  %v14422_v26 = vcombine.low %v4957_v7, %v4965_v12  ;;  %v5053_v7 = vld [vmem:[#allocation11 + $0x1490] sm:$0xff] }
 0x4f3   :  { %11191 = vmatpush1.bf16.msra.mxu1 %v14328_v28  ;;  %11028 = vmatprep.subr.bf16.mxu0 %v14343_v3  ;;  %v14424_v28 = vcombine.low %v4958_v8, %v4966_v9  ;;  %v14439_v3 = vcombine.high %v4973_v24, %v4981_v21  ;;  %v5061_v12 = vld [vmem:[#allocation11 + $0x14d0] sm:$0xff]  ;;  %v5054_v8 = vld [vmem:[#allocation11 + $0x1498] sm:$0xff] }
 0x4f4   :  { %11192 = vmatprep.subr.bf16.mxu1 %v14345_v33  ;;  %v14441_v33 = vcombine.high %v4974_v22, %v4982_v25  ;;  %v5062_v9 = vld [vmem:[#allocation11 + $0x14d8] sm:$0xff] }
 0x4f6   :  { %11029 = vmatpush1.bf16.msra.mxu0 %v14342_v41  ;;  %v14438_v41 = vcombine.low %v4973_v24, %v4981_v21  ;;  %v5069_v24 = vld [vmem:[#allocation11 + $0x1510] sm:$0xff] }
 0x4f7   :  { %11193 = vmatpush1.bf16.msra.mxu1 %v14344_v62  ;;  %11030 = vmatprep.subr.bf16.mxu0 %v14359_v23  ;;  %v14440_v62 = vcombine.low %v4974_v22, %v4982_v25  ;;  %v14455_v23 = vcombine.high %v4989_v35, %v4997_v39  ;;  %v5077_v21 = vld [vmem:[#allocation11 + $0x1550] sm:$0xff]  ;;  %v5070_v22 = vld [vmem:[#allocation11 + $0x1518] sm:$0xff] }
 0x4f8   :  { %11194 = vmatprep.subr.bf16.mxu1 %v14361_v42  ;;  %v14457_v42 = vcombine.high %v4990_v54, %v4998_v40  ;;  %v5078_v25 = vld [vmem:[#allocation11 + $0x1558] sm:$0xff] }
 0x4fa   :  { %11031 = vmatpush1.bf16.msra.mxu0 %v14358_v16  ;;  %v14454_v16 = vcombine.low %v4989_v35, %v4997_v39  ;;  %v5085_v35 = vld [vmem:[#allocation11 + $0x1590] sm:$0xff] }
 0x4fb   :  { %11195 = vmatpush1.bf16.msra.mxu1 %v14360_v59  ;;  %11041 = vmatprep.subr.bf16.mxu0 %v14375_v47  ;;  %v14456_v59 = vcombine.low %v4990_v54, %v4998_v40  ;;  %v14471_v47 = vcombine.high %v5005_v43, %v5013_v46  ;;  %v5093_v39 = vld [vmem:[#allocation11 + $0x15d0] sm:$0xff]  ;;  %v5086_v54 = vld [vmem:[#allocation11 + $0x1598] sm:$0xff] }
 0x4fc   :  { %11205 = vmatprep.subr.bf16.mxu1 %v14377_v48  ;;  %v14473_v48 = vcombine.high %v5006_v30, %v5014_v13  ;;  %v5094_v40 = vld [vmem:[#allocation11 + $0x15d8] sm:$0xff]  ;;  %v5101_v43 = vld [vmem:[#allocation11 + $0x1610] sm:$0xff] }
 0x4fd   :  { %11033 = vmatmul.mubr.bf16.vlgmr.msra.gmra.mrb[16].mxu0 %v16200_v45  ;;  %v5109_v46 = vld [vmem:[#allocation11 + $0x1650] sm:$0xff] }
 0x4fe   :  { %11197 = vmatmul.mubr.bf16.vlgmr.msra.gmra.mrb[16].mxu1 %v16200_v45  ;;  %11042 = vmatpush1.bf16.msra.mxu0 %v14374_v51  ;;  %v5022_v51 = vld [vmem:[#allocation11 + $0x1398] sm:$0xff] }
 0x4ff   :  { %11073 = vmatprep.mubr.bf16.mxu0 %v16214_v36  ;;  %11206 = vmatpush1.bf16.msra.mxu1 %v14376_v55  ;;  %v14472_v55 = vcombine.low %v5006_v30, %v5014_v13  ;;  %v14489_v61 = vcombine.high %v5022_v51, %v5030_v60  ;;  %v5102_v30 = vld [vmem:[#allocation11 + $0x1618] sm:$0xff] }
 0x500   :  { %11237 = vmatprep.mubr.bf16.mxu1 %v16214_v36  ;;  %11043 = vmatprep.subr.bf16.mxu0 %v14391_v27  ;;  %v14487_v27 = vcombine.high %v5021_v1, %v5029_v50  ;;  %v5110_v13 = vld [vmem:[#allocation11 + $0x1658] sm:$0xff] }
 0x501   :  { %11207 = vmatprep.subr.bf16.mxu1 %v14393_v4  ;;  %v5045_v4 = vld [vmem:[#allocation11 + $0x1450] sm:$0xff] }
 0x502   :  { %11044 = vmatpush1.bf16.msra.mxu0 %v14390_v37  ;;  %v14486_v37 = vcombine.low %v5021_v1, %v5029_v50  ;;  %v5117_v1 = vld [vmem:[#allocation11 + $0x1690] sm:$0xff] }
 0x503   :  { %11208 = vmatpush1.bf16.msra.mxu1 %v14392_v6  ;;  %11045 = vmatprep.subr.bf16.mxu0 %v14407_v44  ;;  %v14488_v6 = vcombine.low %v5022_v51, %v5030_v60  ;;  %v14503_v44 = vcombine.high %v5037_v63, %v5045_v4  ;;  %v5125_v50 = vld [vmem:[#allocation11 + $0x16d0] sm:$0xff]  ;;  %v5118_v51 = vld [vmem:[#allocation11 + $0x1698] sm:$0xff] }
 0x504   :  { %11209 = vmatprep.subr.bf16.mxu1 %v14409_v14  ;;  %v14505_v14 = vcombine.high %v5038_v0, %v5046_v5  ;;  %v5126_v60 = vld [vmem:[#allocation11 + $0x16d8] sm:$0xff] }
 0x506   :  { %11046 = vmatpush1.bf16.msra.mxu0 %v14406_v10  ;;  %v14502_v10 = vcombine.low %v5037_v63, %v5045_v4  ;;  %v5133_v63 = vld [vmem:[#allocation11 + $0x1710] sm:$0xff] }
 0x507   :  { %11210 = vmatpush1.bf16.msra.mxu1 %v14408_v18  ;;  %11047 = vmatprep.subr.bf16.mxu0 %v14423_v19  ;;  %v14504_v18 = vcombine.low %v5038_v0, %v5046_v5  ;;  %v14519_v19 = vcombine.high %v5053_v7, %v5061_v12  ;;  %v5141_v4 = vld [vmem:[#allocation11 + $0x1750] sm:$0xff]  ;;  %v5134_v0 = vld [vmem:[#allocation11 + $0x1718] sm:$0xff] }
 0x508   :  { %11211 = vmatprep.subr.bf16.mxu1 %v14425_v58  ;;  %v14521_v58 = vcombine.high %v5054_v8, %v5062_v9  ;;  %v5142_v5 = vld [vmem:[#allocation11 + $0x1758] sm:$0xff] }
 0x50a   :  { %11048 = vmatpush1.bf16.msra.mxu0 %v14422_v26  ;;  %v14518_v26 = vcombine.low %v5053_v7, %v5061_v12  ;;  %v5149_v7 = vld [vmem:[#allocation11 + $0x1790] sm:$0xff] }
 0x50b   :  { %11212 = vmatpush1.bf16.msra.mxu1 %v14424_v28  ;;  %11049 = vmatprep.subr.bf16.mxu0 %v14439_v3  ;;  %v14520_v28 = vcombine.low %v5054_v8, %v5062_v9  ;;  %v14535_v3 = vcombine.high %v5069_v24, %v5077_v21  ;;  %v5157_v12 = vld [vmem:[#allocation11 + $0x17d0] sm:$0xff]  ;;  %v5150_v8 = vld [vmem:[#allocation11 + $0x1798] sm:$0xff] }
 0x50c   :  { %11213 = vmatprep.subr.bf16.mxu1 %v14441_v33  ;;  %v14537_v33 = vcombine.high %v5070_v22, %v5078_v25  ;;  %v5158_v9 = vld [vmem:[#allocation11 + $0x17d8] sm:$0xff] }
 0x50e   :  { %11050 = vmatpush1.bf16.msra.mxu0 %v14438_v41  ;;  %v14534_v41 = vcombine.low %v5069_v24, %v5077_v21  ;;  %v5165_v24 = vld [vmem:[#allocation11 + $0x1810] sm:$0xff] }
 0x50f   :  { %11214 = vmatpush1.bf16.msra.mxu1 %v14440_v62  ;;  %11051 = vmatprep.subr.bf16.mxu0 %v14455_v23  ;;  %v14536_v62 = vcombine.low %v5070_v22, %v5078_v25  ;;  %v14551_v23 = vcombine.high %v5085_v35, %v5093_v39  ;;  %v5173_v21 = vld [vmem:[#allocation11 + $0x1850] sm:$0xff]  ;;  %v5166_v22 = vld [vmem:[#allocation11 + $0x1818] sm:$0xff] }
 0x510   :  { %11215 = vmatprep.subr.bf16.mxu1 %v14457_v42  ;;  %v14553_v42 = vcombine.high %v5086_v54, %v5094_v40  ;;  %v5174_v25 = vld [vmem:[#allocation11 + $0x1858] sm:$0xff] }
 0x512   :  { %11052 = vmatpush1.bf16.msra.mxu0 %v14454_v16  ;;  %v14550_v16 = vcombine.low %v5085_v35, %v5093_v39  ;;  %v5181_v35 = vld [vmem:[#allocation11 + $0x1890] sm:$0xff] }
 0x513   :  { %11216 = vmatpush1.bf16.msra.mxu1 %v14456_v59  ;;  %11053 = vmatprep.subr.bf16.mxu0 %v14471_v47  ;;  %v14552_v59 = vcombine.low %v5086_v54, %v5094_v40  ;;  %v14567_v47 = vcombine.high %v5101_v43, %v5109_v46  ;;  %v5189_v39 = vld [vmem:[#allocation11 + $0x18d0] sm:$0xff]  ;;  %v14630_v54 = vcombine.low %v5165_v24, %v5173_v21  ;;  %v5182_v40 = vld [vmem:[#allocation11 + $0x1898] sm:$0xff] }
 0x514   :  { %11217 = vmatprep.subr.bf16.mxu1 %v14473_v48  ;;  %v14569_v48 = vcombine.high %v5102_v30, %v5110_v13 }
 0x516   :  { %11054 = vmatpush1.bf16.msra.mxu0 %v14470_v53  ;;  %v14566_v53 = vcombine.low %v5101_v43, %v5109_v46  ;;  %v5205_v43 = vld [vmem:[#allocation11 + $0x1950] sm:$0xff] }
 0x517   :  { %11218 = vmatpush1.bf16.msra.mxu1 %v14472_v55  ;;  %11055 = vmatprep.subr.bf16.mxu0 %v14487_v27  ;;  %v14568_v55 = vcombine.low %v5102_v30, %v5110_v13  ;;  %v14583_v27 = vcombine.high %v5117_v1, %v5125_v50  ;;  %v5198_v30 = vld [vmem:[#allocation11 + $0x1918] sm:$0xff] }
 0x518   :  { %11219 = vmatprep.subr.bf16.mxu1 %v14489_v61  ;;  %v14585_v61 = vcombine.high %v5118_v51, %v5126_v60  ;;  %v5206_v13 = vld [vmem:[#allocation11 + $0x1958] sm:$0xff] }
 0x51a   :  { %11056 = vmatpush1.bf16.msra.mxu0 %v14486_v37  ;;  %v14582_v37 = vcombine.low %v5117_v1, %v5125_v50  ;;  %v5213_v1 = vld [vmem:[#allocation11 + $0x1990] sm:$0xff] }
 0x51b   :  { %11220 = vmatpush1.bf16.msra.mxu1 %v14488_v6  ;;  %11057 = vmatprep.subr.bf16.mxu0 %v14503_v44  ;;  %v14584_v6 = vcombine.low %v5118_v51, %v5126_v60  ;;  %v14599_v44 = vcombine.high %v5133_v63, %v5141_v4  ;;  %v5221_v50 = vld [vmem:[#allocation11 + $0x19d0] sm:$0xff]  ;;  %v5214_v51 = vld [vmem:[#allocation11 + $0x1998] sm:$0xff] }
 0x51c   :  { %11221 = vmatprep.subr.bf16.mxu1 %v14505_v14  ;;  %v14601_v14 = vcombine.high %v5134_v0, %v5142_v5  ;;  %v5222_v60 = vld [vmem:[#allocation11 + $0x19d8] sm:$0xff] }
 0x51e   :  { %11058 = vmatpush1.bf16.msra.mxu0 %v14502_v10  ;;  %v14598_v10 = vcombine.low %v5133_v63, %v5141_v4  ;;  %v5229_v63 = vld [vmem:[#allocation11 + $0x1a10] sm:$0xff] }
 0x51f   :  { %11222 = vmatpush1.bf16.msra.mxu1 %v14504_v18  ;;  %11059 = vmatprep.subr.bf16.mxu0 %v14519_v19  ;;  %v14600_v18 = vcombine.low %v5134_v0, %v5142_v5  ;;  %v14615_v19 = vcombine.high %v5149_v7, %v5157_v12  ;;  %v5237_v4 = vld [vmem:[#allocation11 + $0x1a50] sm:$0xff]  ;;  %v5230_v0 = vld [vmem:[#allocation11 + $0x1a18] sm:$0xff] }
 0x520   :  { %11223 = vmatprep.subr.bf16.mxu1 %v14521_v58  ;;  %v14617_v58 = vcombine.high %v5150_v8, %v5158_v9  ;;  %v5238_v5 = vld [vmem:[#allocation11 + $0x1a58] sm:$0xff] }
 0x522   :  { %11060 = vmatpush1.bf16.msra.mxu0 %v14518_v26  ;;  %v14614_v26 = vcombine.low %v5149_v7, %v5157_v12  ;;  %v5245_v7 = vld [vmem:[#allocation11 + $0x1a90] sm:$0xff] }
 0x523   :  { %11224 = vmatpush1.bf16.msra.mxu1 %v14520_v28  ;;  %11061 = vmatprep.subr.bf16.mxu0 %v14535_v3  ;;  %v14616_v28 = vcombine.low %v5150_v8, %v5158_v9  ;;  %v14631_v3 = vcombine.high %v5165_v24, %v5173_v21  ;;  %v5253_v12 = vld [vmem:[#allocation11 + $0x1ad0] sm:$0xff]  ;;  %v5246_v8 = vld [vmem:[#allocation11 + $0x1a98] sm:$0xff] }
 0x524   :  { %11225 = vmatprep.subr.bf16.mxu1 %v14537_v33  ;;  %v14633_v33 = vcombine.high %v5166_v22, %v5174_v25  ;;  %v5254_v9 = vld [vmem:[#allocation11 + $0x1ad8] sm:$0xff]  ;;  %v5261_v24 = vld [vmem:[#allocation11 + $0x1b10] sm:$0xff] }
 0x525   :  { %v5269_v21 = vld [vmem:[#allocation11 + $0x1b50] sm:$0xff] }
 0x526   :  { %11062 = vmatpush1.bf16.msra.mxu0 %v14534_v41  ;;  %v5190_v41 = vld [vmem:[#allocation11 + $0x18d8] sm:$0xff] }
 0x527   :  { %11226 = vmatpush1.bf16.msra.mxu1 %v14536_v62  ;;  %11063 = vmatprep.subr.bf16.mxu0 %v14551_v23  ;;  %v14632_v62 = vcombine.low %v5166_v22, %v5174_v25  ;;  %v14647_v23 = vcombine.high %v5181_v35, %v5189_v39  ;;  %v14649_v46 = vcombine.high %v5182_v40, %v5190_v41  ;;  %v5262_v22 = vld [vmem:[#allocation11 + $0x1b18] sm:$0xff] }
 0x528   :  { %11227 = vmatprep.subr.bf16.mxu1 %v14553_v42  ;;  %v5197_v42 = vld [vmem:[#allocation11 + $0x1910] sm:$0xff]  ;;  %v5270_v25 = vld [vmem:[#allocation11 + $0x1b58] sm:$0xff] }
 0x52a   :  { %11064 = vmatpush1.bf16.msra.mxu0 %v14550_v16  ;;  %v14646_v16 = vcombine.low %v5181_v35, %v5189_v39  ;;  %v14729_v39 = vcombine.high %v5262_v22, %v5270_v25 }
 0x52b   :  { %11228 = vmatpush1.bf16.msra.mxu1 %v14552_v59  ;;  %11065 = vmatprep.subr.bf16.mxu0 %v14567_v47  ;;  %v14648_v59 = vcombine.low %v5182_v40, %v5190_v41  ;;  %v14663_v47 = vcombine.high %v5197_v42, %v5205_v43  ;;  %v5285_v40 = vld [vmem:[#allocation11 + $0x1bd0] sm:$0xff] }
 0x52c   :  { %11229 = vmatprep.subr.bf16.mxu1 %v14569_v48  ;;  %v14665_v48 = vcombine.high %v5198_v30, %v5206_v13 }
 0x52e   :  { %11066 = vmatpush1.bf16.msra.mxu0 %v14566_v53  ;;  %v14662_v53 = vcombine.low %v5197_v42, %v5205_v43  ;;  %v5286_v42 = vld [vmem:[#allocation11 + $0x1bd8] sm:$0xff] }
 0x52f   :  { %11230 = vmatpush1.bf16.msra.mxu1 %v14568_v55  ;;  %11067 = vmatprep.subr.bf16.mxu0 %v14583_v27  ;;  %v14664_v55 = vcombine.low %v5198_v30, %v5206_v13  ;;  %v14679_v27 = vcombine.high %v5213_v1, %v5221_v50  ;;  %v14726_v30 = vcombine.low %v5261_v24, %v5269_v21 }
 0x530   :  { %11231 = vmatprep.subr.bf16.mxu1 %v14585_v61  ;;  %v14681_v61 = vcombine.high %v5214_v51, %v5222_v60 }
 0x532   :  { %11068 = vmatpush1.bf16.msra.mxu0 %v14582_v37  ;;  %v14678_v37 = vcombine.low %v5213_v1, %v5221_v50  ;;  %v5293_v1 = vld [vmem:[#allocation11 + $0x1c10] sm:$0xff] }
 0x533   :  { %11232 = vmatpush1.bf16.msra.mxu1 %v14584_v6  ;;  %11069 = vmatprep.subr.bf16.mxu0 %v14599_v44  ;;  %v14680_v6 = vcombine.low %v5214_v51, %v5222_v60  ;;  %v14695_v44 = vcombine.high %v5229_v63, %v5237_v4  ;;  %v5301_v50 = vld [vmem:[#allocation11 + $0x1c50] sm:$0xff]  ;;  %v5294_v51 = vld [vmem:[#allocation11 + $0x1c18] sm:$0xff] }
 0x534   :  { %11233 = vmatprep.subr.bf16.mxu1 %v14601_v14  ;;  %v14697_v14 = vcombine.high %v5230_v0, %v5238_v5  ;;  %v5302_v60 = vld [vmem:[#allocation11 + $0x1c58] sm:$0xff] }
 0x536   :  { %11070 = vmatpush1.bf16.msra.mxu0 %v14598_v10  ;;  %v14694_v10 = vcombine.low %v5229_v63, %v5237_v4  ;;  %v5309_v63 = vld [vmem:[#allocation11 + $0x1c90] sm:$0xff] }
 0x537   :  { %11234 = vmatpush1.bf16.msra.mxu1 %v14600_v18  ;;  %11071 = vmatprep.subr.bf16.mxu0 %v14615_v19  ;;  %v14696_v18 = vcombine.low %v5230_v0, %v5238_v5  ;;  %v14711_v19 = vcombine.high %v5245_v7, %v5253_v12  ;;  %v5317_v4 = vld [vmem:[#allocation11 + $0x1cd0] sm:$0xff]  ;;  %v5310_v0 = vld [vmem:[#allocation11 + $0x1c98] sm:$0xff] }
 0x538   :  { %11235 = vmatprep.subr.bf16.mxu1 %v14617_v58  ;;  %v14713_v58 = vcombine.high %v5246_v8, %v5254_v9  ;;  %v5318_v5 = vld [vmem:[#allocation11 + $0x1cd8] sm:$0xff] }
 0x53a   :  { %11072 = vmatpush1.bf16.msra.mxu0 %v14614_v26  ;;  %v14710_v26 = vcombine.low %v5245_v7, %v5253_v12  ;;  %v5325_v7 = vld [vmem:[#allocation11 + $0x1d10] sm:$0xff] }
 0x53b   :  { %11236 = vmatpush1.bf16.msra.mxu1 %v14616_v28  ;;  %11082 = vmatprep.subr.bf16.mxu0 %v14631_v3  ;;  %v14712_v28 = vcombine.low %v5246_v8, %v5254_v9  ;;  %v14727_v3 = vcombine.high %v5261_v24, %v5269_v21  ;;  %v5333_v12 = vld [vmem:[#allocation11 + $0x1d50] sm:$0xff]  ;;  %v5326_v8 = vld [vmem:[#allocation11 + $0x1d18] sm:$0xff] }
 0x53c   :  { %11246 = vmatprep.subr.bf16.mxu1 %v14633_v33  ;;  %v5334_v9 = vld [vmem:[#allocation11 + $0x1d58] sm:$0xff]  ;;  %v5341_v24 = vld [vmem:[#allocation11 + $0x1d90] sm:$0xff] }
 0x53d   :  { %11074 = vmatmul.mubr.bf16.vlgmr.msra.gmra.mrb[16].mxu0 %v16216_v49  ;;  %v5349_v21 = vld [vmem:[#allocation11 + $0x1dd0] sm:$0xff] }
 0x53e   :  { %11238 = vmatmul.mubr.bf16.vlgmr.msra.gmra.mrb[16].mxu1 %v16216_v49  ;;  %11083 = vmatpush1.bf16.msra.mxu0 %v14630_v54  ;;  %v5277_v54 = vld [vmem:[#allocation11 + $0x1b90] sm:$0xff] }
 0x53f   :  { %11114 = vmatprep.mubr.bf16.mxu0 %v16220_v57  ;;  %11247 = vmatpush1.bf16.msra.mxu1 %v14632_v62 }
 0x540   :  { %11278 = vmatprep.mubr.bf16.mxu1 %v16220_v57  ;;  %11084 = vmatprep.subr.bf16.mxu0 %v14647_v23  ;;  %v5278_v23 = vld [vmem:[#allocation11 + $0x1b98] sm:$0xff] }
 0x541   :  { %11248 = vmatprep.subr.bf16.mxu1 %v14649_v46 }
 0x542   :  { %11085 = vmatpush1.bf16.msra.mxu0 %v14646_v16 }
 0x543   :  { %11249 = vmatpush1.bf16.msra.mxu1 %v14648_v59  ;;  %11086 = vmatprep.subr.bf16.mxu0 %v14663_v47  ;;  %v14728_v59 = vcombine.low %v5262_v22, %v5270_v25  ;;  %v14743_v47 = vcombine.high %v5277_v54, %v5285_v40  ;;  %v5342_v22 = vld [vmem:[#allocation11 + $0x1d98] sm:$0xff] }
 0x544   :  { %11250 = vmatprep.subr.bf16.mxu1 %v14665_v48  ;;  %v14745_v48 = vcombine.high %v5278_v23, %v5286_v42  ;;  %v5350_v25 = vld [vmem:[#allocation11 + $0x1dd8] sm:$0xff] }
 0x546   :  { %11087 = vmatpush1.bf16.msra.mxu0 %v14662_v53  ;;  %v14742_v53 = vcombine.low %v5277_v54, %v5285_v40  ;;  %v5357_v54 = vld [vmem:[#allocation11 + $0x1e10] sm:$0xff] }
 0x547   :  { %11251 = vmatpush1.bf16.msra.mxu1 %v14664_v55  ;;  %11088 = vmatprep.subr.bf16.mxu0 %v14679_v27  ;;  %v14744_v55 = vcombine.low %v5278_v23, %v5286_v42  ;;  %v14759_v27 = vcombine.high %v5293_v1, %v5301_v50  ;;  %v5365_v40 = vld [vmem:[#allocation11 + $0x1e50] sm:$0xff]  ;;  %v5358_v23 = vld [vmem:[#allocation11 + $0x1e18] sm:$0xff] }
 0x548   :  { %11252 = vmatprep.subr.bf16.mxu1 %v14681_v61  ;;  %v14761_v61 = vcombine.high %v5294_v51, %v5302_v60  ;;  %v5366_v42 = vld [vmem:[#allocation11 + $0x1e58] sm:$0xff] }
 0x54a   :  { %11089 = vmatpush1.bf16.msra.mxu0 %v14678_v37  ;;  %v14758_v37 = vcombine.low %v5293_v1, %v5301_v50  ;;  %v14822_v1 = vcombine.low %v5357_v54, %v5365_v40  ;;  %v14824_v50 = vcombine.low %v5358_v23, %v5366_v42 }
 0x54b   :  { %11253 = vmatpush1.bf16.msra.mxu1 %v14680_v6  ;;  %11090 = vmatprep.subr.bf16.mxu0 %v14695_v44  ;;  %v14760_v6 = vcombine.low %v5294_v51, %v5302_v60  ;;  %v14775_v44 = vcombine.high %v5309_v63, %v5317_v4 }
 0x54c   :  { %11254 = vmatprep.subr.bf16.mxu1 %v14697_v14  ;;  %v14777_v14 = vcombine.high %v5310_v0, %v5318_v5 }
 0x54e   :  { %11091 = vmatpush1.bf16.msra.mxu0 %v14694_v10  ;;  %v14774_v10 = vcombine.low %v5309_v63, %v5317_v4 }
 0x54f   :  { %11255 = vmatpush1.bf16.msra.mxu1 %v14696_v18  ;;  %11092 = vmatprep.subr.bf16.mxu0 %v14711_v19  ;;  %v14776_v18 = vcombine.low %v5310_v0, %v5318_v5  ;;  %v14791_v19 = vcombine.high %v5325_v7, %v5333_v12 }
 0x550   :  { %v16247_v33 = vpop.f32.mrb[12].mxu0  ;;  %v16249_v35 = vpop.f32.mrb[12].mxu1  ;;  %11256 = vmatprep.subr.bf16.mxu1 %v14713_v58  ;;  %v14793_v58 = vcombine.high %v5326_v8, %v5334_v9 }
 0x551   :  { %v16251_v41 = vpop.f32.mrb[13].mxu0  ;;  %v16253_v62 = vpop.f32.mrb[13].mxu1 }
 0x552   :  { %v10792_v43 = vpop.f32.mrb[14].mxu0  ;;  %v10956_v46 = vpop.f32.mrb[14].mxu1  ;;  %11093 = vmatpush1.bf16.msra.mxu0 %v14710_v26  ;;  %v14790_v26 = vcombine.low %v5325_v7, %v5333_v12 }
 0x553   :  { %11257 = vmatpush1.bf16.msra.mxu1 %v14712_v28  ;;  %v10793_v13 = vpop.f32.mrb[15].mxu0  ;;  %v10957_v16 = vpop.f32.mrb[15].mxu1  ;;  %11094 = vmatprep.subr.bf16.mxu0 %v14727_v3  ;;  %v14792_v28 = vcombine.low %v5326_v8, %v5334_v9  ;;  %v14807_v3 = vcombine.high %v5341_v24, %v5349_v21  ;;  %v14806_v43 = vcombine.low %v5341_v24, %v5349_v21 }
 0x554   :  { %11258 = vmatprep.subr.bf16.mxu1 %v14729_v39  ;;  %v14809_v39 = vcombine.high %v5342_v22, %v5350_v25  ;;  %v14808_v46 = vcombine.low %v5342_v22, %v5350_v25  ;;  %v14825_v13 = vcombine.high %v5358_v23, %v5366_v42  ;;  %v5373_v16 = vld [vmem:[#allocation11 + $0x1e90] sm:$0xff]  ;;  %v4431_v42 = vld [vmem:[#allocation11 + $0x120] sm:$0xff] }
 0x556   :  { %11095 = vmatpush1.bf16.msra.mxu0 %v14726_v30  ;;  %v14823_v30 = vcombine.high %v5357_v54, %v5365_v40  ;;  %v4424_v54 = vld [vmem:[#allocation11 + $0xe8] sm:$0xff] }
 0x557   :  { %11259 = vmatpush1.bf16.msra.mxu1 %v14728_v59  ;;  %11096 = vmatprep.subr.bf16.mxu0 %v14743_v47  ;;  %v5381_v59 = vld [vmem:[#allocation11 + $0x1ed0] sm:$0xff]  ;;  %v5374_v47 = vld [vmem:[#allocation11 + $0x1e98] sm:$0xff] }
 0x558   :  { %11260 = vmatprep.subr.bf16.mxu1 %v14745_v48  ;;  %v5382_v48 = vld [vmem:[#allocation11 + $0x1ed8] sm:$0xff]  ;;  %v14839_v51 = vcombine.high %v5373_v16, %v5381_v59  ;;  %v14838_v63 = vcombine.low %v5373_v16, %v5381_v59 }
 0x559   :  { %v14841_v60 = vcombine.high %v5374_v47, %v5382_v48  ;;  %v14840_v4 = vcombine.low %v5374_v47, %v5382_v48 }
 0x55a   :  { %11097 = vmatpush1.bf16.msra.mxu0 %v14742_v53  ;;  %v5389_v53 = vld [vmem:[#allocation11 + $0x1f10] sm:$0xff] }
 0x55b   :  { %11261 = vmatpush1.bf16.msra.mxu1 %v14744_v55  ;;  %11098 = vmatprep.subr.bf16.mxu0 %v14759_v27  ;;  %v5397_v55 = vld [vmem:[#allocation11 + $0x1f50] sm:$0xff]  ;;  %v5390_v27 = vld [vmem:[#allocation11 + $0x1f18] sm:$0xff] }
 0x55c   :  { %11262 = vmatprep.subr.bf16.mxu1 %v14761_v61  ;;  %v5398_v61 = vld [vmem:[#allocation11 + $0x1f58] sm:$0xff]  ;;  %v14855_v0 = vcombine.high %v5389_v53, %v5397_v55  ;;  %v14854_v7 = vcombine.low %v5389_v53, %v5397_v55 }
 0x55d   :  { %v14857_v5 = vcombine.high %v5390_v27, %v5398_v61  ;;  %v14856_v12 = vcombine.low %v5390_v27, %v5398_v61 }
 0x55e   :  { %11099 = vmatpush1.bf16.msra.mxu0 %v14758_v37  ;;  %v5405_v37 = vld [vmem:[#allocation11 + $0x1f90] sm:$0xff] }
 0x55f   :  { %11263 = vmatpush1.bf16.msra.mxu1 %v14760_v6  ;;  %11100 = vmatprep.subr.bf16.mxu0 %v14775_v44  ;;  %v5413_v6 = vld [vmem:[#allocation11 + $0x1fd0] sm:$0xff]  ;;  %v5406_v44 = vld [vmem:[#allocation11 + $0x1f98] sm:$0xff] }
 0x560   :  { %11264 = vmatprep.subr.bf16.mxu1 %v14777_v14  ;;  %v5414_v14 = vld [vmem:[#allocation11 + $0x1fd8] sm:$0xff]  ;;  %v14871_v8 = vcombine.high %v5405_v37, %v5413_v6  ;;  %v14870_v24 = vcombine.low %v5405_v37, %v5413_v6 }
 0x561   :  { %v14873_v9 = vcombine.high %v5406_v44, %v5414_v14  ;;  %v14872_v21 = vcombine.low %v5406_v44, %v5414_v14 }
 0x562   :  { %11101 = vmatpush1.bf16.msra.mxu0 %v14774_v10  ;;  %v4399_v10 = vld [vmem:[#allocation11 + $0x20] sm:$0xff] }
 0x563   :  { %11265 = vmatpush1.bf16.msra.mxu1 %v14776_v18  ;;  %11102 = vmatprep.subr.bf16.mxu0 %v14791_v19  ;;  %v4407_v18 = vld [vmem:[#allocation11 + $0x60] sm:$0xff]  ;;  %v4400_v19 = vld [vmem:[#allocation11 + $0x28] sm:$0xff] }
 0x564   :  { %11266 = vmatprep.subr.bf16.mxu1 %v14793_v58  ;;  %v4408_v58 = vld [vmem:[#allocation11 + $0x68] sm:$0xff]  ;;  %v13867_v22 = vcombine.high %v4399_v10, %v4407_v18 }
 0x565   :  { %v13869_v25 = vcombine.high %v4400_v19, %v4408_v58  ;;  %v13868_v40 = vcombine.low %v4400_v19, %v4408_v58 }
 0x566   :  { %11103 = vmatpush1.bf16.msra.mxu0 %v14790_v26  ;;  %v4415_v26 = vld [vmem:[#allocation11 + $0xa0] sm:$0xff] }
 0x567   :  { %11267 = vmatpush1.bf16.msra.mxu1 %v14792_v28  ;;  %11104 = vmatprep.subr.bf16.mxu0 %v14807_v3  ;;  %v4423_v28 = vld [vmem:[#allocation11 + $0xe0] sm:$0xff]  ;;  %v13866_v3 = vcombine.low %v4399_v10, %v4407_v18 }
 0x568   :  { %11268 = vmatprep.subr.bf16.mxu1 %v14809_v39  ;;  %v4416_v39 = vld [vmem:[#allocation11 + $0xa8] sm:$0xff]  ;;  %v13883_v23 = vcombine.high %v4415_v26, %v4423_v28  ;;  %v13882_v16 = vcombine.low %v4415_v26, %v4423_v28 }
 0x569   :  { %v13884_v59 = vcombine.low %v4416_v39, %v4424_v54 }
 0x56a   :  { %11105 = vmatpush1.bf16.msra.mxu0 %v14806_v43  ;;  %v4439_v43 = vld [vmem:[#allocation11 + $0x160] sm:$0xff] }
 0x56b   :  { %11269 = vmatpush1.bf16.msra.mxu1 %v14808_v46  ;;  %11106 = vmatprep.subr.bf16.mxu0 %v14823_v30  ;;  %v13885_v46 = vcombine.high %v4416_v39, %v4424_v54  ;;  %v4432_v30 = vld [vmem:[#allocation11 + $0x128] sm:$0xff]  ;;  %v13899_v47 = vcombine.high %v4431_v42, %v4439_v43  ;;  %v13898_v53 = vcombine.low %v4431_v42, %v4439_v43  ;;  %v4511_v54 = vld [vmem:[#allocation11 + $0x3a0] sm:$0xff] }
 0x56c   :  { %11270 = vmatprep.subr.bf16.mxu1 %v14825_v13  ;;  %v4440_v13 = vld [vmem:[#allocation11 + $0x168] sm:$0xff] }
 0x56d   :  { %v13901_v48 = vcombine.high %v4432_v30, %v4440_v13  ;;  %v13900_v55 = vcombine.low %v4432_v30, %v4440_v13  ;;  %v4520_v42 = vld [vmem:[#allocation11 + $0x3e8] sm:$0xff] }
 0x56e   :  { %11107 = vmatpush1.bf16.msra.mxu0 %v14822_v1  ;;  %v4447_v1 = vld [vmem:[#allocation11 + $0x1a0] sm:$0xff] }
 0x56f   :  { %11271 = vmatpush1.bf16.msra.mxu1 %v14824_v50  ;;  %11108 = vmatprep.subr.bf16.mxu0 %v14839_v51  ;;  %v4455_v50 = vld [vmem:[#allocation11 + $0x1e0] sm:$0xff]  ;;  %v4448_v51 = vld [vmem:[#allocation11 + $0x1a8] sm:$0xff] }
 0x570   :  { %11272 = vmatprep.subr.bf16.mxu1 %v14841_v60  ;;  %v4456_v60 = vld [vmem:[#allocation11 + $0x1e8] sm:$0xff]  ;;  %v13915_v27 = vcombine.high %v4447_v1, %v4455_v50  ;;  %v13914_v37 = vcombine.low %v4447_v1, %v4455_v50 }
 0x571   :  { %v13917_v61 = vcombine.high %v4448_v51, %v4456_v60  ;;  %v13916_v6 = vcombine.low %v4448_v51, %v4456_v60 }
 0x572   :  { %11109 = vmatpush1.bf16.msra.mxu0 %v14838_v63  ;;  %v4463_v63 = vld [vmem:[#allocation11 + $0x220] sm:$0xff] }
 0x573   :  { %11273 = vmatpush1.bf16.msra.mxu1 %v14840_v4  ;;  %11110 = vmatprep.subr.bf16.mxu0 %v14855_v0  ;;  %v4471_v4 = vld [vmem:[#allocation11 + $0x260] sm:$0xff]  ;;  %v4464_v0 = vld [vmem:[#allocation11 + $0x228] sm:$0xff] }
 0x574   :  { %11274 = vmatprep.subr.bf16.mxu1 %v14857_v5  ;;  %v4472_v5 = vld [vmem:[#allocation11 + $0x268] sm:$0xff]  ;;  %v13931_v44 = vcombine.high %v4463_v63, %v4471_v4  ;;  %v13930_v10 = vcombine.low %v4463_v63, %v4471_v4 }
 0x575   :  { %v13933_v14 = vcombine.high %v4464_v0, %v4472_v5  ;;  %v13932_v18 = vcombine.low %v4464_v0, %v4472_v5 }
 0x576   :  { %11111 = vmatpush1.bf16.msra.mxu0 %v14854_v7  ;;  %v4479_v7 = vld [vmem:[#allocation11 + $0x2a0] sm:$0xff] }
 0x577   :  { %11275 = vmatpush1.bf16.msra.mxu1 %v14856_v12  ;;  %11112 = vmatprep.subr.bf16.mxu0 %v14871_v8  ;;  %v4487_v12 = vld [vmem:[#allocation11 + $0x2e0] sm:$0xff]  ;;  %v4480_v8 = vld [vmem:[#allocation11 + $0x2a8] sm:$0xff] }
 0x578   :  { %11276 = vmatprep.subr.bf16.mxu1 %v14873_v9  ;;  %v4488_v9 = vld [vmem:[#allocation11 + $0x2e8] sm:$0xff]  ;;  %v13947_v19 = vcombine.high %v4479_v7, %v4487_v12  ;;  %v13946_v26 = vcombine.low %v4479_v7, %v4487_v12 }
 0x579   :  { %v13949_v58 = vcombine.high %v4480_v8, %v4488_v9  ;;  %v13948_v28 = vcombine.low %v4480_v8, %v4488_v9 }
 0x57a   :  { %11113 = vmatpush1.bf16.msra.mxu0 %v14870_v24  ;;  %v4495_v24 = vld [vmem:[#allocation11 + $0x320] sm:$0xff] }
 0x57b   :  { %11277 = vmatpush1.bf16.msra.mxu1 %v14872_v21  ;;  %11287 = vmatprep.subr.bf16.mxu0 %v13867_v22  ;;  %v4503_v21 = vld [vmem:[#allocation11 + $0x360] sm:$0xff]  ;;  %v4496_v22 = vld [vmem:[#allocation11 + $0x328] sm:$0xff] }
 0x57c   :  { %11451 = vmatprep.subr.bf16.mxu1 %v13869_v25  ;;  %v4504_v25 = vld [vmem:[#allocation11 + $0x368] sm:$0xff]  ;;  %v13962_v43 = vcombine.low %v4495_v24, %v4503_v21 }
 0x57d   :  { %11115 = vmatmul.mubr.bf16.vlgmr.msra.gmra.mrb[16].mxu0 %v16229_v32  ;;  %v13965_v39 = vcombine.high %v4496_v22, %v4504_v25 }
 0x57e   :  { %11279 = vmatmul.mubr.bf16.vlgmr.msra.gmra.mrb[16].mxu1 %v16229_v32  ;;  %11288 = vmatpush1.bf16.msra.mxu0 %v13866_v3  ;;  %v13963_v3 = vcombine.high %v4495_v24, %v4503_v21 }
 0x57f   :  { %11319 = vmatprep.mubr.bf16.mxu0 %v16177_v52  ;;  %11452 = vmatpush1.bf16.msra.mxu1 %v13868_v40  ;;  %v4519_v40 = vld [vmem:[#allocation11 + $0x3e0] sm:$0xff] }
 0x580   :  { %11483 = vmatprep.mubr.bf16.mxu1 %v16177_v52  ;;  %11289 = vmatprep.subr.bf16.mxu0 %v13883_v23  ;;  %v4512_v23 = vld [vmem:[#allocation11 + $0x3a8] sm:$0xff]  ;;  %v13979_v30 = vcombine.high %v4511_v54, %v4519_v40  ;;  %v13978_v1 = vcombine.low %v4511_v54, %v4519_v40 }
 0x581   :  { %11453 = vmatprep.subr.bf16.mxu1 %v13885_v46  ;;  %v13964_v46 = vcombine.low %v4496_v22, %v4504_v25  ;;  %v13981_v13 = vcombine.high %v4512_v23, %v4520_v42  ;;  %v13980_v50 = vcombine.low %v4512_v23, %v4520_v42 }
 0x582   :  { %11290 = vmatpush1.bf16.msra.mxu0 %v13882_v16  ;;  %v4527_v16 = vld [vmem:[#allocation11 + $0x420] sm:$0xff] }
 0x583   :  { %11454 = vmatpush1.bf16.msra.mxu1 %v13884_v59  ;;  %11291 = vmatprep.subr.bf16.mxu0 %v13899_v47  ;;  %v4535_v59 = vld [vmem:[#allocation11 + $0x460] sm:$0xff]  ;;  %v4528_v47 = vld [vmem:[#allocation11 + $0x428] sm:$0xff] }
 0x584   :  { %11455 = vmatprep.subr.bf16.mxu1 %v13901_v48  ;;  %v4536_v48 = vld [vmem:[#allocation11 + $0x468] sm:$0xff]  ;;  %v13995_v51 = vcombine.high %v4527_v16, %v4535_v59  ;;  %v13994_v63 = vcombine.low %v4527_v16, %v4535_v59 }
 0x585   :  { %v13997_v60 = vcombine.high %v4528_v47, %v4536_v48  ;;  %v13996_v4 = vcombine.low %v4528_v47, %v4536_v48 }
 0x586   :  { %11292 = vmatpush1.bf16.msra.mxu0 %v13898_v53  ;;  %v4543_v53 = vld [vmem:[#allocation11 + $0x4a0] sm:$0xff] }
 0x587   :  { %11456 = vmatpush1.bf16.msra.mxu1 %v13900_v55  ;;  %11293 = vmatprep.subr.bf16.mxu0 %v13915_v27  ;;  %v4551_v55 = vld [vmem:[#allocation11 + $0x4e0] sm:$0xff]  ;;  %v4544_v27 = vld [vmem:[#allocation11 + $0x4a8] sm:$0xff] }
 0x588   :  { %11457 = vmatprep.subr.bf16.mxu1 %v13917_v61  ;;  %v4552_v61 = vld [vmem:[#allocation11 + $0x4e8] sm:$0xff]  ;;  %v14011_v0 = vcombine.high %v4543_v53, %v4551_v55  ;;  %v14010_v7 = vcombine.low %v4543_v53, %v4551_v55 }
 0x589   :  { %v14013_v5 = vcombine.high %v4544_v27, %v4552_v61  ;;  %v14012_v12 = vcombine.low %v4544_v27, %v4552_v61 }
 0x58a   :  { %11294 = vmatpush1.bf16.msra.mxu0 %v13914_v37  ;;  %v4559_v37 = vld [vmem:[#allocation11 + $0x520] sm:$0xff] }
 0x58b   :  { %11458 = vmatpush1.bf16.msra.mxu1 %v13916_v6  ;;  %11295 = vmatprep.subr.bf16.mxu0 %v13931_v44  ;;  %v4567_v6 = vld [vmem:[#allocation11 + $0x560] sm:$0xff]  ;;  %v4560_v44 = vld [vmem:[#allocation11 + $0x528] sm:$0xff] }
 0x58c   :  { %11459 = vmatprep.subr.bf16.mxu1 %v13933_v14  ;;  %v4568_v14 = vld [vmem:[#allocation11 + $0x568] sm:$0xff]  ;;  %v14027_v8 = vcombine.high %v4559_v37, %v4567_v6  ;;  %v14026_v24 = vcombine.low %v4559_v37, %v4567_v6 }
 0x58d   :  { %v14029_v9 = vcombine.high %v4560_v44, %v4568_v14  ;;  %v14028_v21 = vcombine.low %v4560_v44, %v4568_v14 }
 0x58e   :  { %11296 = vmatpush1.bf16.msra.mxu0 %v13930_v10  ;;  %v4575_v10 = vld [vmem:[#allocation11 + $0x5a0] sm:$0xff] }
 0x58f   :  { %11460 = vmatpush1.bf16.msra.mxu1 %v13932_v18  ;;  %11297 = vmatprep.subr.bf16.mxu0 %v13947_v19  ;;  %v4583_v18 = vld [vmem:[#allocation11 + $0x5e0] sm:$0xff]  ;;  %v4576_v19 = vld [vmem:[#allocation11 + $0x5a8] sm:$0xff] }
 0x590   :  { %11461 = vmatprep.subr.bf16.mxu1 %v13949_v58  ;;  %v4584_v58 = vld [vmem:[#allocation11 + $0x5e8] sm:$0xff]  ;;  %v14043_v22 = vcombine.high %v4575_v10, %v4583_v18  ;;  %v14042_v54 = vcombine.low %v4575_v10, %v4583_v18 }
 0x591   :  { %v14045_v25 = vcombine.high %v4576_v19, %v4584_v58  ;;  %v14044_v40 = vcombine.low %v4576_v19, %v4584_v58 }
 0x592   :  { %11298 = vmatpush1.bf16.msra.mxu0 %v13946_v26  ;;  %v4591_v26 = vld [vmem:[#allocation11 + $0x620] sm:$0xff] }
 0x593   :  { %11462 = vmatpush1.bf16.msra.mxu1 %v13948_v28  ;;  %11299 = vmatprep.subr.bf16.mxu0 %v13963_v3  ;;  %v4599_v28 = vld [vmem:[#allocation11 + $0x660] sm:$0xff]  ;;  %v4592_v3 = vld [vmem:[#allocation11 + $0x628] sm:$0xff] }
 0x594   :  { %11463 = vmatprep.subr.bf16.mxu1 %v13965_v39  ;;  %v4600_v39 = vld [vmem:[#allocation11 + $0x668] sm:$0xff]  ;;  %v14059_v23 = vcombine.high %v4591_v26, %v4599_v28  ;;  %v14058_v16 = vcombine.low %v4591_v26, %v4599_v28 }
 0x595   :  { %v14061_v42 = vcombine.high %v4592_v3, %v4600_v39  ;;  %v14060_v59 = vcombine.low %v4592_v3, %v4600_v39  ;;  %v4680_v26 = vld [vmem:[#allocation11 + $0x8e8] sm:$0xff]  ;;  %v4687_v39 = vld [vmem:[#allocation11 + $0x920] sm:$0xff] }
 0x596   :  { %11300 = vmatpush1.bf16.msra.mxu0 %v13962_v43  ;;  %v4607_v43 = vld [vmem:[#allocation11 + $0x6a0] sm:$0xff] }
 0x597   :  { %11464 = vmatpush1.bf16.msra.mxu1 %v13964_v46  ;;  %11301 = vmatprep.subr.bf16.mxu0 %v13979_v30  ;;  %v4615_v46 = vld [vmem:[#allocation11 + $0x6e0] sm:$0xff]  ;;  %v4608_v30 = vld [vmem:[#allocation11 + $0x6a8] sm:$0xff] }
 0x598   :  { %11465 = vmatprep.subr.bf16.mxu1 %v13981_v13  ;;  %v4616_v13 = vld [vmem:[#allocation11 + $0x6e8] sm:$0xff]  ;;  %v14075_v47 = vcombine.high %v4607_v43, %v4615_v46  ;;  %v14074_v53 = vcombine.low %v4607_v43, %v4615_v46 }
 0x599   :  { %v14077_v48 = vcombine.high %v4608_v30, %v4616_v13  ;;  %v14076_v55 = vcombine.low %v4608_v30, %v4616_v13 }
 0x59a   :  { %11302 = vmatpush1.bf16.msra.mxu0 %v13978_v1  ;;  %v4623_v1 = vld [vmem:[#allocation11 + $0x720] sm:$0xff] }
 0x59b   :  { %11466 = vmatpush1.bf16.msra.mxu1 %v13980_v50  ;;  %11303 = vmatprep.subr.bf16.mxu0 %v13995_v51  ;;  %v4631_v50 = vld [vmem:[#allocation11 + $0x760] sm:$0xff]  ;;  %v4624_v51 = vld [vmem:[#allocation11 + $0x728] sm:$0xff] }
 0x59c   :  { %11467 = vmatprep.subr.bf16.mxu1 %v13997_v60  ;;  %v4632_v60 = vld [vmem:[#allocation11 + $0x768] sm:$0xff]  ;;  %v14091_v27 = vcombine.high %v4623_v1, %v4631_v50  ;;  %v14090_v37 = vcombine.low %v4623_v1, %v4631_v50 }
 0x59d   :  { %v14093_v61 = vcombine.high %v4624_v51, %v4632_v60  ;;  %v14092_v6 = vcombine.low %v4624_v51, %v4632_v60 }
 0x59e   :  { %11304 = vmatpush1.bf16.msra.mxu0 %v13994_v63  ;;  %v4639_v63 = vld [vmem:[#allocation11 + $0x7a0] sm:$0xff] }
 0x59f   :  { %11468 = vmatpush1.bf16.msra.mxu1 %v13996_v4  ;;  %11305 = vmatprep.subr.bf16.mxu0 %v14011_v0  ;;  %v4647_v4 = vld [vmem:[#allocation11 + $0x7e0] sm:$0xff]  ;;  %v4640_v0 = vld [vmem:[#allocation11 + $0x7a8] sm:$0xff] }
 0x5a0   :  { %11469 = vmatprep.subr.bf16.mxu1 %v14013_v5  ;;  %v4648_v5 = vld [vmem:[#allocation11 + $0x7e8] sm:$0xff]  ;;  %v14107_v44 = vcombine.high %v4639_v63, %v4647_v4  ;;  %v14106_v10 = vcombine.low %v4639_v63, %v4647_v4 }
 0x5a1   :  { %v14109_v14 = vcombine.high %v4640_v0, %v4648_v5  ;;  %v14108_v18 = vcombine.low %v4640_v0, %v4648_v5 }
 0x5a2   :  { %11306 = vmatpush1.bf16.msra.mxu0 %v14010_v7  ;;  %v4655_v7 = vld [vmem:[#allocation11 + $0x820] sm:$0xff] }
 0x5a3   :  { %11470 = vmatpush1.bf16.msra.mxu1 %v14012_v12  ;;  %11307 = vmatprep.subr.bf16.mxu0 %v14027_v8  ;;  %v4663_v12 = vld [vmem:[#allocation11 + $0x860] sm:$0xff]  ;;  %v4656_v8 = vld [vmem:[#allocation11 + $0x828] sm:$0xff] }
 0x5a4   :  { %11471 = vmatprep.subr.bf16.mxu1 %v14029_v9  ;;  %v4664_v9 = vld [vmem:[#allocation11 + $0x868] sm:$0xff]  ;;  %v14123_v19 = vcombine.high %v4655_v7, %v4663_v12 }
 0x5a5   :  { %v14125_v58 = vcombine.high %v4656_v8, %v4664_v9  ;;  %v14124_v28 = vcombine.low %v4656_v8, %v4664_v9 }
 0x5a6   :  { %11308 = vmatpush1.bf16.msra.mxu0 %v14026_v24  ;;  %v4671_v24 = vld [vmem:[#allocation11 + $0x8a0] sm:$0xff] }
 0x5a7   :  { %11472 = vmatpush1.bf16.msra.mxu1 %v14028_v21  ;;  %11309 = vmatprep.subr.bf16.mxu0 %v14043_v22  ;;  %v4679_v21 = vld [vmem:[#allocation11 + $0x8e0] sm:$0xff]  ;;  %v14122_v22 = vcombine.low %v4655_v7, %v4663_v12 }
 0x5a8   :  { %11473 = vmatprep.subr.bf16.mxu1 %v14045_v25  ;;  %v4672_v25 = vld [vmem:[#allocation11 + $0x8a8] sm:$0xff]  ;;  %v14139_v3 = vcombine.high %v4671_v24, %v4679_v21  ;;  %v14138_v43 = vcombine.low %v4671_v24, %v4679_v21 }
 0x5a9   :  { %v14140_v46 = vcombine.low %v4672_v25, %v4680_v26 }
 0x5aa   :  { %11310 = vmatpush1.bf16.msra.mxu0 %v14042_v54  ;;  %v4695_v54 = vld [vmem:[#allocation11 + $0x960] sm:$0xff] }
 0x5ab   :  { %11474 = vmatpush1.bf16.msra.mxu1 %v14044_v40  ;;  %11311 = vmatprep.subr.bf16.mxu0 %v14059_v23  ;;  %v14141_v40 = vcombine.high %v4672_v25, %v4680_v26  ;;  %v4688_v23 = vld [vmem:[#allocation11 + $0x928] sm:$0xff]  ;;  %v14155_v30 = vcombine.high %v4687_v39, %v4695_v54  ;;  %v14154_v1 = vcombine.low %v4687_v39, %v4695_v54  ;;  %v4767_v26 = vld [vmem:[#allocation11 + $0xba0] sm:$0xff] }
 0x5ac   :  { %11475 = vmatprep.subr.bf16.mxu1 %v14061_v42  ;;  %v4696_v42 = vld [vmem:[#allocation11 + $0x968] sm:$0xff] }
 0x5ad   :  { %v14157_v13 = vcombine.high %v4688_v23, %v4696_v42  ;;  %v14156_v50 = vcombine.low %v4688_v23, %v4696_v42  ;;  %v4776_v39 = vld [vmem:[#allocation11 + $0xbe8] sm:$0xff] }
 0x5ae   :  { %11312 = vmatpush1.bf16.msra.mxu0 %v14058_v16  ;;  %v4703_v16 = vld [vmem:[#allocation11 + $0x9a0] sm:$0xff] }
 0x5af   :  { %11476 = vmatpush1.bf16.msra.mxu1 %v14060_v59  ;;  %11313 = vmatprep.subr.bf16.mxu0 %v14075_v47  ;;  %v4711_v59 = vld [vmem:[#allocation11 + $0x9e0] sm:$0xff]  ;;  %v4704_v47 = vld [vmem:[#allocation11 + $0x9a8] sm:$0xff] }
 0x5b0   :  { %11477 = vmatprep.subr.bf16.mxu1 %v14077_v48  ;;  %v4712_v48 = vld [vmem:[#allocation11 + $0x9e8] sm:$0xff]  ;;  %v14171_v51 = vcombine.high %v4703_v16, %v4711_v59  ;;  %v14170_v63 = vcombine.low %v4703_v16, %v4711_v59 }
 0x5b1   :  { %v14173_v60 = vcombine.high %v4704_v47, %v4712_v48  ;;  %v14172_v4 = vcombine.low %v4704_v47, %v4712_v48 }
 0x5b2   :  { %11314 = vmatpush1.bf16.msra.mxu0 %v14074_v53  ;;  %v4719_v53 = vld [vmem:[#allocation11 + $0xa20] sm:$0xff] }
 0x5b3   :  { %11478 = vmatpush1.bf16.msra.mxu1 %v14076_v55  ;;  %11315 = vmatprep.subr.bf16.mxu0 %v14091_v27  ;;  %v4727_v55 = vld [vmem:[#allocation11 + $0xa60] sm:$0xff]  ;;  %v4720_v27 = vld [vmem:[#allocation11 + $0xa28] sm:$0xff] }
 0x5b4   :  { %11479 = vmatprep.subr.bf16.mxu1 %v14093_v61  ;;  %v4728_v61 = vld [vmem:[#allocation11 + $0xa68] sm:$0xff]  ;;  %v14187_v0 = vcombine.high %v4719_v53, %v4727_v55  ;;  %v14186_v7 = vcombine.low %v4719_v53, %v4727_v55 }
 0x5b5   :  { %v14189_v5 = vcombine.high %v4720_v27, %v4728_v61  ;;  %v14188_v12 = vcombine.low %v4720_v27, %v4728_v61 }
 0x5b6   :  { %11316 = vmatpush1.bf16.msra.mxu0 %v14090_v37  ;;  %v4735_v37 = vld [vmem:[#allocation11 + $0xaa0] sm:$0xff] }
 0x5b7   :  { %11480 = vmatpush1.bf16.msra.mxu1 %v14092_v6  ;;  %11317 = vmatprep.subr.bf16.mxu0 %v14107_v44  ;;  %v4743_v6 = vld [vmem:[#allocation11 + $0xae0] sm:$0xff]  ;;  %v4736_v44 = vld [vmem:[#allocation11 + $0xaa8] sm:$0xff] }
 0x5b8   :  { %11481 = vmatprep.subr.bf16.mxu1 %v14109_v14  ;;  %v4744_v14 = vld [vmem:[#allocation11 + $0xae8] sm:$0xff]  ;;  %v14203_v8 = vcombine.high %v4735_v37, %v4743_v6  ;;  %v14202_v24 = vcombine.low %v4735_v37, %v4743_v6 }
 0x5b9   :  { %v14205_v9 = vcombine.high %v4736_v44, %v4744_v14  ;;  %v14204_v21 = vcombine.low %v4736_v44, %v4744_v14 }
 0x5ba   :  { %11318 = vmatpush1.bf16.msra.mxu0 %v14106_v10  ;;  %v4751_v10 = vld [vmem:[#allocation11 + $0xb20] sm:$0xff] }
 0x5bb   :  { %11482 = vmatpush1.bf16.msra.mxu1 %v14108_v18  ;;  %11328 = vmatprep.subr.bf16.mxu0 %v14123_v19  ;;  %v4759_v18 = vld [vmem:[#allocation11 + $0xb60] sm:$0xff]  ;;  %v4752_v19 = vld [vmem:[#allocation11 + $0xb28] sm:$0xff] }
 0x5bc   :  { %11492 = vmatprep.subr.bf16.mxu1 %v14125_v58  ;;  %v4760_v58 = vld [vmem:[#allocation11 + $0xb68] sm:$0xff]  ;;  %v14218_v54 = vcombine.low %v4751_v10, %v4759_v18 }
 0x5bd   :  { %11320 = vmatmul.mubr.bf16.vlgmr.msra.gmra.mrb[20].mxu0 %v16189_v29  ;;  %v14221_v25 = vcombine.high %v4752_v19, %v4760_v58 }
 0x5be   :  { %11484 = vmatmul.mubr.bf16.vlgmr.msra.gmra.mrb[20].mxu1 %v16189_v29  ;;  %11329 = vmatpush1.bf16.msra.mxu0 %v14122_v22  ;;  %v14219_v22 = vcombine.high %v4751_v10, %v4759_v18 }
 0x5bf   :  { %11360 = vmatprep.mubr.bf16.mxu0 %v16191_v38  ;;  %11493 = vmatpush1.bf16.msra.mxu1 %v14124_v28  ;;  %v4775_v28 = vld [vmem:[#allocation11 + $0xbe0] sm:$0xff] }
 0x5c0   :  { %11524 = vmatprep.mubr.bf16.mxu1 %v16191_v38  ;;  %11330 = vmatprep.subr.bf16.mxu0 %v14139_v3  ;;  %v4768_v3 = vld [vmem:[#allocation11 + $0xba8] sm:$0xff]  ;;  %v14235_v23 = vcombine.high %v4767_v26, %v4775_v28  ;;  %v14234_v16 = vcombine.low %v4767_v26, %v4775_v28 }
 0x5c1   :  { %11494 = vmatprep.subr.bf16.mxu1 %v14141_v40  ;;  %v14220_v40 = vcombine.low %v4752_v19, %v4760_v58  ;;  %v14237_v42 = vcombine.high %v4768_v3, %v4776_v39  ;;  %v14236_v59 = vcombine.low %v4768_v3, %v4776_v39 }
 0x5c2   :  { %11331 = vmatpush1.bf16.msra.mxu0 %v14138_v43  ;;  %v4783_v43 = vld [vmem:[#allocation11 + $0xc20] sm:$0xff] }
 0x5c3   :  { %11495 = vmatpush1.bf16.msra.mxu1 %v14140_v46  ;;  %11332 = vmatprep.subr.bf16.mxu0 %v14155_v30  ;;  %v4791_v46 = vld [vmem:[#allocation11 + $0xc60] sm:$0xff]  ;;  %v4784_v30 = vld [vmem:[#allocation11 + $0xc28] sm:$0xff] }
 0x5c4   :  { %11496 = vmatprep.subr.bf16.mxu1 %v14157_v13  ;;  %v4792_v13 = vld [vmem:[#allocation11 + $0xc68] sm:$0xff]  ;;  %v14251_v47 = vcombine.high %v4783_v43, %v4791_v46  ;;  %v14250_v53 = vcombine.low %v4783_v43, %v4791_v46 }
 0x5c5   :  { %v14253_v48 = vcombine.high %v4784_v30, %v4792_v13  ;;  %v14252_v55 = vcombine.low %v4784_v30, %v4792_v13 }
 0x5c6   :  { %11333 = vmatpush1.bf16.msra.mxu0 %v14154_v1  ;;  %v4799_v1 = vld [vmem:[#allocation11 + $0xca0] sm:$0xff] }
 0x5c7   :  { %11497 = vmatpush1.bf16.msra.mxu1 %v14156_v50  ;;  %11334 = vmatprep.subr.bf16.mxu0 %v14171_v51  ;;  %v4807_v50 = vld [vmem:[#allocation11 + $0xce0] sm:$0xff]  ;;  %v4800_v51 = vld [vmem:[#allocation11 + $0xca8] sm:$0xff] }
 0x5c8   :  { %11498 = vmatprep.subr.bf16.mxu1 %v14173_v60  ;;  %v4808_v60 = vld [vmem:[#allocation11 + $0xce8] sm:$0xff]  ;;  %v14267_v27 = vcombine.high %v4799_v1, %v4807_v50  ;;  %v14266_v37 = vcombine.low %v4799_v1, %v4807_v50 }
 0x5c9   :  { %v14269_v61 = vcombine.high %v4800_v51, %v4808_v60  ;;  %v14268_v6 = vcombine.low %v4800_v51, %v4808_v60 }
 0x5ca   :  { %11335 = vmatpush1.bf16.msra.mxu0 %v14170_v63  ;;  %v4815_v63 = vld [vmem:[#allocation11 + $0xd20] sm:$0xff] }
 0x5cb   :  { %11499 = vmatpush1.bf16.msra.mxu1 %v14172_v4  ;;  %11336 = vmatprep.subr.bf16.mxu0 %v14187_v0  ;;  %v4823_v4 = vld [vmem:[#allocation11 + $0xd60] sm:$0xff]  ;;  %v4816_v0 = vld [vmem:[#allocation11 + $0xd28] sm:$0xff] }
 0x5cc   :  { %11500 = vmatprep.subr.bf16.mxu1 %v14189_v5  ;;  %v4824_v5 = vld [vmem:[#allocation11 + $0xd68] sm:$0xff]  ;;  %v14283_v44 = vcombine.high %v4815_v63, %v4823_v4  ;;  %v14282_v10 = vcombine.low %v4815_v63, %v4823_v4 }
 0x5cd   :  { %v14285_v14 = vcombine.high %v4816_v0, %v4824_v5  ;;  %v14284_v18 = vcombine.low %v4816_v0, %v4824_v5 }
 0x5ce   :  { %11337 = vmatpush1.bf16.msra.mxu0 %v14186_v7  ;;  %v4831_v7 = vld [vmem:[#allocation11 + $0xda0] sm:$0xff] }
 0x5cf   :  { %11501 = vmatpush1.bf16.msra.mxu1 %v14188_v12  ;;  %11338 = vmatprep.subr.bf16.mxu0 %v14203_v8  ;;  %v4839_v12 = vld [vmem:[#allocation11 + $0xde0] sm:$0xff]  ;;  %v4832_v8 = vld [vmem:[#allocation11 + $0xda8] sm:$0xff] }
 0x5d0   :  { %11502 = vmatprep.subr.bf16.mxu1 %v14205_v9  ;;  %v4840_v9 = vld [vmem:[#allocation11 + $0xde8] sm:$0xff]  ;;  %v14299_v19 = vcombine.high %v4831_v7, %v4839_v12  ;;  %v14298_v26 = vcombine.low %v4831_v7, %v4839_v12 }
 0x5d1   :  { %v14301_v58 = vcombine.high %v4832_v8, %v4840_v9  ;;  %v14300_v28 = vcombine.low %v4832_v8, %v4840_v9 }
 0x5d2   :  { %11339 = vmatpush1.bf16.msra.mxu0 %v14202_v24  ;;  %v4847_v24 = vld [vmem:[#allocation11 + $0xe20] sm:$0xff] }
 0x5d3   :  { %11503 = vmatpush1.bf16.msra.mxu1 %v14204_v21  ;;  %11340 = vmatprep.subr.bf16.mxu0 %v14219_v22  ;;  %v4855_v21 = vld [vmem:[#allocation11 + $0xe60] sm:$0xff]  ;;  %v4848_v22 = vld [vmem:[#allocation11 + $0xe28] sm:$0xff] }
 0x5d4   :  { %11504 = vmatprep.subr.bf16.mxu1 %v14221_v25  ;;  %v4856_v25 = vld [vmem:[#allocation11 + $0xe68] sm:$0xff]  ;;  %v14315_v3 = vcombine.high %v4847_v24, %v4855_v21  ;;  %v14314_v43 = vcombine.low %v4847_v24, %v4855_v21 }
 0x5d5   :  { %v14317_v39 = vcombine.high %v4848_v22, %v4856_v25  ;;  %v14316_v46 = vcombine.low %v4848_v22, %v4856_v25  ;;  %v4936_v24 = vld [vmem:[#allocation11 + $0x10e8] sm:$0xff]  ;;  %v4943_v25 = vld [vmem:[#allocation11 + $0x1120] sm:$0xff] }
 0x5d6   :  { %11341 = vmatpush1.bf16.msra.mxu0 %v14218_v54  ;;  %v4863_v54 = vld [vmem:[#allocation11 + $0xea0] sm:$0xff] }
 0x5d7   :  { %11505 = vmatpush1.bf16.msra.mxu1 %v14220_v40  ;;  %11342 = vmatprep.subr.bf16.mxu0 %v14235_v23  ;;  %v4871_v40 = vld [vmem:[#allocation11 + $0xee0] sm:$0xff]  ;;  %v4864_v23 = vld [vmem:[#allocation11 + $0xea8] sm:$0xff] }
 0x5d8   :  { %11506 = vmatprep.subr.bf16.mxu1 %v14237_v42  ;;  %v4872_v42 = vld [vmem:[#allocation11 + $0xee8] sm:$0xff]  ;;  %v14331_v30 = vcombine.high %v4863_v54, %v4871_v40  ;;  %v14330_v1 = vcombine.low %v4863_v54, %v4871_v40 }
 0x5d9   :  { %v14333_v13 = vcombine.high %v4864_v23, %v4872_v42  ;;  %v14332_v50 = vcombine.low %v4864_v23, %v4872_v42 }
 0x5da   :  { %11343 = vmatpush1.bf16.msra.mxu0 %v14234_v16  ;;  %v4879_v16 = vld [vmem:[#allocation11 + $0xf20] sm:$0xff] }
 0x5db   :  { %11507 = vmatpush1.bf16.msra.mxu1 %v14236_v59  ;;  %11344 = vmatprep.subr.bf16.mxu0 %v14251_v47  ;;  %v4887_v59 = vld [vmem:[#allocation11 + $0xf60] sm:$0xff]  ;;  %v4880_v47 = vld [vmem:[#allocation11 + $0xf28] sm:$0xff] }
 0x5dc   :  { %11508 = vmatprep.subr.bf16.mxu1 %v14253_v48  ;;  %v4888_v48 = vld [vmem:[#allocation11 + $0xf68] sm:$0xff]  ;;  %v14347_v51 = vcombine.high %v4879_v16, %v4887_v59  ;;  %v14346_v63 = vcombine.low %v4879_v16, %v4887_v59 }
 0x5dd   :  { %v14349_v60 = vcombine.high %v4880_v47, %v4888_v48  ;;  %v14348_v4 = vcombine.low %v4880_v47, %v4888_v48 }
 0x5de   :  { %11345 = vmatpush1.bf16.msra.mxu0 %v14250_v53  ;;  %v4895_v53 = vld [vmem:[#allocation11 + $0xfa0] sm:$0xff] }
 0x5df   :  { %11509 = vmatpush1.bf16.msra.mxu1 %v14252_v55  ;;  %11346 = vmatprep.subr.bf16.mxu0 %v14267_v27  ;;  %v4903_v55 = vld [vmem:[#allocation11 + $0xfe0] sm:$0xff]  ;;  %v4896_v27 = vld [vmem:[#allocation11 + $0xfa8] sm:$0xff] }
 0x5e0   :  { %11510 = vmatprep.subr.bf16.mxu1 %v14269_v61  ;;  %v4904_v61 = vld [vmem:[#allocation11 + $0xfe8] sm:$0xff]  ;;  %v14363_v0 = vcombine.high %v4895_v53, %v4903_v55  ;;  %v14362_v7 = vcombine.low %v4895_v53, %v4903_v55 }
 0x5e1   :  { %v14365_v5 = vcombine.high %v4896_v27, %v4904_v61  ;;  %v14364_v12 = vcombine.low %v4896_v27, %v4904_v61 }
 0x5e2   :  { %11347 = vmatpush1.bf16.msra.mxu0 %v14266_v37  ;;  %v4911_v37 = vld [vmem:[#allocation11 + $0x1020] sm:$0xff] }
 0x5e3   :  { %11511 = vmatpush1.bf16.msra.mxu1 %v14268_v6  ;;  %11348 = vmatprep.subr.bf16.mxu0 %v14283_v44  ;;  %v4919_v6 = vld [vmem:[#allocation11 + $0x1060] sm:$0xff]  ;;  %v4912_v44 = vld [vmem:[#allocation11 + $0x1028] sm:$0xff] }
 0x5e4   :  { %11512 = vmatprep.subr.bf16.mxu1 %v14285_v14  ;;  %v4920_v14 = vld [vmem:[#allocation11 + $0x1068] sm:$0xff]  ;;  %v14379_v8 = vcombine.high %v4911_v37, %v4919_v6 }
 0x5e5   :  { %v14381_v9 = vcombine.high %v4912_v44, %v4920_v14  ;;  %v14380_v21 = vcombine.low %v4912_v44, %v4920_v14 }
 0x5e6   :  { %11349 = vmatpush1.bf16.msra.mxu0 %v14282_v10  ;;  %v4927_v10 = vld [vmem:[#allocation11 + $0x10a0] sm:$0xff] }
 0x5e7   :  { %11513 = vmatpush1.bf16.msra.mxu1 %v14284_v18  ;;  %11350 = vmatprep.subr.bf16.mxu0 %v14299_v19  ;;  %v4935_v18 = vld [vmem:[#allocation11 + $0x10e0] sm:$0xff]  ;;  %v14378_v19 = vcombine.low %v4911_v37, %v4919_v6 }
 0x5e8   :  { %11514 = vmatprep.subr.bf16.mxu1 %v14301_v58  ;;  %v4928_v58 = vld [vmem:[#allocation11 + $0x10a8] sm:$0xff]  ;;  %v14395_v22 = vcombine.high %v4927_v10, %v4935_v18  ;;  %v14394_v54 = vcombine.low %v4927_v10, %v4935_v18 }
 0x5e9   :  { %v14396_v40 = vcombine.low %v4928_v58, %v4936_v24 }
 0x5ea   :  { %11351 = vmatpush1.bf16.msra.mxu0 %v14298_v26  ;;  %v4951_v26 = vld [vmem:[#allocation11 + $0x1160] sm:$0xff] }
 0x5eb   :  { %11515 = vmatpush1.bf16.msra.mxu1 %v14300_v28  ;;  %11352 = vmatprep.subr.bf16.mxu0 %v14315_v3  ;;  %v14397_v28 = vcombine.high %v4928_v58, %v4936_v24  ;;  %v4944_v3 = vld [vmem:[#allocation11 + $0x1128] sm:$0xff]  ;;  %v14411_v23 = vcombine.high %v4943_v25, %v4951_v26  ;;  %v14410_v16 = vcombine.low %v4943_v25, %v4951_v26  ;;  %v5023_v24 = vld [vmem:[#allocation11 + $0x13a0] sm:$0xff] }
 0x5ec   :  { %11516 = vmatprep.subr.bf16.mxu1 %v14317_v39  ;;  %v4952_v39 = vld [vmem:[#allocation11 + $0x1168] sm:$0xff] }
 0x5ed   :  { %v14413_v42 = vcombine.high %v4944_v3, %v4952_v39  ;;  %v14412_v59 = vcombine.low %v4944_v3, %v4952_v39  ;;  %v5032_v25 = vld [vmem:[#allocation11 + $0x13e8] sm:$0xff] }
 0x5ee   :  { %11353 = vmatpush1.bf16.msra.mxu0 %v14314_v43  ;;  %v4959_v43 = vld [vmem:[#allocation11 + $0x11a0] sm:$0xff] }
 0x5ef   :  { %11517 = vmatpush1.bf16.msra.mxu1 %v14316_v46  ;;  %11354 = vmatprep.subr.bf16.mxu0 %v14331_v30  ;;  %v4967_v46 = vld [vmem:[#allocation11 + $0x11e0] sm:$0xff]  ;;  %v4960_v30 = vld [vmem:[#allocation11 + $0x11a8] sm:$0xff] }
 0x5f0   :  { %11518 = vmatprep.subr.bf16.mxu1 %v14333_v13  ;;  %v4968_v13 = vld [vmem:[#allocation11 + $0x11e8] sm:$0xff]  ;;  %v14427_v47 = vcombine.high %v4959_v43, %v4967_v46  ;;  %v14426_v53 = vcombine.low %v4959_v43, %v4967_v46 }
 0x5f1   :  { %v14429_v48 = vcombine.high %v4960_v30, %v4968_v13  ;;  %v14428_v55 = vcombine.low %v4960_v30, %v4968_v13 }
 0x5f2   :  { %11355 = vmatpush1.bf16.msra.mxu0 %v14330_v1  ;;  %v4975_v1 = vld [vmem:[#allocation11 + $0x1220] sm:$0xff] }
 0x5f3   :  { %11519 = vmatpush1.bf16.msra.mxu1 %v14332_v50  ;;  %11356 = vmatprep.subr.bf16.mxu0 %v14347_v51  ;;  %v4983_v50 = vld [vmem:[#allocation11 + $0x1260] sm:$0xff]  ;;  %v4976_v51 = vld [vmem:[#allocation11 + $0x1228] sm:$0xff] }
 0x5f4   :  { %11520 = vmatprep.subr.bf16.mxu1 %v14349_v60  ;;  %v4984_v60 = vld [vmem:[#allocation11 + $0x1268] sm:$0xff]  ;;  %v14443_v27 = vcombine.high %v4975_v1, %v4983_v50  ;;  %v14442_v37 = vcombine.low %v4975_v1, %v4983_v50 }
 0x5f5   :  { %v14445_v61 = vcombine.high %v4976_v51, %v4984_v60  ;;  %v14444_v6 = vcombine.low %v4976_v51, %v4984_v60 }
 0x5f6   :  { %11357 = vmatpush1.bf16.msra.mxu0 %v14346_v63  ;;  %v4991_v63 = vld [vmem:[#allocation11 + $0x12a0] sm:$0xff] }
 0x5f7   :  { %11521 = vmatpush1.bf16.msra.mxu1 %v14348_v4  ;;  %11358 = vmatprep.subr.bf16.mxu0 %v14363_v0  ;;  %v4999_v4 = vld [vmem:[#allocation11 + $0x12e0] sm:$0xff]  ;;  %v4992_v0 = vld [vmem:[#allocation11 + $0x12a8] sm:$0xff] }
 0x5f8   :  { %11522 = vmatprep.subr.bf16.mxu1 %v14365_v5  ;;  %v5000_v5 = vld [vmem:[#allocation11 + $0x12e8] sm:$0xff]  ;;  %v14459_v44 = vcombine.high %v4991_v63, %v4999_v4  ;;  %v14458_v10 = vcombine.low %v4991_v63, %v4999_v4 }
 0x5f9   :  { %v14461_v14 = vcombine.high %v4992_v0, %v5000_v5  ;;  %v14460_v18 = vcombine.low %v4992_v0, %v5000_v5 }
 0x5fa   :  { %11359 = vmatpush1.bf16.msra.mxu0 %v14362_v7  ;;  %v5007_v7 = vld [vmem:[#allocation11 + $0x1320] sm:$0xff] }
 0x5fb   :  { %11523 = vmatpush1.bf16.msra.mxu1 %v14364_v12  ;;  %11369 = vmatprep.subr.bf16.mxu0 %v14379_v8  ;;  %v5015_v12 = vld [vmem:[#allocation11 + $0x1360] sm:$0xff]  ;;  %v5008_v8 = vld [vmem:[#allocation11 + $0x1328] sm:$0xff] }
 0x5fc   :  { %11533 = vmatprep.subr.bf16.mxu1 %v14381_v9  ;;  %v5016_v9 = vld [vmem:[#allocation11 + $0x1368] sm:$0xff]  ;;  %v14474_v26 = vcombine.low %v5007_v7, %v5015_v12 }
 0x5fd   :  { %11361 = vmatmul.mubr.bf16.vlgmr.msra.gmra.mrb[20].mxu0 %v16200_v45  ;;  %v14477_v58 = vcombine.high %v5008_v8, %v5016_v9 }
 0x5fe   :  { %11525 = vmatmul.mubr.bf16.vlgmr.msra.gmra.mrb[20].mxu1 %v16200_v45  ;;  %11370 = vmatpush1.bf16.msra.mxu0 %v14378_v19  ;;  %v14475_v19 = vcombine.high %v5007_v7, %v5015_v12 }
 0x5ff   :  { %11401 = vmatprep.mubr.bf16.mxu0 %v16214_v36  ;;  %11534 = vmatpush1.bf16.msra.mxu1 %v14380_v21  ;;  %v5031_v21 = vld [vmem:[#allocation11 + $0x13e0] sm:$0xff] }
 0x600   :  { %11565 = vmatprep.mubr.bf16.mxu1 %v16214_v36  ;;  %11371 = vmatprep.subr.bf16.mxu0 %v14395_v22  ;;  %v5024_v22 = vld [vmem:[#allocation11 + $0x13a8] sm:$0xff]  ;;  %v14491_v3 = vcombine.high %v5023_v24, %v5031_v21  ;;  %v14490_v43 = vcombine.low %v5023_v24, %v5031_v21 }
 0x601   :  { %11535 = vmatprep.subr.bf16.mxu1 %v14397_v28  ;;  %v14476_v28 = vcombine.low %v5008_v8, %v5016_v9  ;;  %v14493_v39 = vcombine.high %v5024_v22, %v5032_v25  ;;  %v14492_v46 = vcombine.low %v5024_v22, %v5032_v25 }
 0x602   :  { %11372 = vmatpush1.bf16.msra.mxu0 %v14394_v54  ;;  %v5039_v54 = vld [vmem:[#allocation11 + $0x1420] sm:$0xff] }
 0x603   :  { %11536 = vmatpush1.bf16.msra.mxu1 %v14396_v40  ;;  %11373 = vmatprep.subr.bf16.mxu0 %v14411_v23  ;;  %v5047_v40 = vld [vmem:[#allocation11 + $0x1460] sm:$0xff]  ;;  %v5040_v23 = vld [vmem:[#allocation11 + $0x1428] sm:$0xff] }
 0x604   :  { %11537 = vmatprep.subr.bf16.mxu1 %v14413_v42  ;;  %v5048_v42 = vld [vmem:[#allocation11 + $0x1468] sm:$0xff]  ;;  %v14507_v30 = vcombine.high %v5039_v54, %v5047_v40  ;;  %v14506_v1 = vcombine.low %v5039_v54, %v5047_v40 }
 0x605   :  { %v14509_v13 = vcombine.high %v5040_v23, %v5048_v42  ;;  %v14508_v50 = vcombine.low %v5040_v23, %v5048_v42 }
 0x606   :  { %11374 = vmatpush1.bf16.msra.mxu0 %v14410_v16  ;;  %v5055_v16 = vld [vmem:[#allocation11 + $0x14a0] sm:$0xff] }
 0x607   :  { %11538 = vmatpush1.bf16.msra.mxu1 %v14412_v59  ;;  %11375 = vmatprep.subr.bf16.mxu0 %v14427_v47  ;;  %v5063_v59 = vld [vmem:[#allocation11 + $0x14e0] sm:$0xff]  ;;  %v5056_v47 = vld [vmem:[#allocation11 + $0x14a8] sm:$0xff] }
 0x608   :  { %11539 = vmatprep.subr.bf16.mxu1 %v14429_v48  ;;  %v5064_v48 = vld [vmem:[#allocation11 + $0x14e8] sm:$0xff]  ;;  %v14523_v51 = vcombine.high %v5055_v16, %v5063_v59  ;;  %v14522_v63 = vcombine.low %v5055_v16, %v5063_v59 }
 0x609   :  { %v14525_v60 = vcombine.high %v5056_v47, %v5064_v48  ;;  %v14524_v4 = vcombine.low %v5056_v47, %v5064_v48 }
 0x60a   :  { %11376 = vmatpush1.bf16.msra.mxu0 %v14426_v53  ;;  %v5071_v53 = vld [vmem:[#allocation11 + $0x1520] sm:$0xff] }
 0x60b   :  { %11540 = vmatpush1.bf16.msra.mxu1 %v14428_v55  ;;  %11377 = vmatprep.subr.bf16.mxu0 %v14443_v27  ;;  %v5079_v55 = vld [vmem:[#allocation11 + $0x1560] sm:$0xff]  ;;  %v5072_v27 = vld [vmem:[#allocation11 + $0x1528] sm:$0xff] }
 0x60c   :  { %11541 = vmatprep.subr.bf16.mxu1 %v14445_v61  ;;  %v5080_v61 = vld [vmem:[#allocation11 + $0x1568] sm:$0xff]  ;;  %v14539_v0 = vcombine.high %v5071_v53, %v5079_v55  ;;  %v14538_v7 = vcombine.low %v5071_v53, %v5079_v55 }
 0x60d   :  { %v14541_v5 = vcombine.high %v5072_v27, %v5080_v61  ;;  %v14540_v12 = vcombine.low %v5072_v27, %v5080_v61 }
 0x60e   :  { %11378 = vmatpush1.bf16.msra.mxu0 %v14442_v37  ;;  %v5087_v37 = vld [vmem:[#allocation11 + $0x15a0] sm:$0xff] }
 0x60f   :  { %11542 = vmatpush1.bf16.msra.mxu1 %v14444_v6  ;;  %11379 = vmatprep.subr.bf16.mxu0 %v14459_v44  ;;  %v5095_v6 = vld [vmem:[#allocation11 + $0x15e0] sm:$0xff]  ;;  %v5088_v44 = vld [vmem:[#allocation11 + $0x15a8] sm:$0xff] }
 0x610   :  { %11543 = vmatprep.subr.bf16.mxu1 %v14461_v14  ;;  %v5096_v14 = vld [vmem:[#allocation11 + $0x15e8] sm:$0xff]  ;;  %v14555_v8 = vcombine.high %v5087_v37, %v5095_v6  ;;  %v14554_v24 = vcombine.low %v5087_v37, %v5095_v6 }
 0x611   :  { %v14557_v9 = vcombine.high %v5088_v44, %v5096_v14  ;;  %v14556_v21 = vcombine.low %v5088_v44, %v5096_v14 }
 0x612   :  { %11380 = vmatpush1.bf16.msra.mxu0 %v14458_v10  ;;  %v5103_v10 = vld [vmem:[#allocation11 + $0x1620] sm:$0xff] }
 0x613   :  { %11544 = vmatpush1.bf16.msra.mxu1 %v14460_v18  ;;  %11381 = vmatprep.subr.bf16.mxu0 %v14475_v19  ;;  %v5111_v18 = vld [vmem:[#allocation11 + $0x1660] sm:$0xff]  ;;  %v5104_v19 = vld [vmem:[#allocation11 + $0x1628] sm:$0xff] }
 0x614   :  { %11545 = vmatprep.subr.bf16.mxu1 %v14477_v58  ;;  %v5112_v58 = vld [vmem:[#allocation11 + $0x1668] sm:$0xff]  ;;  %v14571_v22 = vcombine.high %v5103_v10, %v5111_v18  ;;  %v14570_v54 = vcombine.low %v5103_v10, %v5111_v18 }
 0x615   :  { %v14573_v25 = vcombine.high %v5104_v19, %v5112_v58  ;;  %v14572_v40 = vcombine.low %v5104_v19, %v5112_v58  ;;  %v5192_v10 = vld [vmem:[#allocation11 + $0x18e8] sm:$0xff]  ;;  %v5199_v58 = vld [vmem:[#allocation11 + $0x1920] sm:$0xff] }
 0x616   :  { %11382 = vmatpush1.bf16.msra.mxu0 %v14474_v26  ;;  %v5119_v26 = vld [vmem:[#allocation11 + $0x16a0] sm:$0xff] }
 0x617   :  { %11546 = vmatpush1.bf16.msra.mxu1 %v14476_v28  ;;  %11383 = vmatprep.subr.bf16.mxu0 %v14491_v3  ;;  %v5127_v28 = vld [vmem:[#allocation11 + $0x16e0] sm:$0xff]  ;;  %v5120_v3 = vld [vmem:[#allocation11 + $0x16a8] sm:$0xff] }
 0x618   :  { %11547 = vmatprep.subr.bf16.mxu1 %v14493_v39  ;;  %v5128_v39 = vld [vmem:[#allocation11 + $0x16e8] sm:$0xff]  ;;  %v14587_v23 = vcombine.high %v5119_v26, %v5127_v28  ;;  %v14586_v16 = vcombine.low %v5119_v26, %v5127_v28 }
 0x619   :  { %v14589_v42 = vcombine.high %v5120_v3, %v5128_v39  ;;  %v14588_v59 = vcombine.low %v5120_v3, %v5128_v39 }
 0x61a   :  { %11384 = vmatpush1.bf16.msra.mxu0 %v14490_v43  ;;  %v5135_v43 = vld [vmem:[#allocation11 + $0x1720] sm:$0xff] }
 0x61b   :  { %11548 = vmatpush1.bf16.msra.mxu1 %v14492_v46  ;;  %11385 = vmatprep.subr.bf16.mxu0 %v14507_v30  ;;  %v5143_v46 = vld [vmem:[#allocation11 + $0x1760] sm:$0xff]  ;;  %v5136_v30 = vld [vmem:[#allocation11 + $0x1728] sm:$0xff] }
 0x61c   :  { %11549 = vmatprep.subr.bf16.mxu1 %v14509_v13  ;;  %v5144_v13 = vld [vmem:[#allocation11 + $0x1768] sm:$0xff]  ;;  %v14603_v47 = vcombine.high %v5135_v43, %v5143_v46  ;;  %v14602_v53 = vcombine.low %v5135_v43, %v5143_v46 }
 0x61d   :  { %v14605_v48 = vcombine.high %v5136_v30, %v5144_v13  ;;  %v14604_v55 = vcombine.low %v5136_v30, %v5144_v13 }
 0x61e   :  { %11386 = vmatpush1.bf16.msra.mxu0 %v14506_v1  ;;  %v5151_v1 = vld [vmem:[#allocation11 + $0x17a0] sm:$0xff] }
 0x61f   :  { %11550 = vmatpush1.bf16.msra.mxu1 %v14508_v50  ;;  %11387 = vmatprep.subr.bf16.mxu0 %v14523_v51  ;;  %v5159_v50 = vld [vmem:[#allocation11 + $0x17e0] sm:$0xff]  ;;  %v5152_v51 = vld [vmem:[#allocation11 + $0x17a8] sm:$0xff] }
 0x620   :  { %11551 = vmatprep.subr.bf16.mxu1 %v14525_v60  ;;  %v5160_v60 = vld [vmem:[#allocation11 + $0x17e8] sm:$0xff]  ;;  %v14619_v27 = vcombine.high %v5151_v1, %v5159_v50  ;;  %v14618_v37 = vcombine.low %v5151_v1, %v5159_v50 }
 0x621   :  { %v14621_v61 = vcombine.high %v5152_v51, %v5160_v60  ;;  %v14620_v6 = vcombine.low %v5152_v51, %v5160_v60 }
 0x622   :  { %11388 = vmatpush1.bf16.msra.mxu0 %v14522_v63  ;;  %v5167_v63 = vld [vmem:[#allocation11 + $0x1820] sm:$0xff] }
 0x623   :  { %11552 = vmatpush1.bf16.msra.mxu1 %v14524_v4  ;;  %11389 = vmatprep.subr.bf16.mxu0 %v14539_v0  ;;  %v5175_v4 = vld [vmem:[#allocation11 + $0x1860] sm:$0xff]  ;;  %v5168_v0 = vld [vmem:[#allocation11 + $0x1828] sm:$0xff] }
 0x624   :  { %11553 = vmatprep.subr.bf16.mxu1 %v14541_v5  ;;  %v5176_v5 = vld [vmem:[#allocation11 + $0x1868] sm:$0xff]  ;;  %v14635_v44 = vcombine.high %v5167_v63, %v5175_v4 }
 0x625   :  { %v14637_v14 = vcombine.high %v5168_v0, %v5176_v5  ;;  %v14636_v18 = vcombine.low %v5168_v0, %v5176_v5 }
 0x626   :  { %11390 = vmatpush1.bf16.msra.mxu0 %v14538_v7  ;;  %v5183_v7 = vld [vmem:[#allocation11 + $0x18a0] sm:$0xff] }
 0x627   :  { %11554 = vmatpush1.bf16.msra.mxu1 %v14540_v12  ;;  %11391 = vmatprep.subr.bf16.mxu0 %v14555_v8  ;;  %v5191_v12 = vld [vmem:[#allocation11 + $0x18e0] sm:$0xff]  ;;  %v14634_v8 = vcombine.low %v5167_v63, %v5175_v4 }
 0x628   :  { %11555 = vmatprep.subr.bf16.mxu1 %v14557_v9  ;;  %v5184_v9 = vld [vmem:[#allocation11 + $0x18a8] sm:$0xff]  ;;  %v14651_v19 = vcombine.high %v5183_v7, %v5191_v12  ;;  %v14650_v26 = vcombine.low %v5183_v7, %v5191_v12 }
 0x629   :  { %v14652_v28 = vcombine.low %v5184_v9, %v5192_v10 }
 0x62a   :  { %11392 = vmatpush1.bf16.msra.mxu0 %v14554_v24  ;;  %v5207_v24 = vld [vmem:[#allocation11 + $0x1960] sm:$0xff] }
 0x62b   :  { %11556 = vmatpush1.bf16.msra.mxu1 %v14556_v21  ;;  %11393 = vmatprep.subr.bf16.mxu0 %v14571_v22  ;;  %v14653_v21 = vcombine.high %v5184_v9, %v5192_v10  ;;  %v5200_v22 = vld [vmem:[#allocation11 + $0x1928] sm:$0xff]  ;;  %v14667_v3 = vcombine.high %v5199_v58, %v5207_v24  ;;  %v14666_v43 = vcombine.low %v5199_v58, %v5207_v24 }
 0x62c   :  { %11557 = vmatprep.subr.bf16.mxu1 %v14573_v25  ;;  %v5208_v25 = vld [vmem:[#allocation11 + $0x1968] sm:$0xff] }
 0x62d   :  { %v14669_v39 = vcombine.high %v5200_v22, %v5208_v25  ;;  %v14668_v46 = vcombine.low %v5200_v22, %v5208_v25  ;;  %v5288_v22 = vld [vmem:[#allocation11 + $0x1be8] sm:$0xff] }
 0x62e   :  { %11394 = vmatpush1.bf16.msra.mxu0 %v14570_v54  ;;  %v5215_v54 = vld [vmem:[#allocation11 + $0x19a0] sm:$0xff] }
 0x62f   :  { %11558 = vmatpush1.bf16.msra.mxu1 %v14572_v40  ;;  %11395 = vmatprep.subr.bf16.mxu0 %v14587_v23  ;;  %v5223_v40 = vld [vmem:[#allocation11 + $0x19e0] sm:$0xff]  ;;  %v5216_v23 = vld [vmem:[#allocation11 + $0x19a8] sm:$0xff] }
 0x630   :  { %11559 = vmatprep.subr.bf16.mxu1 %v14589_v42  ;;  %v5224_v42 = vld [vmem:[#allocation11 + $0x19e8] sm:$0xff]  ;;  %v14683_v30 = vcombine.high %v5215_v54, %v5223_v40  ;;  %v14682_v1 = vcombine.low %v5215_v54, %v5223_v40 }
 0x631   :  { %v14685_v13 = vcombine.high %v5216_v23, %v5224_v42  ;;  %v14684_v50 = vcombine.low %v5216_v23, %v5224_v42 }
 0x632   :  { %11396 = vmatpush1.bf16.msra.mxu0 %v14586_v16  ;;  %v5231_v16 = vld [vmem:[#allocation11 + $0x1a20] sm:$0xff] }
 0x633   :  { %11560 = vmatpush1.bf16.msra.mxu1 %v14588_v59  ;;  %11397 = vmatprep.subr.bf16.mxu0 %v14603_v47  ;;  %v5239_v59 = vld [vmem:[#allocation11 + $0x1a60] sm:$0xff]  ;;  %v5232_v47 = vld [vmem:[#allocation11 + $0x1a28] sm:$0xff] }
 0x634   :  { %11561 = vmatprep.subr.bf16.mxu1 %v14605_v48  ;;  %v5240_v48 = vld [vmem:[#allocation11 + $0x1a68] sm:$0xff]  ;;  %v14699_v51 = vcombine.high %v5231_v16, %v5239_v59  ;;  %v14698_v63 = vcombine.low %v5231_v16, %v5239_v59 }
 0x635   :  { %v14701_v60 = vcombine.high %v5232_v47, %v5240_v48  ;;  %v14700_v4 = vcombine.low %v5232_v47, %v5240_v48 }
 0x636   :  { %11398 = vmatpush1.bf16.msra.mxu0 %v14602_v53  ;;  %v5247_v53 = vld [vmem:[#allocation11 + $0x1aa0] sm:$0xff] }
 0x637   :  { %11562 = vmatpush1.bf16.msra.mxu1 %v14604_v55  ;;  %11399 = vmatprep.subr.bf16.mxu0 %v14619_v27  ;;  %v5255_v55 = vld [vmem:[#allocation11 + $0x1ae0] sm:$0xff]  ;;  %v5248_v27 = vld [vmem:[#allocation11 + $0x1aa8] sm:$0xff] }
 0x638   :  { %11563 = vmatprep.subr.bf16.mxu1 %v14621_v61  ;;  %v5256_v61 = vld [vmem:[#allocation11 + $0x1ae8] sm:$0xff]  ;;  %v14715_v0 = vcombine.high %v5247_v53, %v5255_v55  ;;  %v14714_v7 = vcombine.low %v5247_v53, %v5255_v55 }
 0x639   :  { %v14717_v5 = vcombine.high %v5248_v27, %v5256_v61  ;;  %v14716_v12 = vcombine.low %v5248_v27, %v5256_v61 }
 0x63a   :  { %11400 = vmatpush1.bf16.msra.mxu0 %v14618_v37  ;;  %v5263_v37 = vld [vmem:[#allocation11 + $0x1b20] sm:$0xff] }
 0x63b   :  { %11564 = vmatpush1.bf16.msra.mxu1 %v14620_v6  ;;  %11410 = vmatprep.subr.bf16.mxu0 %v14635_v44  ;;  %v5271_v6 = vld [vmem:[#allocation11 + $0x1b60] sm:$0xff]  ;;  %v5264_v44 = vld [vmem:[#allocation11 + $0x1b28] sm:$0xff] }
 0x63c   :  { %11574 = vmatprep.subr.bf16.mxu1 %v14637_v14  ;;  %v5272_v14 = vld [vmem:[#allocation11 + $0x1b68] sm:$0xff] }
 0x63d   :  { %11402 = vmatmul.mubr.bf16.vlgmr.msra.gmra.mrb[20].mxu0 %v16216_v49  ;;  %v14733_v10 = vcombine.high %v5264_v44, %v5272_v14  ;;  %v14732_v54 = vcombine.low %v5264_v44, %v5272_v14 }
 0x63e   :  { %11566 = vmatmul.mubr.bf16.vlgmr.msra.gmra.mrb[20].mxu1 %v16216_v49  ;;  %11411 = vmatpush1.bf16.msra.mxu0 %v14634_v8  ;;  %v14731_v8 = vcombine.high %v5263_v37, %v5271_v6 }
 0x63f   :  { %11442 = vmatprep.mubr.bf16.mxu0 %v16220_v57  ;;  %11575 = vmatpush1.bf16.msra.mxu1 %v14636_v18  ;;  %v5279_v18 = vld [vmem:[#allocation11 + $0x1ba0] sm:$0xff] }
 0x640   :  { %11606 = vmatprep.mubr.bf16.mxu1 %v16220_v57  ;;  %11412 = vmatprep.subr.bf16.mxu0 %v14651_v19  ;;  %v5287_v19 = vld [vmem:[#allocation11 + $0x1be0] sm:$0xff] }
 0x641   :  { %11576 = vmatprep.subr.bf16.mxu1 %v14653_v21  ;;  %v5280_v21 = vld [vmem:[#allocation11 + $0x1ba8] sm:$0xff]  ;;  %v14747_v40 = vcombine.high %v5279_v18, %v5287_v19  ;;  %v14746_v16 = vcombine.low %v5279_v18, %v5287_v19 }
 0x642   :  { %11413 = vmatpush1.bf16.msra.mxu0 %v14650_v26  ;;  %v14749_v42 = vcombine.high %v5280_v21, %v5288_v22  ;;  %v14748_v59 = vcombine.low %v5280_v21, %v5288_v22 }
 0x643   :  { %11577 = vmatpush1.bf16.msra.mxu1 %v14652_v28  ;;  %11414 = vmatprep.subr.bf16.mxu0 %v14667_v3  ;;  %v14730_v28 = vcombine.low %v5263_v37, %v5271_v6 }
 0x644   :  { %11578 = vmatprep.subr.bf16.mxu1 %v14669_v39 }
 0x646   :  { %11415 = vmatpush1.bf16.msra.mxu0 %v14666_v43  ;;  %v5295_v43 = vld [vmem:[#allocation11 + $0x1c20] sm:$0xff] }
 0x647   :  { %11579 = vmatpush1.bf16.msra.mxu1 %v14668_v46  ;;  %11416 = vmatprep.subr.bf16.mxu0 %v14683_v30  ;;  %v5303_v46 = vld [vmem:[#allocation11 + $0x1c60] sm:$0xff]  ;;  %v5296_v30 = vld [vmem:[#allocation11 + $0x1c28] sm:$0xff] }
 0x648   :  { %11580 = vmatprep.subr.bf16.mxu1 %v14685_v13  ;;  %v5304_v13 = vld [vmem:[#allocation11 + $0x1c68] sm:$0xff]  ;;  %v14763_v47 = vcombine.high %v5295_v43, %v5303_v46  ;;  %v14762_v53 = vcombine.low %v5295_v43, %v5303_v46  ;;  %v5375_v43 = vld [vmem:[#allocation11 + $0x1ea0] sm:$0xff] }
 0x649   :  { %v14765_v48 = vcombine.high %v5296_v30, %v5304_v13  ;;  %v14764_v55 = vcombine.low %v5296_v30, %v5304_v13  ;;  %v5383_v46 = vld [vmem:[#allocation11 + $0x1ee0] sm:$0xff]  ;;  %v5376_v30 = vld [vmem:[#allocation11 + $0x1ea8] sm:$0xff] }
 0x64a   :  { %11417 = vmatpush1.bf16.msra.mxu0 %v14682_v1  ;;  %v5311_v1 = vld [vmem:[#allocation11 + $0x1ca0] sm:$0xff]  ;;  %v5384_v13 = vld [vmem:[#allocation11 + $0x1ee8] sm:$0xff] }
 0x64b   :  { %11581 = vmatpush1.bf16.msra.mxu1 %v14684_v50  ;;  %11418 = vmatprep.subr.bf16.mxu0 %v14699_v51  ;;  %v5319_v50 = vld [vmem:[#allocation11 + $0x1ce0] sm:$0xff]  ;;  %v5312_v51 = vld [vmem:[#allocation11 + $0x1ca8] sm:$0xff] }
 0x64c   :  { %11582 = vmatprep.subr.bf16.mxu1 %v14701_v60  ;;  %v5320_v60 = vld [vmem:[#allocation11 + $0x1ce8] sm:$0xff]  ;;  %v14779_v27 = vcombine.high %v5311_v1, %v5319_v50  ;;  %v14778_v37 = vcombine.low %v5311_v1, %v5319_v50  ;;  %v5391_v1 = vld [vmem:[#allocation11 + $0x1f20] sm:$0xff] }
 0x64d   :  { %v14781_v61 = vcombine.high %v5312_v51, %v5320_v60  ;;  %v14780_v6 = vcombine.low %v5312_v51, %v5320_v60  ;;  %v5399_v50 = vld [vmem:[#allocation11 + $0x1f60] sm:$0xff]  ;;  %v5392_v51 = vld [vmem:[#allocation11 + $0x1f28] sm:$0xff] }
 0x64e   :  { %11419 = vmatpush1.bf16.msra.mxu0 %v14698_v63  ;;  %v5327_v63 = vld [vmem:[#allocation11 + $0x1d20] sm:$0xff]  ;;  %v5400_v60 = vld [vmem:[#allocation11 + $0x1f68] sm:$0xff] }
 0x64f   :  { %11583 = vmatpush1.bf16.msra.mxu1 %v14700_v4  ;;  %11420 = vmatprep.subr.bf16.mxu0 %v14715_v0  ;;  %v5335_v4 = vld [vmem:[#allocation11 + $0x1d60] sm:$0xff]  ;;  %v5328_v0 = vld [vmem:[#allocation11 + $0x1d28] sm:$0xff] }
 0x650   :  { %v16271_v9 = vpop.f32.mrb[16].mxu0  ;;  %11584 = vmatprep.subr.bf16.mxu1 %v14717_v5  ;;  %v5336_v5 = vld [vmem:[#allocation11 + $0x1d68] sm:$0xff]  ;;  %v14795_v44 = vcombine.high %v5327_v63, %v5335_v4  ;;  %v14794_v18 = vcombine.low %v5327_v63, %v5335_v4  ;;  %v5407_v63 = vld [vmem:[#allocation11 + $0x1fa0] sm:$0xff] }
 0x651   :  { %v16273_v58 = vpop.f32.mrb[16].mxu1  ;;  %v16275_v24 = vpop.f32.mrb[17].mxu0  ;;  %v14797_v14 = vcombine.high %v5328_v0, %v5336_v5  ;;  %v14796_v19 = vcombine.low %v5328_v0, %v5336_v5  ;;  %v5415_v4 = vld [vmem:[#allocation11 + $0x1fe0] sm:$0xff]  ;;  %v5408_v0 = vld [vmem:[#allocation11 + $0x1fa8] sm:$0xff] }
 0x652   :  { %v16277_v25 = vpop.f32.mrb[17].mxu1  ;;  %v11120_v26 = vpop.f32.mrb[18].mxu0  ;;  %11421 = vmatpush1.bf16.msra.mxu0 %v14714_v7  ;;  %v5343_v7 = vld [vmem:[#allocation11 + $0x1da0] sm:$0xff]  ;;  %v5416_v5 = vld [vmem:[#allocation11 + $0x1fe8] sm:$0xff] }
 0x653   :  { %v11284_v3 = vpop.f32.mrb[18].mxu1  ;;  %11585 = vmatpush1.bf16.msra.mxu1 %v14716_v12  ;;  %v11121_v39 = vpop.f32.mrb[19].mxu0  ;;  %11422 = vmatprep.subr.bf16.mxu0 %v14731_v8  ;;  %v5351_v12 = vld [vmem:[#allocation11 + $0x1de0] sm:$0xff]  ;;  %v5344_v8 = vld [vmem:[#allocation11 + $0x1da8] sm:$0xff] }
 0x654   :  { %v11285_v23 = vpop.f32.mrb[19].mxu1  ;;  %11586 = vmatprep.subr.bf16.mxu1 %v14733_v10  ;;  %v5352_v10 = vld [vmem:[#allocation11 + $0x1de8] sm:$0xff]  ;;  %v14811_v21 = vcombine.high %v5343_v7, %v5351_v12  ;;  %v5359_v26 = vld [vmem:[#allocation11 + $0x1e20] sm:$0xff] }
 0x655   :  { %v14813_v22 = vcombine.high %v5344_v8, %v5352_v10  ;;  %v5360_v3 = vld [vmem:[#allocation11 + $0x1e28] sm:$0xff] }
 0x656   :  { %11423 = vmatpush1.bf16.msra.mxu0 %v14730_v28  ;;  %v5367_v28 = vld [vmem:[#allocation11 + $0x1e60] sm:$0xff]  ;;  %v5368_v39 = vld [vmem:[#allocation11 + $0x1e68] sm:$0xff] }
 0x657   :  { %11587 = vmatpush1.bf16.msra.mxu1 %v14732_v54  ;;  %11424 = vmatprep.subr.bf16.mxu0 %v14747_v40  ;;  %v14810_v54 = vcombine.low %v5343_v7, %v5351_v12  ;;  %v14812_v40 = vcombine.low %v5344_v8, %v5352_v10  ;;  %v14827_v23 = vcombine.high %v5359_v26, %v5367_v28  ;;  %v4401_v7 = vld [vmem:[#allocation11 + $0x30] sm:$0xff]  ;;  %v4402_v8 = vld [vmem:[#allocation11 + $0x38] sm:$0xff] }
 0x658   :  { %11588 = vmatprep.subr.bf16.mxu1 %v14749_v42  ;;  %v14829_v42 = vcombine.high %v5360_v3, %v5368_v39  ;;  %v4409_v12 = vld [vmem:[#allocation11 + $0x70] sm:$0xff]  ;;  %v4410_v10 = vld [vmem:[#allocation11 + $0x78] sm:$0xff] }
 0x65a   :  { %11425 = vmatpush1.bf16.msra.mxu0 %v14746_v16  ;;  %v14826_v16 = vcombine.low %v5359_v26, %v5367_v28  ;;  %v4417_v26 = vld [vmem:[#allocation11 + $0xb0] sm:$0xff] }
 0x65b   :  { %11589 = vmatpush1.bf16.msra.mxu1 %v14748_v59  ;;  %11426 = vmatprep.subr.bf16.mxu0 %v14763_v47  ;;  %v14828_v59 = vcombine.low %v5360_v3, %v5368_v39  ;;  %v14843_v47 = vcombine.high %v5375_v43, %v5383_v46  ;;  %v4425_v28 = vld [vmem:[#allocation11 + $0xf0] sm:$0xff]  ;;  %v13870_v3 = vcombine.low %v4401_v7, %v4409_v12  ;;  %v4418_v39 = vld [vmem:[#allocation11 + $0xb8] sm:$0xff] }
 0x65c   :  { %11590 = vmatprep.subr.bf16.mxu1 %v14765_v48  ;;  %v14845_v48 = vcombine.high %v5376_v30, %v5384_v13 }
 0x65e   :  { %11427 = vmatpush1.bf16.msra.mxu0 %v14762_v53  ;;  %v14842_v53 = vcombine.low %v5375_v43, %v5383_v46  ;;  %v4441_v43 = vld [vmem:[#allocation11 + $0x170] sm:$0xff] }
 0x65f   :  { %11591 = vmatpush1.bf16.msra.mxu1 %v14764_v55  ;;  %11428 = vmatprep.subr.bf16.mxu0 %v14779_v27  ;;  %v14844_v55 = vcombine.low %v5376_v30, %v5384_v13  ;;  %v14859_v27 = vcombine.high %v5391_v1, %v5399_v50  ;;  %v4434_v30 = vld [vmem:[#allocation11 + $0x138] sm:$0xff] }
 0x660   :  { %11592 = vmatprep.subr.bf16.mxu1 %v14781_v61  ;;  %v14861_v61 = vcombine.high %v5392_v51, %v5400_v60  ;;  %v4442_v13 = vld [vmem:[#allocation11 + $0x178] sm:$0xff] }
 0x662   :  { %11429 = vmatpush1.bf16.msra.mxu0 %v14778_v37  ;;  %v14858_v37 = vcombine.low %v5391_v1, %v5399_v50  ;;  %v4449_v1 = vld [vmem:[#allocation11 + $0x1b0] sm:$0xff] }
 0x663   :  { %11593 = vmatpush1.bf16.msra.mxu1 %v14780_v6  ;;  %11430 = vmatprep.subr.bf16.mxu0 %v14795_v44  ;;  %v14860_v6 = vcombine.low %v5392_v51, %v5400_v60  ;;  %v14875_v44 = vcombine.high %v5407_v63, %v5415_v4  ;;  %v4457_v50 = vld [vmem:[#allocation11 + $0x1f0] sm:$0xff]  ;;  %v4450_v51 = vld [vmem:[#allocation11 + $0x1b8] sm:$0xff] }
 0x664   :  { %11594 = vmatprep.subr.bf16.mxu1 %v14797_v14  ;;  %v14877_v14 = vcombine.high %v5408_v0, %v5416_v5  ;;  %v4458_v60 = vld [vmem:[#allocation11 + $0x1f8] sm:$0xff] }
 0x666   :  { %11431 = vmatpush1.bf16.msra.mxu0 %v14794_v18  ;;  %v14874_v18 = vcombine.low %v5407_v63, %v5415_v4  ;;  %v4465_v63 = vld [vmem:[#allocation11 + $0x230] sm:$0xff] }
 0x667   :  { %11595 = vmatpush1.bf16.msra.mxu1 %v14796_v19  ;;  %11432 = vmatprep.subr.bf16.mxu0 %v14811_v21  ;;  %v14876_v19 = vcombine.low %v5408_v0, %v5416_v5  ;;  %v13871_v21 = vcombine.high %v4401_v7, %v4409_v12  ;;  %v4473_v4 = vld [vmem:[#allocation11 + $0x270] sm:$0xff]  ;;  %v4466_v0 = vld [vmem:[#allocation11 + $0x238] sm:$0xff] }
 0x668   :  { %11596 = vmatprep.subr.bf16.mxu1 %v14813_v22  ;;  %v13873_v22 = vcombine.high %v4402_v8, %v4410_v10  ;;  %v4474_v5 = vld [vmem:[#allocation11 + $0x278] sm:$0xff]  ;;  %v4489_v7 = vld [vmem:[#allocation11 + $0x2f0] sm:$0xff] }
 0x669   :  { %v4482_v12 = vld [vmem:[#allocation11 + $0x2b8] sm:$0xff] }
 0x66a   :  { %11433 = vmatpush1.bf16.msra.mxu0 %v14810_v54  ;;  %v4426_v54 = vld [vmem:[#allocation11 + $0xf8] sm:$0xff] }
 0x66b   :  { %11597 = vmatpush1.bf16.msra.mxu1 %v14812_v40  ;;  %11434 = vmatprep.subr.bf16.mxu0 %v14827_v23  ;;  %v13872_v40 = vcombine.low %v4402_v8, %v4410_v10  ;;  %v13887_v23 = vcombine.high %v4417_v26, %v4425_v28  ;;  %v13889_v46 = vcombine.high %v4418_v39, %v4426_v54  ;;  %v4490_v8 = vld [vmem:[#allocation11 + $0x2f8] sm:$0xff] }
 0x66c   :  { %11598 = vmatprep.subr.bf16.mxu1 %v14829_v42  ;;  %v4433_v42 = vld [vmem:[#allocation11 + $0x130] sm:$0xff]  ;;  %v13934_v10 = vcombine.low %v4465_v63, %v4473_v4 }
 0x66e   :  { %11435 = vmatpush1.bf16.msra.mxu0 %v14826_v16  ;;  %v13886_v16 = vcombine.low %v4417_v26, %v4425_v28  ;;  %v4505_v26 = vld [vmem:[#allocation11 + $0x370] sm:$0xff]  ;;  %v4498_v28 = vld [vmem:[#allocation11 + $0x338] sm:$0xff] }
 0x66f   :  { %11599 = vmatpush1.bf16.msra.mxu1 %v14828_v59  ;;  %11436 = vmatprep.subr.bf16.mxu0 %v14843_v47  ;;  %v13888_v59 = vcombine.low %v4418_v39, %v4426_v54  ;;  %v13903_v47 = vcombine.high %v4433_v42, %v4441_v43  ;;  %v13952_v54 = vcombine.low %v4482_v12, %v4490_v8 }
 0x670   :  { %11600 = vmatprep.subr.bf16.mxu1 %v14845_v48  ;;  %v13905_v48 = vcombine.high %v4434_v30, %v4442_v13 }
 0x672   :  { %11437 = vmatpush1.bf16.msra.mxu0 %v14842_v53  ;;  %v13902_v53 = vcombine.low %v4433_v42, %v4441_v43  ;;  %v4513_v42 = vld [vmem:[#allocation11 + $0x3b0] sm:$0xff] }
 0x673   :  { %11601 = vmatpush1.bf16.msra.mxu1 %v14844_v55  ;;  %11438 = vmatprep.subr.bf16.mxu0 %v14859_v27  ;;  %v13904_v55 = vcombine.low %v4434_v30, %v4442_v13  ;;  %v13919_v27 = vcombine.high %v4449_v1, %v4457_v50  ;;  %v4521_v43 = vld [vmem:[#allocation11 + $0x3f0] sm:$0xff]  ;;  %v4522_v30 = vld [vmem:[#allocation11 + $0x3f8] sm:$0xff] }
 0x674   :  { %11602 = vmatprep.subr.bf16.mxu1 %v14861_v61  ;;  %v13921_v61 = vcombine.high %v4450_v51, %v4458_v60 }
 0x676   :  { %11439 = vmatpush1.bf16.msra.mxu0 %v14858_v37  ;;  %v13920_v37 = vcombine.low %v4450_v51, %v4458_v60  ;;  %v4538_v51 = vld [vmem:[#allocation11 + $0x478] sm:$0xff]  ;;  %v13982_v60 = vcombine.low %v4513_v42, %v4521_v43 }
 0x677   :  { %11603 = vmatpush1.bf16.msra.mxu1 %v14860_v6  ;;  %11440 = vmatprep.subr.bf16.mxu0 %v14875_v44  ;;  %v13935_v6 = vcombine.high %v4465_v63, %v4473_v4  ;;  %v13937_v44 = vcombine.high %v4466_v0, %v4474_v5  ;;  %v4553_v63 = vld [vmem:[#allocation11 + $0x4f0] sm:$0xff]  ;;  %v4546_v4 = vld [vmem:[#allocation11 + $0x4b8] sm:$0xff] }
 0x678   :  { %11604 = vmatprep.subr.bf16.mxu1 %v14877_v14  ;;  %v4481_v14 = vld [vmem:[#allocation11 + $0x2b0] sm:$0xff] }
 0x679   :  { %v13950_v39 = vcombine.low %v4481_v14, %v4489_v7 }
 0x67a   :  { %11441 = vmatpush1.bf16.msra.mxu0 %v14874_v18  ;;  %v13936_v18 = vcombine.low %v4466_v0, %v4474_v5  ;;  %v4554_v0 = vld [vmem:[#allocation11 + $0x4f8] sm:$0xff] }
 0x67b   :  { %11605 = vmatpush1.bf16.msra.mxu1 %v14876_v19  ;;  %11615 = vmatprep.subr.bf16.mxu0 %v13871_v21  ;;  %v13951_v19 = vcombine.high %v4481_v14, %v4489_v7  ;;  %v13953_v21 = vcombine.high %v4482_v12, %v4490_v8  ;;  %v4569_v14 = vld [vmem:[#allocation11 + $0x570] sm:$0xff]  ;;  %v4562_v7 = vld [vmem:[#allocation11 + $0x538] sm:$0xff] }
 0x67c   :  { %11779 = vmatprep.subr.bf16.mxu1 %v13873_v22  ;;  %v4497_v22 = vld [vmem:[#allocation11 + $0x330] sm:$0xff]  ;;  %v4570_v12 = vld [vmem:[#allocation11 + $0x578] sm:$0xff] }
 0x67d   :  { %11443 = vmatmul.mubr.bf16.vlgmr.msra.gmra.mrb[20].mxu0 %v16229_v32  ;;  %v13966_v13 = vcombine.low %v4497_v22, %v4505_v26 }
 0x67e   :  { %11607 = vmatmul.mubr.bf16.vlgmr.msra.gmra.mrb[20].mxu1 %v16229_v32  ;;  %11616 = vmatpush1.bf16.msra.mxu0 %v13870_v3  ;;  %v4506_v3 = vld [vmem:[#allocation11 + $0x378] sm:$0xff] }
 0x67f   :  { %11647 = vmatprep.mubr.bf16.mxu0 %v16177_v52  ;;  %11780 = vmatpush1.bf16.msra.mxu1 %v13872_v40  ;;  %v13967_v40 = vcombine.high %v4497_v22, %v4505_v26  ;;  %v4585_v22 = vld [vmem:[#allocation11 + $0x5f0] sm:$0xff]  ;;  %v4578_v26 = vld [vmem:[#allocation11 + $0x5b8] sm:$0xff] }
 0x680   :  { %11811 = vmatprep.mubr.bf16.mxu1 %v16177_v52  ;;  %11617 = vmatprep.subr.bf16.mxu0 %v13887_v23  ;;  %v13918_v52 = vcombine.low %v4449_v1, %v4457_v50  ;;  %v13969_v23 = vcombine.high %v4498_v28, %v4506_v3  ;;  %v4537_v1 = vld [vmem:[#allocation11 + $0x470] sm:$0xff]  ;;  %v4530_v50 = vld [vmem:[#allocation11 + $0x438] sm:$0xff] }
 0x681   :  { %11781 = vmatprep.subr.bf16.mxu1 %v13889_v46  ;;  %v4514_v46 = vld [vmem:[#allocation11 + $0x3b8] sm:$0xff] }
 0x682   :  { %11618 = vmatpush1.bf16.msra.mxu0 %v13886_v16  ;;  %v13968_v16 = vcombine.low %v4498_v28, %v4506_v3  ;;  %v4586_v28 = vld [vmem:[#allocation11 + $0x5f8] sm:$0xff] }
 0x683   :  { %11782 = vmatpush1.bf16.msra.mxu1 %v13888_v59  ;;  %11619 = vmatprep.subr.bf16.mxu0 %v13903_v47  ;;  %v13983_v59 = vcombine.high %v4513_v42, %v4521_v43  ;;  %v13985_v47 = vcombine.high %v4514_v46, %v4522_v30  ;;  %v4601_v42 = vld [vmem:[#allocation11 + $0x670] sm:$0xff]  ;;  %v4594_v43 = vld [vmem:[#allocation11 + $0x638] sm:$0xff] }
 0x684   :  { %11783 = vmatprep.subr.bf16.mxu1 %v13905_v48  ;;  %v4529_v48 = vld [vmem:[#allocation11 + $0x430] sm:$0xff] }
 0x685   :  { %v13998_v5 = vcombine.low %v4529_v48, %v4537_v1 }
 0x686   :  { %11620 = vmatpush1.bf16.msra.mxu0 %v13902_v53  ;;  %v13984_v53 = vcombine.low %v4514_v46, %v4522_v30  ;;  %v4602_v46 = vld [vmem:[#allocation11 + $0x678] sm:$0xff] }
 0x687   :  { %11784 = vmatpush1.bf16.msra.mxu1 %v13904_v55  ;;  %11621 = vmatprep.subr.bf16.mxu0 %v13919_v27  ;;  %v13999_v55 = vcombine.high %v4529_v48, %v4537_v1  ;;  %v14001_v27 = vcombine.high %v4530_v50, %v4538_v51  ;;  %v4617_v48 = vld [vmem:[#allocation11 + $0x6f0] sm:$0xff]  ;;  %v4610_v1 = vld [vmem:[#allocation11 + $0x6b8] sm:$0xff] }
 0x688   :  { %11785 = vmatprep.subr.bf16.mxu1 %v13921_v61  ;;  %v4545_v61 = vld [vmem:[#allocation11 + $0x4b0] sm:$0xff] }
 0x689   :  { %v14014_v8 = vcombine.low %v4545_v61, %v4553_v63 }
 0x68a   :  { %11622 = vmatpush1.bf16.msra.mxu0 %v13918_v52  ;;  %v14000_v52 = vcombine.low %v4530_v50, %v4538_v51  ;;  %v4618_v50 = vld [vmem:[#allocation11 + $0x6f8] sm:$0xff] }
 0x68b   :  { %11786 = vmatpush1.bf16.msra.mxu1 %v13920_v37  ;;  %11623 = vmatprep.subr.bf16.mxu0 %v13935_v6  ;;  %v14015_v37 = vcombine.high %v4545_v61, %v4553_v63  ;;  %v14017_v6 = vcombine.high %v4546_v4, %v4554_v0  ;;  %v4633_v61 = vld [vmem:[#allocation11 + $0x770] sm:$0xff]  ;;  %v4626_v63 = vld [vmem:[#allocation11 + $0x738] sm:$0xff] }
 0x68c   :  { %11787 = vmatprep.subr.bf16.mxu1 %v13937_v44  ;;  %v4561_v44 = vld [vmem:[#allocation11 + $0x530] sm:$0xff] }
 0x68d   :  { %v14030_v3 = vcombine.low %v4561_v44, %v4569_v14 }
 0x68e   :  { %11624 = vmatpush1.bf16.msra.mxu0 %v13934_v10  ;;  %v14016_v10 = vcombine.low %v4546_v4, %v4554_v0  ;;  %v4634_v4 = vld [vmem:[#allocation11 + $0x778] sm:$0xff] }
 0x68f   :  { %11788 = vmatpush1.bf16.msra.mxu1 %v13936_v18  ;;  %11625 = vmatprep.subr.bf16.mxu0 %v13951_v19  ;;  %v14031_v18 = vcombine.high %v4561_v44, %v4569_v14  ;;  %v14033_v19 = vcombine.high %v4562_v7, %v4570_v12  ;;  %v4649_v44 = vld [vmem:[#allocation11 + $0x7f0] sm:$0xff]  ;;  %v4642_v14 = vld [vmem:[#allocation11 + $0x7b8] sm:$0xff] }
 0x690   :  { %11789 = vmatprep.subr.bf16.mxu1 %v13953_v21  ;;  %v4577_v21 = vld [vmem:[#allocation11 + $0x5b0] sm:$0xff] }
 0x691   :  { %v14046_v30 = vcombine.low %v4577_v21, %v4585_v22 }
 0x692   :  { %11626 = vmatpush1.bf16.msra.mxu0 %v13950_v39  ;;  %v14032_v39 = vcombine.low %v4562_v7, %v4570_v12  ;;  %v4650_v7 = vld [vmem:[#allocation11 + $0x7f8] sm:$0xff] }
 0x693   :  { %11790 = vmatpush1.bf16.msra.mxu1 %v13952_v54  ;;  %11627 = vmatprep.subr.bf16.mxu0 %v13967_v40  ;;  %v14047_v54 = vcombine.high %v4577_v21, %v4585_v22  ;;  %v14049_v40 = vcombine.high %v4578_v26, %v4586_v28  ;;  %v4665_v21 = vld [vmem:[#allocation11 + $0x870] sm:$0xff]  ;;  %v4658_v22 = vld [vmem:[#allocation11 + $0x838] sm:$0xff] }
 0x694   :  { %11791 = vmatprep.subr.bf16.mxu1 %v13969_v23  ;;  %v4593_v23 = vld [vmem:[#allocation11 + $0x630] sm:$0xff] }
 0x695   :  { %v14062_v51 = vcombine.low %v4593_v23, %v4601_v42 }
 0x696   :  { %11628 = vmatpush1.bf16.msra.mxu0 %v13966_v13  ;;  %v14048_v13 = vcombine.low %v4578_v26, %v4586_v28  ;;  %v4666_v26 = vld [vmem:[#allocation11 + $0x878] sm:$0xff] }
 0x697   :  { %11792 = vmatpush1.bf16.msra.mxu1 %v13968_v16  ;;  %11629 = vmatprep.subr.bf16.mxu0 %v13983_v59  ;;  %v14063_v16 = vcombine.high %v4593_v23, %v4601_v42  ;;  %v14065_v59 = vcombine.high %v4594_v43, %v4602_v46  ;;  %v4681_v23 = vld [vmem:[#allocation11 + $0x8f0] sm:$0xff] }
 0x698   :  { %11793 = vmatprep.subr.bf16.mxu1 %v13985_v47  ;;  %v4609_v47 = vld [vmem:[#allocation11 + $0x6b0] sm:$0xff] }
 0x699   :  { %v14078_v0 = vcombine.low %v4609_v47, %v4617_v48 }
 0x69a   :  { %11630 = vmatpush1.bf16.msra.mxu0 %v13982_v60  ;;  %v14064_v60 = vcombine.low %v4594_v43, %v4602_v46  ;;  %v4674_v43 = vld [vmem:[#allocation11 + $0x8b8] sm:$0xff] }
 0x69b   :  { %11794 = vmatpush1.bf16.msra.mxu1 %v13984_v53  ;;  %11631 = vmatprep.subr.bf16.mxu0 %v13999_v55  ;;  %v14079_v53 = vcombine.high %v4609_v47, %v4617_v48  ;;  %v14081_v55 = vcombine.high %v4610_v1, %v4618_v50  ;;  %v4682_v46 = vld [vmem:[#allocation11 + $0x8f8] sm:$0xff] }
 0x69c   :  { %11795 = vmatprep.subr.bf16.mxu1 %v14001_v27  ;;  %v4625_v27 = vld [vmem:[#allocation11 + $0x730] sm:$0xff]  ;;  %v14145_v47 = vcombine.high %v4674_v43, %v4682_v46  ;;  %v4690_v48 = vld [vmem:[#allocation11 + $0x938] sm:$0xff] }
 0x69d   :  { %v14094_v12 = vcombine.low %v4625_v27, %v4633_v61 }
 0x69e   :  { %11632 = vmatpush1.bf16.msra.mxu0 %v13998_v5  ;;  %v14080_v5 = vcombine.low %v4610_v1, %v4618_v50  ;;  %v4698_v1 = vld [vmem:[#allocation11 + $0x978] sm:$0xff] }
 0x69f   :  { %11796 = vmatpush1.bf16.msra.mxu1 %v14000_v52  ;;  %11633 = vmatprep.subr.bf16.mxu0 %v14015_v37  ;;  %v14095_v52 = vcombine.high %v4625_v27, %v4633_v61  ;;  %v14097_v37 = vcombine.high %v4626_v63, %v4634_v4  ;;  %v4713_v27 = vld [vmem:[#allocation11 + $0x9f0] sm:$0xff]  ;;  %v4706_v61 = vld [vmem:[#allocation11 + $0x9b8] sm:$0xff] }
 0x6a0   :  { %11797 = vmatprep.subr.bf16.mxu1 %v14017_v6  ;;  %v4641_v6 = vld [vmem:[#allocation11 + $0x7b0] sm:$0xff] }
 0x6a1   :  { %v14110_v28 = vcombine.low %v4641_v6, %v4649_v44 }
 0x6a2   :  { %11634 = vmatpush1.bf16.msra.mxu0 %v14014_v8  ;;  %v14096_v8 = vcombine.low %v4626_v63, %v4634_v4  ;;  %v4714_v63 = vld [vmem:[#allocation11 + $0x9f8] sm:$0xff] }
 0x6a3   :  { %11798 = vmatpush1.bf16.msra.mxu1 %v14016_v10  ;;  %11635 = vmatprep.subr.bf16.mxu0 %v14031_v18  ;;  %v14111_v10 = vcombine.high %v4641_v6, %v4649_v44  ;;  %v14113_v18 = vcombine.high %v4642_v14, %v4650_v7  ;;  %v4722_v6 = vld [vmem:[#allocation11 + $0xa38] sm:$0xff] }
 0x6a4   :  { %11799 = vmatprep.subr.bf16.mxu1 %v14033_v19  ;;  %v4657_v19 = vld [vmem:[#allocation11 + $0x830] sm:$0xff]  ;;  %v4730_v44 = vld [vmem:[#allocation11 + $0xa78] sm:$0xff] }
 0x6a5   :  { %v14126_v42 = vcombine.low %v4657_v19, %v4665_v21 }
 0x6a6   :  { %11636 = vmatpush1.bf16.msra.mxu0 %v14030_v3  ;;  %v14112_v3 = vcombine.low %v4642_v14, %v4650_v7  ;;  %v14176_v14 = vcombine.low %v4706_v61, %v4714_v63 }
 0x6a7   :  { %11800 = vmatpush1.bf16.msra.mxu1 %v14032_v39  ;;  %11637 = vmatprep.subr.bf16.mxu0 %v14047_v54  ;;  %v14127_v39 = vcombine.high %v4657_v19, %v4665_v21  ;;  %v14129_v54 = vcombine.high %v4658_v22, %v4666_v26  ;;  %v4746_v19 = vld [vmem:[#allocation11 + $0xaf8] sm:$0xff] }
 0x6a8   :  { %11801 = vmatprep.subr.bf16.mxu1 %v14049_v40  ;;  %v4673_v40 = vld [vmem:[#allocation11 + $0x8b0] sm:$0xff] }
 0x6a9   :  { %v14142_v50 = vcombine.low %v4673_v40, %v4681_v23 }
 0x6aa   :  { %11638 = vmatpush1.bf16.msra.mxu0 %v14046_v30  ;;  %v14128_v30 = vcombine.low %v4658_v22, %v4666_v26  ;;  %v14192_v22 = vcombine.low %v4722_v6, %v4730_v44 }
 0x6ab   :  { %11802 = vmatpush1.bf16.msra.mxu1 %v14048_v13  ;;  %11639 = vmatprep.subr.bf16.mxu0 %v14063_v16  ;;  %v14143_v13 = vcombine.high %v4673_v40, %v4681_v23  ;;  %v4689_v16 = vld [vmem:[#allocation11 + $0x930] sm:$0xff]  ;;  %v4762_v40 = vld [vmem:[#allocation11 + $0xb78] sm:$0xff] }
 0x6ac   :  { %11803 = vmatprep.subr.bf16.mxu1 %v14065_v59  ;;  %v4697_v59 = vld [vmem:[#allocation11 + $0x970] sm:$0xff] }
 0x6ad   :  { %v14158_v4 = vcombine.low %v4689_v16, %v4697_v59 }
 0x6ae   :  { %11640 = vmatpush1.bf16.msra.mxu0 %v14062_v51  ;;  %v14144_v51 = vcombine.low %v4674_v43, %v4682_v46 }
 0x6af   :  { %11804 = vmatpush1.bf16.msra.mxu1 %v14064_v60  ;;  %11641 = vmatprep.subr.bf16.mxu0 %v14079_v53  ;;  %v14159_v60 = vcombine.high %v4689_v16, %v4697_v59  ;;  %v14161_v53 = vcombine.high %v4690_v48, %v4698_v1  ;;  %v4770_v16 = vld [vmem:[#allocation11 + $0xbb8] sm:$0xff] }
 0x6b0   :  { %11805 = vmatprep.subr.bf16.mxu1 %v14081_v55  ;;  %v4705_v55 = vld [vmem:[#allocation11 + $0x9b0] sm:$0xff]  ;;  %v4778_v59 = vld [vmem:[#allocation11 + $0xbf8] sm:$0xff] }
 0x6b2   :  { %11642 = vmatpush1.bf16.msra.mxu0 %v14078_v0  ;;  %v14175_v0 = vcombine.high %v4705_v55, %v4713_v27 }
 0x6b3   :  { %11806 = vmatpush1.bf16.msra.mxu1 %v14080_v5  ;;  %11643 = vmatprep.subr.bf16.mxu0 %v14095_v52  ;;  %v14177_v5 = vcombine.high %v4706_v61, %v4714_v63  ;;  %v4721_v52 = vld [vmem:[#allocation11 + $0xa30] sm:$0xff]  ;;  %v14240_v61 = vcombine.low %v4770_v16, %v4778_v59 }
 0x6b4   :  { %11807 = vmatprep.subr.bf16.mxu1 %v14097_v37  ;;  %v4729_v37 = vld [vmem:[#allocation11 + $0xa70] sm:$0xff] }
 0x6b5   :  { %v14191_v7 = vcombine.high %v4721_v52, %v4729_v37  ;;  %v14190_v21 = vcombine.low %v4721_v52, %v4729_v37  ;;  %v4810_v52 = vld [vmem:[#allocation11 + $0xcf8] sm:$0xff] }
 0x6b6   :  { %11644 = vmatpush1.bf16.msra.mxu0 %v14094_v12  ;;  %v14193_v12 = vcombine.high %v4722_v6, %v4730_v44 }
 0x6b7   :  { %11808 = vmatpush1.bf16.msra.mxu1 %v14096_v8  ;;  %11645 = vmatprep.subr.bf16.mxu0 %v14111_v10  ;;  %v4737_v8 = vld [vmem:[#allocation11 + $0xab0] sm:$0xff] }
 0x6b8   :  { %11809 = vmatprep.subr.bf16.mxu1 %v14113_v18  ;;  %v4745_v10 = vld [vmem:[#allocation11 + $0xaf0] sm:$0xff]  ;;  %v4738_v18 = vld [vmem:[#allocation11 + $0xab8] sm:$0xff] }
 0x6b9   :  { %v14207_v26 = vcombine.high %v4737_v8, %v4745_v10  ;;  %v14206_v23 = vcombine.low %v4737_v8, %v4745_v10  ;;  %v4826_v8 = vld [vmem:[#allocation11 + $0xd78] sm:$0xff] }
 0x6ba   :  { %11646 = vmatpush1.bf16.msra.mxu0 %v14110_v28  ;;  %v14209_v28 = vcombine.high %v4738_v18, %v4746_v19 }
 0x6bb   :  { %11810 = vmatpush1.bf16.msra.mxu1 %v14112_v3  ;;  %11656 = vmatprep.subr.bf16.mxu0 %v14127_v39  ;;  %v4753_v3 = vld [vmem:[#allocation11 + $0xb30] sm:$0xff] }
 0x6bc   :  { %11820 = vmatprep.subr.bf16.mxu1 %v14129_v54  ;;  %v4761_v39 = vld [vmem:[#allocation11 + $0xb70] sm:$0xff]  ;;  %v4754_v54 = vld [vmem:[#allocation11 + $0xb38] sm:$0xff] }
 0x6bd   :  { %11648 = vmatmul.mubr.bf16.vlgmr.msra.gmra.mrb[24].mxu0 %v16189_v29  ;;  %v14223_v43 = vcombine.high %v4753_v3, %v4761_v39  ;;  %v14225_v46 = vcombine.high %v4754_v54, %v4762_v40 }
 0x6be   :  { %11812 = vmatmul.mubr.bf16.vlgmr.msra.gmra.mrb[24].mxu1 %v16189_v29  ;;  %11657 = vmatpush1.bf16.msra.mxu0 %v14126_v42  ;;  %v14160_v29 = vcombine.low %v4690_v48, %v4698_v1  ;;  %v14208_v42 = vcombine.low %v4738_v18, %v4746_v19  ;;  %v14224_v48 = vcombine.low %v4754_v54, %v4762_v40 }
 0x6bf   :  { %11688 = vmatprep.mubr.bf16.mxu0 %v16191_v38  ;;  %11821 = vmatpush1.bf16.msra.mxu1 %v14128_v30  ;;  %v4769_v30 = vld [vmem:[#allocation11 + $0xbb0] sm:$0xff] }
 0x6c0   :  { %11852 = vmatprep.mubr.bf16.mxu1 %v16191_v38  ;;  %11658 = vmatprep.subr.bf16.mxu0 %v14143_v13  ;;  %v14174_v38 = vcombine.low %v4705_v55, %v4713_v27  ;;  %v4777_v13 = vld [vmem:[#allocation11 + $0xbf0] sm:$0xff]  ;;  %v4794_v55 = vld [vmem:[#allocation11 + $0xc78] sm:$0xff] }
 0x6c1   :  { %11822 = vmatprep.subr.bf16.mxu1 %v14145_v47  ;;  %v14222_v47 = vcombine.low %v4753_v3, %v4761_v39  ;;  %v14239_v1 = vcombine.high %v4769_v30, %v4777_v13  ;;  %v14238_v27 = vcombine.low %v4769_v30, %v4777_v13  ;;  %v4842_v3 = vld [vmem:[#allocation11 + $0xdf8] sm:$0xff] }
 0x6c2   :  { %11659 = vmatpush1.bf16.msra.mxu0 %v14142_v50  ;;  %v14241_v50 = vcombine.high %v4770_v16, %v4778_v59  ;;  %v4858_v30 = vld [vmem:[#allocation11 + $0xe78] sm:$0xff] }
 0x6c3   :  { %11823 = vmatpush1.bf16.msra.mxu1 %v14144_v51  ;;  %11660 = vmatprep.subr.bf16.mxu0 %v14159_v60  ;;  %v4785_v51 = vld [vmem:[#allocation11 + $0xc30] sm:$0xff] }
 0x6c4   :  { %11824 = vmatprep.subr.bf16.mxu1 %v14161_v53  ;;  %v4793_v60 = vld [vmem:[#allocation11 + $0xc70] sm:$0xff]  ;;  %v4786_v53 = vld [vmem:[#allocation11 + $0xc38] sm:$0xff] }
 0x6c5   :  { %v14255_v63 = vcombine.high %v4785_v51, %v4793_v60  ;;  %v14254_v37 = vcombine.low %v4785_v51, %v4793_v60  ;;  %v14256_v6 = vcombine.low %v4786_v53, %v4794_v55  ;;  %v4874_v51 = vld [vmem:[#allocation11 + $0xef8] sm:$0xff] }
 0x6c6   :  { %11661 = vmatpush1.bf16.msra.mxu0 %v14158_v4  ;;  %v14257_v4 = vcombine.high %v4786_v53, %v4794_v55 }
 0x6c7   :  { %11825 = vmatpush1.bf16.msra.mxu1 %v14160_v29  ;;  %11662 = vmatprep.subr.bf16.mxu0 %v14175_v0  ;;  %v4801_v29 = vld [vmem:[#allocation11 + $0xcb0] sm:$0xff] }
 0x6c8   :  { %11826 = vmatprep.subr.bf16.mxu1 %v14177_v5  ;;  %v4809_v0 = vld [vmem:[#allocation11 + $0xcf0] sm:$0xff]  ;;  %v4802_v5 = vld [vmem:[#allocation11 + $0xcb8] sm:$0xff] }
 0x6c9   :  { %v14271_v44 = vcombine.high %v4801_v29, %v4809_v0  ;;  %v14270_v10 = vcombine.low %v4801_v29, %v4809_v0  ;;  %v14272_v18 = vcombine.low %v4802_v5, %v4810_v52  ;;  %v4890_v29 = vld [vmem:[#allocation11 + $0xf78] sm:$0xff] }
 0x6ca   :  { %11663 = vmatpush1.bf16.msra.mxu0 %v14174_v38  ;;  %v14273_v38 = vcombine.high %v4802_v5, %v4810_v52 }
 0x6cb   :  { %11827 = vmatpush1.bf16.msra.mxu1 %v14176_v14  ;;  %11664 = vmatprep.subr.bf16.mxu0 %v14191_v7  ;;  %v4817_v14 = vld [vmem:[#allocation11 + $0xd30] sm:$0xff] }
 0x6cc   :  { %11828 = vmatprep.subr.bf16.mxu1 %v14193_v12  ;;  %v4825_v7 = vld [vmem:[#allocation11 + $0xd70] sm:$0xff]  ;;  %v4818_v12 = vld [vmem:[#allocation11 + $0xd38] sm:$0xff] }
 0x6cd   :  { %v14287_v19 = vcombine.high %v4817_v14, %v4825_v7  ;;  %v14286_v39 = vcombine.low %v4817_v14, %v4825_v7  ;;  %v14288_v54 = vcombine.low %v4818_v12, %v4826_v8  ;;  %v4906_v14 = vld [vmem:[#allocation11 + $0xff8] sm:$0xff] }
 0x6ce   :  { %11665 = vmatpush1.bf16.msra.mxu0 %v14190_v21  ;;  %v14289_v21 = vcombine.high %v4818_v12, %v4826_v8 }
 0x6cf   :  { %11829 = vmatpush1.bf16.msra.mxu1 %v14192_v22  ;;  %11666 = vmatprep.subr.bf16.mxu0 %v14207_v26  ;;  %v4833_v22 = vld [vmem:[#allocation11 + $0xdb0] sm:$0xff] }
 0x6d0   :  { %11830 = vmatprep.subr.bf16.mxu1 %v14209_v28  ;;  %v4841_v26 = vld [vmem:[#allocation11 + $0xdf0] sm:$0xff]  ;;  %v4834_v28 = vld [vmem:[#allocation11 + $0xdb8] sm:$0xff] }
 0x6d1   :  { %v14303_v40 = vcombine.high %v4833_v22, %v4841_v26  ;;  %v14302_v13 = vcombine.low %v4833_v22, %v4841_v26  ;;  %v14304_v16 = vcombine.low %v4834_v28, %v4842_v3  ;;  %v4922_v22 = vld [vmem:[#allocation11 + $0x1078] sm:$0xff] }
 0x6d2   :  { %11667 = vmatpush1.bf16.msra.mxu0 %v14206_v23  ;;  %v14305_v23 = vcombine.high %v4834_v28, %v4842_v3 }
 0x6d3   :  { %11831 = vmatpush1.bf16.msra.mxu1 %v14208_v42  ;;  %11668 = vmatprep.subr.bf16.mxu0 %v14223_v43  ;;  %v4849_v42 = vld [vmem:[#allocation11 + $0xe30] sm:$0xff] }
 0x6d4   :  { %11832 = vmatprep.subr.bf16.mxu1 %v14225_v46  ;;  %v4857_v43 = vld [vmem:[#allocation11 + $0xe70] sm:$0xff]  ;;  %v4850_v46 = vld [vmem:[#allocation11 + $0xe38] sm:$0xff] }
 0x6d5   :  { %v14319_v59 = vcombine.high %v4849_v42, %v4857_v43  ;;  %v14318_v60 = vcombine.low %v4849_v42, %v4857_v43  ;;  %v14320_v53 = vcombine.low %v4850_v46, %v4858_v30  ;;  %v4930_v42 = vld [vmem:[#allocation11 + $0x10b8] sm:$0xff] }
 0x6d6   :  { %11669 = vmatpush1.bf16.msra.mxu0 %v14222_v47  ;;  %v14321_v47 = vcombine.high %v4850_v46, %v4858_v30  ;;  %v4938_v43 = vld [vmem:[#allocation11 + $0x10f8] sm:$0xff] }
 0x6d7   :  { %11833 = vmatpush1.bf16.msra.mxu1 %v14224_v48  ;;  %11670 = vmatprep.subr.bf16.mxu0 %v14239_v1  ;;  %v4865_v48 = vld [vmem:[#allocation11 + $0xeb0] sm:$0xff] }
 0x6d8   :  { %11834 = vmatprep.subr.bf16.mxu1 %v14241_v50  ;;  %v4873_v1 = vld [vmem:[#allocation11 + $0xef0] sm:$0xff]  ;;  %v4866_v50 = vld [vmem:[#allocation11 + $0xeb8] sm:$0xff] }
 0x6d9   :  { %v14335_v55 = vcombine.high %v4865_v48, %v4873_v1  ;;  %v14334_v0 = vcombine.low %v4865_v48, %v4873_v1  ;;  %v14336_v5 = vcombine.low %v4866_v50, %v4874_v51  ;;  %v4954_v48 = vld [vmem:[#allocation11 + $0x1178] sm:$0xff] }
 0x6da   :  { %11671 = vmatpush1.bf16.msra.mxu0 %v14238_v27  ;;  %v14337_v27 = vcombine.high %v4866_v50, %v4874_v51  ;;  %v14400_v50 = vcombine.low %v4930_v42, %v4938_v43 }
 0x6db   :  { %11835 = vmatpush1.bf16.msra.mxu1 %v14240_v61  ;;  %11672 = vmatprep.subr.bf16.mxu0 %v14255_v63  ;;  %v4881_v61 = vld [vmem:[#allocation11 + $0xf30] sm:$0xff] }
 0x6dc   :  { %11836 = vmatprep.subr.bf16.mxu1 %v14257_v4  ;;  %v4889_v63 = vld [vmem:[#allocation11 + $0xf70] sm:$0xff]  ;;  %v4882_v4 = vld [vmem:[#allocation11 + $0xf38] sm:$0xff] }
 0x6dd   :  { %v14351_v52 = vcombine.high %v4881_v61, %v4889_v63  ;;  %v14350_v7 = vcombine.low %v4881_v61, %v4889_v63  ;;  %v14352_v12 = vcombine.low %v4882_v4, %v4890_v29  ;;  %v4970_v61 = vld [vmem:[#allocation11 + $0x11f8] sm:$0xff] }
 0x6de   :  { %11673 = vmatpush1.bf16.msra.mxu0 %v14254_v37  ;;  %v14353_v37 = vcombine.high %v4882_v4, %v4890_v29 }
 0x6df   :  { %11837 = vmatpush1.bf16.msra.mxu1 %v14256_v6  ;;  %11674 = vmatprep.subr.bf16.mxu0 %v14271_v44  ;;  %v4897_v6 = vld [vmem:[#allocation11 + $0xfb0] sm:$0xff] }
 0x6e0   :  { %11838 = vmatprep.subr.bf16.mxu1 %v14273_v38  ;;  %v4905_v44 = vld [vmem:[#allocation11 + $0xff0] sm:$0xff]  ;;  %v4898_v38 = vld [vmem:[#allocation11 + $0xfb8] sm:$0xff] }
 0x6e1   :  { %v14367_v8 = vcombine.high %v4897_v6, %v4905_v44  ;;  %v14366_v26 = vcombine.low %v4897_v6, %v4905_v44  ;;  %v14368_v28 = vcombine.low %v4898_v38, %v4906_v14 }
 0x6e2   :  { %11675 = vmatpush1.bf16.msra.mxu0 %v14270_v10  ;;  %v14369_v10 = vcombine.high %v4898_v38, %v4906_v14  ;;  %v4993_v14 = vld [vmem:[#allocation11 + $0x12b0] sm:$0xff] }
 0x6e3   :  { %11839 = vmatpush1.bf16.msra.mxu1 %v14272_v18  ;;  %11676 = vmatprep.subr.bf16.mxu0 %v14287_v19  ;;  %v4913_v18 = vld [vmem:[#allocation11 + $0x1030] sm:$0xff] }
 0x6e4   :  { %11840 = vmatprep.subr.bf16.mxu1 %v14289_v21  ;;  %v4921_v19 = vld [vmem:[#allocation11 + $0x1070] sm:$0xff]  ;;  %v4914_v21 = vld [vmem:[#allocation11 + $0x1038] sm:$0xff] }
 0x6e5   :  { %v14383_v3 = vcombine.high %v4913_v18, %v4921_v19  ;;  %v14384_v46 = vcombine.low %v4914_v21, %v4922_v22 }
 0x6e6   :  { %11677 = vmatpush1.bf16.msra.mxu0 %v14286_v39  ;;  %v14385_v39 = vcombine.high %v4914_v21, %v4922_v22  ;;  %v5009_v22 = vld [vmem:[#allocation11 + $0x1330] sm:$0xff] }
 0x6e7   :  { %11841 = vmatpush1.bf16.msra.mxu1 %v14288_v54  ;;  %11678 = vmatprep.subr.bf16.mxu0 %v14303_v40  ;;  %v4929_v54 = vld [vmem:[#allocation11 + $0x10b0] sm:$0xff] }
 0x6e8   :  { %11842 = vmatprep.subr.bf16.mxu1 %v14305_v23  ;;  %v4937_v40 = vld [vmem:[#allocation11 + $0x10f0] sm:$0xff]  ;;  %v14382_v23 = vcombine.low %v4913_v18, %v4921_v19 }
 0x6e9   :  { %v14399_v30 = vcombine.high %v4929_v54, %v4937_v40  ;;  %v14398_v1 = vcombine.low %v4929_v54, %v4937_v40 }
 0x6ea   :  { %11679 = vmatpush1.bf16.msra.mxu0 %v14302_v13  ;;  %v4945_v13 = vld [vmem:[#allocation11 + $0x1130] sm:$0xff] }
 0x6eb   :  { %11843 = vmatpush1.bf16.msra.mxu1 %v14304_v16  ;;  %11680 = vmatprep.subr.bf16.mxu0 %v14319_v59  ;;  %v4953_v16 = vld [vmem:[#allocation11 + $0x1170] sm:$0xff]  ;;  %v14401_v59 = vcombine.high %v4930_v42, %v4938_v43 }
 0x6ec   :  { %11844 = vmatprep.subr.bf16.mxu1 %v14321_v47  ;;  %v4946_v47 = vld [vmem:[#allocation11 + $0x1138] sm:$0xff]  ;;  %v14415_v51 = vcombine.high %v4945_v13, %v4953_v16  ;;  %v14414_v63 = vcombine.low %v4945_v13, %v4953_v16  ;;  %v5025_v42 = vld [vmem:[#allocation11 + $0x13b0] sm:$0xff] }
 0x6ed   :  { %v5033_v43 = vld [vmem:[#allocation11 + $0x13f0] sm:$0xff] }
 0x6ee   :  { %11681 = vmatpush1.bf16.msra.mxu0 %v14318_v60  ;;  %v14417_v60 = vcombine.high %v4946_v47, %v4954_v48 }
 0x6ef   :  { %11845 = vmatpush1.bf16.msra.mxu1 %v14320_v53  ;;  %11682 = vmatprep.subr.bf16.mxu0 %v14335_v55  ;;  %v4961_v53 = vld [vmem:[#allocation11 + $0x11b0] sm:$0xff] }
 0x6f0   :  { %11846 = vmatprep.subr.bf16.mxu1 %v14337_v27  ;;  %v4969_v55 = vld [vmem:[#allocation11 + $0x11f0] sm:$0xff]  ;;  %v4962_v27 = vld [vmem:[#allocation11 + $0x11b8] sm:$0xff] }
 0x6f1   :  { %v14431_v4 = vcombine.high %v4961_v53, %v4969_v55  ;;  %v14433_v29 = vcombine.high %v4962_v27, %v4970_v61  ;;  %v14432_v6 = vcombine.low %v4962_v27, %v4970_v61  ;;  %v5057_v61 = vld [vmem:[#allocation11 + $0x14b0] sm:$0xff] }
 0x6f2   :  { %11683 = vmatpush1.bf16.msra.mxu0 %v14334_v0  ;;  %v4977_v0 = vld [vmem:[#allocation11 + $0x1230] sm:$0xff] }
 0x6f3   :  { %11847 = vmatpush1.bf16.msra.mxu1 %v14336_v5  ;;  %11684 = vmatprep.subr.bf16.mxu0 %v14351_v52  ;;  %v4985_v5 = vld [vmem:[#allocation11 + $0x1270] sm:$0xff]  ;;  %v4978_v52 = vld [vmem:[#allocation11 + $0x1238] sm:$0xff] }
 0x6f4   :  { %11848 = vmatprep.subr.bf16.mxu1 %v14353_v37  ;;  %v4986_v37 = vld [vmem:[#allocation11 + $0x1278] sm:$0xff]  ;;  %v14447_v44 = vcombine.high %v4977_v0, %v4985_v5 }
 0x6f5   :  { %v14449_v38 = vcombine.high %v4978_v52, %v4986_v37  ;;  %v14448_v18 = vcombine.low %v4978_v52, %v4986_v37  ;;  %v5073_v37 = vld [vmem:[#allocation11 + $0x1530] sm:$0xff] }
 0x6f6   :  { %11685 = vmatpush1.bf16.msra.mxu0 %v14350_v7  ;;  %v5001_v7 = vld [vmem:[#allocation11 + $0x12f0] sm:$0xff] }
 0x6f7   :  { %11849 = vmatpush1.bf16.msra.mxu1 %v14352_v12  ;;  %11686 = vmatprep.subr.bf16.mxu0 %v14367_v8  ;;  %v4994_v12 = vld [vmem:[#allocation11 + $0x12b8] sm:$0xff]  ;;  %v14463_v19 = vcombine.high %v4993_v14, %v5001_v7 }
 0x6f8   :  { %11850 = vmatprep.subr.bf16.mxu1 %v14369_v10  ;;  %v5002_v8 = vld [vmem:[#allocation11 + $0x12f8] sm:$0xff]  ;;  %v14446_v10 = vcombine.low %v4977_v0, %v4985_v5 }
 0x6f9   :  { %v14465_v21 = vcombine.high %v4994_v12, %v5002_v8  ;;  %v14464_v54 = vcombine.low %v4994_v12, %v5002_v8  ;;  %v5089_v8 = vld [vmem:[#allocation11 + $0x15b0] sm:$0xff] }
 0x6fa   :  { %11687 = vmatpush1.bf16.msra.mxu0 %v14366_v26  ;;  %v5017_v26 = vld [vmem:[#allocation11 + $0x1370] sm:$0xff] }
 0x6fb   :  { %11851 = vmatpush1.bf16.msra.mxu1 %v14368_v28  ;;  %11697 = vmatprep.subr.bf16.mxu0 %v14383_v3  ;;  %v5010_v28 = vld [vmem:[#allocation11 + $0x1338] sm:$0xff]  ;;  %v14479_v40 = vcombine.high %v5009_v22, %v5017_v26  ;;  %v14478_v13 = vcombine.low %v5009_v22, %v5017_v26 }
 0x6fc   :  { %11861 = vmatprep.subr.bf16.mxu1 %v14385_v39  ;;  %v5018_v3 = vld [vmem:[#allocation11 + $0x1378] sm:$0xff]  ;;  %v14462_v39 = vcombine.low %v4993_v14, %v5001_v7 }
 0x6fd   :  { %11689 = vmatmul.mubr.bf16.vlgmr.msra.gmra.mrb[24].mxu0 %v16200_v45  ;;  %v14480_v16 = vcombine.low %v5010_v28, %v5018_v3 }
 0x6fe   :  { %11853 = vmatmul.mubr.bf16.vlgmr.msra.gmra.mrb[24].mxu1 %v16200_v45  ;;  %11698 = vmatpush1.bf16.msra.mxu0 %v14382_v23  ;;  %v14416_v45 = vcombine.low %v4946_v47, %v4954_v48  ;;  %v14481_v23 = vcombine.high %v5010_v28, %v5018_v3  ;;  %v5041_v48 = vld [vmem:[#allocation11 + $0x1430] sm:$0xff] }
 0x6ff   :  { %11729 = vmatprep.mubr.bf16.mxu0 %v16214_v36  ;;  %11862 = vmatpush1.bf16.msra.mxu1 %v14384_v46  ;;  %v5026_v46 = vld [vmem:[#allocation11 + $0x13b8] sm:$0xff]  ;;  %v5105_v3 = vld [vmem:[#allocation11 + $0x1630] sm:$0xff] }
 0x700   :  { %11893 = vmatprep.mubr.bf16.mxu1 %v16214_v36  ;;  %11699 = vmatprep.subr.bf16.mxu0 %v14399_v30  ;;  %v14430_v36 = vcombine.low %v4961_v53, %v4969_v55  ;;  %v5034_v30 = vld [vmem:[#allocation11 + $0x13f8] sm:$0xff] }
 0x701   :  { %11863 = vmatprep.subr.bf16.mxu1 %v14401_v59  ;;  %v14495_v59 = vcombine.high %v5025_v42, %v5033_v43  ;;  %v14497_v47 = vcombine.high %v5026_v46, %v5034_v30  ;;  %v14496_v53 = vcombine.low %v5026_v46, %v5034_v30  ;;  %v5121_v30 = vld [vmem:[#allocation11 + $0x16b0] sm:$0xff] }
 0x702   :  { %11700 = vmatpush1.bf16.msra.mxu0 %v14398_v1  ;;  %v5049_v1 = vld [vmem:[#allocation11 + $0x1470] sm:$0xff] }
 0x703   :  { %11864 = vmatpush1.bf16.msra.mxu1 %v14400_v50  ;;  %11701 = vmatprep.subr.bf16.mxu0 %v14415_v51  ;;  %v5042_v50 = vld [vmem:[#allocation11 + $0x1438] sm:$0xff]  ;;  %v14511_v55 = vcombine.high %v5041_v48, %v5049_v1 }
 0x704   :  { %11865 = vmatprep.subr.bf16.mxu1 %v14417_v60  ;;  %v5050_v51 = vld [vmem:[#allocation11 + $0x1478] sm:$0xff]  ;;  %v14494_v60 = vcombine.low %v5025_v42, %v5033_v43 }
 0x705   :  { %v14513_v27 = vcombine.high %v5042_v50, %v5050_v51  ;;  %v14512_v0 = vcombine.low %v5042_v50, %v5050_v51  ;;  %v5137_v51 = vld [vmem:[#allocation11 + $0x1730] sm:$0xff] }
 0x706   :  { %11702 = vmatpush1.bf16.msra.mxu0 %v14414_v63  ;;  %v5065_v63 = vld [vmem:[#allocation11 + $0x14f0] sm:$0xff] }
 0x707   :  { %11866 = vmatpush1.bf16.msra.mxu1 %v14416_v45  ;;  %11703 = vmatprep.subr.bf16.mxu0 %v14431_v4  ;;  %v5058_v45 = vld [vmem:[#allocation11 + $0x14b8] sm:$0xff]  ;;  %v14527_v5 = vcombine.high %v5057_v61, %v5065_v63 }
 0x708   :  { %11867 = vmatprep.subr.bf16.mxu1 %v14433_v29  ;;  %v5066_v4 = vld [vmem:[#allocation11 + $0x14f8] sm:$0xff]  ;;  %v14510_v29 = vcombine.low %v5041_v48, %v5049_v1 }
 0x709   :  { %v14529_v52 = vcombine.high %v5058_v45, %v5066_v4  ;;  %v14528_v14 = vcombine.low %v5058_v45, %v5066_v4  ;;  %v5153_v4 = vld [vmem:[#allocation11 + $0x17b0] sm:$0xff] }
 0x70a   :  { %11704 = vmatpush1.bf16.msra.mxu0 %v14430_v36  ;;  %v5081_v36 = vld [vmem:[#allocation11 + $0x1570] sm:$0xff] }
 0x70b   :  { %11868 = vmatpush1.bf16.msra.mxu1 %v14432_v6  ;;  %11705 = vmatprep.subr.bf16.mxu0 %v14447_v44  ;;  %v5074_v6 = vld [vmem:[#allocation11 + $0x1538] sm:$0xff]  ;;  %v14543_v7 = vcombine.high %v5073_v37, %v5081_v36 }
 0x70c   :  { %11869 = vmatprep.subr.bf16.mxu1 %v14449_v38  ;;  %v5082_v44 = vld [vmem:[#allocation11 + $0x1578] sm:$0xff]  ;;  %v14526_v38 = vcombine.low %v5057_v61, %v5065_v63 }
 0x70d   :  { %v14545_v12 = vcombine.high %v5074_v6, %v5082_v44  ;;  %v14544_v22 = vcombine.low %v5074_v6, %v5082_v44  ;;  %v5169_v44 = vld [vmem:[#allocation11 + $0x1830] sm:$0xff] }
 0x70e   :  { %11706 = vmatpush1.bf16.msra.mxu0 %v14446_v10  ;;  %v5097_v10 = vld [vmem:[#allocation11 + $0x15f0] sm:$0xff] }
 0x70f   :  { %11870 = vmatpush1.bf16.msra.mxu1 %v14448_v18  ;;  %11707 = vmatprep.subr.bf16.mxu0 %v14463_v19  ;;  %v5090_v18 = vld [vmem:[#allocation11 + $0x15b8] sm:$0xff]  ;;  %v14559_v26 = vcombine.high %v5089_v8, %v5097_v10 }
 0x710   :  { %11871 = vmatprep.subr.bf16.mxu1 %v14465_v21  ;;  %v5098_v19 = vld [vmem:[#allocation11 + $0x15f8] sm:$0xff]  ;;  %v14542_v21 = vcombine.low %v5073_v37, %v5081_v36 }
 0x711   :  { %v14561_v28 = vcombine.high %v5090_v18, %v5098_v19  ;;  %v14560_v42 = vcombine.low %v5090_v18, %v5098_v19  ;;  %v5185_v19 = vld [vmem:[#allocation11 + $0x18b0] sm:$0xff] }
 0x712   :  { %11708 = vmatpush1.bf16.msra.mxu0 %v14462_v39  ;;  %v5113_v39 = vld [vmem:[#allocation11 + $0x1670] sm:$0xff] }
 0x713   :  { %11872 = vmatpush1.bf16.msra.mxu1 %v14464_v54  ;;  %11709 = vmatprep.subr.bf16.mxu0 %v14479_v40  ;;  %v5106_v54 = vld [vmem:[#allocation11 + $0x1638] sm:$0xff]  ;;  %v14575_v43 = vcombine.high %v5105_v3, %v5113_v39 }
 0x714   :  { %11873 = vmatprep.subr.bf16.mxu1 %v14481_v23  ;;  %v5114_v40 = vld [vmem:[#allocation11 + $0x1678] sm:$0xff]  ;;  %v14558_v23 = vcombine.low %v5089_v8, %v5097_v10 }
 0x715   :  { %v14577_v46 = vcombine.high %v5106_v54, %v5114_v40  ;;  %v14576_v48 = vcombine.low %v5106_v54, %v5114_v40  ;;  %v5201_v54 = vld [vmem:[#allocation11 + $0x1930] sm:$0xff] }
 0x716   :  { %11710 = vmatpush1.bf16.msra.mxu0 %v14478_v13  ;;  %v5129_v13 = vld [vmem:[#allocation11 + $0x16f0] sm:$0xff] }
 0x717   :  { %11874 = vmatpush1.bf16.msra.mxu1 %v14480_v16  ;;  %11711 = vmatprep.subr.bf16.mxu0 %v14495_v59  ;;  %v5122_v16 = vld [vmem:[#allocation11 + $0x16b8] sm:$0xff]  ;;  %v14591_v1 = vcombine.high %v5121_v30, %v5129_v13  ;;  %v5209_v40 = vld [vmem:[#allocation11 + $0x1970] sm:$0xff] }
 0x718   :  { %11875 = vmatprep.subr.bf16.mxu1 %v14497_v47  ;;  %v5130_v59 = vld [vmem:[#allocation11 + $0x16f8] sm:$0xff]  ;;  %v14574_v47 = vcombine.low %v5105_v3, %v5113_v39 }
 0x719   :  { %v14593_v50 = vcombine.high %v5122_v16, %v5130_v59  ;;  %v14592_v61 = vcombine.low %v5122_v16, %v5130_v59  ;;  %v5217_v59 = vld [vmem:[#allocation11 + $0x19b0] sm:$0xff] }
 0x71a   :  { %11712 = vmatpush1.bf16.msra.mxu0 %v14494_v60  ;;  %v5145_v60 = vld [vmem:[#allocation11 + $0x1770] sm:$0xff] }
 0x71b   :  { %11876 = vmatpush1.bf16.msra.mxu1 %v14496_v53  ;;  %11713 = vmatprep.subr.bf16.mxu0 %v14511_v55  ;;  %v5138_v53 = vld [vmem:[#allocation11 + $0x1738] sm:$0xff]  ;;  %v14607_v63 = vcombine.high %v5137_v51, %v5145_v60 }
 0x71c   :  { %11877 = vmatprep.subr.bf16.mxu1 %v14513_v27  ;;  %v5146_v55 = vld [vmem:[#allocation11 + $0x1778] sm:$0xff]  ;;  %v14590_v27 = vcombine.low %v5121_v30, %v5129_v13  ;;  %v14671_v13 = vcombine.high %v5201_v54, %v5209_v40 }
 0x71d   :  { %v14609_v45 = vcombine.high %v5138_v53, %v5146_v55  ;;  %v14608_v37 = vcombine.low %v5138_v53, %v5146_v55  ;;  %v5233_v53 = vld [vmem:[#allocation11 + $0x1a30] sm:$0xff] }
 0x71e   :  { %11714 = vmatpush1.bf16.msra.mxu0 %v14510_v29  ;;  %v5161_v29 = vld [vmem:[#allocation11 + $0x17f0] sm:$0xff] }
 0x71f   :  { %11878 = vmatpush1.bf16.msra.mxu1 %v14512_v0  ;;  %11715 = vmatprep.subr.bf16.mxu0 %v14527_v5  ;;  %v5154_v0 = vld [vmem:[#allocation11 + $0x17b8] sm:$0xff]  ;;  %v14623_v36 = vcombine.high %v5153_v4, %v5161_v29  ;;  %v5241_v55 = vld [vmem:[#allocation11 + $0x1a70] sm:$0xff] }
 0x720   :  { %11879 = vmatprep.subr.bf16.mxu1 %v14529_v52  ;;  %v5162_v5 = vld [vmem:[#allocation11 + $0x17f8] sm:$0xff]  ;;  %v14606_v52 = vcombine.low %v5137_v51, %v5145_v60 }
 0x721   :  { %v14625_v6 = vcombine.high %v5154_v0, %v5162_v5  ;;  %v14624_v8 = vcombine.low %v5154_v0, %v5162_v5  ;;  %v5257_v0 = vld [vmem:[#allocation11 + $0x1af0] sm:$0xff]  ;;  %v5250_v5 = vld [vmem:[#allocation11 + $0x1ab8] sm:$0xff] }
 0x722   :  { %11716 = vmatpush1.bf16.msra.mxu0 %v14526_v38  ;;  %v5177_v38 = vld [vmem:[#allocation11 + $0x1870] sm:$0xff] }
 0x723   :  { %11880 = vmatpush1.bf16.msra.mxu1 %v14528_v14  ;;  %11717 = vmatprep.subr.bf16.mxu0 %v14543_v7  ;;  %v5170_v14 = vld [vmem:[#allocation11 + $0x1838] sm:$0xff]  ;;  %v14639_v10 = vcombine.high %v5169_v44, %v5177_v38 }
 0x724   :  { %11881 = vmatprep.subr.bf16.mxu1 %v14545_v12  ;;  %v5178_v7 = vld [vmem:[#allocation11 + $0x1878] sm:$0xff]  ;;  %v14622_v12 = vcombine.low %v5153_v4, %v5161_v29  ;;  %v5249_v29 = vld [vmem:[#allocation11 + $0x1ab0] sm:$0xff] }
 0x725   :  { %v14641_v18 = vcombine.high %v5170_v14, %v5178_v7  ;;  %v14640_v3 = vcombine.low %v5170_v14, %v5178_v7  ;;  %v5273_v14 = vld [vmem:[#allocation11 + $0x1b70] sm:$0xff]  ;;  %v5266_v7 = vld [vmem:[#allocation11 + $0x1b38] sm:$0xff] }
 0x726   :  { %11718 = vmatpush1.bf16.msra.mxu0 %v14542_v21  ;;  %v5193_v21 = vld [vmem:[#allocation11 + $0x18f0] sm:$0xff] }
 0x727   :  { %11882 = vmatpush1.bf16.msra.mxu1 %v14544_v22  ;;  %11719 = vmatprep.subr.bf16.mxu0 %v14559_v26  ;;  %v14638_v22 = vcombine.low %v5169_v44, %v5177_v38  ;;  %v5186_v26 = vld [vmem:[#allocation11 + $0x18b8] sm:$0xff]  ;;  %v14655_v39 = vcombine.high %v5185_v19, %v5193_v21  ;;  %v5265_v38 = vld [vmem:[#allocation11 + $0x1b30] sm:$0xff] }
 0x728   :  { %11883 = vmatprep.subr.bf16.mxu1 %v14561_v28  ;;  %v5194_v28 = vld [vmem:[#allocation11 + $0x18f8] sm:$0xff] }
 0x729   :  { %v14656_v30 = vcombine.low %v5186_v26, %v5194_v28 }
 0x72a   :  { %11720 = vmatpush1.bf16.msra.mxu0 %v14558_v23  ;;  %v14657_v23 = vcombine.high %v5186_v26, %v5194_v28  ;;  %v5289_v26 = vld [vmem:[#allocation11 + $0x1bf0] sm:$0xff] }
 0x72b   :  { %11884 = vmatpush1.bf16.msra.mxu1 %v14560_v42  ;;  %11721 = vmatprep.subr.bf16.mxu0 %v14575_v43  ;;  %v5202_v42 = vld [vmem:[#allocation11 + $0x1938] sm:$0xff] }
 0x72c   :  { %11885 = vmatprep.subr.bf16.mxu1 %v14577_v46  ;;  %v5210_v43 = vld [vmem:[#allocation11 + $0x1978] sm:$0xff]  ;;  %v14654_v46 = vcombine.low %v5185_v19, %v5193_v21 }
 0x72d   :  { %v14673_v16 = vcombine.high %v5202_v42, %v5210_v43 }
 0x72e   :  { %11722 = vmatpush1.bf16.msra.mxu0 %v14574_v47  ;;  %v5225_v47 = vld [vmem:[#allocation11 + $0x19f0] sm:$0xff] }
 0x72f   :  { %11886 = vmatpush1.bf16.msra.mxu1 %v14576_v48  ;;  %11723 = vmatprep.subr.bf16.mxu0 %v14591_v1  ;;  %v5218_v48 = vld [vmem:[#allocation11 + $0x19b8] sm:$0xff]  ;;  %v14687_v51 = vcombine.high %v5217_v59, %v5225_v47 }
 0x730   :  { %11887 = vmatprep.subr.bf16.mxu1 %v14593_v50  ;;  %v5226_v1 = vld [vmem:[#allocation11 + $0x19f8] sm:$0xff]  ;;  %v14670_v50 = vcombine.low %v5201_v54, %v5209_v40 }
 0x731   :  { %v14689_v60 = vcombine.high %v5218_v48, %v5226_v1  ;;  %v5290_v54 = vld [vmem:[#allocation11 + $0x1bf8] sm:$0xff] }
 0x732   :  { %11724 = vmatpush1.bf16.msra.mxu0 %v14590_v27  ;;  %v5234_v27 = vld [vmem:[#allocation11 + $0x1a38] sm:$0xff] }
 0x733   :  { %11888 = vmatpush1.bf16.msra.mxu1 %v14592_v61  ;;  %11725 = vmatprep.subr.bf16.mxu0 %v14607_v63  ;;  %v5242_v61 = vld [vmem:[#allocation11 + $0x1a78] sm:$0xff]  ;;  %v14688_v63 = vcombine.low %v5218_v48, %v5226_v1  ;;  %v5305_v48 = vld [vmem:[#allocation11 + $0x1c70] sm:$0xff] }
 0x734   :  { %11889 = vmatprep.subr.bf16.mxu1 %v14609_v45  ;;  %v14703_v45 = vcombine.high %v5233_v53, %v5241_v55  ;;  %v14705_v4 = vcombine.high %v5234_v27, %v5242_v61  ;;  %v5298_v1 = vld [vmem:[#allocation11 + $0x1c38] sm:$0xff] }
 0x736   :  { %11726 = vmatpush1.bf16.msra.mxu0 %v14606_v52  ;;  %v5258_v52 = vld [vmem:[#allocation11 + $0x1af8] sm:$0xff] }
 0x737   :  { %11890 = vmatpush1.bf16.msra.mxu1 %v14608_v37  ;;  %11727 = vmatprep.subr.bf16.mxu0 %v14623_v36  ;;  %v14702_v37 = vcombine.low %v5233_v53, %v5241_v55  ;;  %v14704_v36 = vcombine.low %v5234_v27, %v5242_v61  ;;  %v14721_v44 = vcombine.high %v5250_v5, %v5258_v52  ;;  %v5313_v55 = vld [vmem:[#allocation11 + $0x1cb0] sm:$0xff]  ;;  %v5314_v61 = vld [vmem:[#allocation11 + $0x1cb8] sm:$0xff] }
 0x738   :  { %11891 = vmatprep.subr.bf16.mxu1 %v14625_v6  ;;  %v14719_v6 = vcombine.high %v5249_v29, %v5257_v0  ;;  %v5321_v27 = vld [vmem:[#allocation11 + $0x1cf0] sm:$0xff] }
 0x73a   :  { %11728 = vmatpush1.bf16.msra.mxu0 %v14622_v12  ;;  %v5274_v12 = vld [vmem:[#allocation11 + $0x1b78] sm:$0xff] }
 0x73b   :  { %11892 = vmatpush1.bf16.msra.mxu1 %v14624_v8  ;;  %11738 = vmatprep.subr.bf16.mxu0 %v14639_v10  ;;  %v14718_v8 = vcombine.low %v5249_v29, %v5257_v0  ;;  %v14720_v10 = vcombine.low %v5250_v5, %v5258_v52  ;;  %v14737_v21 = vcombine.high %v5266_v7, %v5274_v12  ;;  %v5329_v0 = vld [vmem:[#allocation11 + $0x1d30] sm:$0xff]  ;;  %v5330_v52 = vld [vmem:[#allocation11 + $0x1d38] sm:$0xff] }
 0x73c   :  { %11902 = vmatprep.subr.bf16.mxu1 %v14641_v18  ;;  %v14735_v18 = vcombine.high %v5265_v38, %v5273_v14  ;;  %v5337_v5 = vld [vmem:[#allocation11 + $0x1d70] sm:$0xff] }
 0x73d   :  { %11730 = vmatmul.mubr.bf16.vlgmr.msra.gmra.mrb[24].mxu0 %v16216_v49 }
 0x73e   :  { %11894 = vmatmul.mubr.bf16.vlgmr.msra.gmra.mrb[24].mxu1 %v16216_v49  ;;  %11739 = vmatpush1.bf16.msra.mxu0 %v14638_v22  ;;  %v14672_v49 = vcombine.low %v5202_v42, %v5210_v43  ;;  %v5281_v22 = vld [vmem:[#allocation11 + $0x1bb0] sm:$0xff]  ;;  %v14734_v42 = vcombine.low %v5265_v38, %v5273_v14 }
 0x73f   :  { %11770 = vmatprep.mubr.bf16.mxu0 %v16220_v57  ;;  %11903 = vmatpush1.bf16.msra.mxu1 %v14640_v3  ;;  %v5345_v14 = vld [vmem:[#allocation11 + $0x1db0] sm:$0xff] }
 0x740   :  { %11934 = vmatprep.mubr.bf16.mxu1 %v16220_v57  ;;  %11740 = vmatprep.subr.bf16.mxu0 %v14655_v39  ;;  %v14686_v57 = vcombine.low %v5217_v59, %v5225_v47  ;;  %v5282_v39 = vld [vmem:[#allocation11 + $0x1bb8] sm:$0xff]  ;;  %v5297_v47 = vld [vmem:[#allocation11 + $0x1c30] sm:$0xff] }
 0x741   :  { %11904 = vmatprep.subr.bf16.mxu1 %v14657_v23  ;;  %v14753_v59 = vcombine.high %v5282_v39, %v5290_v54 }
 0x742   :  { %11741 = vmatpush1.bf16.msra.mxu0 %v14654_v46 }
 0x743   :  { %11905 = vmatpush1.bf16.msra.mxu1 %v14656_v30  ;;  %11742 = vmatprep.subr.bf16.mxu0 %v14671_v13  ;;  %v14736_v30 = vcombine.low %v5266_v7, %v5274_v12  ;;  %v14751_v13 = vcombine.high %v5281_v22, %v5289_v26  ;;  %v5353_v7 = vld [vmem:[#allocation11 + $0x1df0] sm:$0xff]  ;;  %v5346_v12 = vld [vmem:[#allocation11 + $0x1db8] sm:$0xff] }
 0x744   :  { %11906 = vmatprep.subr.bf16.mxu1 %v14673_v16 }
 0x746   :  { %11743 = vmatpush1.bf16.msra.mxu0 %v14670_v50  ;;  %v5306_v50 = vld [vmem:[#allocation11 + $0x1c78] sm:$0xff] }
 0x747   :  { %11907 = vmatpush1.bf16.msra.mxu1 %v14672_v49  ;;  %11744 = vmatprep.subr.bf16.mxu0 %v14687_v51  ;;  %v14750_v49 = vcombine.low %v5281_v22, %v5289_v26  ;;  %v14752_v51 = vcombine.low %v5282_v39, %v5290_v54  ;;  %v14769_v53 = vcombine.high %v5298_v1, %v5306_v50  ;;  %v5361_v26 = vld [vmem:[#allocation11 + $0x1e30] sm:$0xff]  ;;  %v5362_v54 = vld [vmem:[#allocation11 + $0x1e38] sm:$0xff] }
 0x748   :  { %11908 = vmatprep.subr.bf16.mxu1 %v14689_v60  ;;  %v14767_v60 = vcombine.high %v5297_v47, %v5305_v48  ;;  %v5369_v39 = vld [vmem:[#allocation11 + $0x1e70] sm:$0xff] }
 0x74a   :  { %11745 = vmatpush1.bf16.msra.mxu0 %v14686_v57  ;;  %v5322_v57 = vld [vmem:[#allocation11 + $0x1cf8] sm:$0xff] }
 0x74b   :  { %11909 = vmatpush1.bf16.msra.mxu1 %v14688_v63  ;;  %11746 = vmatprep.subr.bf16.mxu0 %v14703_v45  ;;  %v14766_v63 = vcombine.low %v5297_v47, %v5305_v48  ;;  %v14768_v45 = vcombine.low %v5298_v1, %v5306_v50  ;;  %v14785_v29 = vcombine.high %v5314_v61, %v5322_v57  ;;  %v5386_v47 = vld [vmem:[#allocation11 + $0x1ef8] sm:$0xff] }
 0x74c   :  { %11910 = vmatprep.subr.bf16.mxu1 %v14705_v4  ;;  %v14783_v4 = vcombine.high %v5313_v55, %v5321_v27  ;;  %v14830_v48 = vcombine.low %v5361_v26, %v5369_v39 }
 0x74e   :  { %11747 = vmatpush1.bf16.msra.mxu0 %v14702_v37  ;;  %v5338_v37 = vld [vmem:[#allocation11 + $0x1d78] sm:$0xff] }
 0x74f   :  { %11911 = vmatpush1.bf16.msra.mxu1 %v14704_v36  ;;  %11748 = vmatprep.subr.bf16.mxu0 %v14719_v6  ;;  %v14782_v36 = vcombine.low %v5313_v55, %v5321_v27  ;;  %v14784_v6 = vcombine.low %v5314_v61, %v5322_v57  ;;  %v14801_v38 = vcombine.high %v5330_v52, %v5338_v37  ;;  %v5402_v55 = vld [vmem:[#allocation11 + $0x1f78] sm:$0xff]  ;;  %v16303_v27 = vld [vmem:[#allocation13] sm:$0xff] }
 0x750   :  { %v16295_v19 = vpop.f32.mrb[20].mxu0  ;;  %11912 = vmatprep.subr.bf16.mxu1 %v14721_v44  ;;  %v14799_v44 = vcombine.high %v5329_v0, %v5337_v5 }
 0x751   :  { %v16297_v28 = vpop.f32.mrb[20].mxu1  ;;  %v16299_v3 = vpop.f32.mrb[21].mxu0 }
 0x752   :  { %v16301_v40 = vpop.f32.mrb[21].mxu1  ;;  %v11448_v23 = vpop.f32.mrb[22].mxu0  ;;  %11749 = vmatpush1.bf16.msra.mxu0 %v14718_v8  ;;  %v5354_v8 = vld [vmem:[#allocation11 + $0x1df8] sm:$0xff] }
 0x753   :  { %v11612_v43 = vpop.f32.mrb[22].mxu1  ;;  %11913 = vmatpush1.bf16.msra.mxu1 %v14720_v10  ;;  %v11449_v46 = vpop.f32.mrb[23].mxu0  ;;  %11750 = vmatprep.subr.bf16.mxu0 %v14735_v18  ;;  %v14798_v10 = vcombine.low %v5329_v0, %v5337_v5  ;;  %v14800_v18 = vcombine.low %v5330_v52, %v5338_v37  ;;  %v14817_v22 = vcombine.high %v5346_v12, %v5354_v8  ;;  %v5370_v23 = vld [vmem:[#allocation11 + $0x1e78] sm:$0xff] }
 0x754   :  { %v11613_v16 = vpop.f32.mrb[23].mxu1  ;;  %11914 = vmatprep.subr.bf16.mxu1 %v14737_v21  ;;  %v14815_v21 = vcombine.high %v5345_v14, %v5353_v7  ;;  %v14816_v43 = vcombine.low %v5346_v12, %v5354_v8  ;;  %v14831_v46 = vcombine.high %v5361_v26, %v5369_v39  ;;  %v14832_v1 = vcombine.low %v5362_v54, %v5370_v23  ;;  %v5410_v5 = vld [vmem:[#allocation11 + $0x1fb8] sm:$0xff]  ;;  %v15501_v26 = vld [vmem:[#allocation14] sm:$0xff]  }
 0x755   :  { %v5385_v16 = vld [vmem:[#allocation11 + $0x1ef0] sm:$0xff]  ;;  %v5438_v0 = vrot.slane %v16303_v27, %v16068_v17  ;;  %v5418_v52 = vld [vmem:[#allocation11 + $0x1ff8] sm:$0xff]  ;;  %v5446_v37 = vrot.slane %v16303_v27, %v16075_v31 }
 0x756   :  { %11751 = vmatpush1.bf16.msra.mxu0 %v14734_v42  ;;  %v14814_v42 = vcombine.low %v5345_v14, %v5353_v7  ;;  %v14880_v8 = vcombine.low %v5410_v5, %v5418_v52  ;;  %v15502_v39 = vld [vmem:[#allocation14 + $0x80] sm:$0xff]  }
 0x757   :  { %11915 = vmatpush1.bf16.msra.mxu1 %v14736_v30  ;;  %11752 = vmatprep.subr.bf16.mxu0 %v14751_v13  ;;  %v14833_v30 = vcombine.high %v5362_v54, %v5370_v23  ;;  %v5377_v13 = vld [vmem:[#allocation11 + $0x1eb0] sm:$0xff]  ;;  %v15324_v14 = vadd.f32 %v16251_v41, %v5438_v0  ;;  %v15326_v7 = vadd.f32 %v16253_v62, %v5446_v37  ;;  %v15503_v54 = vld [vmem:[#allocation14 + $0x48] sm:$0xff]   ;;  %v15526_v37 = vld [vmem:[#allocation14 + $0xb0] sm:$0xff]  }
 0x758   :  { %11916 = vmatprep.subr.bf16.mxu1 %v14753_v59  ;;  %v5378_v59 = vld [vmem:[#allocation11 + $0x1eb8] sm:$0xff]  ;;  %v14847_v50 = vcombine.high %v5377_v13, %v5385_v16  ;;  %v14846_v61 = vcombine.low %v5377_v13, %v5385_v16  ;;  %v15509_v13 = vld [vmem:[#allocation14 + $0x10] sm:$0xff]   ;;  %v5462_v0 = vrot.slane %v16303_v27, %v16125_v11 }
 0x759   :  { %v14848_v57 = vcombine.low %v5378_v59, %v5386_v47  ;;  %v15504_v62 = vld [vmem:[#allocation14 + $0xc8] sm:$0xff]   ;;  %v15510_v16 = vld [vmem:[#allocation14 + $0x90] sm:$0xff]  }
 0x75a   :  { %11753 = vmatpush1.bf16.msra.mxu0 %v14750_v49  ;;  %v14849_v49 = vcombine.high %v5378_v59, %v5386_v47  ;;  %v15511_v59 = vld [vmem:[#allocation14 + $0x58] sm:$0xff]  }
 0x75b   :  { %11917 = vmatpush1.bf16.msra.mxu1 %v14752_v51  ;;  %11754 = vmatprep.subr.bf16.mxu0 %v14767_v60  ;;  %v5393_v51 = vld [vmem:[#allocation11 + $0x1f30] sm:$0xff]  ;;  %v15512_v47 = vld [vmem:[#allocation14 + $0xd8] sm:$0xff]  }
 0x75c   :  { %11918 = vmatprep.subr.bf16.mxu1 %v14769_v53  ;;  %v5401_v60 = vld [vmem:[#allocation11 + $0x1f70] sm:$0xff]  ;;  %v5394_v53 = vld [vmem:[#allocation11 + $0x1f38] sm:$0xff] }
 0x75e   :  { %11755 = vmatpush1.bf16.msra.mxu0 %v14766_v63  ;;  %v14863_v63 = vcombine.high %v5393_v51, %v5401_v60 }
 0x75f   :  { %11919 = vmatpush1.bf16.msra.mxu1 %v14768_v45  ;;  %11756 = vmatprep.subr.bf16.mxu0 %v14783_v4  ;;  %v14865_v45 = vcombine.high %v5394_v53, %v5402_v55  ;;  %v5409_v4 = vld [vmem:[#allocation11 + $0x1fb0] sm:$0xff] }
 0x760   :  { %11920 = vmatprep.subr.bf16.mxu1 %v14785_v29  ;;  %v5417_v29 = vld [vmem:[#allocation11 + $0x1ff0] sm:$0xff] }
 0x761   :  { %v14878_v12 = vcombine.low %v5409_v4, %v5417_v29 }
 0x762   :  { %11757 = vmatpush1.bf16.msra.mxu0 %v14782_v36  ;;  %v14862_v36 = vcombine.low %v5393_v51, %v5401_v60  ;;  %v15518_v51 = vld [vmem:[#allocation14 + $0xa0] sm:$0xff]   ;;  %v15519_v60 = vld [vmem:[#allocation14 + $0x68] sm:$0xff]  }
 0x763   :  { %11921 = vmatpush1.bf16.msra.mxu1 %v14784_v6  ;;  %11758 = vmatprep.subr.bf16.mxu0 %v14799_v44  ;;  %v14864_v6 = vcombine.low %v5394_v53, %v5402_v55  ;;  %v14879_v44 = vcombine.high %v5409_v4, %v5417_v29  ;;  %v15520_v53 = vld [vmem:[#allocation14 + $0xe8] sm:$0xff]   ;;  %v15524_v4 = vld [vmem:[#allocation14 + $0xf0] sm:$0xff]   ;;  %v5454_v29 = vrot.slane %v16303_v27, %v16105_v34 }
 0x764   :  { %11922 = vmatprep.subr.bf16.mxu1 %v14801_v38  ;;  %v14881_v38 = vcombine.high %v5410_v5, %v5418_v52  ;;  %v15521_v55 = vld [vmem:[#allocation14 + $0x28] sm:$0xff]   ;;  %v15525_v5 = vld [vmem:[#allocation14 + $0x30] sm:$0xff]  }
 0x766   :  { %11759 = vmatpush1.bf16.msra.mxu0 %v14798_v10  ;;  %v15499_v10 = vld [vmem:[#allocation14 + $0x40] sm:$0xff]  }
 0x767   :  { %11923 = vmatpush1.bf16.msra.mxu1 %v14800_v18  ;;  %11760 = vmatprep.subr.bf16.mxu0 %v14815_v21  ;;  %v15500_v18 = vld [vmem:[#allocation14 + $0xc0] sm:$0xff]   ;;  %v11944_v21 = vmax.f32 %v15324_v14, 0.0  ;;  %v15330_v14 = vadd.f32 %v16277_v25, %v5462_v0  ;;  %v15535_v25 = vld [vmem:[#allocation14 + $0x148] sm:$0xff]  }
 0x768   :  { %11924 = vmatprep.subr.bf16.mxu1 %v14817_v22  ;;  %v11946_v22 = vmax.f32 %v15326_v7, 0.0  ;;  %v15529_v7 = vld [vmem:[#allocation14 + $0x38] sm:$0xff]  }
 0x769   :  { %v12217_v41 = vpack.c.bf16 %v11944_v21, %v11944_v21 }
 0x76a   :  { %11761 = vmatpush1.bf16.msra.mxu0 %v14814_v42  ;;  %v12219_v23 = vpack.c.bf16 %v11946_v22, %v11946_v22  ;;  %v15505_v42 = vld [vmem:[#allocation14 + $0x8] sm:$0xff]   ;;  %v11950_v22 = vmax.f32 %v15330_v14, 0.0 }
 0x76b   :  { %11925 = vmatpush1.bf16.msra.mxu1 %v14816_v43  ;;  %11762 = vmatprep.subr.bf16.mxu0 %v14831_v46  ;;  %v15506_v43 = vld [vmem:[#allocation14 + $0x88] sm:$0xff]   ;;  %v15507_v46 = vld [vmem:[#allocation14 + $0x50] sm:$0xff]  }
 0x76c   :  { %11926 = vmatprep.subr.bf16.mxu1 %v14833_v30  ;;  %v15508_v30 = vld [vmem:[#allocation14 + $0xd0] sm:$0xff]  }
 0x76e   :  { %11763 = vmatpush1.bf16.msra.mxu0 %v14830_v48  ;;  %v15514_v48 = vld [vmem:[#allocation14 + $0x98] sm:$0xff]  }
 0x76f   :  { %11927 = vmatpush1.bf16.msra.mxu1 %v14832_v1  ;;  %11764 = vmatprep.subr.bf16.mxu0 %v14847_v50  ;;  %v15515_v1 = vld [vmem:[#allocation14 + $0x60] sm:$0xff]  }
 0x770   :  { %11928 = vmatprep.subr.bf16.mxu1 %v14849_v49  ;;  %v15516_v50 = vld [vmem:[#allocation14 + $0xe0] sm:$0xff]  }
 0x771   :  { %v15517_v49 = vld [vmem:[#allocation14 + $0x20] sm:$0xff]  }
 0x772   :  { %11765 = vmatpush1.bf16.msra.mxu0 %v14846_v61  ;;  %v5434_v61 = vrot.slane %v16303_v27, %v16063_v15 }
 0x773   :  { %11929 = vmatpush1.bf16.msra.mxu1 %v14848_v57  ;;  %11766 = vmatprep.subr.bf16.mxu0 %v14863_v63  ;;  %v15522_v57 = vld [vmem:[#allocation14 + $0xa8] sm:$0xff]   ;;  %v15523_v63 = vld [vmem:[#allocation14 + $0x70] sm:$0xff]  }
 0x774   :  { %11930 = vmatprep.subr.bf16.mxu1 %v14865_v45  ;;  %v5442_v45 = vrot.slane %v16303_v27, %v16098_v20  ;;  %v15323_v52 = vadd.f32 %v16247_v33, %v5434_v61  ;;  %v5450_v61 = vrot.slane %v16303_v27, %v16122_v2 }
 0x776   :  { %11767 = vmatpush1.bf16.msra.mxu0 %v14862_v36  ;;  %v15527_v36 = vld [vmem:[#allocation14 + $0x78] sm:$0xff]  }
 0x777   :  { %11931 = vmatpush1.bf16.msra.mxu1 %v14864_v6  ;;  %11768 = vmatprep.subr.bf16.mxu0 %v14879_v44  ;;  %v15325_v6 = vadd.f32 %v16249_v35, %v5442_v45  ;;  %v15528_v44 = vld [vmem:[#allocation14 + $0xf8] sm:$0xff]   ;;  %v15533_v35 = vld [vmem:[#allocation14 + $0x100] sm:$0xff]   ;;  %v5458_v45 = vrot.slane %v16303_v27, %v16142_v56 }
 0x778   :  { %11932 = vmatprep.subr.bf16.mxu1 %v14881_v38  ;;  %v15328_v38 = vadd.f32 %v16275_v24, %v5454_v29  ;;  %v15534_v24 = vld [vmem:[#allocation14 + $0x180] sm:$0xff]   ;;  %v15560_v27 = vld [vmem:[#allocation14 + $0x1f8] sm:$0xff]  }
 0x779   :  { %v11945_v33 = vmax.f32 %v15325_v6, 0.0  ;;  %v15329_v6 = vadd.f32 %v16273_v58, %v5458_v45  ;;  %v15565_v58 = vld [vmem:[#allocation14 + $0x200] sm:$0xff]   ;;  %v15593_v45 = vld [vmem:[#allocation14 + $0x238] sm:$0xff]  }
 0x77a   :  { %11769 = vmatpush1.bf16.msra.mxu0 %v14878_v12  ;;  %v11943_v12 = vmax.f32 %v15323_v52, 0.0  ;;  %v11948_v21 = vmax.f32 %v15328_v38, 0.0  ;;  %v15327_v52 = vadd.f32 %v16271_v9, %v5450_v61  ;;  %v15590_v61 = vld [vmem:[#allocation14 + $0x2b0] sm:$0xff]  }
 0x77b   :  { %11933 = vmatpush1.bf16.msra.mxu1 %v14880_v8  ;;  %15011 = vmatprep.subr.bf16.mxu0 %v15499_v10  ;;  %v15530_v8 = vld [vmem:[#allocation14 + $0xb8] sm:$0xff]   ;;  %v15531_v10 = vld [vmem:[#allocation14 + $0x140] sm:$0xff]   ;;  %v11949_v9 = vmax.f32 %v15329_v6, 0.0  ;;  %v15600_v6 = vld [vmem:[#allocation14 + $0x3c8] sm:$0xff]  }
 0x77c   :  { %15033 = vmatprep.subr.bf16.mxu1 %v15500_v18  ;;  %v15532_v18 = vld [vmem:[#allocation14 + $0x1c0] sm:$0xff]   ;;  %v11947_v14 = vmax.f32 %v15327_v52, 0.0 }
 0x77d   :  { %11771 = vmatmul.mubr.bf16.vlgmr.msra.gmra.mrb[24].mxu0 %v16229_v32 }
 0x77e   :  { %11935 = vmatmul.mubr.bf16.vlgmr.msra.gmra.mrb[24].mxu1 %v16229_v32  ;;  %15012 = vmatpush3.bf16.msra.mxu0 %v15501_v26  ;;  %v15513_v32 = vld [vmem:[#allocation14 + $0x18] sm:$0xff]   ;;  %v12216_v26 = vpack.c.bf16 %v11943_v12, %v11943_v12  ;;  %v15564_v12 = vld [vmem:[#allocation14 + $0x2c0] sm:$0xff]  }
 0x77f   :  { %13038 = vmatprep.mubr.bf16.mxu0 %v12217_v41  ;;  %15034 = vmatpush3.bf16.msra.mxu1 %v15502_v39  ;;  %v12218_v39 = vpack.c.bf16 %v11945_v33, %v11945_v33  ;;  %v15536_v41 = vld [vmem:[#allocation14 + $0x1c8] sm:$0xff]   ;;  %v12220_v33 = vpack.c.bf16 %v11947_v14, %v11947_v14  ;;  %v15605_v14 = vld [vmem:[#allocation14 + $0x310] sm:$0xff]  }
 0x780   :  { %13078 = vmatprep.mubr.bf16.mxu1 %v12219_v23  ;;  %15013 = vmatprep.subr.bf16.mxu0 %v15503_v54  ;;  %v12221_v54 = vpack.c.bf16 %v11948_v21, %v11948_v21  ;;  %v15537_v23 = vld [vmem:[#allocation14 + $0x108] sm:$0xff]  }
 0x781   :  { %15035 = vmatprep.subr.bf16.mxu1 %v15504_v62  ;;  %v12223_v62 = vpack.c.bf16 %v11950_v22, %v11950_v22  ;;  %v15568_v22 = vld [vmem:[#allocation14 + $0x2c8] sm:$0xff]  }
 0x782   :  { %15014 = vmatpush3.bf16.msra.mxu0 %v15505_v42  ;;  %v15538_v42 = vld [vmem:[#allocation14 + $0x188] sm:$0xff]  }
 0x783   :  { %15036 = vmatpush3.bf16.msra.mxu1 %v15506_v43  ;;  %15015 = vmatprep.subr.bf16.mxu0 %v15507_v46  ;;  %v15539_v43 = vld [vmem:[#allocation14 + $0x150] sm:$0xff]  }
 0x784   :  { %15037 = vmatprep.subr.bf16.mxu1 %v15508_v30  ;;  %v15540_v46 = vld [vmem:[#allocation14 + $0x1d0] sm:$0xff]  }
 0x785   :  { %v15541_v30 = vld [vmem:[#allocation14 + $0x110] sm:$0xff]  }
 0x786   :  { %15016 = vmatpush3.bf16.msra.mxu0 %v15509_v13  ;;  %v15542_v13 = vld [vmem:[#allocation14 + $0x190] sm:$0xff]  }
 0x787   :  { %15038 = vmatpush3.bf16.msra.mxu1 %v15510_v16  ;;  %15017 = vmatprep.subr.bf16.mxu0 %v15511_v59  ;;  %v15543_v16 = vld [vmem:[#allocation14 + $0x158] sm:$0xff]  }
 0x788   :  { %15039 = vmatprep.subr.bf16.mxu1 %v15512_v47  ;;  %v15544_v59 = vld [vmem:[#allocation14 + $0x1d8] sm:$0xff]  }
 0x789   :  { %v15545_v47 = vld [vmem:[#allocation14 + $0x118] sm:$0xff]  }
 0x78a   :  { %15018 = vmatpush3.bf16.msra.mxu0 %v15513_v32  ;;  %v15546_v32 = vld [vmem:[#allocation14 + $0x198] sm:$0xff]  }
 0x78b   :  { %15040 = vmatpush3.bf16.msra.mxu1 %v15514_v48  ;;  %15019 = vmatprep.subr.bf16.mxu0 %v15515_v1  ;;  %v15547_v48 = vld [vmem:[#allocation14 + $0x160] sm:$0xff]  }
 0x78c   :  { %15041 = vmatprep.subr.bf16.mxu1 %v15516_v50  ;;  %v15548_v1 = vld [vmem:[#allocation14 + $0x1e0] sm:$0xff]  }
 0x78d   :  { %v15549_v50 = vld [vmem:[#allocation14 + $0x120] sm:$0xff]  }
 0x78e   :  { %15020 = vmatpush3.bf16.msra.mxu0 %v15517_v49  ;;  %v15550_v49 = vld [vmem:[#allocation14 + $0x1a0] sm:$0xff]  }
 0x78f   :  { %15042 = vmatpush3.bf16.msra.mxu1 %v15518_v51  ;;  %15021 = vmatprep.subr.bf16.mxu0 %v15519_v60  ;;  %v15551_v51 = vld [vmem:[#allocation14 + $0x168] sm:$0xff]  }
 0x790   :  { %15043 = vmatprep.subr.bf16.mxu1 %v15520_v53  ;;  %v15552_v60 = vld [vmem:[#allocation14 + $0x1e8] sm:$0xff]   ;;  %v16325_v53 = vld [vmem:[#allocation13 + $0x8] sm:$0xff] }
 0x791   :  { %v5470_v29 = vrot.slane %v16325_v53, %v16068_v17  ;;  %v5478_v0 = vrot.slane %v16325_v53, %v16075_v31  ;;  %v15561_v17 = vld [vmem:[#allocation14 + $0x138] sm:$0xff]  }
 0x792   :  { %15022 = vmatpush3.bf16.msra.mxu0 %v15521_v55  ;;  %v15553_v55 = vld [vmem:[#allocation14 + $0x128] sm:$0xff]   ;;  %v15562_v31 = vld [vmem:[#allocation14 + $0x1b8] sm:$0xff]  }
 0x793   :  { %15044 = vmatpush3.bf16.msra.mxu1 %v15522_v57  ;;  %15023 = vmatprep.subr.bf16.mxu0 %v15523_v63  ;;  %v15554_v57 = vld [vmem:[#allocation14 + $0x1a8] sm:$0xff]   ;;  %v15555_v63 = vld [vmem:[#allocation14 + $0x170] sm:$0xff]   ;;  %v15334_v38 = vadd.f32 %v16301_v40, %v5478_v0 }
 0x794   :  { %15045 = vmatprep.subr.bf16.mxu1 %v15524_v4  ;;  %v15556_v4 = vld [vmem:[#allocation14 + $0x1f0] sm:$0xff]   ;;  %v15567_v40 = vld [vmem:[#allocation14 + $0x248] sm:$0xff]  }
 0x796   :  { %15024 = vmatpush3.bf16.msra.mxu0 %v15525_v5  ;;  %v15557_v5 = vld [vmem:[#allocation14 + $0x130] sm:$0xff]  }
 0x797   :  { %15046 = vmatpush3.bf16.msra.mxu1 %v15526_v37  ;;  %15025 = vmatprep.subr.bf16.mxu0 %v15527_v36  ;;  %v15558_v37 = vld [vmem:[#allocation14 + $0x1b0] sm:$0xff]   ;;  %v15559_v36 = vld [vmem:[#allocation14 + $0x178] sm:$0xff]  }
 0x798   :  { %15047 = vmatprep.subr.bf16.mxu1 %v15528_v44  ;;  %v15332_v44 = vadd.f32 %v16299_v3, %v5470_v29  ;;  %v15566_v3 = vld [vmem:[#allocation14 + $0x280] sm:$0xff]  }
 0x799   :  { %v15595_v29 = vld [vmem:[#allocation14 + $0x340] sm:$0xff]  }
 0x79a   :  { %15026 = vmatpush3.bf16.msra.mxu0 %v15529_v7  ;;  %v15563_v7 = vld [vmem:[#allocation14 + $0x240] sm:$0xff]  }
 0x79b   :  { %15048 = vmatpush3.bf16.msra.mxu1 %v15530_v8  ;;  %15055 = vmatprep.subr.bf16.mxu0 %v15531_v10  ;;  %v11952_v8 = vmax.f32 %v15332_v44, 0.0  ;;  %v11954_v10 = vmax.f32 %v15334_v38, 0.0  ;;  %v15602_v44 = vld [vmem:[#allocation14 + $0x388] sm:$0xff]   ;;  %v15603_v38 = vld [vmem:[#allocation14 + $0x350] sm:$0xff]  }
 0x79c   :  { %15077 = vmatprep.subr.bf16.mxu1 %v15532_v18  ;;  %v12222_v18 = vpack.c.bf16 %v11949_v9, %v11949_v9  ;;  %v15608_v9 = vld [vmem:[#allocation14 + $0x3d8] sm:$0xff]  }
 0x79d   :  { %13039 = vmatmul.mubr.bf16.vlgmr.msra.gmra.mrb[28].mxu0 %v12216_v26  ;;  %v12225_v21 = vpack.c.bf16 %v11952_v8, %v11952_v8  ;;  %v15569_v26 = vld [vmem:[#allocation14 + $0x208] sm:$0xff]   ;;  %v15610_v8 = vld [vmem:[#allocation14 + $0x398] sm:$0xff]  }
 0x79e   :  { %13079 = vmatmul.mubr.bf16.vlgmr.msra.gmra.mrb[28].mxu1 %v12218_v39  ;;  %15056 = vmatpush3.bf16.msra.mxu0 %v15533_v35  ;;  %v12227_v35 = vpack.c.bf16 %v11954_v10, %v11954_v10  ;;  %v15571_v39 = vld [vmem:[#allocation14 + $0x250] sm:$0xff]   ;;  %v15611_v10 = vld [vmem:[#allocation14 + $0x360] sm:$0xff]  }
 0x79f   :  { %13118 = vmatprep.mubr.bf16.mxu0 %v12221_v54  ;;  %15078 = vmatpush3.bf16.msra.mxu1 %v15534_v24  ;;  %v15570_v24 = vld [vmem:[#allocation14 + $0x288] sm:$0xff]   ;;  %v15573_v54 = vld [vmem:[#allocation14 + $0x210] sm:$0xff]  }
 0x7a0   :  { %13158 = vmatprep.mubr.bf16.mxu1 %v12223_v62  ;;  %15057 = vmatprep.subr.bf16.mxu0 %v15535_v25  ;;  %v15572_v25 = vld [vmem:[#allocation14 + $0x2d0] sm:$0xff]   ;;  %v15575_v62 = vld [vmem:[#allocation14 + $0x258] sm:$0xff]  }
 0x7a1   :  { %15079 = vmatprep.subr.bf16.mxu1 %v15536_v41  ;;  %v15574_v41 = vld [vmem:[#allocation14 + $0x290] sm:$0xff]  }
 0x7a2   :  { %15058 = vmatpush3.bf16.msra.mxu0 %v15537_v23  ;;  %v15576_v23 = vld [vmem:[#allocation14 + $0x2d8] sm:$0xff]  }
 0x7a3   :  { %15080 = vmatpush3.bf16.msra.mxu1 %v15538_v42  ;;  %15059 = vmatprep.subr.bf16.mxu0 %v15539_v43  ;;  %v15577_v42 = vld [vmem:[#allocation14 + $0x218] sm:$0xff]  }
 0x7a4   :  { %15081 = vmatprep.subr.bf16.mxu1 %v15540_v46  ;;  %v15578_v43 = vld [vmem:[#allocation14 + $0x298] sm:$0xff]   ;;  %v15579_v46 = vld [vmem:[#allocation14 + $0x260] sm:$0xff]  }
 0x7a6   :  { %15060 = vmatpush3.bf16.msra.mxu0 %v15541_v30  ;;  %v15580_v30 = vld [vmem:[#allocation14 + $0x2e0] sm:$0xff]  }
 0x7a7   :  { %15082 = vmatpush3.bf16.msra.mxu1 %v15542_v13  ;;  %15061 = vmatprep.subr.bf16.mxu0 %v15543_v16  ;;  %v15581_v13 = vld [vmem:[#allocation14 + $0x220] sm:$0xff]  }
 0x7a8   :  { %15083 = vmatprep.subr.bf16.mxu1 %v15544_v59  ;;  %v15582_v16 = vld [vmem:[#allocation14 + $0x2a0] sm:$0xff]   ;;  %v15583_v59 = vld [vmem:[#allocation14 + $0x268] sm:$0xff]  }
 0x7aa   :  { %15062 = vmatpush3.bf16.msra.mxu0 %v15545_v47  ;;  %v15584_v47 = vld [vmem:[#allocation14 + $0x2e8] sm:$0xff]  }
 0x7ab   :  { %15084 = vmatpush3.bf16.msra.mxu1 %v15546_v32  ;;  %15063 = vmatprep.subr.bf16.mxu0 %v15547_v48  ;;  %v15585_v32 = vld [vmem:[#allocation14 + $0x228] sm:$0xff]   ;;  %v5466_v48 = vrot.slane %v16325_v53, %v16063_v15  ;;  %v15592_v15 = vld [vmem:[#allocation14 + $0x2f8] sm:$0xff]  }
 0x7ac   :  { %15085 = vmatprep.subr.bf16.mxu1 %v15548_v1  ;;  %v15586_v1 = vld [vmem:[#allocation14 + $0x2a8] sm:$0xff]  }
 0x7ae   :  { %15064 = vmatpush3.bf16.msra.mxu0 %v15549_v50  ;;  %v15587_v50 = vld [vmem:[#allocation14 + $0x270] sm:$0xff]  }
 0x7af   :  { %15086 = vmatpush3.bf16.msra.mxu1 %v15550_v49  ;;  %15065 = vmatprep.subr.bf16.mxu0 %v15551_v51  ;;  %v5474_v49 = vrot.slane %v16325_v53, %v16098_v20  ;;  %v15588_v51 = vld [vmem:[#allocation14 + $0x2f0] sm:$0xff]   ;;  %v15594_v20 = vld [vmem:[#allocation14 + $0x2b8] sm:$0xff]  }
 0x7b0   :  { %15087 = vmatprep.subr.bf16.mxu1 %v15552_v60  ;;  %v15589_v60 = vld [vmem:[#allocation14 + $0x230] sm:$0xff]  }
 0x7b2   :  { %15066 = vmatpush3.bf16.msra.mxu0 %v15553_v55  ;;  %v15331_v55 = vadd.f32 %v16295_v19, %v5466_v48  ;;  %v15597_v19 = vld [vmem:[#allocation14 + $0x300] sm:$0xff]  }
 0x7b3   :  { %15088 = vmatpush3.bf16.msra.mxu1 %v15554_v57  ;;  %15067 = vmatprep.subr.bf16.mxu0 %v15555_v63  ;;  %v15591_v57 = vld [vmem:[#allocation14 + $0x278] sm:$0xff]   ;;  %v15333_v63 = vadd.f32 %v16297_v28, %v5474_v49 }
 0x7b4   :  { %15089 = vmatprep.subr.bf16.mxu1 %v15556_v4  ;;  %v11951_v4 = vmax.f32 %v15331_v55, 0.0 }
 0x7b5   :  { %v11953_v0 = vmax.f32 %v15333_v63, 0.0 }
 0x7b6   :  { %15068 = vmatpush3.bf16.msra.mxu0 %v15557_v5  ;;  %v15596_v5 = vld [vmem:[#allocation14 + $0x3c0] sm:$0xff]   ;;  %v12224_v52 = vpack.c.bf16 %v11951_v4, %v11951_v4 }
 0x7b7   :  { %15090 = vmatpush3.bf16.msra.mxu1 %v15558_v37  ;;  %15069 = vmatprep.subr.bf16.mxu0 %v15559_v36  ;;  %v15598_v37 = vld [vmem:[#allocation14 + $0x380] sm:$0xff]   ;;  %v15599_v36 = vld [vmem:[#allocation14 + $0x348] sm:$0xff]   ;;  %v12226_v28 = vpack.c.bf16 %v11953_v0, %v11953_v0 }
 0x7b8   :  { %15091 = vmatprep.subr.bf16.mxu1 %v15560_v27  ;;  %v15601_v27 = vld [vmem:[#allocation14 + $0x308] sm:$0xff]  }
 0x7ba   :  { %15070 = vmatpush3.bf16.msra.mxu0 %v15561_v17  ;;  %v15604_v17 = vld [vmem:[#allocation14 + $0x3d0] sm:$0xff]  }
 0x7bb   :  { %15092 = vmatpush3.bf16.msra.mxu1 %v15562_v31  ;;  %15099 = vmatprep.subr.bf16.mxu0 %v15563_v7  ;;  %v15606_v31 = vld [vmem:[#allocation14 + $0x390] sm:$0xff]   ;;  %v15607_v7 = vld [vmem:[#allocation14 + $0x358] sm:$0xff]  }
 0x7bc   :  { %15121 = vmatprep.subr.bf16.mxu1 %v15564_v12  ;;  %v15609_v12 = vld [vmem:[#allocation14 + $0x318] sm:$0xff]  }
 0x7bd   :  { %13119 = vmatmul.mubr.bf16.vlgmr.msra.gmra.mrb[32].mxu0 %v12220_v33  ;;  %v15613_v33 = vld [vmem:[#allocation14 + $0x320] sm:$0xff]  }
 0x7be   :  { %13159 = vmatmul.mubr.bf16.vlgmr.msra.gmra.mrb[32].mxu1 %v12222_v18  ;;  %15100 = vmatpush3.bf16.msra.mxu0 %v15565_v58  ;;  %v15612_v58 = vld [vmem:[#allocation14 + $0x3e0] sm:$0xff]   ;;  %v15615_v18 = vld [vmem:[#allocation14 + $0x368] sm:$0xff]  }
 0x7bf   :  { %13198 = vmatprep.mubr.bf16.mxu0 %v12225_v21  ;;  %15122 = vmatpush3.bf16.msra.mxu1 %v15566_v3  ;;  %v15614_v3 = vld [vmem:[#allocation14 + $0x3a0] sm:$0xff]   ;;  %v15617_v21 = vld [vmem:[#allocation14 + $0x328] sm:$0xff]  }
 0x7c0   :  { %13238 = vmatprep.mubr.bf16.mxu1 %v12227_v35  ;;  %15101 = vmatprep.subr.bf16.mxu0 %v15567_v40  ;;  %v15616_v40 = vld [vmem:[#allocation14 + $0x3e8] sm:$0xff]   ;;  %v15619_v35 = vld [vmem:[#allocation14 + $0x370] sm:$0xff]  }
 0x7c1   :  { %15123 = vmatprep.subr.bf16.mxu1 %v15568_v22  ;;  %v15618_v22 = vld [vmem:[#allocation14 + $0x3a8] sm:$0xff]  }
 0x7c2   :  { %15102 = vmatpush3.bf16.msra.mxu0 %v15569_v26  ;;  %v15620_v26 = vld [vmem:[#allocation14 + $0x3f0] sm:$0xff]  }
 0x7c3   :  { %15124 = vmatpush3.bf16.msra.mxu1 %v15570_v24  ;;  %15103 = vmatprep.subr.bf16.mxu0 %v15571_v39  ;;  %v15621_v24 = vld [vmem:[#allocation14 + $0x330] sm:$0xff]  }
 0x7c4   :  { %15125 = vmatprep.subr.bf16.mxu1 %v15572_v25  ;;  %v15622_v39 = vld [vmem:[#allocation14 + $0x3b0] sm:$0xff]   ;;  %v15623_v25 = vld [vmem:[#allocation14 + $0x378] sm:$0xff]  }
 0x7c6   :  { %15104 = vmatpush3.bf16.msra.mxu0 %v15573_v54  ;;  %v15624_v54 = vld [vmem:[#allocation14 + $0x3f8] sm:$0xff]  }
 0x7c7   :  { %15126 = vmatpush3.bf16.msra.mxu1 %v15574_v41  ;;  %15105 = vmatprep.subr.bf16.mxu0 %v15575_v62  ;;  %v15625_v41 = vld [vmem:[#allocation14 + $0x338] sm:$0xff]  }
 0x7c8   :  { %15127 = vmatprep.subr.bf16.mxu1 %v15576_v23  ;;  %v15626_v62 = vld [vmem:[#allocation14 + $0x3b8] sm:$0xff]   ;;  %v5482_v23 = vrot.slane %v16325_v53, %v16122_v2 }
 0x7ca   :  { %15106 = vmatpush3.bf16.msra.mxu0 %v15577_v42  ;;  %v5490_v42 = vrot.slane %v16325_v53, %v16142_v56 }
 0x7cb   :  { %15128 = vmatpush3.bf16.msra.mxu1 %v15578_v43  ;;  %15107 = vmatprep.subr.bf16.mxu0 %v15579_v46  ;;  %v5486_v43 = vrot.slane %v16325_v53, %v16105_v34  ;;  %v5494_v46 = vrot.slane %v16325_v53, %v16125_v11 }
 0x7cc   :  { %15129 = vmatprep.subr.bf16.mxu1 %v15580_v30 }
 0x7ce   :  { %15108 = vmatpush3.bf16.msra.mxu0 %v15581_v13 }
 0x7cf   :  { %15130 = vmatpush3.bf16.msra.mxu1 %v15582_v16  ;;  %15109 = vmatprep.subr.bf16.mxu0 %v15583_v59 }
 0x7d0   :  { %15131 = vmatprep.subr.bf16.mxu1 %v15584_v47 }
 0x7d2   :  { %15110 = vmatpush3.bf16.msra.mxu0 %v15585_v32 }
 0x7d3   :  { %15132 = vmatpush3.bf16.msra.mxu1 %v15586_v1  ;;  %15111 = vmatprep.subr.bf16.mxu0 %v15587_v50 }
 0x7d4   :  { %15133 = vmatprep.subr.bf16.mxu1 %v15588_v51 }
 0x7d6   :  { %15112 = vmatpush3.bf16.msra.mxu0 %v15589_v60 }
 0x7d7   :  { %15134 = vmatpush3.bf16.msra.mxu1 %v15590_v61  ;;  %15113 = vmatprep.subr.bf16.mxu0 %v15591_v57 }
 0x7d8   :  { %15135 = vmatprep.subr.bf16.mxu1 %v15592_v15 }
 0x7da   :  { %15114 = vmatpush3.bf16.msra.mxu0 %v15593_v45  ;;  %v14882_v45 = vld [vmem:[#allocation16] ss:$0 sm:$0xff] }
 0x7db   :  { %15136 = vmatpush3.bf16.msra.mxu1 %v15594_v20  ;;  %15143 = vmatprep.subr.bf16.mxu0 %v15595_v29 }
 0x7dc   :  { %15165 = vmatprep.subr.bf16.mxu1 %v15596_v5 }
 0x7dd   :  { %13199 = vmatmul.mubr.bf16.vlgmr.msra.gmra.mrb[36].mxu0 %v12224_v52 }
 0x7de   :  { %13239 = vmatmul.mubr.bf16.vlgmr.msra.gmra.mrb[36].mxu1 %v12226_v28  ;;  %15144 = vmatpush3.bf16.msra.mxu0 %v15597_v19 }
 0x7df   :  { %15166 = vmatpush3.bf16.msra.mxu1 %v15598_v37  ;;  %15145 = vmatprep.subr.bf16.mxu0 %v15599_v36 }
 0x7e0   :  { %15167 = vmatprep.subr.bf16.mxu1 %v15600_v6 }
 0x7e2   :  { %15146 = vmatpush3.bf16.msra.mxu0 %v15601_v27 }
 0x7e3   :  { %15168 = vmatpush3.bf16.msra.mxu1 %v15602_v44  ;;  %15147 = vmatprep.subr.bf16.mxu0 %v15603_v38 }
 0x7e4   :  { %15169 = vmatprep.subr.bf16.mxu1 %v15604_v17 }
 0x7e6   :  { %15148 = vmatpush3.bf16.msra.mxu0 %v15605_v14 }
 0x7e7   :  { %15170 = vmatpush3.bf16.msra.mxu1 %v15606_v31  ;;  %15149 = vmatprep.subr.bf16.mxu0 %v15607_v7 }
 0x7e8   :  { %15171 = vmatprep.subr.bf16.mxu1 %v15608_v9 }
 0x7ea   :  { %15150 = vmatpush3.bf16.msra.mxu0 %v15609_v12 }
 0x7eb   :  { %15172 = vmatpush3.bf16.msra.mxu1 %v15610_v8  ;;  %15151 = vmatprep.subr.bf16.mxu0 %v15611_v10 }
 0x7ec   :  { %15173 = vmatprep.subr.bf16.mxu1 %v15612_v58 }
 0x7ee   :  { %15152 = vmatpush3.bf16.msra.mxu0 %v15613_v33 }
 0x7ef   :  { %15174 = vmatpush3.bf16.msra.mxu1 %v15614_v3  ;;  %15153 = vmatprep.subr.bf16.mxu0 %v15615_v18 }
 0x7f0   :  { %15175 = vmatprep.subr.bf16.mxu1 %v15616_v40 }
 0x7f2   :  { %15154 = vmatpush3.bf16.msra.mxu0 %v15617_v21 }
 0x7f3   :  { %15176 = vmatpush3.bf16.msra.mxu1 %v15618_v22  ;;  %15155 = vmatprep.subr.bf16.mxu0 %v15619_v35 }
 0x7f4   :  { %15177 = vmatprep.subr.bf16.mxu1 %v15620_v26 }
 0x7f6   :  { %15156 = vmatpush3.bf16.msra.mxu0 %v15621_v24 }
 0x7f7   :  { %15178 = vmatpush3.bf16.msra.mxu1 %v15622_v39  ;;  %15157 = vmatprep.subr.bf16.mxu0 %v15623_v25 }
 0x7f8   :  { %15179 = vmatprep.subr.bf16.mxu1 %v15624_v54 }
 0x7fa   :  { %15158 = vmatpush3.bf16.msra.mxu0 %v15625_v41 }
 0x7fb   :  { %15180 = vmatpush3.bf16.msra.mxu1 %v15626_v62 }
 0x850   :  { %v11772_v30 = vpop.f32.mrb[24].mxu0 }
 0x851   :  { %v15335_v13 = vadd.f32 %v11772_v30, %v5482_v23  ;;  %v11936_v16 = vpop.f32.mrb[24].mxu1  ;;  %v11774_v59 = vpop.f32.mrb[25].mxu0 }
 0x852   :  { %v15337_v47 = vadd.f32 %v11936_v16, %v5490_v42  ;;  %v15336_v32 = vadd.f32 %v11774_v59, %v5486_v43  ;;  %v11938_v48 = vpop.f32.mrb[25].mxu1  ;;  %v11776_v1 = vpop.f32.mrb[26].mxu0 }
 0x853   :  { %v11955_v50 = vmax.f32 %v15335_v13, 0.0  ;;  %v15338_v49 = vadd.f32 %v11938_v48, %v5494_v46  ;;  %v11940_v2 = vpop.f32.mrb[26].mxu1  ;;  %v11777_v51 = vpop.f32.mrb[27].mxu0 }
 0x854   :  { %v11957_v60 = vmax.f32 %v15337_v47, 0.0  ;;  %v11956_v56 = vmax.f32 %v15336_v32, 0.0  ;;  %v11941_v55 = vpop.f32.mrb[27].mxu1 }
 0x855   :  { %v11958_v61 = vmax.f32 %v15338_v49, 0.0  ;;  %v12228_v57 = vpack.c.bf16 %v11955_v50, %v11955_v50 }
 0x856   :  { %v12229_v34 = vpack.c.bf16 %v11956_v56, %v11956_v56  ;;  %v12230_v11 = vpack.c.bf16 %v11957_v60, %v11957_v60 }
 0x857   :  { %v12231_v63 = vpack.c.bf16 %v11958_v61, %v11958_v61 }
 0x858   :  { %13278 = vmatprep.mubr.bf16.mxu0 %v12229_v34 }
 0x859   :  { %13318 = vmatprep.mubr.bf16.mxu1 %v12231_v63  ;;  %13279 = vmatmul.mubr.bf16.vlgmr.msra.gmra.mrb[40].mxu0 %v12228_v57 }
 0x85a   :  { %13319 = vmatmul.mubr.bf16.vlgmr.msra.gmra.mrb[40].mxu1 %v12230_v11 }
 0x870   :  { %v15027_v53 = vpop.f32.mrb[28].mxu0 }
 0x871   :  { %v15049_v15 = vpop.f32.mrb[28].mxu1  ;;  %v15028_v4 = vpop.f32.mrb[29].mxu0 }
 0x872   :  { %v15029_v20 = vadd.f32 %v15028_v4, %v15027_v53  ;;  %v15050_v29 = vpop.f32.mrb[29].mxu1  ;;  %v15030_v0 = vpop.f32.mrb[30].mxu0 }
 0x873   :  { %v15051_v5 = vadd.f32 %v15050_v29, %v15049_v15  ;;  %v15052_v19 = vpop.f32.mrb[30].mxu1  ;;  %v15031_v52 = vpop.f32.mrb[31].mxu0 }
 0x874   :  { %v13041_v37 = vadd.f32 %v15029_v20, %v14882_v45  ;;  %v15053_v36 = vpop.f32.mrb[31].mxu1 }
 0x876   :  { %v13081_v28 = vadd.f32 %v15051_v5, %v13041_v37 }
 0x890   :  { %v15071_v6 = vpop.f32.mrb[32].mxu0 }
 0x891   :  { %v15093_v27 = vpop.f32.mrb[32].mxu1  ;;  %v15072_v44 = vpop.f32.mrb[33].mxu0 }
 0x892   :  { %v15073_v38 = vadd.f32 %v15072_v44, %v15071_v6  ;;  %v15094_v17 = vpop.f32.mrb[33].mxu1  ;;  %v15074_v14 = vpop.f32.mrb[34].mxu0 }
 0x893   :  { %v15095_v31 = vadd.f32 %v15094_v17, %v15093_v27  ;;  %v15096_v7 = vpop.f32.mrb[34].mxu1  ;;  %v15075_v9 = vpop.f32.mrb[35].mxu0 }
 0x894   :  { %v13121_v12 = vadd.f32 %v15073_v38, %v13081_v28  ;;  %v15097_v8 = vpop.f32.mrb[35].mxu1 }
 0x896   :  { %v13161_v10 = vadd.f32 %v15095_v31, %v13121_v12 }
 0x8b0   :  { %v15115_v58 = vpop.f32.mrb[36].mxu0 }
 0x8b1   :  { %v15137_v33 = vpop.f32.mrb[36].mxu1  ;;  %v15116_v3 = vpop.f32.mrb[37].mxu0 }
 0x8b2   :  { %v15117_v18 = vadd.f32 %v15116_v3, %v15115_v58  ;;  %v15138_v40 = vpop.f32.mrb[37].mxu1  ;;  %v15118_v21 = vpop.f32.mrb[38].mxu0 }
 0x8b3   :  { %v15139_v22 = vadd.f32 %v15138_v40, %v15137_v33  ;;  %v15140_v35 = vpop.f32.mrb[38].mxu1  ;;  %v15119_v26 = vpop.f32.mrb[39].mxu0 }
 0x8b4   :  { %v13201_v24 = vadd.f32 %v15117_v18, %v13161_v10  ;;  %v15141_v39 = vpop.f32.mrb[39].mxu1 }
 0x8b6   :  { %v13241_v25 = vadd.f32 %v15139_v22, %v13201_v24 }
 0x92c   :  { %v15159_v54 = vpop.f32.mrb[40].mxu0 }
 0x92d   :  { %v15181_v41 = vpop.f32.mrb[40].mxu1  ;;  %v15160_v62 = vpop.f32.mrb[41].mxu0 }
 0x92e   :  { %v15161_v23 = vadd.f32 %v15160_v62, %v15159_v54  ;;  %v15182_v42 = vpop.f32.mrb[41].mxu1  ;;  %v15162_v43 = vpop.f32.mrb[42].mxu0 }
 0x92f   :  { %v15183_v46 = vadd.f32 %v15182_v42, %v15181_v41  ;;  %v15184_v30 = vpop.f32.mrb[42].mxu1  ;;  %v15163_v13 = vpop.f32.mrb[43].mxu0 }
 0x930   :  { %v13281_v16 = vadd.f32 %v15161_v23, %v13241_v25  ;;  %v15185_v59 = vpop.f32.mrb[43].mxu1 }
 0x932   :  { %v13321_v47 = vadd.f32 %v15183_v46, %v13281_v16 }
 0x934   :  { %13326 = vst [vmem:[#allocation17] sm:$0xff] %v13321_v47 }
 0x935   :  { %15838 = shalt.err (!%p15835_p6)
}
 0x936   :  { %s15839_s23 = scalar_lea.hbm %s16374_s9, 128 }
 0x937   :  { %p15840_p7 = scmp.ne.s32.totalorder %s16374_s9, %s15839_s23  ;;  %p15843_p8 = scmp.lt.u32.totalorder %s15839_s23, %s16374_s9 }
 0x939   :  { %p15845_p9 = pnand %p15843_p8, %p15840_p7 }
 0x93b   :  { %15848 = shalt.err (!%p15845_p9)
}
 0x93c   :  { %13336 = dma.vmem_to_hbm [thread:$0]  %s13334_s28, 128, %s16374_s9, [#allocation4]  }
 0x93d   :  { %15859 = dma.done.wait [#allocation4], 128  }
 0x93e   :  { %15860 = vsyncadd [#allocation4], 4294967168 }
 0x93f   :  { %13340 = vsyncpa [#allocation3], 1 }
 0x940   :  { %13341 = vsyncpa [#allocation6], 1 }
 0x941   :  { %13342 = vsyncpa [#allocation9], 1 }
 0x942   :  { %13343 = vsyncpa [#allocation12], 1 }
 0x943   :  { %13344 = vsyncpa [#allocation15], 1 }
 0x944   :  { %13345 = vsyncpa [#allocation4], 1 }

</bundles_post_ra>
